<compile_context>
chip_gen: v6e
topology: v6e:2x2x1
jax: 0.10.0
libtpu: 0.0.40
codegen_flags: <defaults>
</compile_context>

<pallas_src>
import functools

import jax
import jax.numpy as jnp
from jax import lax
from jax.experimental import pallas as pl
from jax.experimental.pallas import tpu as pltpu


def _round_up(x, m):
    return (x + m - 1) // m * m


# ------------------------------------------------------------------------ Pallas kernels
def _gemm_kernel(a_ref, w_ref, o_ref, acc_ref, *, act):
    """o = act(A @ W); K-reduction over grid axis 1, f32 accumulation."""
    k = pl.program_id(1)

    @pl.when(k == 0)
    def _():
        acc_ref[...] = jnp.zeros_like(acc_ref)

    acc_ref[...] += jnp.dot(a_ref[...], w_ref[...],
                            preferred_element_type=jnp.float32)

    @pl.when(k == pl.num_programs(1) - 1)
    def _():
        y = acc_ref[...]
        if act == "relu":
            y = jnp.maximum(y, 0.0)
        elif act == "sigmoid":
            # exp on EUP; exact divide keeps the result in [0, 1]
            y = 1.0 / (1.0 + jnp.exp(-y))
        o_ref[...] = y.astype(o_ref.dtype)


def _bn_relu_1x1_kernel(z_ref, w_ref, c1_ref, c2_ref, o_ref):
    """o = relu(relu(z + c1) @ W2 + c2): BN1+ReLU + 1x1x1 deconv + BN2+ReLU (lane-padded)."""
    y1 = jnp.maximum(z_ref[...] + c1_ref[...], 0.0)
    y2 = jnp.dot(y1.astype(w_ref.dtype), w_ref[...],
                 preferred_element_type=jnp.float32) + c2_ref[...]
    o_ref[...] = jnp.maximum(y2, 0.0).astype(o_ref.dtype)


# ------------------------------------------------------------------------ kernel wrappers
def fused_gemm(A, W, act="none", *, tm_max=512, tk_max=2048):
    """act(A @ W).  A:(M,K); W:(Kp,N) bf16 with Kp,N multiples of 128 and Kp >= K."""
    M, K = A.shape
    Kp, N = W.shape
    assert Kp % 128 == 0 and N % 128 == 0 and Kp >= K
    tm = min(_round_up(M, 16), tm_max)           # bf16-friendly sublane multiple
    Mp = _round_up(M, tm)
    tk = Kp if Kp <= tk_max else tk_max
    assert Kp % tk == 0
    A = jnp.pad(A.astype(jnp.bfloat16), ((0, Mp - M), (0, Kp - K)))
    out = pl.pallas_call(
        functools.partial(_gemm_kernel, act=act),
        out_shape=jax.ShapeDtypeStruct((Mp, N), jnp.float32),
        grid_spec=pltpu.PrefetchScalarGridSpec(
            num_scalar_prefetch=0,
            grid=(Mp // tm, Kp // tk),
            in_specs=[
                pl.BlockSpec((tm, tk), lambda i, k: (i, k)),
                pl.BlockSpec((tk, N), lambda i, k: (k, 0)),
            ],
            out_specs=pl.BlockSpec((tm, N), lambda i, k: (i, 0)),
            scratch_shapes=[pltpu.VMEM((tm, N), jnp.float32)],
        ),
        compiler_params=pltpu.CompilerParams(
            dimension_semantics=("parallel", "arbitrary"),
            vmem_limit_bytes=32 * 1024 * 1024),
    )(A, W)
    return out[:M]


def fused_bn_relu_1x1(Z, W2, c1, c2, n_out, *, tm_max=512):
    """relu(relu(Z + c1) @ W2 + c2)[:, :n_out].  Z:(M,C) f32; W2:(128,128) bf16."""
    M, C = Z.shape
    L = W2.shape[0]                               # 128 (lane-dense)
    tm = min(_round_up(M, 8), tm_max)
    Mp = _round_up(M, tm)
    Zp = jnp.pad(Z.astype(jnp.float32), ((0, Mp - M), (0, L - C)))
    out = pl.pallas_call(
        _bn_relu_1x1_kernel,
        out_shape=jax.ShapeDtypeStruct((Mp, L), jnp.float32),
        grid_spec=pltpu.PrefetchScalarGridSpec(
            num_scalar_prefetch=0,
            grid=(Mp // tm,),
            in_specs=[
                pl.BlockSpec((tm, L), lambda i: (i, 0)),
                pl.BlockSpec((L, L), lambda i: (0, 0)),
                pl.BlockSpec((1, L), lambda i: (0, 0)),
                pl.BlockSpec((1, L), lambda i: (0, 0)),
            ],
            out_specs=pl.BlockSpec((tm, L), lambda i: (i, 0)),
        ),
        compiler_params=pltpu.CompilerParams(
            dimension_semantics=("parallel",),
            vmem_limit_bytes=32 * 1024 * 1024),
    )(Zp, W2, c1, c2)
    return out[:M, :n_out]


# ----------------------------------------------------- col2im (overlap-add) for k=4,s=2,p=1
def _shift_down(x, axis):
    """y[j] = x[j-1] (zero at j=0)."""
    L = x.shape[axis]
    pad = [(0, 0)] * x.ndim
    pad[axis] = (1, 0)
    return lax.slice_in_dim(jnp.pad(x, pad), 0, L, axis=axis)


def _shift_up(x, axis):
    """y[j] = x[j+1] (zero at j=L-1)."""
    L = x.shape[axis]
    pad = [(0, 0)] * x.ndim
    pad[axis] = (0, 1)
    return lax.slice_in_dim(jnp.pad(x, pad), 1, L + 1, axis=axis)


def _col2im_stride2_k4_p1(P):
    """P: (B, D, H, W, 4, 4, 4, C) scatter patches -> (B, 2D, 2H, 2W, C).

    For o = 2i - 1 + k:  even o=2j gets P[j,k=1] + P[j-1,k=3];
                         odd  o=2j+1 gets P[j,k=2] + P[j+1,k=0].
    """
    B, D, H, W, _, _, _, C = P.shape
    # W dim (spatial axis 3, kernel axis 6)
    even = P[:, :, :, :, :, :, 1, :] + _shift_down(P[:, :, :, :, :, :, 3, :], 3)
    odd = P[:, :, :, :, :, :, 2, :] + _shift_up(P[:, :, :, :, :, :, 0, :], 3)
    P = jnp.stack([even, odd], axis=4).reshape(B, D, H, 2 * W, 4, 4, C)
    # H dim (spatial axis 2, kernel axis 5)
    even = P[:, :, :, :, :, 1, :] + _shift_down(P[:, :, :, :, :, 3, :], 2)
    odd = P[:, :, :, :, :, 2, :] + _shift_up(P[:, :, :, :, :, 0, :], 2)
    P = jnp.stack([even, odd], axis=3).reshape(B, D, 2 * H, 2 * W, 4, C)
    # D dim (spatial axis 1, kernel axis 4)
    even = P[:, :, :, :, 1, :] + _shift_down(P[:, :, :, :, 3, :], 1)
    odd = P[:, :, :, :, 2, :] + _shift_up(P[:, :, :, :, 0, :], 1)
    P = jnp.stack([even, odd], axis=2).reshape(B, 2 * D, 2 * H, 2 * W, C)
    return P


# ---------------------------------------------------------------------------- model blocks
def _deconv_block(x_cl, blk):
    """ConvT3d(4,2,1)+BN+ReLU + ConvT3d(1,1)+BN+ReLU.  Channel-last in/out."""
    B, D, H, W, Cin = x_cl.shape
    cout = blk["w1"].shape[1] // 64
    A = x_cl.reshape(B * D * H * W, Cin)
    patches = fused_gemm(A, blk["w1"], act="none")              # (M, 64*cout), BN1 scale folded
    P = patches.reshape(B, D, H, W, 4, 4, 4, cout)
    z1 = _col2im_stride2_k4_p1(P)                               # (B, 2D, 2H, 2W, cout)
    OD, OH, OW = 2 * D, 2 * H, 2 * W
    y = fused_bn_relu_1x1(z1.reshape(B * OD * OH * OW, cout),
                          blk["w2"], blk["c1"], blk["c2"], cout)
    return y.reshape(B, OD, OH, OW, cout)


def _rec_conv_sigmoid(x_cl, w_aug):
    """ConvTranspose3d(C,1,3,1,1) + Sigmoid (same-size conv with flipped kernel)."""
    B, D, H, W, C = x_cl.shape
    xp = jnp.pad(x_cl, ((0, 0), (1, 1), (1, 1), (1, 1), (0, 0)))
    cols = [xp[:, a:a + D, b:b + H, c:c + W, :]
            for a in range(3) for b in range(3) for c in range(3)]
    A = jnp.stack(cols, axis=4).reshape(B * D * H * W, 27 * C)
    A = jnp.concatenate([A, jnp.ones((A.shape[0], 1), A.dtype)], axis=1)  # bias column
    out = fused_gemm(A, w_aug, act="sigmoid")                   # (M, 128) lane-dense
    return out[:, :1].reshape(B, D, H, W, 1)


# ------------------------------------------------------------------------------- parameters
def _bn_fold(key, c, eps=1e-5):
    k1, k2, k3, k4 = jax.random.split(key, 4)
    gamma = 1.0 + 0.1 * jax.random.normal(k1, (c,), jnp.float32)
    beta = 0.1 * jax.random.normal(k2, (c,), jnp.float32)
    mean = 0.1 * jax.random.normal(k3, (c,), jnp.float32)
    var = 1.0 + 0.1 * jnp.abs(jax.random.normal(k4, (c,), jnp.float32))
    scale = gamma / jnp.sqrt(var + eps)
    shift = beta - mean * scale
    return scale, shift


def _prep_block(w1, b1, bn1, w2, b2, bn2):
    """Precompute kernel-ready matrices (BN folded, bf16, lane/K padded) for one block."""
    s1, t1 = bn1
    s2, t2 = bn2
    cin, cout = w1.shape[0], w1.shape[1]
    # stride-2 deconv as input-GEMM: columns ordered ((kd*4+kh)*4+kw)*cout + co
    w1m = jnp.transpose(w1, (0, 2, 3, 4, 1)).reshape(cin, 64 * cout)
    w1m = w1m * jnp.tile(s1, 64)[None, :]                  # fold BN1 scale per out channel
    kp = _round_up(cin, 128)
    w1m = jnp.pad(w1m, ((0, kp - cin), (0, 0))).astype(jnp.bfloat16)
    # 1x1x1 deconv (+ BN2 scale) as (cout, cout) matmul, lane-padded to 128
    w2m = w2[:, :, 0, 0, 0] * s2[None, :]
    w2p = jnp.zeros((128, 128), jnp.float32).at[:cout, :cout].set(w2m).astype(jnp.bfloat16)
    c1p = jnp.zeros((1, 128), jnp.float32).at[0, :cout].set(b1 * s1 + t1)
    c2p = jnp.zeros((1, 128), jnp.float32).at[0, :cout].set(b2 * s2 + t2)
    return {"w1": w1m, "w2": w2p, "c1": c1p, "c2": c2p}


def _prep_rec(wr, br):
    """rec_conv weight: spatially flipped, bias-augmented row, padded to (256, 128)."""
    cin = wr.shape[0]
    wf = wr[:, :, ::-1, ::-1, ::-1]
    wrm = jnp.transpose(wf, (2, 3, 4, 0, 1)).reshape(27 * cin)
    kp = _round_up(27 * cin + 1, 128)
    w = jnp.zeros((kp, 128), jnp.float32)
    w = w.at[:27 * cin, 0].set(wrm).at[27 * cin, 0].set(br[0])
    return w.astype(jnp.bfloat16)


def init_params(key, expansion=1):
    ks = iter(jax.random.split(key, 32))

    def w(shape):
        return 0.05 * jax.random.normal(next(ks), shape, jnp.float32)

    def b(shape):
        return 0.02 * jax.random.normal(next(ks), shape, jnp.float32)

    p = {}
    p["d1"] = _prep_block(w((512 * expansion, 64, 4, 4, 4)), b((64,)), _bn_fold(next(ks), 64),
                          w((64, 64, 1, 1, 1)), b((64,)), _bn_fold(next(ks), 64))
    p["d2"] = _prep_block(w((256 * expansion + 64, 32, 4, 4, 4)), b((32,)), _bn_fold(next(ks), 32),
                          w((32, 32, 1, 1, 1)), b((32,)), _bn_fold(next(ks), 32))
    p["d3"] = _prep_block(w((128 * expansion + 32, 8, 4, 4, 4)), b((8,)), _bn_fold(next(ks), 8),
                          w((8, 8, 1, 1, 1)), b((8,)), _bn_fold(next(ks), 8))
    p["rec"] = _prep_rec(w((8, 1, 3, 3, 3)), b((1,)))
    return p


# ------------------------------------------------------------------------------------ forward
def _to_channel_last(x):
    return jnp.transpose(x, (0, 2, 3, 4, 1))      # NCDHW -> NDHWC


def segnet3d_rec_forward(params, c1, c2, c3, c4, x):
    del c1                                         # unused by the reference forward
    c2 = _to_channel_last(c2)
    c3 = _to_channel_last(c3)
    c4 = _to_channel_last(c4)
    dcr1 = _deconv_block(c4, params["d1"])
    dcr2 = _deconv_block(jnp.concatenate([c3, dcr1], axis=-1), params["d2"])
    rec = _deconv_block(jnp.concatenate([c2, dcr2], axis=-1), params["d3"])
    # trilinear F.interpolate(..., align_corners=False) == half-pixel-center linear resize
    # TODO(synk): resize + col2im overlap-add stay in XLA glue (no clean Pallas win here).
    B, C = rec.shape[0], rec.shape[-1]
    rec = jax.image.resize(rec, (B,) + tuple(x.shape[2:]) + (C,), method="trilinear")
    rec = _rec_conv_sigmoid(rec, params["rec"])
    return jnp.transpose(rec, (0, 4, 1, 2, 3))     # NDHWC -> NCDHW


if __name__ == "__main__":
    key = jax.random.PRNGKey(0)
    kp, k1, k2, k3, k4, kx = jax.random.split(key, 6)

    expansion = 1
    B = 2
    params = init_params(kp, expansion)

    # encoder features at decreasing spatial resolution (SegNet-style pyramid)
    c4 = jax.random.normal(k4, (B, 512 * expansion, 1, 1, 1), jnp.float32)
    c3 = jax.random.normal(k3, (B, 256 * expansion, 2, 2, 2), jnp.float32)
    c2 = jax.random.normal(k2, (B, 128 * expansion, 4, 4, 4), jnp.float32)
    c1 = jax.random.normal(k1, (B, 64 * expansion, 8, 8, 8), jnp.float32)   # unused
    x = jax.random.normal(kx, (B, 1, 8, 8, 8), jnp.float32)

    fwd = jax.jit(segnet3d_rec_forward)
    out = jax.block_until_ready(fwd(params, c1, c2, c3, c4, x))

    assert out.shape == (B, 1, 8, 8, 8), out.shape
    assert bool(jnp.all(jnp.isfinite(out)))
    assert bool(jnp.all((out >= 0.0) & (out <= 1.0)))   # sigmoid output range
    print("KERNEL_OK")
</pallas_src>

<mosaic_0001>
module attributes {stable_mosaic.version = 11 : i64} {
  func.func @_gemm_kernel(%arg0: i32, %arg1: i32, %arg2: memref<16x512xbf16, #tpu.memory_space<vmem>>, %arg3: memref<512x4096xbf16, #tpu.memory_space<vmem>>, %arg4: memref<16x4096xf32, #tpu.memory_space<vmem>>, %arg5: memref<16x4096xf32, #tpu.memory_space<vmem>>) attributes {dimension_semantics = [#tpu.dimension_semantics<parallel>, #tpu.dimension_semantics<arbitrary>], iteration_bounds = array<i64: 1, 1>, scalar_prefetch = 0 : i64, scratch_operands = 1 : i64, tpu.core_type = #tpu.core_type<tc>, window_params = [{transform_indices = @transform_0, window_bounds = array<i64: 16, 512>}, {transform_indices = @transform_1, window_bounds = array<i64: 512, 4096>}, {transform_indices = @transform_2, window_bounds = array<i64: 16, 4096>}]} {
    %c0_i32 = arith.constant 0 : i32
    %0 = arith.cmpi eq, %arg1, %c0_i32 : i32
    %1 = arith.extui %0 : i1 to i32
    %c0_i32_0 = arith.constant 0 : i32
    %2 = arith.cmpi ne, %1, %c0_i32_0 : i32
    scf.if %2 {
      %cst_10 = arith.constant 0.000000e+00 : f32
      %12 = vector.broadcast %cst_10 : f32 to vector<16x4096xf32>
      %c0_11 = arith.constant 0 : index
      %c0_12 = arith.constant 0 : index
      %13 = vector.load %arg5[%c0_11, %c0_12] : memref<16x4096xf32, #tpu.memory_space<vmem>>, vector<16x4096xf32>
      tpu.vector_store %arg5[%c0_11, %c0_12], %12 {strides = array<i32>} : memref<16x4096xf32, #tpu.memory_space<vmem>>, vector<16x4096xf32>,
    } else {
    }
    %c0 = arith.constant 0 : index
    %c0_1 = arith.constant 0 : index
    %3 = vector.load %arg5[%c0, %c0_1] : memref<16x4096xf32, #tpu.memory_space<vmem>>, vector<16x4096xf32>
    %c0_2 = arith.constant 0 : index
    %c0_3 = arith.constant 0 : index
    %4 = vector.load %arg2[%c0_2, %c0_3] : memref<16x512xbf16, #tpu.memory_space<vmem>>, vector<16x512xbf16>
    %c0_4 = arith.constant 0 : index
    %c0_5 = arith.constant 0 : index
    %5 = vector.load %arg3[%c0_4, %c0_5] : memref<512x4096xbf16, #tpu.memory_space<vmem>>, vector<512x4096xbf16>
    %cst = arith.constant dense<0.000000e+00> : vector<16x4096xf32>
    %6 = tpu.matmul %4, %5, %cst {dimension_numbers = #tpu.dot_dimension_numbers<[1], [0], [0], [1], [0, 0, 1, 1], [], []>} : vector<16x512xbf16>, vector<512x4096xbf16>, vector<16x4096xf32> -> vector<16x4096xf32>
    %7 = arith.addf %3, %6 : vector<16x4096xf32>
    %c0_6 = arith.constant 0 : index
    %c0_7 = arith.constant 0 : index
    %8 = vector.load %arg5[%c0_6, %c0_7] : memref<16x4096xf32, #tpu.memory_space<vmem>>, vector<16x4096xf32>
    tpu.vector_store %arg5[%c0_6, %c0_7], %7 {strides = array<i32>} : memref<16x4096xf32, #tpu.memory_space<vmem>>, vector<16x4096xf32>,
    %c0_i32_8 = arith.constant 0 : i32
    %9 = arith.cmpi eq, %arg1, %c0_i32_8 : i32
    %10 = arith.extui %9 : i1 to i32
    %c0_i32_9 = arith.constant 0 : i32
    %11 = arith.cmpi ne, %10, %c0_i32_9 : i32
    scf.if %11 {
      %c0_10 = arith.constant 0 : index
      %c0_11 = arith.constant 0 : index
      %12 = vector.load %arg5[%c0_10, %c0_11] : memref<16x4096xf32, #tpu.memory_space<vmem>>, vector<16x4096xf32>
      %c0_12 = arith.constant 0 : index
      %c0_13 = arith.constant 0 : index
      %13 = vector.load %arg4[%c0_12, %c0_13] : memref<16x4096xf32, #tpu.memory_space<vmem>>, vector<16x4096xf32>
      tpu.vector_store %arg4[%c0_12, %c0_13], %12 {strides = array<i32>} : memref<16x4096xf32, #tpu.memory_space<vmem>>, vector<16x4096xf32>,
    } else {
    }
    return
  }
  func.func @transform_0(%arg0: i32, %arg1: i32) -> (i32, i32) {
    %c0_i32 = arith.constant 0 : i32
    return %arg0, %arg1 : i32, i32
  }
  func.func @transform_1(%arg0: i32, %arg1: i32) -> (i32, i32) {
    %c0_i32 = arith.constant 0 : i32
    %c0_i32_0 = arith.constant 0 : i32
    return %arg1, %c0_i32 : i32, i32
  }
  func.func @transform_2(%arg0: i32, %arg1: i32) -> (i32, i32) {
    %c0_i32 = arith.constant 0 : i32
    %c0_i32_0 = arith.constant 0 : i32
    return %arg0, %c0_i32 : i32, i32
  }
}

module attributes {stable_mosaic.version = 11 : i64} {
  func.func @_bn_relu_1x1_kernel(%arg0: i32, %arg1: memref<16x128xf32, #tpu.memory_space<vmem>>, %arg2: memref<128x128xbf16, #tpu.memory_space<vmem>>, %arg3: memref<1x128xf32, #tpu.memory_space<vmem>>, %arg4: memref<1x128xf32, #tpu.memory_space<vmem>>, %arg5: memref<16x128xf32, #tpu.memory_space<vmem>>) attributes {dimension_semantics = [#tpu.dimension_semantics<parallel>], iteration_bounds = array<i64: 1>, scalar_prefetch = 0 : i64, scratch_operands = 0 : i64, tpu.core_type = #tpu.core_type<tc>, window_params = [{transform_indices = @transform_0, window_bounds = array<i64: 16, 128>}, {pipeline_mode = #tpu.pipeline_mode<synchronous>, transform_indices = @transform_1, window_bounds = array<i64: 128, 128>}, {pipeline_mode = #tpu.pipeline_mode<synchronous>, transform_indices = @transform_2, window_bounds = array<i64: 1, 128>}, {pipeline_mode = #tpu.pipeline_mode<synchronous>, transform_indices = @transform_3, window_bounds = array<i64: 1, 128>}, {transform_indices = @transform_4, window_bounds = array<i64: 16, 128>}]} {
    %c0 = arith.constant 0 : index
    %c0_0 = arith.constant 0 : index
    %0 = vector.load %arg1[%c0, %c0_0] : memref<16x128xf32, #tpu.memory_space<vmem>>, vector<16x128xf32>
    %c0_1 = arith.constant 0 : index
    %c0_2 = arith.constant 0 : index
    %1 = vector.load %arg3[%c0_1, %c0_2] : memref<1x128xf32, #tpu.memory_space<vmem>>, vector<1x128xf32>
    %2 = vector.broadcast %1 : vector<1x128xf32> to vector<16x128xf32>
    %3 = arith.addf %0, %2 : vector<16x128xf32>
    %cst = arith.constant 0.000000e+00 : f32
    %4 = vector.broadcast %cst : f32 to vector<16x128xf32>
    %5 = arith.maximumf %3, %4 : vector<16x128xf32>
    %6 = arith.truncf %5 : vector<16x128xf32> to vector<16x128xbf16>
    %c0_3 = arith.constant 0 : index
    %c0_4 = arith.constant 0 : index
    %7 = vector.load %arg2[%c0_3, %c0_4] : memref<128x128xbf16, #tpu.memory_space<vmem>>, vector<128x128xbf16>
    %cst_5 = arith.constant dense<0.000000e+00> : vector<16x128xf32>
    %8 = tpu.matmul %6, %7, %cst_5 {dimension_numbers = #tpu.dot_dimension_numbers<[1], [0], [0], [1], [0, 0, 1, 1], [], []>} : vector<16x128xbf16>, vector<128x128xbf16>, vector<16x128xf32> -> vector<16x128xf32>
    %c0_6 = arith.constant 0 : index
    %c0_7 = arith.constant 0 : index
    %9 = vector.load %arg4[%c0_6, %c0_7] : memref<1x128xf32, #tpu.memory_space<vmem>>, vector<1x128xf32>
    %10 = vector.broadcast %9 : vector<1x128xf32> to vector<16x128xf32>
    %11 = arith.addf %8, %10 : vector<16x128xf32>
    %cst_8 = arith.constant 0.000000e+00 : f32
    %12 = vector.broadcast %cst_8 : f32 to vector<16x128xf32>
    %13 = arith.maximumf %11, %12 : vector<16x128xf32>
    %c0_9 = arith.constant 0 : index
    %c0_10 = arith.constant 0 : index
    %14 = vector.load %arg5[%c0_9, %c0_10] : memref<16x128xf32, #tpu.memory_space<vmem>>, vector<16x128xf32>
    tpu.vector_store %arg5[%c0_9, %c0_10], %13 {strides = array<i32>} : memref<16x128xf32, #tpu.memory_space<vmem>>, vector<16x128xf32>,
    return
  }
  func.func @transform_0(%arg0: i32) -> (i32, i32) {
    %c0_i32 = arith.constant 0 : i32
    %c0_i32_0 = arith.constant 0 : i32
    return %arg0, %c0_i32 : i32, i32
  }
  func.func @transform_1(%arg0: i32) -> (i32, i32) {
    %c0_i32 = arith.constant 0 : i32
    %c0_i32_0 = arith.constant 0 : i32
    %c0_i32_1 = arith.constant 0 : i32
    return %c0_i32, %c0_i32_0 : i32, i32
  }
  func.func @transform_2(%arg0: i32) -> (i32, i32) {
    %c0_i32 = arith.constant 0 : i32
    %c0_i32_0 = arith.constant 0 : i32
    %c0_i32_1 = arith.constant 0 : i32
    return %c0_i32, %c0_i32_0 : i32, i32
  }
  func.func @transform_3(%arg0: i32) -> (i32, i32) {
    %c0_i32 = arith.constant 0 : i32
    %c0_i32_0 = arith.constant 0 : i32
    %c0_i32_1 = arith.constant 0 : i32
    return %c0_i32, %c0_i32_0 : i32, i32
  }
  func.func @transform_4(%arg0: i32) -> (i32, i32) {
    %c0_i32 = arith.constant 0 : i32
    %c0_i32_0 = arith.constant 0 : i32
    return %arg0, %c0_i32 : i32, i32
  }
}

module attributes {stable_mosaic.version = 11 : i64} {
  func.func @_gemm_kernel(%arg0: i32, %arg1: i32, %arg2: memref<16x384xbf16, #tpu.memory_space<vmem>>, %arg3: memref<384x2048xbf16, #tpu.memory_space<vmem>>, %arg4: memref<16x2048xf32, #tpu.memory_space<vmem>>, %arg5: memref<16x2048xf32, #tpu.memory_space<vmem>>) attributes {dimension_semantics = [#tpu.dimension_semantics<parallel>, #tpu.dimension_semantics<arbitrary>], iteration_bounds = array<i64: 1, 1>, scalar_prefetch = 0 : i64, scratch_operands = 1 : i64, tpu.core_type = #tpu.core_type<tc>, window_params = [{transform_indices = @transform_0, window_bounds = array<i64: 16, 384>}, {transform_indices = @transform_1, window_bounds = array<i64: 384, 2048>}, {transform_indices = @transform_2, window_bounds = array<i64: 16, 2048>}]} {
    %c0_i32 = arith.constant 0 : i32
    %0 = arith.cmpi eq, %arg1, %c0_i32 : i32
    %1 = arith.extui %0 : i1 to i32
    %c0_i32_0 = arith.constant 0 : i32
    %2 = arith.cmpi ne, %1, %c0_i32_0 : i32
    scf.if %2 {
      %cst_10 = arith.constant 0.000000e+00 : f32
      %12 = vector.broadcast %cst_10 : f32 to vector<16x2048xf32>
      %c0_11 = arith.constant 0 : index
      %c0_12 = arith.constant 0 : index
      %13 = vector.load %arg5[%c0_11, %c0_12] : memref<16x2048xf32, #tpu.memory_space<vmem>>, vector<16x2048xf32>
      tpu.vector_store %arg5[%c0_11, %c0_12], %12 {strides = array<i32>} : memref<16x2048xf32, #tpu.memory_space<vmem>>, vector<16x2048xf32>,
    } else {
    }
    %c0 = arith.constant 0 : index
    %c0_1 = arith.constant 0 : index
    %3 = vector.load %arg5[%c0, %c0_1] : memref<16x2048xf32, #tpu.memory_space<vmem>>, vector<16x2048xf32>
    %c0_2 = arith.constant 0 : index
    %c0_3 = arith.constant 0 : index
    %4 = vector.load %arg2[%c0_2, %c0_3] : memref<16x384xbf16, #tpu.memory_space<vmem>>, vector<16x384xbf16>
    %c0_4 = arith.constant 0 : index
    %c0_5 = arith.constant 0 : index
    %5 = vector.load %arg3[%c0_4, %c0_5] : memref<384x2048xbf16, #tpu.memory_space<vmem>>, vector<384x2048xbf16>
    %cst = arith.constant dense<0.000000e+00> : vector<16x2048xf32>
    %6 = tpu.matmul %4, %5, %cst {dimension_numbers = #tpu.dot_dimension_numbers<[1], [0], [0], [1], [0, 0, 1, 1], [], []>} : vector<16x384xbf16>, vector<384x2048xbf16>, vector<16x2048xf32> -> vector<16x2048xf32>
    %7 = arith.addf %3, %6 : vector<16x2048xf32>
    %c0_6 = arith.constant 0 : index
    %c0_7 = arith.constant 0 : index
    %8 = vector.load %arg5[%c0_6, %c0_7] : memref<16x2048xf32, #tpu.memory_space<vmem>>, vector<16x2048xf32>
    tpu.vector_store %arg5[%c0_6, %c0_7], %7 {strides = array<i32>} : memref<16x2048xf32, #tpu.memory_space<vmem>>, vector<16x2048xf32>,
    %c0_i32_8 = arith.constant 0 : i32
    %9 = arith.cmpi eq, %arg1, %c0_i32_8 : i32
    %10 = arith.extui %9 : i1 to i32
    %c0_i32_9 = arith.constant 0 : i32
    %11 = arith.cmpi ne, %10, %c0_i32_9 : i32
    scf.if %11 {
      %c0_10 = arith.constant 0 : index
      %c0_11 = arith.constant 0 : index
      %12 = vector.load %arg5[%c0_10, %c0_11] : memref<16x2048xf32, #tpu.memory_space<vmem>>, vector<16x2048xf32>
      %c0_12 = arith.constant 0 : index
      %c0_13 = arith.constant 0 : index
      %13 = vector.load %arg4[%c0_12, %c0_13] : memref<16x2048xf32, #tpu.memory_space<vmem>>, vector<16x2048xf32>
      tpu.vector_store %arg4[%c0_12, %c0_13], %12 {strides = array<i32>} : memref<16x2048xf32, #tpu.memory_space<vmem>>, vector<16x2048xf32>,
    } else {
    }
    return
  }
  func.func @transform_0(%arg0: i32, %arg1: i32) -> (i32, i32) {
    %c0_i32 = arith.constant 0 : i32
    return %arg0, %arg1 : i32, i32
  }
  func.func @transform_1(%arg0: i32, %arg1: i32) -> (i32, i32) {
    %c0_i32 = arith.constant 0 : i32
    %c0_i32_0 = arith.constant 0 : i32
    return %arg1, %c0_i32 : i32, i32
  }
  func.func @transform_2(%arg0: i32, %arg1: i32) -> (i32, i32) {
    %c0_i32 = arith.constant 0 : i32
    %c0_i32_0 = arith.constant 0 : i32
    return %arg0, %c0_i32 : i32, i32
  }
}

module attributes {stable_mosaic.version = 11 : i64} {
  func.func @_bn_relu_1x1_kernel(%arg0: i32, %arg1: memref<128x128xf32, #tpu.memory_space<vmem>>, %arg2: memref<128x128xbf16, #tpu.memory_space<vmem>>, %arg3: memref<1x128xf32, #tpu.memory_space<vmem>>, %arg4: memref<1x128xf32, #tpu.memory_space<vmem>>, %arg5: memref<128x128xf32, #tpu.memory_space<vmem>>) attributes {dimension_semantics = [#tpu.dimension_semantics<parallel>], iteration_bounds = array<i64: 1>, scalar_prefetch = 0 : i64, scratch_operands = 0 : i64, tpu.core_type = #tpu.core_type<tc>, window_params = [{transform_indices = @transform_0, window_bounds = array<i64: 128, 128>}, {pipeline_mode = #tpu.pipeline_mode<synchronous>, transform_indices = @transform_1, window_bounds = array<i64: 128, 128>}, {pipeline_mode = #tpu.pipeline_mode<synchronous>, transform_indices = @transform_2, window_bounds = array<i64: 1, 128>}, {pipeline_mode = #tpu.pipeline_mode<synchronous>, transform_indices = @transform_3, window_bounds = array<i64: 1, 128>}, {transform_indices = @transform_4, window_bounds = array<i64: 128, 128>}]} {
    %c0 = arith.constant 0 : index
    %c0_0 = arith.constant 0 : index
    %0 = vector.load %arg1[%c0, %c0_0] : memref<128x128xf32, #tpu.memory_space<vmem>>, vector<128x128xf32>
    %c0_1 = arith.constant 0 : index
    %c0_2 = arith.constant 0 : index
    %1 = vector.load %arg3[%c0_1, %c0_2] : memref<1x128xf32, #tpu.memory_space<vmem>>, vector<1x128xf32>
    %2 = vector.broadcast %1 : vector<1x128xf32> to vector<128x128xf32>
    %3 = arith.addf %0, %2 : vector<128x128xf32>
    %cst = arith.constant 0.000000e+00 : f32
    %4 = vector.broadcast %cst : f32 to vector<128x128xf32>
    %5 = arith.maximumf %3, %4 : vector<128x128xf32>
    %6 = arith.truncf %5 : vector<128x128xf32> to vector<128x128xbf16>
    %c0_3 = arith.constant 0 : index
    %c0_4 = arith.constant 0 : index
    %7 = vector.load %arg2[%c0_3, %c0_4] : memref<128x128xbf16, #tpu.memory_space<vmem>>, vector<128x128xbf16>
    %cst_5 = arith.constant dense<0.000000e+00> : vector<128x128xf32>
    %8 = tpu.matmul %6, %7, %cst_5 {dimension_numbers = #tpu.dot_dimension_numbers<[1], [0], [0], [1], [0, 0, 1, 1], [], []>} : vector<128x128xbf16>, vector<128x128xbf16>, vector<128x128xf32> -> vector<128x128xf32>
    %c0_6 = arith.constant 0 : index
    %c0_7 = arith.constant 0 : index
    %9 = vector.load %arg4[%c0_6, %c0_7] : memref<1x128xf32, #tpu.memory_space<vmem>>, vector<1x128xf32>
    %10 = vector.broadcast %9 : vector<1x128xf32> to vector<128x128xf32>
    %11 = arith.addf %8, %10 : vector<128x128xf32>
    %cst_8 = arith.constant 0.000000e+00 : f32
    %12 = vector.broadcast %cst_8 : f32 to vector<128x128xf32>
    %13 = arith.maximumf %11, %12 : vector<128x128xf32>
    %c0_9 = arith.constant 0 : index
    %c0_10 = arith.constant 0 : index
    %14 = vector.load %arg5[%c0_9, %c0_10] : memref<128x128xf32, #tpu.memory_space<vmem>>, vector<128x128xf32>
    tpu.vector_store %arg5[%c0_9, %c0_10], %13 {strides = array<i32>} : memref<128x128xf32, #tpu.memory_space<vmem>>, vector<128x128xf32>,
    return
  }
  func.func @transform_0(%arg0: i32) -> (i32, i32) {
    %c0_i32 = arith.constant 0 : i32
    %c0_i32_0 = arith.constant 0 : i32
    return %arg0, %c0_i32 : i32, i32
  }
  func.func @transform_1(%arg0: i32) -> (i32, i32) {
    %c0_i32 = arith.constant 0 : i32
    %c0_i32_0 = arith.constant 0 : i32
    %c0_i32_1 = arith.constant 0 : i32
    return %c0_i32, %c0_i32_0 : i32, i32
  }
  func.func @transform_2(%arg0: i32) -> (i32, i32) {
    %c0_i32 = arith.constant 0 : i32
    %c0_i32_0 = arith.constant 0 : i32
    %c0_i32_1 = arith.constant 0 : i32
    return %c0_i32, %c0_i32_0 : i32, i32
  }
  func.func @transform_3(%arg0: i32) -> (i32, i32) {
    %c0_i32 = arith.constant 0 : i32
    %c0_i32_0 = arith.constant 0 : i32
    %c0_i32_1 = arith.constant 0 : i32
    return %c0_i32, %c0_i32_0 : i32, i32
  }
  func.func @transform_4(%arg0: i32) -> (i32, i32) {
    %c0_i32 = arith.constant 0 : i32
    %c0_i32_0 = arith.constant 0 : i32
    return %arg0, %c0_i32 : i32, i32
  }
}

module attributes {stable_mosaic.version = 11 : i64} {
  func.func @_gemm_kernel(%arg0: i32, %arg1: i32, %arg2: memref<128x256xbf16, #tpu.memory_space<vmem>>, %arg3: memref<256x512xbf16, #tpu.memory_space<vmem>>, %arg4: memref<128x512xf32, #tpu.memory_space<vmem>>, %arg5: memref<128x512xf32, #tpu.memory_space<vmem>>) attributes {dimension_semantics = [#tpu.dimension_semantics<parallel>, #tpu.dimension_semantics<arbitrary>], iteration_bounds = array<i64: 1, 1>, scalar_prefetch = 0 : i64, scratch_operands = 1 : i64, tpu.core_type = #tpu.core_type<tc>, window_params = [{transform_indices = @transform_0, window_bounds = array<i64: 128, 256>}, {transform_indices = @transform_1, window_bounds = array<i64: 256, 512>}, {transform_indices = @transform_2, window_bounds = array<i64: 128, 512>}]} {
    %c0_i32 = arith.constant 0 : i32
    %0 = arith.cmpi eq, %arg1, %c0_i32 : i32
    %1 = arith.extui %0 : i1 to i32
    %c0_i32_0 = arith.constant 0 : i32
    %2 = arith.cmpi ne, %1, %c0_i32_0 : i32
    scf.if %2 {
      %cst_10 = arith.constant 0.000000e+00 : f32
      %12 = vector.broadcast %cst_10 : f32 to vector<128x512xf32>
      %c0_11 = arith.constant 0 : index
      %c0_12 = arith.constant 0 : index
      %13 = vector.load %arg5[%c0_11, %c0_12] : memref<128x512xf32, #tpu.memory_space<vmem>>, vector<128x512xf32>
      tpu.vector_store %arg5[%c0_11, %c0_12], %12 {strides = array<i32>} : memref<128x512xf32, #tpu.memory_space<vmem>>, vector<128x512xf32>,
    } else {
    }
    %c0 = arith.constant 0 : index
    %c0_1 = arith.constant 0 : index
    %3 = vector.load %arg5[%c0, %c0_1] : memref<128x512xf32, #tpu.memory_space<vmem>>, vector<128x512xf32>
    %c0_2 = arith.constant 0 : index
    %c0_3 = arith.constant 0 : index
    %4 = vector.load %arg2[%c0_2, %c0_3] : memref<128x256xbf16, #tpu.memory_space<vmem>>, vector<128x256xbf16>
    %c0_4 = arith.constant 0 : index
    %c0_5 = arith.constant 0 : index
    %5 = vector.load %arg3[%c0_4, %c0_5] : memref<256x512xbf16, #tpu.memory_space<vmem>>, vector<256x512xbf16>
    %cst = arith.constant dense<0.000000e+00> : vector<128x512xf32>
    %6 = tpu.matmul %4, %5, %cst {dimension_numbers = #tpu.dot_dimension_numbers<[1], [0], [0], [1], [0, 0, 1, 1], [], []>} : vector<128x256xbf16>, vector<256x512xbf16>, vector<128x512xf32> -> vector<128x512xf32>
    %7 = arith.addf %3, %6 : vector<128x512xf32>
    %c0_6 = arith.constant 0 : index
    %c0_7 = arith.constant 0 : index
    %8 = vector.load %arg5[%c0_6, %c0_7] : memref<128x512xf32, #tpu.memory_space<vmem>>, vector<128x512xf32>
    tpu.vector_store %arg5[%c0_6, %c0_7], %7 {strides = array<i32>} : memref<128x512xf32, #tpu.memory_space<vmem>>, vector<128x512xf32>,
    %c0_i32_8 = arith.constant 0 : i32
    %9 = arith.cmpi eq, %arg1, %c0_i32_8 : i32
    %10 = arith.extui %9 : i1 to i32
    %c0_i32_9 = arith.constant 0 : i32
    %11 = arith.cmpi ne, %10, %c0_i32_9 : i32
    scf.if %11 {
      %c0_10 = arith.constant 0 : index
      %c0_11 = arith.constant 0 : index
      %12 = vector.load %arg5[%c0_10, %c0_11] : memref<128x512xf32, #tpu.memory_space<vmem>>, vector<128x512xf32>
      %c0_12 = arith.constant 0 : index
      %c0_13 = arith.constant 0 : index
      %13 = vector.load %arg4[%c0_12, %c0_13] : memref<128x512xf32, #tpu.memory_space<vmem>>, vector<128x512xf32>
      tpu.vector_store %arg4[%c0_12, %c0_13], %12 {strides = array<i32>} : memref<128x512xf32, #tpu.memory_space<vmem>>, vector<128x512xf32>,
    } else {
    }
    return
  }
  func.func @transform_0(%arg0: i32, %arg1: i32) -> (i32, i32) {
    %c0_i32 = arith.constant 0 : i32
    return %arg0, %arg1 : i32, i32
  }
  func.func @transform_1(%arg0: i32, %arg1: i32) -> (i32, i32) {
    %c0_i32 = arith.constant 0 : i32
    %c0_i32_0 = arith.constant 0 : i32
    return %arg1, %c0_i32 : i32, i32
  }
  func.func @transform_2(%arg0: i32, %arg1: i32) -> (i32, i32) {
    %c0_i32 = arith.constant 0 : i32
    %c0_i32_0 = arith.constant 0 : i32
    return %arg0, %c0_i32 : i32, i32
  }
}

module attributes {stable_mosaic.version = 11 : i64} {
  func.func @_bn_relu_1x1_kernel(%arg0: i32, %arg1: memref<512x128xf32, #tpu.memory_space<vmem>>, %arg2: memref<128x128xbf16, #tpu.memory_space<vmem>>, %arg3: memref<1x128xf32, #tpu.memory_space<vmem>>, %arg4: memref<1x128xf32, #tpu.memory_space<vmem>>, %arg5: memref<512x128xf32, #tpu.memory_space<vmem>>) attributes {dimension_semantics = [#tpu.dimension_semantics<parallel>], iteration_bounds = array<i64: 2>, scalar_prefetch = 0 : i64, scratch_operands = 0 : i64, tpu.core_type = #tpu.core_type<tc>, window_params = [{transform_indices = @transform_0, window_bounds = array<i64: 512, 128>}, {pipeline_mode = #tpu.pipeline_mode<synchronous>, transform_indices = @transform_1, window_bounds = array<i64: 128, 128>}, {pipeline_mode = #tpu.pipeline_mode<synchronous>, transform_indices = @transform_2, window_bounds = array<i64: 1, 128>}, {pipeline_mode = #tpu.pipeline_mode<synchronous>, transform_indices = @transform_3, window_bounds = array<i64: 1, 128>}, {transform_indices = @transform_4, window_bounds = array<i64: 512, 128>}]} {
    %c0 = arith.constant 0 : index
    %c0_0 = arith.constant 0 : index
    %0 = vector.load %arg1[%c0, %c0_0] : memref<512x128xf32, #tpu.memory_space<vmem>>, vector<512x128xf32>
    %c0_1 = arith.constant 0 : index
    %c0_2 = arith.constant 0 : index
    %1 = vector.load %arg3[%c0_1, %c0_2] : memref<1x128xf32, #tpu.memory_space<vmem>>, vector<1x128xf32>
    %2 = vector.broadcast %1 : vector<1x128xf32> to vector<512x128xf32>
    %3 = arith.addf %0, %2 : vector<512x128xf32>
    %cst = arith.constant 0.000000e+00 : f32
    %4 = vector.broadcast %cst : f32 to vector<512x128xf32>
    %5 = arith.maximumf %3, %4 : vector<512x128xf32>
    %6 = arith.truncf %5 : vector<512x128xf32> to vector<512x128xbf16>
    %c0_3 = arith.constant 0 : index
    %c0_4 = arith.constant 0 : index
    %7 = vector.load %arg2[%c0_3, %c0_4] : memref<128x128xbf16, #tpu.memory_space<vmem>>, vector<128x128xbf16>
    %cst_5 = arith.constant dense<0.000000e+00> : vector<512x128xf32>
    %8 = tpu.matmul %6, %7, %cst_5 {dimension_numbers = #tpu.dot_dimension_numbers<[1], [0], [0], [1], [0, 0, 1, 1], [], []>} : vector<512x128xbf16>, vector<128x128xbf16>, vector<512x128xf32> -> vector<512x128xf32>
    %c0_6 = arith.constant 0 : index
    %c0_7 = arith.constant 0 : index
    %9 = vector.load %arg4[%c0_6, %c0_7] : memref<1x128xf32, #tpu.memory_space<vmem>>, vector<1x128xf32>
    %10 = vector.broadcast %9 : vector<1x128xf32> to vector<512x128xf32>
    %11 = arith.addf %8, %10 : vector<512x128xf32>
    %cst_8 = arith.constant 0.000000e+00 : f32
    %12 = vector.broadcast %cst_8 : f32 to vector<512x128xf32>
    %13 = arith.maximumf %11, %12 : vector<512x128xf32>
    %c0_9 = arith.constant 0 : index
    %c0_10 = arith.constant 0 : index
    %14 = vector.load %arg5[%c0_9, %c0_10] : memref<512x128xf32, #tpu.memory_space<vmem>>, vector<512x128xf32>
    tpu.vector_store %arg5[%c0_9, %c0_10], %13 {strides = array<i32>} : memref<512x128xf32, #tpu.memory_space<vmem>>, vector<512x128xf32>,
    return
  }
  func.func @transform_0(%arg0: i32) -> (i32, i32) {
    %c0_i32 = arith.constant 0 : i32
    %c0_i32_0 = arith.constant 0 : i32
    return %arg0, %c0_i32 : i32, i32
  }
  func.func @transform_1(%arg0: i32) -> (i32, i32) {
    %c0_i32 = arith.constant 0 : i32
    %c0_i32_0 = arith.constant 0 : i32
    %c0_i32_1 = arith.constant 0 : i32
    return %c0_i32, %c0_i32_0 : i32, i32
  }
  func.func @transform_2(%arg0: i32) -> (i32, i32) {
    %c0_i32 = arith.constant 0 : i32
    %c0_i32_0 = arith.constant 0 : i32
    %c0_i32_1 = arith.constant 0 : i32
    return %c0_i32, %c0_i32_0 : i32, i32
  }
  func.func @transform_3(%arg0: i32) -> (i32, i32) {
    %c0_i32 = arith.constant 0 : i32
    %c0_i32_0 = arith.constant 0 : i32
    %c0_i32_1 = arith.constant 0 : i32
    return %c0_i32, %c0_i32_0 : i32, i32
  }
  func.func @transform_4(%arg0: i32) -> (i32, i32) {
    %c0_i32 = arith.constant 0 : i32
    %c0_i32_0 = arith.constant 0 : i32
    return %arg0, %c0_i32 : i32, i32
  }
}

module attributes {stable_mosaic.version = 11 : i64} {
  func.func @_gemm_kernel(%arg0: i32, %arg1: i32, %arg2: memref<512x256xbf16, #tpu.memory_space<vmem>>, %arg3: memref<256x128xbf16, #tpu.memory_space<vmem>>, %arg4: memref<512x128xf32, #tpu.memory_space<vmem>>, %arg5: memref<512x128xf32, #tpu.memory_space<vmem>>) attributes {dimension_semantics = [#tpu.dimension_semantics<parallel>, #tpu.dimension_semantics<arbitrary>], iteration_bounds = array<i64: 2, 1>, scalar_prefetch = 0 : i64, scratch_operands = 1 : i64, tpu.core_type = #tpu.core_type<tc>, window_params = [{transform_indices = @transform_0, window_bounds = array<i64: 512, 256>}, {transform_indices = @transform_1, window_bounds = array<i64: 256, 128>}, {transform_indices = @transform_2, window_bounds = array<i64: 512, 128>}]} {
    %c0_i32 = arith.constant 0 : i32
    %0 = arith.cmpi eq, %arg1, %c0_i32 : i32
    %1 = arith.extui %0 : i1 to i32
    %c0_i32_0 = arith.constant 0 : i32
    %2 = arith.cmpi ne, %1, %c0_i32_0 : i32
    scf.if %2 {
      %cst_10 = arith.constant 0.000000e+00 : f32
      %12 = vector.broadcast %cst_10 : f32 to vector<512x128xf32>
      %c0_11 = arith.constant 0 : index
      %c0_12 = arith.constant 0 : index
      %13 = vector.load %arg5[%c0_11, %c0_12] : memref<512x128xf32, #tpu.memory_space<vmem>>, vector<512x128xf32>
      tpu.vector_store %arg5[%c0_11, %c0_12], %12 {strides = array<i32>} : memref<512x128xf32, #tpu.memory_space<vmem>>, vector<512x128xf32>,
    } else {
    }
    %c0 = arith.constant 0 : index
    %c0_1 = arith.constant 0 : index
    %3 = vector.load %arg5[%c0, %c0_1] : memref<512x128xf32, #tpu.memory_space<vmem>>, vector<512x128xf32>
    %c0_2 = arith.constant 0 : index
    %c0_3 = arith.constant 0 : index
    %4 = vector.load %arg2[%c0_2, %c0_3] : memref<512x256xbf16, #tpu.memory_space<vmem>>, vector<512x256xbf16>
    %c0_4 = arith.constant 0 : index
    %c0_5 = arith.constant 0 : index
    %5 = vector.load %arg3[%c0_4, %c0_5] : memref<256x128xbf16, #tpu.memory_space<vmem>>, vector<256x128xbf16>
    %cst = arith.constant dense<0.000000e+00> : vector<512x128xf32>
    %6 = tpu.matmul %4, %5, %cst {dimension_numbers = #tpu.dot_dimension_numbers<[1], [0], [0], [1], [0, 0, 1, 1], [], []>} : vector<512x256xbf16>, vector<256x128xbf16>, vector<512x128xf32> -> vector<512x128xf32>
    %7 = arith.addf %3, %6 : vector<512x128xf32>
    %c0_6 = arith.constant 0 : index
    %c0_7 = arith.constant 0 : index
    %8 = vector.load %arg5[%c0_6, %c0_7] : memref<512x128xf32, #tpu.memory_space<vmem>>, vector<512x128xf32>
    tpu.vector_store %arg5[%c0_6, %c0_7], %7 {strides = array<i32>} : memref<512x128xf32, #tpu.memory_space<vmem>>, vector<512x128xf32>,
    %c0_i32_8 = arith.constant 0 : i32
    %9 = arith.cmpi eq, %arg1, %c0_i32_8 : i32
    %10 = arith.extui %9 : i1 to i32
    %c0_i32_9 = arith.constant 0 : i32
    %11 = arith.cmpi ne, %10, %c0_i32_9 : i32
    scf.if %11 {
      %c0_10 = arith.constant 0 : index
      %c0_11 = arith.constant 0 : index
      %12 = vector.load %arg5[%c0_10, %c0_11] : memref<512x128xf32, #tpu.memory_space<vmem>>, vector<512x128xf32>
      %cst_12 = arith.constant 0.000000e+00 : f32
      %13 = vector.broadcast %cst_12 : f32 to vector<512x128xf32>
      %14 = arith.subf %13, %12 : vector<512x128xf32>
      %15 = math.exp %14 : vector<512x128xf32>
      %cst_13 = arith.constant 1.000000e+00 : f32
      %16 = vector.broadcast %cst_13 : f32 to vector<512x128xf32>
      %17 = arith.addf %16, %15 : vector<512x128xf32>
      %cst_14 = arith.constant 1.000000e+00 : f32
      %18 = vector.broadcast %cst_14 : f32 to vector<512x128xf32>
      %19 = arith.divf %18, %17 : vector<512x128xf32>
      %c0_15 = arith.constant 0 : index
      %c0_16 = arith.constant 0 : index
      %20 = vector.load %arg4[%c0_15, %c0_16] : memref<512x128xf32, #tpu.memory_space<vmem>>, vector<512x128xf32>
      tpu.vector_store %arg4[%c0_15, %c0_16], %19 {strides = array<i32>} : memref<512x128xf32, #tpu.memory_space<vmem>>, vector<512x128xf32>,
    } else {
    }
    return
  }
  func.func @transform_0(%arg0: i32, %arg1: i32) -> (i32, i32) {
    %c0_i32 = arith.constant 0 : i32
    return %arg0, %arg1 : i32, i32
  }
  func.func @transform_1(%arg0: i32, %arg1: i32) -> (i32, i32) {
    %c0_i32 = arith.constant 0 : i32
    %c0_i32_0 = arith.constant 0 : i32
    return %arg1, %c0_i32 : i32, i32
  }
  func.func @transform_2(%arg0: i32, %arg1: i32) -> (i32, i32) {
    %c0_i32 = arith.constant 0 : i32
    %c0_i32_0 = arith.constant 0 : i32
    return %arg0, %c0_i32 : i32, i32
  }
}

</mosaic_0001>

<bundles_post_ra>
// kernel: segnet3d_rec_forward.8
= control target key start
LH: loop header
LB: loop body
LE: loop exit
PB: predicated region body
PF: predicated region fallthrough
CT: control target
= control target key end

     0   :  { %9 = vsyncpa [#allocation3], 0  ;;  %s362_s0 = inlined_call_operand.vmem [shape: f32[16,128], index: 0, kind: input, shape index: {}]   ;;  %s363_s1 = inlined_call_operand.hbm [shape: bf16[128,128], index: 1, kind: input, shape index: {}]   ;;  %s364_s2 = inlined_call_operand.hbm [shape: f32[1,128], index: 2, kind: input, shape index: {}]   ;;  %s365_s3 = inlined_call_operand.hbm [shape: f32[1,128], index: 3, kind: input, shape index: {}]   ;;  %s366_s4 = inlined_call_operand.vmem [shape: f32[16,128], index: 4, kind: output, shape index: {}]  }
   0x1   :  { %10 = vsyncpa [#allocation5], 0  ;;  %s309_s15 = smov [#allocation4]   ;;  %s310_s17 = smov [#allocation2]  }
   0x2   :  { %s31_s16 = sshll.u32 %s309_s15, 4  ;;  %s18_s18 = sshll.u32 %s310_s17, 4  ;;  %s32_s16 = int_to_ptr.vmem [resolvable:$true] %s31_s16  ;;  %s19_s18 = int_to_ptr.vmem [resolvable:$true] %s18_s18 }
   0x3   :  { %s253_s19 = scalar_lea.vmem %s32_s16, 16  ;;  %s257_s20 = scalar_lea.vmem %s32_s16, 32 }
   0x4   :  { %p254_p0 = scmp.ne.s32.totalorder %s32_s16, %s253_s19  ;;  %p258_p1 = scmp.lt.s32.totalorder %s32_s16, %s32_s16 }
   0x5   :  { %p259_p2 = scmp.lt.s32.totalorder %s257_s20, %s253_s19 }
   0x7   :  { %p260_p3 = por %p259_p2, %p258_p1 }
   0x9   :  { %p261_p4 = pnand %p260_p3, %p254_p0 }
   0xb   :  { %264 = shalt.err (!%p261_p4)
}
   0xc   :  { %34 = dma.hbm_to_vmem [thread:$0]  %s364_s2, 16, %s32_s16, [#allocation5]  }
   0xd   :  { %s273_s23 = scalar_lea.vmem %s19_s18, 1024  ;;  %p278_p6 = scmp.lt.s32.totalorder %s19_s18, %s19_s18 }
   0xe   :  { %p274_p5 = scmp.ne.s32.totalorder %s19_s18, %s273_s23  ;;  %p279_p7 = scmp.lt.s32.totalorder %s273_s23, %s273_s23 }
  0x10   :  { %p280_p8 = por %p279_p7, %p278_p6 }
  0x12   :  { %p281_p9 = pnand %p280_p8, %p274_p5 }
  0x14   :  { %284 = shalt.err (!%p281_p9)
}
  0x15   :  { %s311_s24 = smov 64   ;;  %s312_s25 = smov 4  }
  0x16   :  { %24 = dma.hbm_to_vmem [thread:$0]  %s363_s1, 1024, %s19_s18, [#allocation3], %s311_s24, %s311_s24, %s312_s25  }
  0x17   :  { %s313_s28 = smov [#allocation6]  }
  0x18   :  { %s41_s29 = sshll.u32 %s313_s28, 4  ;;  %s42_s29 = int_to_ptr.vmem [resolvable:$true] %s41_s29 }
  0x19   :  { %s293_s30 = scalar_lea.vmem %s42_s29, 16  ;;  %s297_s5 = scalar_lea.vmem %s42_s29, 32 }
  0x1a   :  { %p294_p10 = scmp.ne.s32.totalorder %s42_s29, %s293_s30  ;;  %p298_p11 = scmp.lt.s32.totalorder %s42_s29, %s42_s29 }
  0x1b   :  { %p299_p12 = scmp.lt.s32.totalorder %s297_s5, %s293_s30 }
  0x1d   :  { %p300_p13 = por %p299_p12, %p298_p11 }
  0x1f   :  { %p301_p0 = pnand %p300_p13, %p294_p10 }
  0x21   :  { %304 = shalt.err (!%p301_p0)
}
  0x22   :  { %44 = dma.hbm_to_vmem [thread:$0]  %s365_s3, 16, %s42_s29, [#allocation5]  }
  0x23   :  { %305 = dma.done.wait [#allocation3], 1024  }
  0x24   :  { %306 = vsyncadd [#allocation3], 4294966272 }
  0x25   :  { %307 = dma.done.wait [#allocation5], 32  }
  0x26   :  { %308 = vsyncadd [#allocation5], 4294967264  ;;  %v314_v0 = vmov 0.0   ;;  %vm315_vm0 = vmmov 0   ;;  %v237_v1 = vld [vmem:[#allocation2 + $0x38] sm:$0xff]   ;;  %v238_v2 = vld [vmem:[#allocation2 + $0x30] sm:$0xff]  }
  0x27   :  { %210 = vmatprep.subr.bf16.mxu0 %v314_v0  ;;  %226 = vmatprep.mubr.msk.bf16.mxu0 %vm315_vm0, %v314_v0  ;;  %v239_v3 = vld [vmem:[#allocation2 + $0x28] sm:$0xff]   ;;  %v240_v4 = vld [vmem:[#allocation2 + $0x20] sm:$0xff]   ;;  %v241_v5 = vld [vmem:[#allocation2 + $0x18] sm:$0xff]  }
  0x28   :  { %211 = vmatpush3.bf16.msra.mxu0 %v237_v1  ;;  %v242_v6 = vld [vmem:[#allocation2 + $0x10] sm:$0xff]   ;;  %v55_v7 = vld [vmem:[%s362_s0] sm:$0xff]  ;;  %v56_v8 = vld [vmem:[%s362_s0 + $0x8] sm:$0xff] }
  0x29   :  { %212 = vmatprep.subr.bf16.mxu0 %v314_v0  ;;  %v191_v9 = vld [vmem:[#allocation4] ss:$0 sm:$0xff]  ;;  %v243_v12 = vld [vmem:[#allocation2 + $0x8] sm:$0xff]   ;;  %v192_v17 = vld [vmem:[#allocation6] ss:$0 sm:$0xff] }
  0x2a   :  { %v64_v10 = vadd.f32 %v191_v9, %v55_v7  ;;  %v65_v11 = vadd.f32 %v191_v9, %v56_v8  ;;  %v244_v15 = vld [vmem:[#allocation2] sm:$0xff]  }
  0x2c   :  { %213 = vmatpush3.bf16.msra.mxu0 %v238_v2  ;;  %v66_v13 = vmax.f32 %v64_v10, 0.0  ;;  %v67_v14 = vmax.f32 %v65_v11, 0.0 }
  0x2d   :  { %214 = vmatprep.subr.bf16.mxu0 %v314_v0 }
  0x2e   :  { %v68_v16 = vpack.c.bf16 %v67_v14, %v66_v13 }
  0x30   :  { %215 = vmatpush3.bf16.msra.mxu0 %v239_v3 }
  0x31   :  { %216 = vmatprep.subr.bf16.mxu0 %v314_v0 }
  0x34   :  { %217 = vmatpush3.bf16.msra.mxu0 %v240_v4 }
  0x35   :  { %218 = vmatprep.subr.bf16.mxu0 %v314_v0 }
  0x38   :  { %219 = vmatpush3.bf16.msra.mxu0 %v241_v5 }
  0x39   :  { %220 = vmatprep.subr.bf16.mxu0 %v314_v0 }
  0x3c   :  { %221 = vmatpush3.bf16.msra.mxu0 %v242_v6 }
  0x3d   :  { %222 = vmatprep.subr.bf16.mxu0 %v314_v0 }
  0x40   :  { %223 = vmatpush3.bf16.msra.mxu0 %v243_v12 }
  0x41   :  { %224 = vmatprep.subr.bf16.mxu0 %v314_v0 }
  0x44   :  { %225 = vmatpush3.bf16.msra.mxu0 %v244_v15 }
  0x47   :  { %227 = vmatmul.mubr.bf16.vlgmr.msra.gmra.mxu0 %v68_v16 }
 0x107   :  { %v174_v18 = vpop.f32.mrf.mxu0 }
 0x108   :  { %v175_v19 = vadd.f32 %v192_v17, %v174_v18 }
 0x109   :  { %v228_v20 = vpop.f32.mrf.mxu0 }
 0x10a   :  { %v181_v21 = vmax.f32 %v175_v19, 0.0 }
 0x10b   :  { %v177_v22 = vpop.f32.mrf.mxu0 }
 0x10c   :  { %183 = vst [vmem:[%s366_s4] sm:$0xff] %v181_v21  ;;  %v178_v23 = vadd.f32 %v192_v17, %v177_v22 }
 0x10d   :  { %v229_v24 = vpop.f32.mrf.mxu0 }
 0x10e   :  { %v182_v25 = vmax.f32 %v178_v23, 0.0 }
 0x110   :  { %184 = vst [vmem:[%s366_s4 + $0x8] sm:$0xff] %v182_v25 }
 0x111   :  { %189 = vsyncpa [#allocation3], 1 }
 0x112   :  { %190 = vsyncpa [#allocation5], 1 }

// kernel: segnet3d_rec_forward.9
= control target key start
LH: loop header
LB: loop body
LE: loop exit
PB: predicated region body
PF: predicated region fallthrough
CT: control target
= control target key end

     0   :  { %7 = vsyncpa [#allocation4], 0  ;;  %s3663_s9 = smov [#allocation3]   ;;  %s3845_s0 = inlined_call_operand.vmem [shape: bf16[16,384], index: 0, kind: input, shape index: {}]   ;;  %s3846_s1 = inlined_call_operand.hbm [shape: bf16[384,2048], index: 1, kind: input, shape index: {}]   ;;  %s3847_s2 = inlined_call_operand.vmem [shape: f32[16,2048], index: 2, kind: output, shape index: {}]  }
   0x1   :  { %s15_s10 = sshll.u32 %s3663_s9, 4  ;;  %s16_s10 = int_to_ptr.vmem [resolvable:$true] %s15_s10 }
   0x2   :  { %s3649_s11 = scalar_lea.vmem %s16_s10, 49152  ;;  %p3654_p1 = scmp.lt.s32.totalorder %s16_s10, %s16_s10 }
   0x3   :  { %p3650_p0 = scmp.ne.s32.totalorder %s16_s10, %s3649_s11  ;;  %p3655_p2 = scmp.lt.s32.totalorder %s3649_s11, %s3649_s11 }
   0x5   :  { %p3656_p3 = por %p3655_p2, %p3654_p1 }
   0x7   :  { %p3657_p4 = pnand %p3656_p3, %p3650_p0 }
   0x9   :  { %3660 = shalt.err (!%p3657_p4)
}
   0xa   :  { %s3664_s12 = smov 1024   ;;  %s3665_s13 = smov 64  }
   0xb   :  { %21 = dma.hbm_to_vmem [thread:$0]  %s3846_s1, 49152, %s16_s10, [#allocation4], %s3664_s12, %s3664_s12, %s3665_s13  }
   0xc   :  { %3661 = dma.done.wait [#allocation4], 49152  }
   0xd   :  { %3662 = vsyncadd [#allocation4], 4294918144  ;;  %v3666_v0 = vmov 0   ;;  %v210_v1 = vld [vmem:[#allocation3 + $0x380] sm:$0xff] }
   0xe   :  { %2493 = vmatprep.mubr.bf16.mxu1 %v3666_v0  ;;  %v218_v2 = vld [vmem:[#allocation3 + $0x3c0] sm:$0xff] }
   0xf   :  { %v466_v3 = vld [vmem:[#allocation3 + $0xb80] sm:$0xff]  ;;  %v3358_v4 = vcombine.high %v210_v1, %v218_v2  ;;  %v3357_v6 = vcombine.low %v210_v1, %v218_v2 }
  0x10   :  { %v474_v5 = vld [vmem:[#allocation3 + $0xbc0] sm:$0xff] }
  0x11   :  { %v194_v7 = vld [vmem:[#allocation3 + $0x300] sm:$0xff]  ;;  %v3614_v9 = vcombine.high %v466_v3, %v474_v5  ;;  %v3613_v10 = vcombine.low %v466_v3, %v474_v5  ;;  %2418 = vmatprep.subr.bf16.mxu0 %v3358_v4  ;;  %v211_v3 = vld [vmem:[#allocation3 + $0x388] sm:$0xff] }
  0x12   :  { %v202_v8 = vld [vmem:[#allocation3 + $0x340] sm:$0xff]  ;;  %2419 = vmatpush1.bf16.msra.mxu0 %v3357_v6  ;;  %v219_v4 = vld [vmem:[#allocation3 + $0x3c8] sm:$0xff] }
  0x13   :  { %v3342_v11 = vcombine.high %v194_v7, %v202_v8  ;;  %v450_v12 = vld [vmem:[#allocation3 + $0xb00] sm:$0xff]  ;;  %2461 = vmatprep.subr.bf16.mxu1 %v3614_v9  ;;  %v3341_v19 = vcombine.low %v194_v7, %v202_v8  ;;  %v3360_v8 = vcombine.high %v211_v3, %v219_v4 }
  0x14   :  { %v458_v13 = vld [vmem:[#allocation3 + $0xb40] sm:$0xff]  ;;  %2462 = vmatpush1.bf16.msra.mxu1 %v3613_v10 }
  0x15   :  { %v178_v14 = vld [vmem:[#allocation3 + $0x280] sm:$0xff]  ;;  %v3598_v15 = vcombine.high %v450_v12, %v458_v13  ;;  %2420 = vmatprep.subr.bf16.mxu0 %v3342_v11  ;;  %v3597_v20 = vcombine.low %v450_v12, %v458_v13  ;;  %v195_v11 = vld [vmem:[#allocation3 + $0x308] sm:$0xff] }
  0x16   :  { %v186_v16 = vld [vmem:[#allocation3 + $0x2c0] sm:$0xff]  ;;  %2421 = vmatpush1.bf16.msra.mxu0 %v3341_v19  ;;  %v203_v12 = vld [vmem:[#allocation3 + $0x348] sm:$0xff] }
  0x17   :  { %v434_v17 = vld [vmem:[#allocation3 + $0xa80] sm:$0xff]  ;;  %v3326_v21 = vcombine.high %v178_v14, %v186_v16  ;;  %2463 = vmatprep.subr.bf16.mxu1 %v3598_v15  ;;  %v3325_v27 = vcombine.low %v178_v14, %v186_v16  ;;  %v3695_v13 = vld [vmem:[%s3845_s0 + $0x8] ss:$12 sps:$4 sm:$0xff]   ;;  %v3359_v15 = vcombine.low %v211_v3, %v219_v4 }
  0x18   :  { %v442_v18 = vld [vmem:[#allocation3 + $0xac0] sm:$0xff]  ;;  %2464 = vmatpush1.bf16.msra.mxu1 %v3597_v20  ;;  %v179_v20 = vld [vmem:[#allocation3 + $0x288] sm:$0xff] }
  0x19   :  { %v3582_v22 = vcombine.high %v434_v17, %v442_v18  ;;  %v162_v23 = vld [vmem:[#allocation3 + $0x200] sm:$0xff]  ;;  %2422 = vmatprep.subr.bf16.mxu0 %v3326_v21  ;;  %v3581_v28 = vcombine.low %v434_v17, %v442_v18  ;;  %v3344_v17 = vcombine.high %v195_v11, %v203_v12  ;;  %v187_v21 = vld [vmem:[#allocation3 + $0x2c8] sm:$0xff] }
  0x1a   :  { %v170_v24 = vld [vmem:[#allocation3 + $0x240] sm:$0xff]  ;;  %2423 = vmatpush1.bf16.msra.mxu0 %v3325_v27  ;;  %v467_v4 = vld [vmem:[#allocation3 + $0xb88] sm:$0xff] }
  0x1b   :  { %v418_v25 = vld [vmem:[#allocation3 + $0xa00] sm:$0xff]  ;;  %v3310_v29 = vcombine.high %v162_v23, %v170_v24  ;;  %2465 = vmatprep.subr.bf16.mxu1 %v3582_v22  ;;  %v3309_v35 = vcombine.low %v162_v23, %v170_v24  ;;  %v3343_v23 = vcombine.low %v195_v11, %v203_v12  ;;  %v451_v12 = vld [vmem:[#allocation3 + $0xb08] sm:$0xff] }
  0x1c   :  { %v426_v26 = vld [vmem:[#allocation3 + $0xa40] sm:$0xff]  ;;  %2466 = vmatpush1.bf16.msra.mxu1 %v3581_v28  ;;  %v163_v28 = vld [vmem:[#allocation3 + $0x208] sm:$0xff] }
  0x1d   :  { %v3566_v30 = vcombine.high %v418_v25, %v426_v26  ;;  %v146_v31 = vld [vmem:[#allocation3 + $0x180] sm:$0xff]  ;;  %2424 = vmatprep.subr.bf16.mxu0 %v3310_v29  ;;  %v3565_v36 = vcombine.low %v418_v25, %v426_v26  ;;  %v3328_v25 = vcombine.high %v179_v20, %v187_v21  ;;  %v171_v29 = vld [vmem:[#allocation3 + $0x248] sm:$0xff] }
  0x1e   :  { %v154_v32 = vld [vmem:[#allocation3 + $0x1c0] sm:$0xff]  ;;  %2425 = vmatpush1.bf16.msra.mxu0 %v3309_v35 }
  0x1f   :  { %v402_v33 = vld [vmem:[#allocation3 + $0x980] sm:$0xff]  ;;  %v3294_v37 = vcombine.high %v146_v31, %v154_v32  ;;  %2467 = vmatprep.subr.bf16.mxu1 %v3566_v30  ;;  %v3293_v43 = vcombine.low %v146_v31, %v154_v32  ;;  %v3327_v31 = vcombine.low %v179_v20, %v187_v21 }
  0x20   :  { %v410_v34 = vld [vmem:[#allocation3 + $0x9c0] sm:$0xff]  ;;  %2468 = vmatpush1.bf16.msra.mxu1 %v3565_v36  ;;  %v147_v36 = vld [vmem:[#allocation3 + $0x188] sm:$0xff] }
  0x21   :  { %v3550_v38 = vcombine.high %v402_v33, %v410_v34  ;;  %v130_v39 = vld [vmem:[#allocation3 + $0x100] sm:$0xff]  ;;  %2426 = vmatprep.subr.bf16.mxu0 %v3294_v37  ;;  %v3549_v44 = vcombine.low %v402_v33, %v410_v34  ;;  %v3312_v33 = vcombine.high %v163_v28, %v171_v29  ;;  %v155_v37 = vld [vmem:[#allocation3 + $0x1c8] sm:$0xff] }
  0x22   :  { %v138_v40 = vld [vmem:[#allocation3 + $0x140] sm:$0xff]  ;;  %2427 = vmatpush1.bf16.msra.mxu0 %v3293_v43 }
  0x23   :  { %v386_v41 = vld [vmem:[#allocation3 + $0x900] sm:$0xff]  ;;  %v3278_v45 = vcombine.high %v130_v39, %v138_v40  ;;  %2469 = vmatprep.subr.bf16.mxu1 %v3550_v38  ;;  %v3277_v51 = vcombine.low %v130_v39, %v138_v40  ;;  %v3311_v39 = vcombine.low %v163_v28, %v171_v29 }
  0x24   :  { %v394_v42 = vld [vmem:[#allocation3 + $0x940] sm:$0xff]  ;;  %2470 = vmatpush1.bf16.msra.mxu1 %v3549_v44  ;;  %v131_v44 = vld [vmem:[#allocation3 + $0x108] sm:$0xff] }
  0x25   :  { %v3534_v46 = vcombine.high %v386_v41, %v394_v42  ;;  %v114_v47 = vld [vmem:[#allocation3 + $0x80] sm:$0xff]  ;;  %2428 = vmatprep.subr.bf16.mxu0 %v3278_v45  ;;  %v3533_v52 = vcombine.low %v386_v41, %v394_v42  ;;  %v3296_v41 = vcombine.high %v147_v36, %v155_v37  ;;  %v139_v45 = vld [vmem:[#allocation3 + $0x148] sm:$0xff] }
  0x26   :  { %v122_v48 = vld [vmem:[#allocation3 + $0xc0] sm:$0xff]  ;;  %2429 = vmatpush1.bf16.msra.mxu0 %v3277_v51 }
  0x27   :  { %v370_v49 = vld [vmem:[#allocation3 + $0x880] sm:$0xff]  ;;  %v3262_v53 = vcombine.high %v114_v47, %v122_v48  ;;  %2471 = vmatprep.subr.bf16.mxu1 %v3534_v46  ;;  %v3261_v60 = vcombine.low %v114_v47, %v122_v48  ;;  %v3295_v47 = vcombine.low %v147_v36, %v155_v37 }
  0x28   :  { %v378_v50 = vld [vmem:[#allocation3 + $0x8c0] sm:$0xff]  ;;  %2472 = vmatpush1.bf16.msra.mxu1 %v3533_v52  ;;  %v115_v52 = vld [vmem:[#allocation3 + $0x88] sm:$0xff] }
  0x29   :  { %v98_v54 = vld [vmem:[#allocation3] sm:$0xff]  ;;  %v3518_v55 = vcombine.high %v370_v49, %v378_v50  ;;  %2430 = vmatprep.subr.bf16.mxu0 %v3262_v53  ;;  %v3517_v61 = vcombine.low %v370_v49, %v378_v50  ;;  %v3280_v49 = vcombine.high %v131_v44, %v139_v45  ;;  %v123_v53 = vld [vmem:[#allocation3 + $0xc8] sm:$0xff] }
  0x2a   :  { %v106_v56 = vld [vmem:[#allocation3 + $0x40] sm:$0xff]  ;;  %2431 = vmatpush1.bf16.msra.mxu0 %v3261_v60 }
  0x2b   :  { %v354_v57 = vld [vmem:[#allocation3 + $0x800] sm:$0xff]  ;;  %v3246_v62 = vcombine.high %v98_v54, %v106_v56  ;;  %2473 = vmatprep.subr.bf16.mxu1 %v3518_v55  ;;  %v3245_v5 = vcombine.low %v98_v54, %v106_v56  ;;  %v3279_v55 = vcombine.low %v131_v44, %v139_v45 }
  0x2c   :  { %v362_v58 = vld [vmem:[#allocation3 + $0x840] sm:$0xff]  ;;  %2474 = vmatpush1.bf16.msra.mxu1 %v3517_v61  ;;  %v99_v61 = vld [vmem:[#allocation3 + $0x8] sm:$0xff] }
  0x2d   :  { %v3689_v59 = vld [vmem:[%s3845_s0 + $0x4] ss:$12 sps:$4 sm:$0xff]   ;;  %v3502_v63 = vcombine.high %v354_v57, %v362_v58  ;;  %2432 = vmatprep.subr.bf16.mxu0 %v3246_v62  ;;  %v3501_v6 = vcombine.low %v354_v57, %v362_v58  ;;  %v3264_v57 = vcombine.high %v115_v52, %v123_v53  ;;  %v107_v62 = vld [vmem:[#allocation3 + $0x48] sm:$0xff] }
  0x2e   :  { %v338_v1 = vld [vmem:[#allocation3 + $0x780] sm:$0xff]  ;;  %2450 = vmatprep.mubr.bf16.mxu0 %v3689_v59  ;;  %2433 = vmatpush1.bf16.msra.mxu0 %v3245_v5  ;;  %v3248_v3 = vcombine.high %v99_v61, %v107_v62  ;;  %v475_v5 = vld [vmem:[#allocation3 + $0xbc8] sm:$0xff] }
  0x2f   :  { %v346_v2 = vld [vmem:[#allocation3 + $0x7c0] sm:$0xff]  ;;  %2475 = vmatprep.subr.bf16.mxu1 %v3502_v63 }
  0x30   :  { %v3486_v7 = vcombine.high %v338_v1, %v346_v2  ;;  %v322_v9 = vld [vmem:[#allocation3 + $0x700] sm:$0xff]  ;;  %v3485_v14 = vcombine.low %v338_v1, %v346_v2  ;;  %2476 = vmatpush1.bf16.msra.mxu1 %v3501_v6  ;;  %v3263_v1 = vcombine.low %v115_v52, %v123_v53  ;;  %v339_v6 = vld [vmem:[#allocation3 + $0x788] sm:$0xff] }
  0x31   :  { %v330_v10 = vld [vmem:[#allocation3 + $0x740] sm:$0xff]  ;;  %2504 = vmatprep.subr.bf16.mxu1 %v3360_v8 }
  0x32   :  { %2434 = vmatprep.subr.bf16.mxu0 %v3486_v7  ;;  %v3470_v16 = vcombine.high %v322_v9, %v330_v10  ;;  %v306_v18 = vld [vmem:[#allocation3 + $0x680] sm:$0xff]  ;;  %v3469_v22 = vcombine.low %v322_v9, %v330_v10  ;;  %v347_v7 = vld [vmem:[#allocation3 + $0x7c8] sm:$0xff]  ;;  %v3247_v9 = vcombine.low %v99_v61, %v107_v62  ;;  %v3616_v10 = vcombine.high %v467_v4, %v475_v5 }
  0x33   :  { %v314_v19 = vld [vmem:[#allocation3 + $0x6c0] sm:$0xff]  ;;  %2494 = vmatmul.mubr.bf16.vlgmr.msra.gmra.mxu1 %v3695_v13  ;;  %2435 = vmatpush2.bf16.msra.mxu0 %v3485_v14  ;;  %v3488_v11 = vcombine.high %v339_v6, %v347_v7  ;;  %v459_v14 = vld [vmem:[#allocation3 + $0xb48] sm:$0xff] }
  0x34   :  { %2505 = vmatpush1.bf16.msra.mxu1 %v3359_v15  ;;  %2436 = vmatprep.subr.bf16.mxu0 %v3470_v16  ;;  %v3454_v24 = vcombine.high %v306_v18, %v314_v19  ;;  %v290_v26 = vld [vmem:[#allocation3 + $0x600] sm:$0xff]  ;;  %v3453_v30 = vcombine.low %v306_v18, %v314_v19  ;;  %v323_v16 = vld [vmem:[#allocation3 + $0x708] sm:$0xff]  ;;  %v3615_v18 = vcombine.low %v467_v4, %v475_v5 }
  0x35   :  { %2506 = vmatprep.subr.bf16.mxu1 %v3344_v17  ;;  %v298_v27 = vld [vmem:[#allocation3 + $0x640] sm:$0xff]  ;;  %2536 = vmatprep.mubr.bf16.mxu1 %v3689_v59  ;;  %v331_v17 = vld [vmem:[#allocation3 + $0x748] sm:$0xff]  ;;  %v3487_v19 = vcombine.low %v339_v6, %v347_v7  ;;  %v3600_v20 = vcombine.high %v451_v12, %v459_v14 }
  0x36   :  { %v3438_v32 = vcombine.high %v290_v26, %v298_v27  ;;  %v274_v34 = vld [vmem:[#allocation3 + $0x580] sm:$0xff]  ;;  %v3437_v38 = vcombine.low %v290_v26, %v298_v27  ;;  %v3472_v21 = vcombine.high %v323_v16, %v331_v17  ;;  %v3599_v26 = vcombine.low %v451_v12, %v459_v14 }
  0x37   :  { %2437 = vmatpush2.bf16.msra.mxu0 %v3469_v22  ;;  %v282_v35 = vld [vmem:[#allocation3 + $0x5c0] sm:$0xff]  ;;  %v435_v22 = vld [vmem:[#allocation3 + $0xa88] sm:$0xff]  ;;  %v3471_v27 = vcombine.low %v323_v16, %v331_v17 }
  0x38   :  { %2507 = vmatpush1.bf16.msra.mxu1 %v3343_v23  ;;  %2438 = vmatprep.subr.bf16.mxu0 %v3454_v24  ;;  %v3422_v40 = vcombine.high %v274_v34, %v282_v35  ;;  %v258_v42 = vld [vmem:[#allocation3 + $0x500] sm:$0xff]  ;;  %v3421_v46 = vcombine.low %v274_v34, %v282_v35  ;;  %v443_v23 = vld [vmem:[#allocation3 + $0xac8] sm:$0xff] }
  0x39   :  { %2508 = vmatprep.subr.bf16.mxu1 %v3328_v25  ;;  %v266_v43 = vld [vmem:[#allocation3 + $0x540] sm:$0xff]  ;;  %v307_v24 = vld [vmem:[#allocation3 + $0x688] sm:$0xff]  ;;  %v3584_v28 = vcombine.high %v435_v22, %v443_v23  ;;  %v3583_v34 = vcombine.low %v435_v22, %v443_v23 }
  0x3a   :  { %v3406_v48 = vcombine.high %v258_v42, %v266_v43  ;;  %v242_v50 = vld [vmem:[#allocation3 + $0x480] sm:$0xff]  ;;  %v3405_v54 = vcombine.low %v258_v42, %v266_v43  ;;  %v315_v25 = vld [vmem:[#allocation3 + $0x6c8] sm:$0xff] }
  0x3b   :  { %2439 = vmatpush2.bf16.msra.mxu0 %v3453_v30  ;;  %v250_v51 = vld [vmem:[#allocation3 + $0x4c0] sm:$0xff]  ;;  %v3456_v29 = vcombine.high %v307_v24, %v315_v25  ;;  %v419_v30 = vld [vmem:[#allocation3 + $0xa08] sm:$0xff]  ;;  %v3455_v35 = vcombine.low %v307_v24, %v315_v25 }
  0x3c   :  { %2509 = vmatpush1.bf16.msra.mxu1 %v3327_v31  ;;  %2440 = vmatprep.subr.bf16.mxu0 %v3438_v32  ;;  %v3390_v56 = vcombine.high %v242_v50, %v250_v51  ;;  %v226_v58 = vld [vmem:[#allocation3 + $0x400] sm:$0xff]  ;;  %v3389_v63 = vcombine.low %v242_v50, %v250_v51  ;;  %v427_v31 = vld [vmem:[#allocation3 + $0xa48] sm:$0xff] }
  0x3d   :  { %2510 = vmatprep.subr.bf16.mxu1 %v3312_v33  ;;  %v234_v60 = vld [vmem:[#allocation3 + $0x440] sm:$0xff]  ;;  %v291_v32 = vld [vmem:[#allocation3 + $0x608] sm:$0xff]  ;;  %v3568_v36 = vcombine.high %v419_v30, %v427_v31  ;;  %v3567_v42 = vcombine.low %v419_v30, %v427_v31 }
  0x3e   :  { %v3374_v2 = vcombine.high %v226_v58, %v234_v60  ;;  %v3373_v8 = vcombine.low %v226_v58, %v234_v60  ;;  %v3702_v15 = vld [vmem:[%s3845_s0] ss:$12 sps:$4 sm:$0xff]  }
  0x3f   :  { %2441 = vmatpush2.bf16.msra.mxu0 %v3437_v38  ;;  %v299_v33 = vld [vmem:[#allocation3 + $0x648] sm:$0xff] }
  0x40   :  { %2511 = vmatpush1.bf16.msra.mxu1 %v3311_v39  ;;  %2442 = vmatprep.subr.bf16.mxu0 %v3422_v40  ;;  %v3440_v37 = vcombine.high %v291_v32, %v299_v33  ;;  %v403_v38 = vld [vmem:[#allocation3 + $0x988] sm:$0xff]  ;;  %v3439_v43 = vcombine.low %v291_v32, %v299_v33 }
  0x41   :  { %2512 = vmatprep.subr.bf16.mxu1 %v3296_v41  ;;  %v411_v39 = vld [vmem:[#allocation3 + $0x9c8] sm:$0xff] }
  0x42   :  { %v275_v40 = vld [vmem:[#allocation3 + $0x588] sm:$0xff]  ;;  %v3552_v44 = vcombine.high %v403_v38, %v411_v39  ;;  %v3551_v50 = vcombine.low %v403_v38, %v411_v39 }
  0x43   :  { %2443 = vmatpush2.bf16.msra.mxu0 %v3421_v46  ;;  %v283_v41 = vld [vmem:[#allocation3 + $0x5c8] sm:$0xff] }
  0x44   :  { %2513 = vmatpush1.bf16.msra.mxu1 %v3295_v47  ;;  %2444 = vmatprep.subr.bf16.mxu0 %v3406_v48  ;;  %v3424_v45 = vcombine.high %v275_v40, %v283_v41  ;;  %v387_v46 = vld [vmem:[#allocation3 + $0x908] sm:$0xff]  ;;  %v3423_v51 = vcombine.low %v275_v40, %v283_v41 }
  0x45   :  { %2514 = vmatprep.subr.bf16.mxu1 %v3280_v49  ;;  %v395_v47 = vld [vmem:[#allocation3 + $0x948] sm:$0xff] }
  0x46   :  { %v259_v48 = vld [vmem:[#allocation3 + $0x508] sm:$0xff]  ;;  %v3536_v52 = vcombine.high %v387_v46, %v395_v47  ;;  %v3535_v58 = vcombine.low %v387_v46, %v395_v47 }
  0x47   :  { %2445 = vmatpush2.bf16.msra.mxu0 %v3405_v54  ;;  %v267_v49 = vld [vmem:[#allocation3 + $0x548] sm:$0xff] }
  0x48   :  { %2515 = vmatpush1.bf16.msra.mxu1 %v3279_v55  ;;  %2446 = vmatprep.subr.bf16.mxu0 %v3390_v56  ;;  %v3408_v53 = vcombine.high %v259_v48, %v267_v49  ;;  %v371_v54 = vld [vmem:[#allocation3 + $0x888] sm:$0xff]  ;;  %v3407_v60 = vcombine.low %v259_v48, %v267_v49 }
  0x49   :  { %2516 = vmatprep.subr.bf16.mxu1 %v3264_v57  ;;  %v379_v55 = vld [vmem:[#allocation3 + $0x8c8] sm:$0xff] }
  0x4a   :  { %v243_v56 = vld [vmem:[#allocation3 + $0x488] sm:$0xff]  ;;  %v3520_v61 = vcombine.high %v371_v54, %v379_v55  ;;  %v3519_v4 = vcombine.low %v371_v54, %v379_v55 }
  0x4b   :  { %2447 = vmatpush2.bf16.msra.mxu0 %v3389_v63  ;;  %v251_v57 = vld [vmem:[#allocation3 + $0x4c8] sm:$0xff] }
  0x4c   :  { %2517 = vmatpush1.bf16.msra.mxu1 %v3263_v1  ;;  %2448 = vmatprep.subr.bf16.mxu0 %v3374_v2  ;;  %v3392_v62 = vcombine.high %v243_v56, %v251_v57  ;;  %v355_v63 = vld [vmem:[#allocation3 + $0x808] sm:$0xff]  ;;  %v3391_v5 = vcombine.low %v243_v56, %v251_v57 }
  0x4d   :  { %2518 = vmatprep.subr.bf16.mxu1 %v3248_v3  ;;  %v363_v1 = vld [vmem:[#allocation3 + $0x848] sm:$0xff] }
  0x4e   :  { %v227_v2 = vld [vmem:[#allocation3 + $0x408] sm:$0xff]  ;;  %v3504_v6 = vcombine.high %v355_v63, %v363_v1  ;;  %v3503_v12 = vcombine.low %v355_v63, %v363_v1 }
  0x4f   :  { %2449 = vmatpush2.bf16.msra.mxu0 %v3373_v8  ;;  %v235_v3 = vld [vmem:[#allocation3 + $0x448] sm:$0xff]  ;;  %v212_v8 = vld [vmem:[#allocation3 + $0x390] sm:$0xff] }
  0x50   :  { %2519 = vmatpush1.bf16.msra.mxu1 %v3247_v9  ;;  %2547 = vmatprep.subr.bf16.mxu0 %v3616_v10  ;;  %v3376_v7 = vcombine.high %v227_v2, %v235_v3  ;;  %v220_v9 = vld [vmem:[#allocation3 + $0x3d0] sm:$0xff]  ;;  %v3375_v14 = vcombine.low %v227_v2, %v235_v3 }
  0x51   :  { %2520 = vmatprep.subr.bf16.mxu1 %v3488_v11  ;;  %v468_v10 = vld [vmem:[#allocation3 + $0xb90] sm:$0xff]  ;;  %v3362_v16 = vcombine.high %v212_v8, %v220_v9  ;;  %v3361_v22 = vcombine.low %v212_v8, %v220_v9 }
  0x52   :  { %2451 = vmatmul.mubr.bf16.vlgmr.msra.gmra.mxu0 %v3702_v15  ;;  %v476_v11 = vld [vmem:[#allocation3 + $0xbd0] sm:$0xff] }
  0x53   :  { %2548 = vmatpush1.bf16.msra.mxu0 %v3615_v18  ;;  %2579 = vmatprep.mubr.bf16.mxu0 %v3666_v0  ;;  %v3618_v17 = vcombine.high %v468_v10, %v476_v11  ;;  %v196_v18 = vld [vmem:[#allocation3 + $0x310] sm:$0xff]  ;;  %v3617_v23 = vcombine.low %v468_v10, %v476_v11 }
  0x54   :  { %2521 = vmatpush2.bf16.msra.mxu1 %v3487_v19  ;;  %2549 = vmatprep.subr.bf16.mxu0 %v3600_v20  ;;  %v204_v19 = vld [vmem:[#allocation3 + $0x350] sm:$0xff] }
  0x55   :  { %2522 = vmatprep.subr.bf16.mxu1 %v3472_v21  ;;  %v452_v20 = vld [vmem:[#allocation3 + $0xb10] sm:$0xff]  ;;  %v3346_v24 = vcombine.high %v196_v18, %v204_v19  ;;  %v3345_v30 = vcombine.low %v196_v18, %v204_v19 }
  0x56   :  { %v460_v21 = vld [vmem:[#allocation3 + $0xb50] sm:$0xff] }
  0x57   :  { %2550 = vmatpush1.bf16.msra.mxu0 %v3599_v26  ;;  %v3602_v25 = vcombine.high %v452_v20, %v460_v21  ;;  %v180_v26 = vld [vmem:[#allocation3 + $0x290] sm:$0xff]  ;;  %v3601_v31 = vcombine.low %v452_v20, %v460_v21 }
  0x58   :  { %2523 = vmatpush2.bf16.msra.mxu1 %v3471_v27  ;;  %2551 = vmatprep.subr.bf16.mxu0 %v3584_v28  ;;  %v188_v27 = vld [vmem:[#allocation3 + $0x2d0] sm:$0xff] }
  0x59   :  { %2524 = vmatprep.subr.bf16.mxu1 %v3456_v29  ;;  %v436_v28 = vld [vmem:[#allocation3 + $0xa90] sm:$0xff]  ;;  %v3330_v32 = vcombine.high %v180_v26, %v188_v27  ;;  %v3329_v38 = vcombine.low %v180_v26, %v188_v27 }
  0x5a   :  { %v444_v29 = vld [vmem:[#allocation3 + $0xad0] sm:$0xff] }
  0x5b   :  { %2552 = vmatpush1.bf16.msra.mxu0 %v3583_v34  ;;  %v3586_v33 = vcombine.high %v436_v28, %v444_v29  ;;  %v164_v34 = vld [vmem:[#allocation3 + $0x210] sm:$0xff]  ;;  %v3585_v39 = vcombine.low %v436_v28, %v444_v29 }
  0x5c   :  { %2525 = vmatpush2.bf16.msra.mxu1 %v3455_v35  ;;  %2553 = vmatprep.subr.bf16.mxu0 %v3568_v36  ;;  %v172_v35 = vld [vmem:[#allocation3 + $0x250] sm:$0xff] }
  0x5d   :  { %2526 = vmatprep.subr.bf16.mxu1 %v3440_v37  ;;  %v420_v36 = vld [vmem:[#allocation3 + $0xa10] sm:$0xff]  ;;  %v3314_v40 = vcombine.high %v164_v34, %v172_v35  ;;  %v3313_v46 = vcombine.low %v164_v34, %v172_v35 }
  0x5e   :  { %v428_v37 = vld [vmem:[#allocation3 + $0xa50] sm:$0xff] }
  0x5f   :  { %2554 = vmatpush1.bf16.msra.mxu0 %v3567_v42  ;;  %v3570_v41 = vcombine.high %v420_v36, %v428_v37  ;;  %v148_v42 = vld [vmem:[#allocation3 + $0x190] sm:$0xff]  ;;  %v3569_v47 = vcombine.low %v420_v36, %v428_v37 }
  0x60   :  { %2527 = vmatpush2.bf16.msra.mxu1 %v3439_v43  ;;  %2555 = vmatprep.subr.bf16.mxu0 %v3552_v44  ;;  %v156_v43 = vld [vmem:[#allocation3 + $0x1d0] sm:$0xff] }
  0x61   :  { %2528 = vmatprep.subr.bf16.mxu1 %v3424_v45  ;;  %v404_v44 = vld [vmem:[#allocation3 + $0x990] sm:$0xff]  ;;  %v3298_v48 = vcombine.high %v148_v42, %v156_v43  ;;  %v3297_v54 = vcombine.low %v148_v42, %v156_v43 }
  0x62   :  { %v412_v45 = vld [vmem:[#allocation3 + $0x9d0] sm:$0xff] }
  0x63   :  { %2556 = vmatpush1.bf16.msra.mxu0 %v3551_v50  ;;  %v3554_v49 = vcombine.high %v404_v44, %v412_v45  ;;  %v132_v50 = vld [vmem:[#allocation3 + $0x110] sm:$0xff]  ;;  %v3553_v55 = vcombine.low %v404_v44, %v412_v45 }
  0x64   :  { %2529 = vmatpush2.bf16.msra.mxu1 %v3423_v51  ;;  %2557 = vmatprep.subr.bf16.mxu0 %v3536_v52  ;;  %v140_v51 = vld [vmem:[#allocation3 + $0x150] sm:$0xff] }
  0x65   :  { %2530 = vmatprep.subr.bf16.mxu1 %v3408_v53  ;;  %v388_v52 = vld [vmem:[#allocation3 + $0x910] sm:$0xff]  ;;  %v3282_v56 = vcombine.high %v132_v50, %v140_v51  ;;  %v3281_v63 = vcombine.low %v132_v50, %v140_v51 }
  0x66   :  { %v396_v53 = vld [vmem:[#allocation3 + $0x950] sm:$0xff] }
  0x67   :  { %2558 = vmatpush1.bf16.msra.mxu0 %v3535_v58  ;;  %v3538_v57 = vcombine.high %v388_v52, %v396_v53  ;;  %v116_v58 = vld [vmem:[#allocation3 + $0x90] sm:$0xff]  ;;  %v3537_v1 = vcombine.low %v388_v52, %v396_v53 }
  0x68   :  { %2531 = vmatpush2.bf16.msra.mxu1 %v3407_v60  ;;  %2559 = vmatprep.subr.bf16.mxu0 %v3520_v61  ;;  %v124_v60 = vld [vmem:[#allocation3 + $0xd0] sm:$0xff] }
  0x69   :  { %2532 = vmatprep.subr.bf16.mxu1 %v3392_v62  ;;  %v372_v61 = vld [vmem:[#allocation3 + $0x890] sm:$0xff]  ;;  %v3266_v2 = vcombine.high %v116_v58, %v124_v60  ;;  %v3265_v8 = vcombine.low %v116_v58, %v124_v60 }
  0x6a   :  { %v380_v62 = vld [vmem:[#allocation3 + $0x8d0] sm:$0xff] }
  0x6b   :  { %2560 = vmatpush1.bf16.msra.mxu0 %v3519_v4  ;;  %v3522_v3 = vcombine.high %v372_v61, %v380_v62  ;;  %v100_v4 = vld [vmem:[#allocation3 + $0x10] sm:$0xff]  ;;  %v3521_v9 = vcombine.low %v372_v61, %v380_v62 }
  0x6c   :  { %2533 = vmatpush2.bf16.msra.mxu1 %v3391_v5  ;;  %2561 = vmatprep.subr.bf16.mxu0 %v3504_v6  ;;  %v108_v5 = vld [vmem:[#allocation3 + $0x50] sm:$0xff] }
  0x6d   :  { %2534 = vmatprep.subr.bf16.mxu1 %v3376_v7  ;;  %v356_v6 = vld [vmem:[#allocation3 + $0x810] sm:$0xff]  ;;  %v3250_v10 = vcombine.high %v100_v4, %v108_v5  ;;  %v3249_v18 = vcombine.low %v100_v4, %v108_v5 }
  0x6e   :  { %v364_v7 = vld [vmem:[#allocation3 + $0x850] sm:$0xff] }
  0x6f   :  { %2562 = vmatpush1.bf16.msra.mxu0 %v3503_v12  ;;  %v3506_v11 = vcombine.high %v356_v6, %v364_v7  ;;  %v340_v12 = vld [vmem:[#allocation3 + $0x790] sm:$0xff]  ;;  %v3505_v19 = vcombine.low %v356_v6, %v364_v7 }
  0x70   :  { %2535 = vmatpush2.bf16.msra.mxu1 %v3375_v14  ;;  %2590 = vmatprep.subr.bf16.mxu0 %v3362_v16  ;;  %v348_v14 = vld [vmem:[#allocation3 + $0x7d0] sm:$0xff]  ;;  %v213_v16 = vld [vmem:[#allocation3 + $0x398] sm:$0xff] }
  0x71   :  { %2633 = vmatprep.subr.bf16.mxu1 %v3618_v17  ;;  %v221_v17 = vld [vmem:[#allocation3 + $0x3d8] sm:$0xff]  ;;  %v3490_v20 = vcombine.high %v340_v12, %v348_v14  ;;  %v3489_v26 = vcombine.low %v340_v12, %v348_v14  ;;  %v260_v53 = vld [vmem:[#allocation3 + $0x510] sm:$0xff] }
  0x72   :  { %2580 = vmatmul.mubr.bf16.vlgmr.msra.gmra.mxu0 %v3695_v13  ;;  %v3364_v21 = vcombine.high %v213_v16, %v221_v17  ;;  %v3363_v27 = vcombine.low %v213_v16, %v221_v17  ;;  %v244_v62 = vld [vmem:[#allocation3 + $0x490] sm:$0xff]  ;;  %v469_v17 = vld [vmem:[#allocation3 + $0xb98] sm:$0xff] }
  0x73   :  { %2537 = vmatmul.mubr.bf16.vlgmr.msra.gmra.mxu1 %v3702_v15  ;;  %2591 = vmatpush1.bf16.msra.mxu0 %v3361_v22  ;;  %v324_v22 = vld [vmem:[#allocation3 + $0x710] sm:$0xff] }
  0x74   :  { %2634 = vmatpush1.bf16.msra.mxu1 %v3617_v23  ;;  %2592 = vmatprep.subr.bf16.mxu0 %v3346_v24  ;;  %v332_v23 = vld [vmem:[#allocation3 + $0x750] sm:$0xff]  ;;  %v197_v24 = vld [vmem:[#allocation3 + $0x318] sm:$0xff] }
  0x75   :  { %2635 = vmatprep.subr.bf16.mxu1 %v3602_v25  ;;  %2665 = vmatprep.mubr.bf16.mxu1 %v3666_v0  ;;  %v205_v25 = vld [vmem:[#allocation3 + $0x358] sm:$0xff]  ;;  %v3474_v28 = vcombine.high %v324_v22, %v332_v23  ;;  %v3473_v34 = vcombine.low %v324_v22, %v332_v23  ;;  %v228_v7 = vld [vmem:[#allocation3 + $0x410] sm:$0xff] }
  0x76   :  { %2622 = vmatprep.mubr.bf16.mxu0 %v3689_v59  ;;  %v3348_v29 = vcombine.high %v197_v24, %v205_v25  ;;  %v3347_v35 = vcombine.low %v197_v24, %v205_v25  ;;  %v453_v25 = vld [vmem:[#allocation3 + $0xb18] sm:$0xff] }
  0x77   :  { %2593 = vmatpush1.bf16.msra.mxu0 %v3345_v30  ;;  %v308_v30 = vld [vmem:[#allocation3 + $0x690] sm:$0xff] }
  0x78   :  { %2636 = vmatpush1.bf16.msra.mxu1 %v3601_v31  ;;  %2594 = vmatprep.subr.bf16.mxu0 %v3330_v32  ;;  %v316_v31 = vld [vmem:[#allocation3 + $0x6d0] sm:$0xff]  ;;  %v181_v32 = vld [vmem:[#allocation3 + $0x298] sm:$0xff] }
  0x79   :  { %2637 = vmatprep.subr.bf16.mxu1 %v3586_v33  ;;  %v189_v33 = vld [vmem:[#allocation3 + $0x2d8] sm:$0xff]  ;;  %v3458_v36 = vcombine.high %v308_v30, %v316_v31  ;;  %v3457_v42 = vcombine.low %v308_v30, %v316_v31 }
  0x7a   :  { %v3332_v37 = vcombine.high %v181_v32, %v189_v33  ;;  %v3331_v43 = vcombine.low %v181_v32, %v189_v33  ;;  %v437_v33 = vld [vmem:[#allocation3 + $0xa98] sm:$0xff] }
  0x7b   :  { %2595 = vmatpush1.bf16.msra.mxu0 %v3329_v38  ;;  %v292_v38 = vld [vmem:[#allocation3 + $0x610] sm:$0xff] }
  0x7c   :  { %2638 = vmatpush1.bf16.msra.mxu1 %v3585_v39  ;;  %2596 = vmatprep.subr.bf16.mxu0 %v3314_v40  ;;  %v300_v39 = vld [vmem:[#allocation3 + $0x650] sm:$0xff]  ;;  %v165_v40 = vld [vmem:[#allocation3 + $0x218] sm:$0xff] }
  0x7d   :  { %2639 = vmatprep.subr.bf16.mxu1 %v3570_v41  ;;  %v173_v41 = vld [vmem:[#allocation3 + $0x258] sm:$0xff]  ;;  %v3442_v44 = vcombine.high %v292_v38, %v300_v39  ;;  %v3441_v50 = vcombine.low %v292_v38, %v300_v39 }
  0x7e   :  { %v3316_v45 = vcombine.high %v165_v40, %v173_v41  ;;  %v3315_v51 = vcombine.low %v165_v40, %v173_v41  ;;  %v421_v41 = vld [vmem:[#allocation3 + $0xa18] sm:$0xff] }
  0x7f   :  { %2597 = vmatpush1.bf16.msra.mxu0 %v3313_v46  ;;  %v276_v46 = vld [vmem:[#allocation3 + $0x590] sm:$0xff] }
  0x80   :  { %2640 = vmatpush1.bf16.msra.mxu1 %v3569_v47  ;;  %2598 = vmatprep.subr.bf16.mxu0 %v3298_v48  ;;  %v284_v47 = vld [vmem:[#allocation3 + $0x5d0] sm:$0xff]  ;;  %v149_v48 = vld [vmem:[#allocation3 + $0x198] sm:$0xff] }
  0x81   :  { %2641 = vmatprep.subr.bf16.mxu1 %v3554_v49  ;;  %v157_v49 = vld [vmem:[#allocation3 + $0x1d8] sm:$0xff] }
  0x82   :  { %v3300_v52 = vcombine.high %v149_v48, %v157_v49  ;;  %v3299_v58 = vcombine.low %v149_v48, %v157_v49  ;;  %v405_v49 = vld [vmem:[#allocation3 + $0x998] sm:$0xff] }
  0x83   :  { %2599 = vmatpush1.bf16.msra.mxu0 %v3297_v54  ;;  %v268_v54 = vld [vmem:[#allocation3 + $0x550] sm:$0xff] }
  0x84   :  { %2642 = vmatpush1.bf16.msra.mxu1 %v3553_v55  ;;  %2600 = vmatprep.subr.bf16.mxu0 %v3282_v56  ;;  %v133_v55 = vld [vmem:[#allocation3 + $0x118] sm:$0xff]  ;;  %v3410_v60 = vcombine.high %v260_v53, %v268_v54 }
  0x85   :  { %2643 = vmatprep.subr.bf16.mxu1 %v3538_v57  ;;  %v141_v56 = vld [vmem:[#allocation3 + $0x158] sm:$0xff]  ;;  %v3425_v57 = vcombine.low %v276_v46, %v284_v47 }
  0x86   :  { %v3284_v61 = vcombine.high %v133_v55, %v141_v56  ;;  %v3283_v4 = vcombine.low %v133_v55, %v141_v56  ;;  %v389_v56 = vld [vmem:[#allocation3 + $0x918] sm:$0xff] }
  0x87   :  { %2601 = vmatpush1.bf16.msra.mxu0 %v3281_v63  ;;  %v252_v63 = vld [vmem:[#allocation3 + $0x4d0] sm:$0xff] }
  0x88   :  { %2644 = vmatpush1.bf16.msra.mxu1 %v3537_v1  ;;  %2602 = vmatprep.subr.bf16.mxu0 %v3266_v2  ;;  %v117_v1 = vld [vmem:[#allocation3 + $0x98] sm:$0xff]  ;;  %v3394_v5 = vcombine.high %v244_v62, %v252_v63 }
  0x89   :  { %2645 = vmatprep.subr.bf16.mxu1 %v3522_v3  ;;  %v125_v2 = vld [vmem:[#allocation3 + $0xd8] sm:$0xff]  ;;  %v3409_v3 = vcombine.low %v260_v53, %v268_v54 }
  0x8a   :  { %v3268_v6 = vcombine.high %v117_v1, %v125_v2  ;;  %v3267_v12 = vcombine.low %v117_v1, %v125_v2  ;;  %v373_v2 = vld [vmem:[#allocation3 + $0x898] sm:$0xff] }
  0x8b   :  { %2603 = vmatpush1.bf16.msra.mxu0 %v3265_v8  ;;  %v236_v8 = vld [vmem:[#allocation3 + $0x450] sm:$0xff] }
  0x8c   :  { %2646 = vmatpush1.bf16.msra.mxu1 %v3521_v9  ;;  %2604 = vmatprep.subr.bf16.mxu0 %v3250_v10  ;;  %v101_v9 = vld [vmem:[#allocation3 + $0x18] sm:$0xff]  ;;  %v3378_v14 = vcombine.high %v228_v7, %v236_v8 }
  0x8d   :  { %2647 = vmatprep.subr.bf16.mxu1 %v3506_v11  ;;  %v109_v10 = vld [vmem:[#allocation3 + $0x58] sm:$0xff]  ;;  %v3393_v11 = vcombine.low %v244_v62, %v252_v63 }
  0x8e   :  { %v3252_v16 = vcombine.high %v101_v9, %v109_v10  ;;  %v3251_v22 = vcombine.low %v101_v9, %v109_v10  ;;  %v357_v10 = vld [vmem:[#allocation3 + $0x818] sm:$0xff] }
  0x8f   :  { %2605 = vmatpush1.bf16.msra.mxu0 %v3249_v18  ;;  %v477_v18 = vld [vmem:[#allocation3 + $0xbd8] sm:$0xff] }
  0x90   :  { %2648 = vmatpush1.bf16.msra.mxu1 %v3505_v19  ;;  %2606 = vmatprep.subr.bf16.mxu0 %v3490_v20  ;;  %v341_v19 = vld [vmem:[#allocation3 + $0x798] sm:$0xff]  ;;  %v3620_v23 = vcombine.high %v469_v17, %v477_v18 }
  0x91   :  { %2676 = vmatprep.subr.bf16.mxu1 %v3364_v21  ;;  %v349_v20 = vld [vmem:[#allocation3 + $0x7d8] sm:$0xff]  ;;  %v3377_v21 = vcombine.low %v228_v7, %v236_v8 }
  0x92   :  { %v3492_v24 = vcombine.high %v341_v19, %v349_v20  ;;  %v3491_v30 = vcombine.low %v341_v19, %v349_v20  ;;  %v214_v20 = vld [vmem:[#allocation3 + $0x3a0] sm:$0xff] }
  0x93   :  { %2666 = vmatmul.mubr.bf16.vlgmr.msra.gmra.mxu1 %v3695_v13  ;;  %2607 = vmatpush2.bf16.msra.mxu0 %v3489_v26  ;;  %v461_v26 = vld [vmem:[#allocation3 + $0xb58] sm:$0xff] }
  0x94   :  { %2677 = vmatpush1.bf16.msra.mxu1 %v3363_v27  ;;  %2608 = vmatprep.subr.bf16.mxu0 %v3474_v28  ;;  %v325_v27 = vld [vmem:[#allocation3 + $0x718] sm:$0xff]  ;;  %v3604_v31 = vcombine.high %v453_v25, %v461_v26 }
  0x95   :  { %2678 = vmatprep.subr.bf16.mxu1 %v3348_v29  ;;  %2708 = vmatprep.mubr.bf16.mxu1 %v3689_v59  ;;  %v3426_v59 = vcombine.high %v276_v46, %v284_v47  ;;  %v333_v28 = vld [vmem:[#allocation3 + $0x758] sm:$0xff]  ;;  %v3619_v29 = vcombine.low %v469_v17, %v477_v18 }
  0x96   :  { %v3476_v32 = vcombine.high %v325_v27, %v333_v28  ;;  %v3475_v38 = vcombine.low %v325_v27, %v333_v28  ;;  %v198_v28 = vld [vmem:[#allocation3 + $0x320] sm:$0xff] }
  0x97   :  { %2609 = vmatpush2.bf16.msra.mxu0 %v3473_v34  ;;  %v445_v34 = vld [vmem:[#allocation3 + $0xad8] sm:$0xff] }
  0x98   :  { %2679 = vmatpush1.bf16.msra.mxu1 %v3347_v35  ;;  %2610 = vmatprep.subr.bf16.mxu0 %v3458_v36  ;;  %v309_v35 = vld [vmem:[#allocation3 + $0x698] sm:$0xff]  ;;  %v3588_v39 = vcombine.high %v437_v33, %v445_v34 }
  0x99   :  { %2680 = vmatprep.subr.bf16.mxu1 %v3332_v37  ;;  %v317_v36 = vld [vmem:[#allocation3 + $0x6d8] sm:$0xff]  ;;  %v3603_v37 = vcombine.low %v453_v25, %v461_v26 }
  0x9a   :  { %v3460_v40 = vcombine.high %v309_v35, %v317_v36  ;;  %v3459_v46 = vcombine.low %v309_v35, %v317_v36  ;;  %v182_v36 = vld [vmem:[#allocation3 + $0x2a0] sm:$0xff] }
  0x9b   :  { %2611 = vmatpush2.bf16.msra.mxu0 %v3457_v42  ;;  %v429_v42 = vld [vmem:[#allocation3 + $0xa58] sm:$0xff] }
  0x9c   :  { %2681 = vmatpush1.bf16.msra.mxu1 %v3331_v43  ;;  %2612 = vmatprep.subr.bf16.mxu0 %v3442_v44  ;;  %v293_v43 = vld [vmem:[#allocation3 + $0x618] sm:$0xff]  ;;  %v3572_v47 = vcombine.high %v421_v41, %v429_v42 }
  0x9d   :  { %2682 = vmatprep.subr.bf16.mxu1 %v3316_v45  ;;  %v301_v44 = vld [vmem:[#allocation3 + $0x658] sm:$0xff]  ;;  %v3587_v45 = vcombine.low %v437_v33, %v445_v34 }
  0x9e   :  { %v3444_v48 = vcombine.high %v293_v43, %v301_v44  ;;  %v3443_v53 = vcombine.low %v293_v43, %v301_v44  ;;  %v166_v44 = vld [vmem:[#allocation3 + $0x220] sm:$0xff] }
  0x9f   :  { %2613 = vmatpush2.bf16.msra.mxu0 %v3441_v50  ;;  %v413_v50 = vld [vmem:[#allocation3 + $0x9d8] sm:$0xff] }
  0xa0   :  { %2683 = vmatpush1.bf16.msra.mxu1 %v3315_v51  ;;  %2614 = vmatprep.subr.bf16.mxu0 %v3426_v59  ;;  %v277_v51 = vld [vmem:[#allocation3 + $0x598] sm:$0xff]  ;;  %v3556_v54 = vcombine.high %v405_v49, %v413_v50 }
  0xa1   :  { %2684 = vmatprep.subr.bf16.mxu1 %v3300_v52  ;;  %v285_v59 = vld [vmem:[#allocation3 + $0x5d8] sm:$0xff]  ;;  %v3571_v52 = vcombine.low %v421_v41, %v429_v42 }
  0xa2   :  { %v3428_v55 = vcombine.high %v277_v51, %v285_v59  ;;  %v3427_v62 = vcombine.low %v277_v51, %v285_v59  ;;  %v150_v51 = vld [vmem:[#allocation3 + $0x1a0] sm:$0xff] }
  0xa3   :  { %2615 = vmatpush2.bf16.msra.mxu0 %v3425_v57  ;;  %v397_v57 = vld [vmem:[#allocation3 + $0x958] sm:$0xff]  ;;  %v158_v59 = vld [vmem:[#allocation3 + $0x1e0] sm:$0xff] }
  0xa4   :  { %2685 = vmatpush1.bf16.msra.mxu1 %v3299_v58  ;;  %2616 = vmatprep.subr.bf16.mxu0 %v3410_v60  ;;  %v261_v58 = vld [vmem:[#allocation3 + $0x518] sm:$0xff]  ;;  %v3540_v63 = vcombine.high %v389_v56, %v397_v57 }
  0xa5   :  { %2686 = vmatprep.subr.bf16.mxu1 %v3284_v61  ;;  %v269_v60 = vld [vmem:[#allocation3 + $0x558] sm:$0xff]  ;;  %v3555_v61 = vcombine.low %v405_v49, %v413_v50 }
  0xa6   :  { %v3412_v1 = vcombine.high %v261_v58, %v269_v60  ;;  %v3411_v7 = vcombine.low %v261_v58, %v269_v60  ;;  %v134_v58 = vld [vmem:[#allocation3 + $0x120] sm:$0xff] }
  0xa7   :  { %2617 = vmatpush2.bf16.msra.mxu0 %v3409_v3  ;;  %v381_v3 = vld [vmem:[#allocation3 + $0x8d8] sm:$0xff]  ;;  %v142_v60 = vld [vmem:[#allocation3 + $0x160] sm:$0xff] }
  0xa8   :  { %2687 = vmatpush1.bf16.msra.mxu1 %v3283_v4  ;;  %2618 = vmatprep.subr.bf16.mxu0 %v3394_v5  ;;  %v245_v4 = vld [vmem:[#allocation3 + $0x498] sm:$0xff]  ;;  %v3524_v8 = vcombine.high %v373_v2, %v381_v3 }
  0xa9   :  { %2688 = vmatprep.subr.bf16.mxu1 %v3268_v6  ;;  %v253_v5 = vld [vmem:[#allocation3 + $0x4d8] sm:$0xff]  ;;  %v3539_v6 = vcombine.low %v389_v56, %v397_v57  ;;  %v3302_v56 = vcombine.high %v150_v51, %v158_v59 }
  0xaa   :  { %v3396_v9 = vcombine.high %v245_v4, %v253_v5  ;;  %v3395_v17 = vcombine.low %v245_v4, %v253_v5  ;;  %v118_v4 = vld [vmem:[#allocation3 + $0xa0] sm:$0xff] }
  0xab   :  { %2619 = vmatpush2.bf16.msra.mxu0 %v3393_v11  ;;  %v365_v11 = vld [vmem:[#allocation3 + $0x858] sm:$0xff]  ;;  %v126_v5 = vld [vmem:[#allocation3 + $0xe0] sm:$0xff] }
  0xac   :  { %2689 = vmatpush1.bf16.msra.mxu1 %v3267_v12  ;;  %2620 = vmatprep.subr.bf16.mxu0 %v3378_v14  ;;  %v229_v12 = vld [vmem:[#allocation3 + $0x418] sm:$0xff]  ;;  %v3508_v18 = vcombine.high %v357_v10, %v365_v11 }
  0xad   :  { %2690 = vmatprep.subr.bf16.mxu1 %v3252_v16  ;;  %v237_v14 = vld [vmem:[#allocation3 + $0x458] sm:$0xff]  ;;  %v3523_v16 = vcombine.low %v373_v2, %v381_v3  ;;  %v3286_v2 = vcombine.high %v134_v58, %v142_v60 }
  0xae   :  { %v3380_v19 = vcombine.high %v229_v12, %v237_v14  ;;  %v3379_v25 = vcombine.low %v229_v12, %v237_v14  ;;  %v102_v12 = vld [vmem:[#allocation3 + $0x20] sm:$0xff] }
  0xaf   :  { %2621 = vmatpush2.bf16.msra.mxu0 %v3377_v21  ;;  %v222_v21 = vld [vmem:[#allocation3 + $0x3e0] sm:$0xff] }
  0xb0   :  { %2691 = vmatpush1.bf16.msra.mxu1 %v3251_v22  ;;  %2719 = vmatprep.subr.bf16.mxu0 %v3620_v23  ;;  %v470_v22 = vld [vmem:[#allocation3 + $0xba0] sm:$0xff]  ;;  %v3366_v26 = vcombine.high %v214_v20, %v222_v21 }
  0xb1   :  { %2692 = vmatprep.subr.bf16.mxu1 %v3492_v24  ;;  %v478_v23 = vld [vmem:[#allocation3 + $0xbe0] sm:$0xff]  ;;  %v3507_v24 = vcombine.low %v357_v10, %v365_v11  ;;  %v3270_v10 = vcombine.high %v118_v4, %v126_v5 }
  0xb2   :  { %2623 = vmatmul.mubr.bf16.vlgmr.msra.gmra.mxu0 %v3702_v15  ;;  %v3622_v27 = vcombine.high %v470_v22, %v478_v23  ;;  %v3621_v33 = vcombine.low %v470_v22, %v478_v23  ;;  %v110_v14 = vld [vmem:[#allocation3 + $0x60] sm:$0xff] }
  0xb3   :  { %2720 = vmatpush1.bf16.msra.mxu0 %v3619_v29  ;;  %2751 = vmatprep.mubr.bf16.mxu0 %v3666_v0  ;;  %v206_v29 = vld [vmem:[#allocation3 + $0x360] sm:$0xff] }
  0xb4   :  { %2693 = vmatpush2.bf16.msra.mxu1 %v3491_v30  ;;  %2721 = vmatprep.subr.bf16.mxu0 %v3604_v31  ;;  %v454_v30 = vld [vmem:[#allocation3 + $0xb20] sm:$0xff]  ;;  %v3350_v34 = vcombine.high %v198_v28, %v206_v29 }
  0xb5   :  { %2694 = vmatprep.subr.bf16.mxu1 %v3476_v32  ;;  %v462_v31 = vld [vmem:[#allocation3 + $0xb60] sm:$0xff]  ;;  %v3365_v32 = vcombine.low %v214_v20, %v222_v21  ;;  %v3254_v20 = vcombine.high %v102_v12, %v110_v14 }
  0xb6   :  { %v3606_v35 = vcombine.high %v454_v30, %v462_v31  ;;  %v3605_v41 = vcombine.low %v454_v30, %v462_v31  ;;  %v342_v22 = vld [vmem:[#allocation3 + $0x7a0] sm:$0xff] }
  0xb7   :  { %2722 = vmatpush1.bf16.msra.mxu0 %v3603_v37  ;;  %v190_v37 = vld [vmem:[#allocation3 + $0x2e0] sm:$0xff] }
  0xb8   :  { %2695 = vmatpush2.bf16.msra.mxu1 %v3475_v38  ;;  %2723 = vmatprep.subr.bf16.mxu0 %v3588_v39  ;;  %v438_v38 = vld [vmem:[#allocation3 + $0xaa0] sm:$0xff]  ;;  %v3334_v42 = vcombine.high %v182_v36, %v190_v37 }
  0xb9   :  { %2696 = vmatprep.subr.bf16.mxu1 %v3460_v40  ;;  %v446_v39 = vld [vmem:[#allocation3 + $0xae0] sm:$0xff]  ;;  %v3349_v40 = vcombine.low %v198_v28, %v206_v29 }
  0xba   :  { %v3590_v43 = vcombine.high %v438_v38, %v446_v39  ;;  %v350_v23 = vld [vmem:[#allocation3 + $0x7e0] sm:$0xff] }
  0xbb   :  { %2724 = vmatpush1.bf16.msra.mxu0 %v3587_v45  ;;  %v174_v45 = vld [vmem:[#allocation3 + $0x260] sm:$0xff]  ;;  %v3494_v28 = vcombine.high %v342_v22, %v350_v23 }
  0xbc   :  { %2697 = vmatpush2.bf16.msra.mxu1 %v3459_v46  ;;  %2725 = vmatprep.subr.bf16.mxu0 %v3572_v47  ;;  %v422_v46 = vld [vmem:[#allocation3 + $0xa20] sm:$0xff]  ;;  %v3318_v49 = vcombine.high %v166_v44, %v174_v45 }
  0xbd   :  { %2698 = vmatprep.subr.bf16.mxu1 %v3444_v48  ;;  %v430_v47 = vld [vmem:[#allocation3 + $0xa60] sm:$0xff]  ;;  %v3589_v48 = vcombine.low %v438_v38, %v446_v39 }
  0xbe   :  { %v3574_v50 = vcombine.high %v422_v46, %v430_v47  ;;  %v326_v30 = vld [vmem:[#allocation3 + $0x720] sm:$0xff] }
  0xbf   :  { %2726 = vmatpush1.bf16.msra.mxu0 %v3571_v52  ;;  %v406_v52 = vld [vmem:[#allocation3 + $0x9a0] sm:$0xff] }
  0xc0   :  { %2699 = vmatpush2.bf16.msra.mxu1 %v3443_v53  ;;  %2727 = vmatprep.subr.bf16.mxu0 %v3556_v54  ;;  %v414_v53 = vld [vmem:[#allocation3 + $0x9e0] sm:$0xff]  ;;  %v3317_v54 = vcombine.low %v166_v44, %v174_v45 }
  0xc1   :  { %2700 = vmatprep.subr.bf16.mxu1 %v3428_v55  ;;  %v3573_v55 = vcombine.low %v422_v46, %v430_v47  ;;  %v3558_v57 = vcombine.high %v406_v52, %v414_v53  ;;  %v334_v31 = vld [vmem:[#allocation3 + $0x760] sm:$0xff] }
  0xc2   :  { %v310_v38 = vld [vmem:[#allocation3 + $0x6a0] sm:$0xff] }
  0xc3   :  { %2728 = vmatpush1.bf16.msra.mxu0 %v3555_v61  ;;  %v390_v61 = vld [vmem:[#allocation3 + $0x920] sm:$0xff] }
  0xc4   :  { %2701 = vmatpush2.bf16.msra.mxu1 %v3427_v62  ;;  %2729 = vmatprep.subr.bf16.mxu0 %v3540_v63  ;;  %v398_v62 = vld [vmem:[#allocation3 + $0x960] sm:$0xff]  ;;  %v3301_v63 = vcombine.low %v150_v51, %v158_v59 }
  0xc5   :  { %2702 = vmatprep.subr.bf16.mxu1 %v3412_v1  ;;  %v3557_v1 = vcombine.low %v406_v52, %v414_v53  ;;  %v3542_v3 = vcombine.high %v390_v61, %v398_v62  ;;  %v318_v39 = vld [vmem:[#allocation3 + $0x6e0] sm:$0xff] }
  0xc6   :  { %v3462_v45 = vcombine.high %v310_v38, %v318_v39  ;;  %v294_v47 = vld [vmem:[#allocation3 + $0x620] sm:$0xff] }
  0xc7   :  { %2730 = vmatpush1.bf16.msra.mxu0 %v3539_v6  ;;  %v374_v6 = vld [vmem:[#allocation3 + $0x8a0] sm:$0xff] }
  0xc8   :  { %2703 = vmatpush2.bf16.msra.mxu1 %v3411_v7  ;;  %2731 = vmatprep.subr.bf16.mxu0 %v3524_v8  ;;  %v382_v7 = vld [vmem:[#allocation3 + $0x8e0] sm:$0xff]  ;;  %v3285_v8 = vcombine.low %v134_v58, %v142_v60 }
  0xc9   :  { %2704 = vmatprep.subr.bf16.mxu1 %v3396_v9  ;;  %v3541_v9 = vcombine.low %v390_v61, %v398_v62  ;;  %v3526_v11 = vcombine.high %v374_v6, %v382_v7  ;;  %v278_v53 = vld [vmem:[#allocation3 + $0x5a0] sm:$0xff] }
  0xca   :  { %v262_v62 = vld [vmem:[#allocation3 + $0x520] sm:$0xff] }
  0xcb   :  { %2732 = vmatpush1.bf16.msra.mxu0 %v3523_v16  ;;  %v358_v16 = vld [vmem:[#allocation3 + $0x820] sm:$0xff] }
  0xcc   :  { %2705 = vmatpush2.bf16.msra.mxu1 %v3395_v17  ;;  %2733 = vmatprep.subr.bf16.mxu0 %v3508_v18  ;;  %v366_v17 = vld [vmem:[#allocation3 + $0x860] sm:$0xff]  ;;  %v3269_v18 = vcombine.low %v118_v4, %v126_v5 }
  0xcd   :  { %2706 = vmatprep.subr.bf16.mxu1 %v3380_v19  ;;  %v3525_v19 = vcombine.low %v374_v6, %v382_v7  ;;  %v3510_v21 = vcombine.high %v358_v16, %v366_v17  ;;  %v246_v7 = vld [vmem:[#allocation3 + $0x4a0] sm:$0xff] }
  0xcf   :  { %2734 = vmatpush1.bf16.msra.mxu0 %v3507_v24  ;;  %v215_v24 = vld [vmem:[#allocation3 + $0x3a8] sm:$0xff] }
  0xd0   :  { %2707 = vmatpush2.bf16.msra.mxu1 %v3379_v25  ;;  %2762 = vmatprep.subr.bf16.mxu0 %v3366_v26  ;;  %v223_v25 = vld [vmem:[#allocation3 + $0x3e8] sm:$0xff]  ;;  %v3253_v26 = vcombine.low %v102_v12, %v110_v14 }
  0xd1   :  { %2805 = vmatprep.subr.bf16.mxu1 %v3622_v27  ;;  %v3509_v27 = vcombine.low %v358_v16, %v366_v17  ;;  %v3368_v29 = vcombine.high %v215_v24, %v223_v25  ;;  %v230_v17 = vld [vmem:[#allocation3 + $0x420] sm:$0xff] }
  0xd2   :  { %2752 = vmatmul.mubr.bf16.vlgmr.msra.gmra.mxu0 %v3695_v13  ;;  %v3720_v13 = vld [vmem:[%s3845_s0 + $0x4] ss:$12 sps:$4 sm:$0xff]  }
  0xd3   :  { %2709 = vmatmul.mubr.bf16.vlgmr.msra.gmra.mxu1 %v3702_v15  ;;  %2763 = vmatpush1.bf16.msra.mxu0 %v3365_v32  ;;  %v3333_v15 = vcombine.low %v182_v36, %v190_v37  ;;  %v199_v32 = vld [vmem:[#allocation3 + $0x328] sm:$0xff]  ;;  %v3478_v36 = vcombine.high %v326_v30, %v334_v31 }
  0xd4   :  { %2806 = vmatpush1.bf16.msra.mxu1 %v3621_v33  ;;  %2764 = vmatprep.subr.bf16.mxu0 %v3350_v34  ;;  %v207_v33 = vld [vmem:[#allocation3 + $0x368] sm:$0xff]  ;;  %v3493_v34 = vcombine.low %v342_v22, %v350_v23 }
  0xd5   :  { %2807 = vmatprep.subr.bf16.mxu1 %v3606_v35  ;;  %2837 = vmatprep.mubr.bf16.mxu1 %v3666_v0  ;;  %v3367_v35 = vcombine.low %v215_v24, %v223_v25  ;;  %v3352_v37 = vcombine.high %v199_v32, %v207_v33  ;;  %v3351_v44 = vcombine.low %v199_v32, %v207_v33  ;;  %v471_v25 = vld [vmem:[#allocation3 + $0xba8] sm:$0xff] }
  0xd6   :  { %2794 = vmatprep.mubr.bf16.mxu0 %v3720_v13 }
  0xd7   :  { %2765 = vmatpush1.bf16.msra.mxu0 %v3349_v40  ;;  %v183_v40 = vld [vmem:[#allocation3 + $0x2a8] sm:$0xff] }
  0xd8   :  { %2808 = vmatpush1.bf16.msra.mxu1 %v3605_v41  ;;  %2766 = vmatprep.subr.bf16.mxu0 %v3334_v42  ;;  %v191_v41 = vld [vmem:[#allocation3 + $0x2e8] sm:$0xff] }
  0xd9   :  { %2809 = vmatprep.subr.bf16.mxu1 %v3590_v43  ;;  %v3726_v42 = vld [vmem:[%s3845_s0 + $0x8] ss:$12 sps:$4 sm:$0xff]   ;;  %v3477_v43 = vcombine.low %v326_v30, %v334_v31  ;;  %v3336_v46 = vcombine.high %v183_v40, %v191_v41  ;;  %v3335_v51 = vcombine.low %v183_v40, %v191_v41 }
  0xdb   :  { %2767 = vmatpush1.bf16.msra.mxu0 %v3333_v15  ;;  %v302_v15 = vld [vmem:[#allocation3 + $0x660] sm:$0xff] }
  0xdc   :  { %2810 = vmatpush1.bf16.msra.mxu1 %v3589_v48  ;;  %2768 = vmatprep.subr.bf16.mxu0 %v3318_v49  ;;  %v167_v48 = vld [vmem:[#allocation3 + $0x228] sm:$0xff]  ;;  %v3446_v59 = vcombine.high %v294_v47, %v302_v15 }
  0xdd   :  { %2811 = vmatprep.subr.bf16.mxu1 %v3574_v50  ;;  %v175_v49 = vld [vmem:[#allocation3 + $0x268] sm:$0xff]  ;;  %v3461_v50 = vcombine.low %v310_v38, %v318_v39 }
  0xde   :  { %v3320_v52 = vcombine.high %v167_v48, %v175_v49  ;;  %v3319_v58 = vcombine.low %v167_v48, %v175_v49  ;;  %v319_v48 = vld [vmem:[#allocation3 + $0x6e8] sm:$0xff] }
  0xdf   :  { %2769 = vmatpush1.bf16.msra.mxu0 %v3317_v54  ;;  %v286_v54 = vld [vmem:[#allocation3 + $0x5e0] sm:$0xff] }
  0xe0   :  { %2812 = vmatpush1.bf16.msra.mxu1 %v3573_v55  ;;  %2770 = vmatprep.subr.bf16.mxu0 %v3302_v56  ;;  %v151_v55 = vld [vmem:[#allocation3 + $0x1a8] sm:$0xff]  ;;  %v3430_v60 = vcombine.high %v278_v53, %v286_v54 }
  0xe1   :  { %2813 = vmatprep.subr.bf16.mxu1 %v3558_v57  ;;  %v159_v56 = vld [vmem:[#allocation3 + $0x1e8] sm:$0xff]  ;;  %v3445_v57 = vcombine.low %v294_v47, %v302_v15 }
  0xe2   :  { %v3304_v61 = vcombine.high %v151_v55, %v159_v56  ;;  %v3303_v4 = vcombine.low %v151_v55, %v159_v56  ;;  %v3733_v47 = vld [vmem:[%s3845_s0] ss:$12 sps:$4 sm:$0xff]  }
  0xe3   :  { %2771 = vmatpush1.bf16.msra.mxu0 %v3301_v63  ;;  %v270_v63 = vld [vmem:[#allocation3 + $0x560] sm:$0xff]  ;;  %v311_v15 = vld [vmem:[#allocation3 + $0x6a8] sm:$0xff] }
  0xe4   :  { %2814 = vmatpush1.bf16.msra.mxu1 %v3557_v1  ;;  %2772 = vmatprep.subr.bf16.mxu0 %v3286_v2  ;;  %v135_v1 = vld [vmem:[#allocation3 + $0x128] sm:$0xff]  ;;  %v3414_v5 = vcombine.high %v262_v62, %v270_v63  ;;  %v3464_v55 = vcombine.high %v311_v15, %v319_v48 }
  0xe5   :  { %2815 = vmatprep.subr.bf16.mxu1 %v3542_v3  ;;  %v143_v2 = vld [vmem:[#allocation3 + $0x168] sm:$0xff]  ;;  %v3429_v3 = vcombine.low %v278_v53, %v286_v54 }
  0xe6   :  { %v3288_v6 = vcombine.high %v135_v1, %v143_v2  ;;  %v3287_v12 = vcombine.low %v135_v1, %v143_v2  ;;  %v423_v56 = vld [vmem:[#allocation3 + $0xa28] sm:$0xff] }
  0xe7   :  { %2773 = vmatpush1.bf16.msra.mxu0 %v3285_v8  ;;  %v254_v8 = vld [vmem:[#allocation3 + $0x4e0] sm:$0xff] }
  0xe8   :  { %2816 = vmatpush1.bf16.msra.mxu1 %v3541_v9  ;;  %2774 = vmatprep.subr.bf16.mxu0 %v3270_v10  ;;  %v119_v9 = vld [vmem:[#allocation3 + $0xa8] sm:$0xff]  ;;  %v3398_v14 = vcombine.high %v246_v7, %v254_v8 }
  0xe9   :  { %2817 = vmatprep.subr.bf16.mxu1 %v3526_v11  ;;  %v127_v10 = vld [vmem:[#allocation3 + $0xe8] sm:$0xff]  ;;  %v3413_v11 = vcombine.low %v262_v62, %v270_v63 }
  0xea   :  { %v3272_v16 = vcombine.high %v119_v9, %v127_v10  ;;  %v3271_v22 = vcombine.low %v119_v9, %v127_v10  ;;  %v279_v9 = vld [vmem:[#allocation3 + $0x5a8] sm:$0xff] }
  0xeb   :  { %2775 = vmatpush1.bf16.msra.mxu0 %v3269_v18  ;;  %v238_v18 = vld [vmem:[#allocation3 + $0x460] sm:$0xff]  ;;  %v287_v10 = vld [vmem:[#allocation3 + $0x5e8] sm:$0xff] }
  0xec   :  { %2818 = vmatpush1.bf16.msra.mxu1 %v3525_v19  ;;  %2776 = vmatprep.subr.bf16.mxu0 %v3254_v20  ;;  %v103_v19 = vld [vmem:[#allocation3 + $0x28] sm:$0xff]  ;;  %v3382_v23 = vcombine.high %v230_v17, %v238_v18 }
  0xed   :  { %2819 = vmatprep.subr.bf16.mxu1 %v3510_v21  ;;  %v111_v20 = vld [vmem:[#allocation3 + $0x68] sm:$0xff]  ;;  %v3397_v21 = vcombine.low %v246_v7, %v254_v8 }
  0xee   :  { %v3256_v24 = vcombine.high %v103_v19, %v111_v20  ;;  %v3255_v31 = vcombine.low %v103_v19, %v111_v20  ;;  %v407_v7 = vld [vmem:[#allocation3 + $0x9a8] sm:$0xff] }
  0xef   :  { %2777 = vmatpush1.bf16.msra.mxu0 %v3253_v26  ;;  %v479_v26 = vld [vmem:[#allocation3 + $0xbe8] sm:$0xff] }
  0xf0   :  { %2820 = vmatpush1.bf16.msra.mxu1 %v3509_v27  ;;  %2778 = vmatprep.subr.bf16.mxu0 %v3494_v28  ;;  %v343_v27 = vld [vmem:[#allocation3 + $0x7a8] sm:$0xff]  ;;  %v3624_v32 = vcombine.high %v471_v25, %v479_v26  ;;  %v3623_v38 = vcombine.low %v471_v25, %v479_v26 }
  0xf1   :  { %2848 = vmatprep.subr.bf16.mxu1 %v3368_v29  ;;  %v351_v28 = vld [vmem:[#allocation3 + $0x7e8] sm:$0xff]  ;;  %v3381_v29 = vcombine.low %v230_v17, %v238_v18 }
  0xf2   :  { %v3496_v33 = vcombine.high %v343_v27, %v351_v28  ;;  %v3495_v40 = vcombine.low %v343_v27, %v351_v28  ;;  %v415_v8 = vld [vmem:[#allocation3 + $0x9e8] sm:$0xff] }
  0xf3   :  { %2838 = vmatmul.mubr.bf16.vlgmr.msra.gmra.mxu1 %v3726_v42  ;;  %2779 = vmatpush2.bf16.msra.mxu0 %v3493_v34  ;;  %v2495_v30 = vpop.f32.mrf.mxu1  ;;  %v455_v34 = vld [vmem:[#allocation3 + $0xb28] sm:$0xff] }
  0xf4   :  { %2849 = vmatpush1.bf16.msra.mxu1 %v3367_v35  ;;  %2780 = vmatprep.subr.bf16.mxu0 %v3478_v36  ;;  %v463_v35 = vld [vmem:[#allocation3 + $0xb68] sm:$0xff] }
  0xf5   :  { %2850 = vmatprep.subr.bf16.mxu1 %v3352_v37  ;;  %2880 = vmatprep.mubr.bf16.mxu1 %v3720_v13  ;;  %v327_v36 = vld [vmem:[#allocation3 + $0x728] sm:$0xff]  ;;  %v2497_v39 = vpop.f32.mrf.mxu1  ;;  %v3608_v41 = vcombine.high %v455_v34, %v463_v35 }
  0xf6   :  { %v335_v37 = vld [vmem:[#allocation3 + $0x768] sm:$0xff] }
  0xf7   :  { %2781 = vmatpush2.bf16.msra.mxu0 %v3477_v43  ;;  %v3480_v43 = vcombine.high %v327_v36, %v335_v37  ;;  %v391_v17 = vld [vmem:[#allocation3 + $0x928] sm:$0xff] }
  0xf8   :  { %2851 = vmatpush1.bf16.msra.mxu1 %v3351_v44  ;;  %2782 = vmatprep.subr.bf16.mxu0 %v3462_v45  ;;  %v439_v44 = vld [vmem:[#allocation3 + $0xaa8] sm:$0xff] }
  0xf9   :  { %2852 = vmatprep.subr.bf16.mxu1 %v3336_v46  ;;  %v447_v45 = vld [vmem:[#allocation3 + $0xae8] sm:$0xff] }
  0xfa   :  { %v3592_v53 = vcombine.high %v439_v44, %v447_v45  ;;  %v3591_v63 = vcombine.low %v439_v44, %v447_v45  ;;  %v399_v18 = vld [vmem:[#allocation3 + $0x968] sm:$0xff]  ;;  %v472_v44 = vld [vmem:[#allocation3 + $0xbb0] sm:$0xff] }
  0xfb   :  { %2783 = vmatpush2.bf16.msra.mxu0 %v3461_v50  ;;  %v3607_v50 = vcombine.low %v455_v34, %v463_v35  ;;  %v263_v19 = vld [vmem:[#allocation3 + $0x528] sm:$0xff]  ;;  %v480_v45 = vld [vmem:[#allocation3 + $0xbf0] sm:$0xff] }
  0xfc   :  { %2853 = vmatpush1.bf16.msra.mxu1 %v3335_v51  ;;  %2784 = vmatprep.subr.bf16.mxu0 %v3446_v59  ;;  %v2499_v51 = vpop.f32.mrf.mxu1  ;;  %v271_v20 = vld [vmem:[#allocation3 + $0x568] sm:$0xff] }
  0xfd   :  { %2854 = vmatprep.subr.bf16.mxu1 %v3320_v52  ;;  %v3479_v52 = vcombine.low %v327_v36, %v335_v37  ;;  %v375_v25 = vld [vmem:[#allocation3 + $0x8a8] sm:$0xff] }
  0xfe   :  { %v2501_v1 = vpop.f32.mrf.mxu1  ;;  %v383_v26 = vld [vmem:[#allocation3 + $0x8e8] sm:$0xff] }
  0xff   :  { %2785 = vmatpush2.bf16.msra.mxu0 %v3445_v57  ;;  %v431_v57 = vld [vmem:[#allocation3 + $0xa68] sm:$0xff]  ;;  %v3527_v37 = vcombine.low %v375_v25, %v383_v26 }
 0x100   :  { %2855 = vmatpush1.bf16.msra.mxu1 %v3319_v58  ;;  %2786 = vmatprep.subr.bf16.mxu0 %v3430_v60  ;;  %v295_v60 = vld [vmem:[#allocation3 + $0x628] sm:$0xff] }
 0x101   :  { %2856 = vmatprep.subr.bf16.mxu1 %v3304_v61  ;;  %v303_v61 = vld [vmem:[#allocation3 + $0x668] sm:$0xff] }
 0x102   :  { %v247_v27 = vld [vmem:[#allocation3 + $0x4a8] sm:$0xff] }
 0x103   :  { %2787 = vmatpush2.bf16.msra.mxu0 %v3429_v3  ;;  %v3463_v3 = vcombine.low %v311_v15, %v319_v48  ;;  %v255_v28 = vld [vmem:[#allocation3 + $0x4e8] sm:$0xff] }
 0x104   :  { %2857 = vmatpush1.bf16.msra.mxu1 %v3303_v4  ;;  %2788 = vmatprep.subr.bf16.mxu0 %v3414_v5  ;;  %v3576_v4 = vcombine.high %v423_v56, %v431_v57  ;;  %v367_v34 = vld [vmem:[#allocation3 + $0x868] sm:$0xff] }
 0x105   :  { %2858 = vmatprep.subr.bf16.mxu1 %v3288_v6  ;;  %v3448_v6 = vcombine.high %v295_v60, %v303_v61  ;;  %v231_v35 = vld [vmem:[#allocation3 + $0x428] sm:$0xff] }
 0x106   :  { %v239_v36 = vld [vmem:[#allocation3 + $0x468] sm:$0xff] }
 0x107   :  { %2789 = vmatpush2.bf16.msra.mxu0 %v3413_v11  ;;  %v3575_v11 = vcombine.low %v423_v56, %v431_v57  ;;  %v3383_v15 = vcombine.low %v231_v35, %v239_v36  ;;  %v184_v57 = vld [vmem:[#allocation3 + $0x2b0] sm:$0xff] }
 0x108   :  { %2859 = vmatpush1.bf16.msra.mxu1 %v3287_v12  ;;  %2790 = vmatprep.subr.bf16.mxu0 %v3398_v14  ;;  %v3447_v12 = vcombine.low %v295_v60, %v303_v61  ;;  %v3560_v14 = vcombine.high %v407_v7, %v415_v8  ;;  %v440_v61 = vld [vmem:[#allocation3 + $0xab0] sm:$0xff] }
 0x109   :  { %2860 = vmatprep.subr.bf16.mxu1 %v3272_v16  ;;  %v3432_v16 = vcombine.high %v279_v9, %v287_v10 }
 0x10b   :  { %2791 = vmatpush2.bf16.msra.mxu0 %v3397_v21  ;;  %v3559_v21 = vcombine.low %v407_v7, %v415_v8  ;;  %v168_v8 = vld [vmem:[#allocation3 + $0x230] sm:$0xff] }
 0x10c   :  { %2861 = vmatpush1.bf16.msra.mxu1 %v3271_v22  ;;  %2792 = vmatprep.subr.bf16.mxu0 %v3382_v23  ;;  %v3431_v22 = vcombine.low %v279_v9, %v287_v10  ;;  %v3544_v23 = vcombine.high %v391_v17, %v399_v18  ;;  %v176_v9 = vld [vmem:[#allocation3 + $0x270] sm:$0xff] }
 0x10d   :  { %2862 = vmatprep.subr.bf16.mxu1 %v3256_v24  ;;  %v3416_v24 = vcombine.high %v263_v19, %v271_v20 }
 0x10f   :  { %2793 = vmatpush2.bf16.msra.mxu0 %v3381_v29  ;;  %v3543_v29 = vcombine.low %v391_v17, %v399_v18 }
 0x110   :  { %2863 = vmatpush1.bf16.msra.mxu1 %v3255_v31  ;;  %2891 = vmatprep.subr.bf16.mxu0 %v3624_v32  ;;  %v3528_v31 = vcombine.high %v375_v25, %v383_v26  ;;  %v3400_v32 = vcombine.high %v247_v27, %v255_v28  ;;  %v160_v25 = vld [vmem:[#allocation3 + $0x1f0] sm:$0xff] }
 0x111   :  { %2864 = vmatprep.subr.bf16.mxu1 %v3496_v33  ;;  %v359_v33 = vld [vmem:[#allocation3 + $0x828] sm:$0xff] }
 0x112   :  { %v2452_v46 = vpop.f32.mrf.mxu0  ;;  %2795 = vmatmul.mubr.bf16.vlgmr.msra.gmra.mxu0 %v3733_v47 }
 0x113   :  { %v2496_v49 = vadd.f32 %v2495_v30, %v2452_v46  ;;  %2892 = vmatpush1.bf16.msra.mxu0 %v3623_v38  ;;  %2923 = vmatprep.mubr.bf16.mxu0 %v3666_v0  ;;  %v3415_v30 = vcombine.low %v263_v19, %v271_v20  ;;  %v3399_v38 = vcombine.low %v247_v27, %v255_v28  ;;  %v408_v27 = vld [vmem:[#allocation3 + $0x9b0] sm:$0xff] }
 0x114   :  { %2865 = vmatpush2.bf16.msra.mxu1 %v3495_v40  ;;  %v2454_v59 = vpop.f32.mrf.mxu0  ;;  %2893 = vmatprep.subr.bf16.mxu0 %v3608_v41  ;;  %v3384_v40 = vcombine.high %v231_v35, %v239_v36  ;;  %v216_v41 = vld [vmem:[#allocation3 + $0x3b0] sm:$0xff]  ;;  %v3511_v46 = vcombine.low %v359_v33, %v367_v34 }
 0x115   :  { %3205 = vst [vmem:[%s3847_s2] sm:$0xff] %v2496_v49  ;;  %v2498_v54 = vadd.f32 %v2497_v39, %v2454_v59  ;;  %2866 = vmatprep.subr.bf16.mxu1 %v3480_v43  ;;  %v3512_v39 = vcombine.high %v359_v33, %v367_v34  ;;  %v224_v43 = vld [vmem:[#allocation3 + $0x3f0] sm:$0xff]  ;;  %v3626_v49 = vcombine.high %v472_v44, %v480_v45 }
 0x116   :  { %v2456_v58 = vpop.f32.mrf.mxu0  ;;  %v3370_v48 = vcombine.high %v216_v41, %v224_v43  ;;  %v456_v59 = vld [vmem:[#allocation3 + $0xb30] sm:$0xff] }
 0x117   :  { %3206 = vst [vmem:[%s3847_s2 + $0x8] sm:$0xff] %v2498_v54  ;;  %v2500_v62 = vadd.f32 %v2499_v51, %v2456_v58  ;;  %2894 = vmatpush1.bf16.msra.mxu0 %v3607_v50  ;;  %v200_v50 = vld [vmem:[#allocation3 + $0x330] sm:$0xff]  ;;  %v3625_v54 = vcombine.low %v472_v44, %v480_v45 }
 0x118   :  { %2867 = vmatpush2.bf16.msra.mxu1 %v3479_v52  ;;  %v2458_v2 = vpop.f32.mrf.mxu0  ;;  %2895 = vmatprep.subr.bf16.mxu0 %v3592_v53  ;;  %v208_v51 = vld [vmem:[#allocation3 + $0x370] sm:$0xff]  ;;  %v3369_v53 = vcombine.low %v216_v41, %v224_v43 }
 0x119   :  { %3221 = vst [vmem:[%s3847_s2 + $0x80] sm:$0xff] %v2500_v62  ;;  %v2502_v5 = vadd.f32 %v2501_v1, %v2458_v2  ;;  %2868 = vmatprep.subr.bf16.mxu1 %v3464_v55  ;;  %v464_v52 = vld [vmem:[#allocation3 + $0xb70] sm:$0xff]  ;;  %v3354_v55 = vcombine.high %v200_v50, %v208_v51  ;;  %v3353_v1 = vcombine.low %v200_v50, %v208_v51 }
 0x11a   :  { %v3610_v56 = vcombine.high %v456_v59, %v464_v52  ;;  %v192_v58 = vld [vmem:[#allocation3 + $0x2f0] sm:$0xff] }
 0x11b   :  { %3222 = vst [vmem:[%s3847_s2 + $0x88] sm:$0xff] %v2502_v5  ;;  %2896 = vmatpush1.bf16.msra.mxu0 %v3591_v63  ;;  %v448_v62 = vld [vmem:[#allocation3 + $0xaf0] sm:$0xff]  ;;  %v3338_v5 = vcombine.high %v184_v57, %v192_v58  ;;  %v3337_v17 = vcombine.low %v184_v57, %v192_v58 }
 0x11c   :  { %2869 = vmatpush2.bf16.msra.mxu1 %v3463_v3  ;;  %2897 = vmatprep.subr.bf16.mxu0 %v3576_v4  ;;  %v3609_v4 = vcombine.low %v456_v59, %v464_v52  ;;  %v3594_v7 = vcombine.high %v440_v61, %v448_v62  ;;  %v3593_v20 = vcombine.low %v440_v61, %v448_v62  ;;  %v416_v28 = vld [vmem:[#allocation3 + $0x9f0] sm:$0xff]  ;;  %v225_v61 = vld [vmem:[#allocation3 + $0x3f8] sm:$0xff] }
 0x11d   :  { %2870 = vmatprep.subr.bf16.mxu1 %v3448_v6  ;;  %v136_v33 = vld [vmem:[#allocation3 + $0x130] sm:$0xff] }
 0x11e   :  { %v144_v34 = vld [vmem:[#allocation3 + $0x170] sm:$0xff] }
 0x11f   :  { %2898 = vmatpush1.bf16.msra.mxu0 %v3575_v11  ;;  %v392_v35 = vld [vmem:[#allocation3 + $0x930] sm:$0xff] }
 0x120   :  { %2871 = vmatpush2.bf16.msra.mxu1 %v3447_v12  ;;  %2899 = vmatprep.subr.bf16.mxu0 %v3560_v14  ;;  %v424_v12 = vld [vmem:[#allocation3 + $0xa30] sm:$0xff] }
 0x121   :  { %2872 = vmatprep.subr.bf16.mxu1 %v3432_v16  ;;  %v432_v14 = vld [vmem:[#allocation3 + $0xa70] sm:$0xff] }
 0x122   :  { %v400_v36 = vld [vmem:[#allocation3 + $0x970] sm:$0xff] }
 0x123   :  { %2900 = vmatpush1.bf16.msra.mxu0 %v3559_v21  ;;  %v3322_v21 = vcombine.high %v168_v8, %v176_v9  ;;  %v120_v41 = vld [vmem:[#allocation3 + $0xb0] sm:$0xff] }
 0x124   :  { %2873 = vmatpush2.bf16.msra.mxu1 %v3431_v22  ;;  %2901 = vmatprep.subr.bf16.mxu0 %v3544_v23  ;;  %v3578_v23 = vcombine.high %v424_v12, %v432_v14  ;;  %v128_v43 = vld [vmem:[#allocation3 + $0xf0] sm:$0xff] }
 0x125   :  { %2874 = vmatprep.subr.bf16.mxu1 %v3416_v24  ;;  %v152_v24 = vld [vmem:[#allocation3 + $0x1b0] sm:$0xff] }
 0x126   :  { %v376_v44 = vld [vmem:[#allocation3 + $0x8b0] sm:$0xff] }
 0x127   :  { %2902 = vmatpush1.bf16.msra.mxu0 %v3543_v29  ;;  %v3321_v29 = vcombine.low %v168_v8, %v176_v9  ;;  %v384_v45 = vld [vmem:[#allocation3 + $0x8f0] sm:$0xff] }
 0x128   :  { %2875 = vmatpush2.bf16.msra.mxu1 %v3415_v30  ;;  %2903 = vmatprep.subr.bf16.mxu0 %v3528_v31  ;;  %v3577_v30 = vcombine.low %v424_v12, %v432_v14  ;;  %v3306_v31 = vcombine.high %v152_v24, %v160_v25  ;;  %v104_v50 = vld [vmem:[#allocation3 + $0x30] sm:$0xff]  ;;  %v185_v14 = vld [vmem:[#allocation3 + $0x2b8] sm:$0xff] }
 0x129   :  { %2876 = vmatprep.subr.bf16.mxu1 %v3400_v32  ;;  %v3562_v32 = vcombine.high %v408_v27, %v416_v28  ;;  %v112_v51 = vld [vmem:[#allocation3 + $0x70] sm:$0xff] }
 0x12a   :  { %v360_v59 = vld [vmem:[#allocation3 + $0x830] sm:$0xff]  ;;  %v3257_v62 = vcombine.low %v104_v50, %v112_v51 }
 0x12b   :  { %2904 = vmatpush1.bf16.msra.mxu0 %v3527_v37  ;;  %v3305_v37 = vcombine.low %v152_v24, %v160_v25  ;;  %v368_v52 = vld [vmem:[#allocation3 + $0x870] sm:$0xff]  ;;  %v177_v24 = vld [vmem:[#allocation3 + $0x278] sm:$0xff] }
 0x12c   :  { %2877 = vmatpush2.bf16.msra.mxu1 %v3399_v38  ;;  %2905 = vmatprep.subr.bf16.mxu0 %v3512_v39  ;;  %v3561_v38 = vcombine.low %v408_v27, %v416_v28  ;;  %v3290_v39 = vcombine.high %v136_v33, %v144_v34  ;;  %v344_v57 = vld [vmem:[#allocation3 + $0x7b0] sm:$0xff] }
 0x12d   :  { %2878 = vmatprep.subr.bf16.mxu1 %v3384_v40  ;;  %v3546_v40 = vcombine.high %v392_v35, %v400_v36  ;;  %v352_v58 = vld [vmem:[#allocation3 + $0x7f0] sm:$0xff] }
 0x12e   :  { %v320_v12 = vld [vmem:[#allocation3 + $0x6f0] sm:$0xff] }
 0x12f   :  { %2906 = vmatpush1.bf16.msra.mxu0 %v3511_v46  ;;  %v3289_v46 = vcombine.low %v136_v33, %v144_v34  ;;  %v280_v28 = vld [vmem:[#allocation3 + $0x5b0] sm:$0xff] }
 0x130   :  { %2879 = vmatpush2.bf16.msra.mxu1 %v3383_v15  ;;  %2934 = vmatprep.subr.bf16.mxu0 %v3370_v48  ;;  %v3545_v15 = vcombine.low %v392_v35, %v400_v36  ;;  %v3274_v48 = vcombine.high %v120_v41, %v128_v43  ;;  %v264_v35 = vld [vmem:[#allocation3 + $0x530] sm:$0xff] }
 0x131   :  { %2977 = vmatprep.subr.bf16.mxu1 %v3626_v49  ;;  %v3530_v49 = vcombine.high %v376_v44, %v384_v45  ;;  %v272_v36 = vld [vmem:[#allocation3 + $0x570] sm:$0xff] }
 0x132   :  { %v2581_v60 = vpop.f32.mrf.mxu0  ;;  %2924 = vmatmul.mubr.bf16.vlgmr.msra.gmra.mxu0 %v3726_v42 }
 0x133   :  { %v2538_v63 = vpop.f32.mrf.mxu1  ;;  %2881 = vmatmul.mubr.bf16.vlgmr.msra.gmra.mxu1 %v3733_v47  ;;  %2935 = vmatpush1.bf16.msra.mxu0 %v3369_v53  ;;  %v3273_v53 = vcombine.low %v120_v41, %v128_v43  ;;  %v3418_v41 = vcombine.high %v264_v35, %v272_v36 }
 0x134   :  { %v2582_v2 = vadd.f32 %v2581_v60, %v2538_v63  ;;  %2978 = vmatpush1.bf16.msra.mxu1 %v3625_v54  ;;  %v2583_v3 = vpop.f32.mrf.mxu0  ;;  %2936 = vmatprep.subr.bf16.mxu0 %v3354_v55  ;;  %v3529_v54 = vcombine.low %v376_v44, %v384_v45  ;;  %v3258_v55 = vcombine.high %v104_v50, %v112_v51  ;;  %v217_v60 = vld [vmem:[#allocation3 + $0x3b8] sm:$0xff]  ;;  %v248_v44 = vld [vmem:[#allocation3 + $0x4b0] sm:$0xff] }
 0x135   :  { %v2540_v6 = vpop.f32.mrf.mxu1  ;;  %2979 = vmatprep.subr.bf16.mxu1 %v3610_v56  ;;  %3009 = vmatprep.mubr.bf16.mxu1 %v3666_v0  ;;  %v3514_v56 = vcombine.high %v360_v59, %v368_v52  ;;  %v3513_v63 = vcombine.low %v360_v59, %v368_v52  ;;  %v3371_v8 = vcombine.low %v217_v60, %v225_v61  ;;  %v256_v45 = vld [vmem:[#allocation3 + $0x4f0] sm:$0xff] }
 0x136   :  { %3207 = vst [vmem:[%s3847_s2 + $0x10] sm:$0xff] %v2582_v2  ;;  %v2584_v10 = vadd.f32 %v2583_v3, %v2540_v6  ;;  %v2585_v11 = vpop.f32.mrf.mxu0  ;;  %2966 = vmatprep.mubr.bf16.mxu0 %v3720_v13  ;;  %v3372_v2 = vcombine.high %v217_v60, %v225_v61  ;;  %v328_v3 = vld [vmem:[#allocation3 + $0x730] sm:$0xff]  ;;  %v209_v6 = vld [vmem:[#allocation3 + $0x378] sm:$0xff]  ;;  %v3402_v50 = vcombine.high %v248_v44, %v256_v45 }
 0x137   :  { %v2542_v16 = vpop.f32.mrf.mxu1  ;;  %2937 = vmatpush1.bf16.msra.mxu0 %v3353_v1  ;;  %v3498_v1 = vcombine.high %v344_v57, %v352_v58  ;;  %v232_v59 = vld [vmem:[#allocation3 + $0x430] sm:$0xff]  ;;  %v473_v60 = vld [vmem:[#allocation3 + $0xbb8] sm:$0xff] }
 0x138   :  { %3208 = vst [vmem:[%s3847_s2 + $0x18] sm:$0xff] %v2584_v10  ;;  %v2586_v18 = vadd.f32 %v2585_v11, %v2542_v16  ;;  %2980 = vmatpush1.bf16.msra.mxu1 %v3609_v4  ;;  %v2587_v19 = vpop.f32.mrf.mxu0  ;;  %2938 = vmatprep.subr.bf16.mxu0 %v3338_v5  ;;  %v336_v4 = vld [vmem:[#allocation3 + $0x770] sm:$0xff]  ;;  %v201_v5 = vld [vmem:[#allocation3 + $0x338] sm:$0xff] }
 0x139   :  { %v2544_v22 = vpop.f32.mrf.mxu1  ;;  %2981 = vmatprep.subr.bf16.mxu1 %v3594_v7  ;;  %v3497_v7 = vcombine.low %v344_v57, %v352_v58  ;;  %v3482_v9 = vcombine.high %v328_v3, %v336_v4  ;;  %v3356_v10 = vcombine.high %v201_v5, %v209_v6  ;;  %v312_v11 = vld [vmem:[#allocation3 + $0x6b0] sm:$0xff]  ;;  %v193_v16 = vld [vmem:[#allocation3 + $0x2f8] sm:$0xff] }
 0x13a   :  { %3223 = vst [vmem:[%s3847_s2 + $0x90] sm:$0xff] %v2586_v18  ;;  %v2588_v26 = vadd.f32 %v2587_v19, %v2544_v22  ;;  %v3355_v18 = vcombine.low %v201_v5, %v209_v6  ;;  %v3466_v19 = vcombine.high %v312_v11, %v320_v12  ;;  %v304_v22 = vld [vmem:[#allocation3 + $0x670] sm:$0xff]  ;;  %v3465_v25 = vcombine.low %v312_v11, %v320_v12  ;;  %v481_v61 = vld [vmem:[#allocation3 + $0xbf8] sm:$0xff] }
 0x13b   :  { %2939 = vmatpush1.bf16.msra.mxu0 %v3337_v17  ;;  %v3481_v17 = vcombine.low %v328_v3, %v336_v4  ;;  %v240_v52 = vld [vmem:[#allocation3 + $0x470] sm:$0xff]  ;;  %v3628_v4 = vcombine.high %v473_v60, %v481_v61  ;;  %v457_v6 = vld [vmem:[#allocation3 + $0xb38] sm:$0xff] }
 0x13c   :  { %3224 = vst [vmem:[%s3847_s2 + $0x98] sm:$0xff] %v2588_v26  ;;  %2982 = vmatpush1.bf16.msra.mxu1 %v3593_v20  ;;  %2940 = vmatprep.subr.bf16.mxu0 %v3322_v21  ;;  %v3340_v20 = vcombine.high %v185_v14, %v193_v16  ;;  %v296_v21 = vld [vmem:[#allocation3 + $0x630] sm:$0xff]  ;;  %v3339_v26 = vcombine.low %v185_v14, %v193_v16 }
 0x13d   :  { %2983 = vmatprep.subr.bf16.mxu1 %v3578_v23  ;;  %v169_v23 = vld [vmem:[#allocation3 + $0x238] sm:$0xff]  ;;  %v3386_v57 = vcombine.high %v232_v59, %v240_v52 }
 0x13e   :  { %v3324_v27 = vcombine.high %v169_v23, %v177_v24  ;;  %v3323_v33 = vcombine.low %v169_v23, %v177_v24 }
 0x13f   :  { %2941 = vmatpush1.bf16.msra.mxu0 %v3321_v29  ;;  %v288_v29 = vld [vmem:[#allocation3 + $0x5f0] sm:$0xff] }
 0x140   :  { %2984 = vmatpush1.bf16.msra.mxu1 %v3577_v30  ;;  %2942 = vmatprep.subr.bf16.mxu0 %v3306_v31  ;;  %v153_v30 = vld [vmem:[#allocation3 + $0x1b8] sm:$0xff] }
 0x141   :  { %2985 = vmatprep.subr.bf16.mxu1 %v3562_v32  ;;  %v161_v31 = vld [vmem:[#allocation3 + $0x1f8] sm:$0xff]  ;;  %v3449_v32 = vcombine.low %v296_v21, %v304_v22 }
 0x142   :  { %v3308_v34 = vcombine.high %v153_v30, %v161_v31 }
 0x143   :  { %2943 = vmatpush1.bf16.msra.mxu0 %v3305_v37  ;;  %v137_v37 = vld [vmem:[#allocation3 + $0x138] sm:$0xff] }
 0x144   :  { %2986 = vmatpush1.bf16.msra.mxu1 %v3561_v38  ;;  %2944 = vmatprep.subr.bf16.mxu0 %v3290_v39  ;;  %v145_v38 = vld [vmem:[#allocation3 + $0x178] sm:$0xff]  ;;  %v3433_v39 = vcombine.low %v280_v28, %v288_v29 }
 0x145   :  { %2987 = vmatprep.subr.bf16.mxu1 %v3546_v40  ;;  %v3307_v40 = vcombine.low %v153_v30, %v161_v31  ;;  %v3292_v43 = vcombine.high %v137_v37, %v145_v38  ;;  %v433_v30 = vld [vmem:[#allocation3 + $0xa78] sm:$0xff] }
 0x147   :  { %2945 = vmatpush1.bf16.msra.mxu0 %v3289_v46  ;;  %v121_v46 = vld [vmem:[#allocation3 + $0xb8] sm:$0xff] }
 0x148   :  { %2988 = vmatpush1.bf16.msra.mxu1 %v3545_v15  ;;  %2946 = vmatprep.subr.bf16.mxu0 %v3274_v48  ;;  %v129_v15 = vld [vmem:[#allocation3 + $0xf8] sm:$0xff]  ;;  %v3417_v48 = vcombine.low %v264_v35, %v272_v36 }
 0x149   :  { %2989 = vmatprep.subr.bf16.mxu1 %v3530_v49  ;;  %v3291_v49 = vcombine.low %v137_v37, %v145_v38  ;;  %v3276_v51 = vcombine.high %v121_v46, %v129_v15 }
 0x14b   :  { %2947 = vmatpush1.bf16.msra.mxu0 %v3273_v53  ;;  %v105_v53 = vld [vmem:[#allocation3 + $0x38] sm:$0xff] }
 0x14c   :  { %2990 = vmatpush1.bf16.msra.mxu1 %v3529_v54  ;;  %2948 = vmatprep.subr.bf16.mxu0 %v3258_v55  ;;  %v113_v54 = vld [vmem:[#allocation3 + $0x78] sm:$0xff]  ;;  %v3401_v55 = vcombine.low %v248_v44, %v256_v45 }
 0x14d   :  { %2991 = vmatprep.subr.bf16.mxu1 %v3514_v56  ;;  %v3275_v56 = vcombine.low %v121_v46, %v129_v15  ;;  %v3260_v58 = vcombine.high %v105_v53, %v113_v54  ;;  %v3259_v3 = vcombine.low %v105_v53, %v113_v54  ;;  %v289_v44 = vld [vmem:[#allocation3 + $0x5f8] sm:$0xff] }
 0x14f   :  { %2949 = vmatpush1.bf16.msra.mxu0 %v3257_v62  ;;  %v345_v62 = vld [vmem:[#allocation3 + $0x7b8] sm:$0xff] }
 0x150   :  { %2992 = vmatpush1.bf16.msra.mxu1 %v3513_v63  ;;  %2950 = vmatprep.subr.bf16.mxu0 %v3498_v1  ;;  %v353_v63 = vld [vmem:[#allocation3 + $0x7f8] sm:$0xff]  ;;  %v3385_v1 = vcombine.low %v232_v59, %v240_v52 }
 0x151   :  { %3020 = vmatprep.subr.bf16.mxu1 %v3372_v2  ;;  %v3500_v5 = vcombine.high %v345_v62, %v353_v63  ;;  %v3499_v12 = vcombine.low %v345_v62, %v353_v63  ;;  %v273_v59 = vld [vmem:[#allocation3 + $0x578] sm:$0xff] }
 0x153   :  { %3010 = vmatmul.mubr.bf16.vlgmr.msra.gmra.mxu1 %v3726_v42  ;;  %2951 = vmatpush2.bf16.msra.mxu0 %v3497_v7  ;;  %v3450_v42 = vcombine.high %v296_v21, %v304_v22  ;;  %v2667_v2 = vpop.f32.mrf.mxu1  ;;  %v465_v7 = vld [vmem:[#allocation3 + $0xb78] sm:$0xff] }
 0x154   :  { %3021 = vmatpush1.bf16.msra.mxu1 %v3371_v8  ;;  %2952 = vmatprep.subr.bf16.mxu0 %v3482_v9  ;;  %v329_v8 = vld [vmem:[#allocation3 + $0x738] sm:$0xff]  ;;  %v3612_v14 = vcombine.high %v457_v6, %v465_v7  ;;  %v3611_v23 = vcombine.low %v457_v6, %v465_v7 }
 0x155   :  { %3022 = vmatprep.subr.bf16.mxu1 %v3356_v10  ;;  %3052 = vmatprep.mubr.bf16.mxu1 %v3720_v13  ;;  %v3434_v13 = vcombine.high %v280_v28, %v288_v29  ;;  %v337_v9 = vld [vmem:[#allocation3 + $0x778] sm:$0xff]  ;;  %v3627_v10 = vcombine.low %v473_v60, %v481_v61  ;;  %v2669_v11 = vpop.f32.mrf.mxu1 }
 0x156   :  { %v3484_v16 = vcombine.high %v329_v8, %v337_v9  ;;  %v321_v21 = vld [vmem:[#allocation3 + $0x6f8] sm:$0xff] }
 0x157   :  { %2953 = vmatpush2.bf16.msra.mxu0 %v3481_v17  ;;  %v441_v17 = vld [vmem:[#allocation3 + $0xab8] sm:$0xff]  ;;  %v2671_v24 = vpop.f32.mrf.mxu1 }
 0x158   :  { %3023 = vmatpush1.bf16.msra.mxu1 %v3355_v18  ;;  %2954 = vmatprep.subr.bf16.mxu0 %v3466_v19  ;;  %v449_v18 = vld [vmem:[#allocation3 + $0xaf8] sm:$0xff] }
 0x159   :  { %3024 = vmatprep.subr.bf16.mxu1 %v3340_v20  ;;  %v313_v20 = vld [vmem:[#allocation3 + $0x6b8] sm:$0xff] }
 0x15a   :  { %v3468_v28 = vcombine.high %v313_v20, %v321_v21  ;;  %v425_v29 = vld [vmem:[#allocation3 + $0xa38] sm:$0xff]  ;;  %v3467_v36 = vcombine.low %v313_v20, %v321_v21 }
 0x15b   :  { %2955 = vmatpush2.bf16.msra.mxu0 %v3465_v25  ;;  %v3580_v37 = vcombine.high %v425_v29, %v433_v30  ;;  %v3579_v45 = vcombine.low %v425_v29, %v433_v30  ;;  %v257_v60 = vld [vmem:[#allocation3 + $0x4f8] sm:$0xff] }
 0x15c   :  { %3025 = vmatpush1.bf16.msra.mxu1 %v3339_v26  ;;  %2956 = vmatprep.subr.bf16.mxu0 %v3450_v42  ;;  %v3483_v26 = vcombine.low %v329_v8, %v337_v9  ;;  %v3596_v42 = vcombine.high %v441_v17, %v449_v18 }
 0x15d   :  { %3026 = vmatprep.subr.bf16.mxu1 %v3324_v27 }
 0x15f   :  { %2957 = vmatpush2.bf16.msra.mxu0 %v3449_v32  ;;  %v297_v32 = vld [vmem:[#allocation3 + $0x638] sm:$0xff] }
 0x160   :  { %3027 = vmatpush1.bf16.msra.mxu1 %v3323_v33  ;;  %2958 = vmatprep.subr.bf16.mxu0 %v3434_v13  ;;  %v305_v33 = vld [vmem:[#allocation3 + $0x678] sm:$0xff]  ;;  %v3595_v13 = vcombine.low %v441_v17, %v449_v18 }
 0x161   :  { %3028 = vmatprep.subr.bf16.mxu1 %v3308_v34  ;;  %v2673_v34 = vpop.f32.mrf.mxu1  ;;  %v3451_v46 = vcombine.low %v297_v32, %v305_v33 }
 0x163   :  { %2959 = vmatpush2.bf16.msra.mxu0 %v3433_v39  ;;  %v3452_v39 = vcombine.high %v297_v32, %v305_v33 }
 0x164   :  { %3029 = vmatpush1.bf16.msra.mxu1 %v3307_v40  ;;  %2960 = vmatprep.subr.bf16.mxu0 %v3418_v41  ;;  %v409_v40 = vld [vmem:[#allocation3 + $0x9b8] sm:$0xff] }
 0x165   :  { %3030 = vmatprep.subr.bf16.mxu1 %v3292_v43  ;;  %v417_v41 = vld [vmem:[#allocation3 + $0x9f8] sm:$0xff] }
 0x166   :  { %v281_v43 = vld [vmem:[#allocation3 + $0x5b8] sm:$0xff]  ;;  %v3564_v15 = vcombine.high %v409_v40, %v417_v41  ;;  %v3563_v52 = vcombine.low %v409_v40, %v417_v41 }
 0x167   :  { %2961 = vmatpush2.bf16.msra.mxu0 %v3417_v48  ;;  %v3436_v48 = vcombine.high %v281_v43, %v289_v44  ;;  %v3435_v53 = vcombine.low %v281_v43, %v289_v44 }
 0x168   :  { %3031 = vmatpush1.bf16.msra.mxu1 %v3291_v49  ;;  %2962 = vmatprep.subr.bf16.mxu0 %v3402_v50  ;;  %v393_v49 = vld [vmem:[#allocation3 + $0x938] sm:$0xff] }
 0x169   :  { %3032 = vmatprep.subr.bf16.mxu1 %v3276_v51  ;;  %v401_v50 = vld [vmem:[#allocation3 + $0x978] sm:$0xff] }
 0x16a   :  { %v265_v51 = vld [vmem:[#allocation3 + $0x538] sm:$0xff]  ;;  %v3548_v54 = vcombine.high %v393_v49, %v401_v50  ;;  %v3547_v61 = vcombine.low %v393_v49, %v401_v50 }
 0x16b   :  { %2963 = vmatpush2.bf16.msra.mxu0 %v3401_v55  ;;  %v3420_v55 = vcombine.high %v265_v51, %v273_v59  ;;  %v3419_v62 = vcombine.low %v265_v51, %v273_v59 }
 0x16c   :  { %3033 = vmatpush1.bf16.msra.mxu1 %v3275_v56  ;;  %2964 = vmatprep.subr.bf16.mxu0 %v3386_v57  ;;  %v377_v56 = vld [vmem:[#allocation3 + $0x8b8] sm:$0xff] }
 0x16d   :  { %3034 = vmatprep.subr.bf16.mxu1 %v3260_v58  ;;  %v385_v57 = vld [vmem:[#allocation3 + $0x8f8] sm:$0xff] }
 0x16e   :  { %v249_v58 = vld [vmem:[#allocation3 + $0x4b8] sm:$0xff]  ;;  %v3532_v63 = vcombine.high %v377_v56, %v385_v57  ;;  %v3531_v6 = vcombine.low %v377_v56, %v385_v57 }
 0x16f   :  { %2965 = vmatpush2.bf16.msra.mxu0 %v3385_v1  ;;  %v3404_v1 = vcombine.high %v249_v58, %v257_v60  ;;  %v3403_v7 = vcombine.low %v249_v58, %v257_v60 }
 0x170   :  { %3035 = vmatpush1.bf16.msra.mxu1 %v3259_v3  ;;  %3063 = vmatprep.subr.bf16.mxu0 %v3628_v4  ;;  %v369_v3 = vld [vmem:[#allocation3 + $0x878] sm:$0xff] }
 0x171   :  { %3036 = vmatprep.subr.bf16.mxu1 %v3500_v5  ;;  %v233_v4 = vld [vmem:[#allocation3 + $0x438] sm:$0xff] }
 0x172   :  { %v2624_v19 = vpop.f32.mrf.mxu0  ;;  %2967 = vmatmul.mubr.bf16.vlgmr.msra.gmra.mxu0 %v3733_v47  ;;  %v241_v5 = vld [vmem:[#allocation3 + $0x478] sm:$0xff] }
 0x173   :  { %v2668_v22 = vadd.f32 %v2667_v2, %v2624_v19  ;;  %3064 = vmatpush1.bf16.msra.mxu0 %v3627_v10  ;;  %3095 = vmatprep.mubr.bf16.mxu0 %v3666_v0  ;;  %v361_v2 = vld [vmem:[#allocation3 + $0x838] sm:$0xff]  ;;  %v3388_v9 = vcombine.high %v233_v4, %v241_v5 }
 0x174   :  { %3037 = vmatpush2.bf16.msra.mxu1 %v3499_v12  ;;  %v2626_v25 = vpop.f32.mrf.mxu0  ;;  %3065 = vmatprep.subr.bf16.mxu0 %v3612_v14  ;;  %v3516_v8 = vcombine.high %v361_v2, %v369_v3  ;;  %v3515_v10 = vcombine.low %v361_v2, %v369_v3  ;;  %v3640_v14 = vld [vmem:[%s3845_s0 + $0x8] ss:$12 sps:$4 sm:$0xff]  }
 0x175   :  { %3209 = vst [vmem:[%s3847_s2 + $0x20] sm:$0xff] %v2668_v22  ;;  %v2670_v27 = vadd.f32 %v2669_v11, %v2626_v25  ;;  %3038 = vmatprep.subr.bf16.mxu1 %v3484_v16  ;;  %v3387_v11 = vcombine.low %v233_v4, %v241_v5 }
 0x176   :  { %v2628_v31 = vpop.f32.mrf.mxu0 }
 0x177   :  { %3210 = vst [vmem:[%s3847_s2 + $0x28] sm:$0xff] %v2670_v27  ;;  %v2672_v0 = vadd.f32 %v2671_v24, %v2628_v31  ;;  %3066 = vmatpush1.bf16.msra.mxu0 %v3611_v23 }
 0x178   :  { %3039 = vmatpush2.bf16.msra.mxu1 %v3483_v26  ;;  %v2630_v35 = vpop.f32.mrf.mxu0  ;;  %3067 = vmatprep.subr.bf16.mxu0 %v3596_v42 }
 0x179   :  { %3225 = vst [vmem:[%s3847_s2 + $0xa0] sm:$0xff] %v2672_v0  ;;  %v2674_v38 = vadd.f32 %v2673_v34, %v2630_v35  ;;  %3040 = vmatprep.subr.bf16.mxu1 %v3468_v28 }
 0x17b   :  { %3226 = vst [vmem:[%s3847_s2 + $0xa8] sm:$0xff] %v2674_v38  ;;  %3068 = vmatpush1.bf16.msra.mxu0 %v3595_v13 }
 0x17c   :  { %3041 = vmatpush2.bf16.msra.mxu1 %v3467_v36  ;;  %3069 = vmatprep.subr.bf16.mxu0 %v3580_v37 }
 0x17d   :  { %3042 = vmatprep.subr.bf16.mxu1 %v3452_v39 }
 0x17f   :  { %3070 = vmatpush1.bf16.msra.mxu0 %v3579_v45 }
 0x180   :  { %3043 = vmatpush2.bf16.msra.mxu1 %v3451_v46  ;;  %3071 = vmatprep.subr.bf16.mxu0 %v3564_v15 }
 0x181   :  { %3044 = vmatprep.subr.bf16.mxu1 %v3436_v48 }
 0x183   :  { %3072 = vmatpush1.bf16.msra.mxu0 %v3563_v52 }
 0x184   :  { %3045 = vmatpush2.bf16.msra.mxu1 %v3435_v53  ;;  %3073 = vmatprep.subr.bf16.mxu0 %v3548_v54 }
 0x185   :  { %3046 = vmatprep.subr.bf16.mxu1 %v3420_v55 }
 0x187   :  { %3074 = vmatpush1.bf16.msra.mxu0 %v3547_v61 }
 0x188   :  { %3047 = vmatpush2.bf16.msra.mxu1 %v3419_v62  ;;  %3075 = vmatprep.subr.bf16.mxu0 %v3532_v63 }
 0x189   :  { %3048 = vmatprep.subr.bf16.mxu1 %v3404_v1 }
 0x18b   :  { %3076 = vmatpush1.bf16.msra.mxu0 %v3531_v6 }
 0x18c   :  { %3049 = vmatpush2.bf16.msra.mxu1 %v3403_v7  ;;  %3077 = vmatprep.subr.bf16.mxu0 %v3516_v8 }
 0x18d   :  { %3050 = vmatprep.subr.bf16.mxu1 %v3388_v9 }
 0x18f   :  { %3078 = vmatpush1.bf16.msra.mxu0 %v3515_v10 }
 0x190   :  { %3051 = vmatpush2.bf16.msra.mxu1 %v3387_v11 }
 0x192   :  { %v2753_v12 = vpop.f32.mrf.mxu0  ;;  %3096 = vmatmul.mubr.bf16.vlgmr.msra.gmra.mxu0 %v3640_v14 }
 0x193   :  { %v2710_v16 = vpop.f32.mrf.mxu1  ;;  %3053 = vmatmul.mubr.bf16.vlgmr.msra.gmra.mxu1 %v3733_v47 }
 0x194   :  { %v2754_v17 = vadd.f32 %v2753_v12, %v2710_v16  ;;  %v2755_v18 = vpop.f32.mrf.mxu0 }
 0x195   :  { %v2712_v19 = vpop.f32.mrf.mxu1 }
 0x196   :  { %3211 = vst [vmem:[%s3847_s2 + $0x30] sm:$0xff] %v2754_v17  ;;  %v2756_v20 = vadd.f32 %v2755_v18, %v2712_v19  ;;  %v2757_v21 = vpop.f32.mrf.mxu0 }
 0x197   :  { %v2714_v22 = vpop.f32.mrf.mxu1 }
 0x198   :  { %3212 = vst [vmem:[%s3847_s2 + $0x38] sm:$0xff] %v2756_v20  ;;  %v2758_v23 = vadd.f32 %v2757_v21, %v2714_v22  ;;  %v2759_v24 = vpop.f32.mrf.mxu0 }
 0x199   :  { %v2716_v25 = vpop.f32.mrf.mxu1 }
 0x19a   :  { %3227 = vst [vmem:[%s3847_s2 + $0xb0] sm:$0xff] %v2758_v23  ;;  %v2760_v47 = vadd.f32 %v2759_v24, %v2716_v25 }
 0x19c   :  { %3228 = vst [vmem:[%s3847_s2 + $0xb8] sm:$0xff] %v2760_v47 }
 0x1b3   :  { %v2839_v26 = vpop.f32.mrf.mxu1 }
 0x1b5   :  { %v2841_v42 = vpop.f32.mrf.mxu1 }
 0x1b7   :  { %v2843_v29 = vpop.f32.mrf.mxu1 }
 0x1b9   :  { %v2845_v0 = vpop.f32.mrf.mxu1 }
 0x1d2   :  { %v2796_v27 = vpop.f32.mrf.mxu0 }
 0x1d3   :  { %v2840_v28 = vadd.f32 %v2839_v26, %v2796_v27 }
 0x1d4   :  { %v2798_v30 = vpop.f32.mrf.mxu0 }
 0x1d5   :  { %3213 = vst [vmem:[%s3847_s2 + $0x40] sm:$0xff] %v2840_v28  ;;  %v2842_v31 = vadd.f32 %v2841_v42, %v2798_v30 }
 0x1d6   :  { %v2800_v32 = vpop.f32.mrf.mxu0 }
 0x1d7   :  { %3214 = vst [vmem:[%s3847_s2 + $0x48] sm:$0xff] %v2842_v31  ;;  %v2844_v33 = vadd.f32 %v2843_v29, %v2800_v32 }
 0x1d8   :  { %v2802_v13 = vpop.f32.mrf.mxu0 }
 0x1d9   :  { %3229 = vst [vmem:[%s3847_s2 + $0xc0] sm:$0xff] %v2844_v33  ;;  %v2846_v34 = vadd.f32 %v2845_v0, %v2802_v13 }
 0x1db   :  { %3230 = vst [vmem:[%s3847_s2 + $0xc8] sm:$0xff] %v2846_v34 }
 0x1f2   :  { %v2925_v35 = vpop.f32.mrf.mxu0 }
 0x1f3   :  { %v2882_v36 = vpop.f32.mrf.mxu1 }
 0x1f4   :  { %v2926_v37 = vadd.f32 %v2925_v35, %v2882_v36  ;;  %v2927_v38 = vpop.f32.mrf.mxu0 }
 0x1f5   :  { %v2884_v39 = vpop.f32.mrf.mxu1 }
 0x1f6   :  { %3215 = vst [vmem:[%s3847_s2 + $0x50] sm:$0xff] %v2926_v37  ;;  %v2928_v40 = vadd.f32 %v2927_v38, %v2884_v39  ;;  %v2929_v41 = vpop.f32.mrf.mxu0 }
 0x1f7   :  { %v2886_v43 = vpop.f32.mrf.mxu1 }
 0x1f8   :  { %3216 = vst [vmem:[%s3847_s2 + $0x58] sm:$0xff] %v2928_v40  ;;  %v2930_v44 = vadd.f32 %v2929_v41, %v2886_v43  ;;  %v2931_v45 = vpop.f32.mrf.mxu0 }
 0x1f9   :  { %v2888_v46 = vpop.f32.mrf.mxu1 }
 0x1fa   :  { %3231 = vst [vmem:[%s3847_s2 + $0xd0] sm:$0xff] %v2930_v44  ;;  %v2932_v15 = vadd.f32 %v2931_v45, %v2888_v46 }
 0x1fc   :  { %3232 = vst [vmem:[%s3847_s2 + $0xd8] sm:$0xff] %v2932_v15 }
 0x213   :  { %v3011_v48 = vpop.f32.mrf.mxu1 }
 0x215   :  { %v3013_v49 = vpop.f32.mrf.mxu1 }
 0x217   :  { %v3015_v59 = vpop.f32.mrf.mxu1 }
 0x219   :  { %v3017_v56 = vpop.f32.mrf.mxu1 }
 0x232   :  { %v2968_v50 = vpop.f32.mrf.mxu0 }
 0x233   :  { %v3012_v51 = vadd.f32 %v3011_v48, %v2968_v50 }
 0x234   :  { %v2970_v52 = vpop.f32.mrf.mxu0 }
 0x235   :  { %3217 = vst [vmem:[%s3847_s2 + $0x60] sm:$0xff] %v3012_v51  ;;  %v3014_v53 = vadd.f32 %v3013_v49, %v2970_v52 }
 0x236   :  { %v2972_v54 = vpop.f32.mrf.mxu0 }
 0x237   :  { %3218 = vst [vmem:[%s3847_s2 + $0x68] sm:$0xff] %v3014_v53  ;;  %v3016_v55 = vadd.f32 %v3015_v59, %v2972_v54 }
 0x238   :  { %v2974_v57 = vpop.f32.mrf.mxu0 }
 0x239   :  { %3233 = vst [vmem:[%s3847_s2 + $0xe0] sm:$0xff] %v3016_v55  ;;  %v3018_v58 = vadd.f32 %v3017_v56, %v2974_v57 }
 0x23b   :  { %3234 = vst [vmem:[%s3847_s2 + $0xe8] sm:$0xff] %v3018_v58 }
 0x252   :  { %v3097_v60 = vpop.f32.mrf.mxu0 }
 0x253   :  { %v3054_v61 = vpop.f32.mrf.mxu1 }
 0x254   :  { %v3098_v62 = vadd.f32 %v3097_v60, %v3054_v61  ;;  %v3099_v63 = vpop.f32.mrf.mxu0 }
 0x255   :  { %v3056_v1 = vpop.f32.mrf.mxu1 }
 0x256   :  { %3219 = vst [vmem:[%s3847_s2 + $0x70] sm:$0xff] %v3098_v62  ;;  %v3100_v2 = vadd.f32 %v3099_v63, %v3056_v1  ;;  %v3101_v3 = vpop.f32.mrf.mxu0 }
 0x257   :  { %v3058_v4 = vpop.f32.mrf.mxu1 }
 0x258   :  { %3220 = vst [vmem:[%s3847_s2 + $0x78] sm:$0xff] %v3100_v2  ;;  %v3102_v5 = vadd.f32 %v3101_v3, %v3058_v4  ;;  %v3103_v6 = vpop.f32.mrf.mxu0 }
 0x259   :  { %v3060_v7 = vpop.f32.mrf.mxu1 }
 0x25a   :  { %3235 = vst [vmem:[%s3847_s2 + $0xf0] sm:$0xff] %v3102_v5  ;;  %v3104_v8 = vadd.f32 %v3103_v6, %v3060_v7 }
 0x25c   :  { %3236 = vst [vmem:[%s3847_s2 + $0xf8] sm:$0xff] %v3104_v8 }
 0x25d   :  { %3241 = vsyncpa [#allocation4], 1 }

// kernel: segnet3d_rec_forward.7
= control target key start
LH: loop header
LB: loop body
LE: loop exit
PB: predicated region body
PF: predicated region fallthrough
CT: control target
= control target key end

     0   :  { %7 = vsyncpa [#allocation4], 0  ;;  %s9044_s9 = smov [#allocation3]   ;;  %s9429_s0 = inlined_call_operand.vmem [shape: bf16[16,512], index: 0, kind: input, shape index: {}]   ;;  %s9430_s1 = inlined_call_operand.hbm [shape: bf16[512,4096], index: 1, kind: input, shape index: {}]   ;;  %s9431_s2 = inlined_call_operand.vmem [shape: f32[16,4096], index: 2, kind: output, shape index: {}]  }
   0x1   :  { %s15_s10 = sshll.u32 %s9044_s9, 4  ;;  %s16_s10 = int_to_ptr.vmem [resolvable:$true] %s15_s10 }
   0x2   :  { %s9030_s11 = scalar_lea.vmem %s16_s10, 131072  ;;  %p9035_p1 = scmp.lt.s32.totalorder %s16_s10, %s16_s10 }
   0x3   :  { %p9031_p0 = scmp.ne.s32.totalorder %s16_s10, %s9030_s11  ;;  %p9036_p2 = scmp.lt.s32.totalorder %s9030_s11, %s9030_s11 }
   0x5   :  { %p9037_p3 = por %p9036_p2, %p9035_p1 }
   0x7   :  { %p9038_p4 = pnand %p9037_p3, %p9031_p0 }
   0x9   :  { %9041 = shalt.err (!%p9038_p4)
}
   0xa   :  { %s9045_s12 = smov 2048   ;;  %s9046_s13 = smov 128  }
   0xb   :  { %21 = dma.hbm_to_vmem [thread:$0]  %s9430_s1, 131072, %s16_s10, [#allocation4], %s9045_s12, %s9045_s12, %s9046_s13  }
   0xc   :  { %9042 = dma.done.wait [#allocation4], 131072  }
   0xd   :  { %9043 = vsyncadd [#allocation4], 4294836224  ;;  %v385_v0 = vld [vmem:[#allocation3 + $0x700] sm:$0xff]  ;;  %v9073_v59 = vld [vmem:[%s9429_s0 + $0xc] ss:$16 sps:$4 sm:$0xff]  }
   0xe   :  { %v401_v1 = vld [vmem:[#allocation3 + $0x780] sm:$0xff]  ;;  %6400 = vmatprep.mubr.bf16.mxu1 %v9073_v59 }
   0xf   :  { %v897_v2 = vld [vmem:[#allocation3 + $0x1700] sm:$0xff]  ;;  %v8194_v3 = vcombine.high %v385_v0, %v401_v1  ;;  %v8193_v5 = vcombine.low %v385_v0, %v401_v1 }
  0x10   :  { %v913_v4 = vld [vmem:[#allocation3 + $0x1780] sm:$0xff] }
  0x11   :  { %v353_v6 = vld [vmem:[#allocation3 + $0x600] sm:$0xff]  ;;  %v8706_v8 = vcombine.high %v897_v2, %v913_v4  ;;  %v8705_v9 = vcombine.low %v897_v2, %v913_v4  ;;  %6325 = vmatprep.subr.bf16.mxu0 %v8194_v3 }
  0x12   :  { %v369_v7 = vld [vmem:[#allocation3 + $0x680] sm:$0xff]  ;;  %6326 = vmatpush1.bf16.msra.mxu0 %v8193_v5 }
  0x13   :  { %v8162_v10 = vcombine.high %v353_v6, %v369_v7  ;;  %v865_v11 = vld [vmem:[#allocation3 + $0x1600] sm:$0xff]  ;;  %6368 = vmatprep.subr.bf16.mxu1 %v8706_v8  ;;  %v8161_v18 = vcombine.low %v353_v6, %v369_v7 }
  0x14   :  { %v881_v12 = vld [vmem:[#allocation3 + $0x1680] sm:$0xff]  ;;  %6369 = vmatpush1.bf16.msra.mxu1 %v8705_v9 }
  0x15   :  { %v321_v13 = vld [vmem:[#allocation3 + $0x500] sm:$0xff]  ;;  %v8674_v14 = vcombine.high %v865_v11, %v881_v12  ;;  %6327 = vmatprep.subr.bf16.mxu0 %v8162_v10  ;;  %v8673_v19 = vcombine.low %v865_v11, %v881_v12 }
  0x16   :  { %v337_v15 = vld [vmem:[#allocation3 + $0x580] sm:$0xff]  ;;  %6328 = vmatpush1.bf16.msra.mxu0 %v8161_v18 }
  0x17   :  { %v833_v16 = vld [vmem:[#allocation3 + $0x1500] sm:$0xff]  ;;  %v8130_v20 = vcombine.high %v321_v13, %v337_v15  ;;  %6370 = vmatprep.subr.bf16.mxu1 %v8674_v14  ;;  %v8129_v26 = vcombine.low %v321_v13, %v337_v15 }
  0x18   :  { %v849_v17 = vld [vmem:[#allocation3 + $0x1580] sm:$0xff]  ;;  %6371 = vmatpush1.bf16.msra.mxu1 %v8673_v19 }
  0x19   :  { %v8642_v21 = vcombine.high %v833_v16, %v849_v17  ;;  %v289_v22 = vld [vmem:[#allocation3 + $0x400] sm:$0xff]  ;;  %6329 = vmatprep.subr.bf16.mxu0 %v8130_v20  ;;  %v8641_v27 = vcombine.low %v833_v16, %v849_v17 }
  0x1a   :  { %v305_v23 = vld [vmem:[#allocation3 + $0x480] sm:$0xff]  ;;  %6330 = vmatpush1.bf16.msra.mxu0 %v8129_v26 }
  0x1b   :  { %v801_v24 = vld [vmem:[#allocation3 + $0x1400] sm:$0xff]  ;;  %v8098_v28 = vcombine.high %v289_v22, %v305_v23  ;;  %6372 = vmatprep.subr.bf16.mxu1 %v8642_v21  ;;  %v8097_v34 = vcombine.low %v289_v22, %v305_v23 }
  0x1c   :  { %v817_v25 = vld [vmem:[#allocation3 + $0x1480] sm:$0xff]  ;;  %6373 = vmatpush1.bf16.msra.mxu1 %v8641_v27 }
  0x1d   :  { %v8610_v29 = vcombine.high %v801_v24, %v817_v25  ;;  %v257_v30 = vld [vmem:[#allocation3 + $0x300] sm:$0xff]  ;;  %6331 = vmatprep.subr.bf16.mxu0 %v8098_v28  ;;  %v8609_v35 = vcombine.low %v801_v24, %v817_v25 }
  0x1e   :  { %v273_v31 = vld [vmem:[#allocation3 + $0x380] sm:$0xff]  ;;  %6332 = vmatpush1.bf16.msra.mxu0 %v8097_v34 }
  0x1f   :  { %v769_v32 = vld [vmem:[#allocation3 + $0x1300] sm:$0xff]  ;;  %v8066_v36 = vcombine.high %v257_v30, %v273_v31  ;;  %6374 = vmatprep.subr.bf16.mxu1 %v8610_v29  ;;  %v8065_v42 = vcombine.low %v257_v30, %v273_v31 }
  0x20   :  { %v785_v33 = vld [vmem:[#allocation3 + $0x1380] sm:$0xff]  ;;  %6375 = vmatpush1.bf16.msra.mxu1 %v8609_v35 }
  0x21   :  { %v8578_v37 = vcombine.high %v769_v32, %v785_v33  ;;  %v225_v38 = vld [vmem:[#allocation3 + $0x200] sm:$0xff]  ;;  %6333 = vmatprep.subr.bf16.mxu0 %v8066_v36  ;;  %v8577_v43 = vcombine.low %v769_v32, %v785_v33 }
  0x22   :  { %v241_v39 = vld [vmem:[#allocation3 + $0x280] sm:$0xff]  ;;  %6334 = vmatpush1.bf16.msra.mxu0 %v8065_v42 }
  0x23   :  { %v737_v40 = vld [vmem:[#allocation3 + $0x1200] sm:$0xff]  ;;  %v8034_v44 = vcombine.high %v225_v38, %v241_v39  ;;  %6376 = vmatprep.subr.bf16.mxu1 %v8578_v37  ;;  %v8033_v50 = vcombine.low %v225_v38, %v241_v39 }
  0x24   :  { %v753_v41 = vld [vmem:[#allocation3 + $0x1280] sm:$0xff]  ;;  %6377 = vmatpush1.bf16.msra.mxu1 %v8577_v43 }
  0x25   :  { %v8546_v45 = vcombine.high %v737_v40, %v753_v41  ;;  %v193_v46 = vld [vmem:[#allocation3 + $0x100] sm:$0xff]  ;;  %6335 = vmatprep.subr.bf16.mxu0 %v8034_v44  ;;  %v8545_v52 = vcombine.low %v737_v40, %v753_v41 }
  0x26   :  { %v209_v47 = vld [vmem:[#allocation3 + $0x180] sm:$0xff]  ;;  %6336 = vmatpush1.bf16.msra.mxu0 %v8033_v50 }
  0x27   :  { %v705_v48 = vld [vmem:[#allocation3 + $0x1100] sm:$0xff]  ;;  %v8002_v53 = vcombine.high %v193_v46, %v209_v47  ;;  %6378 = vmatprep.subr.bf16.mxu1 %v8546_v45  ;;  %v8001_v60 = vcombine.low %v193_v46, %v209_v47 }
  0x28   :  { %v721_v49 = vld [vmem:[#allocation3 + $0x1180] sm:$0xff]  ;;  %6379 = vmatpush1.bf16.msra.mxu1 %v8545_v52 }
  0x29   :  { %v161_v51 = vld [vmem:[#allocation3] sm:$0xff]  ;;  %v8514_v55 = vcombine.high %v705_v48, %v721_v49  ;;  %6337 = vmatprep.subr.bf16.mxu0 %v8002_v53  ;;  %v8513_v61 = vcombine.low %v705_v48, %v721_v49 }
  0x2a   :  { %v177_v54 = vld [vmem:[#allocation3 + $0x80] sm:$0xff]  ;;  %6338 = vmatpush1.bf16.msra.mxu0 %v8001_v60 }
  0x2b   :  { %v9068_v56 = vld [vmem:[%s9429_s0 + $0x4] ss:$16 sps:$4 sm:$0xff]   ;;  %v7970_v62 = vcombine.high %v161_v51, %v177_v54  ;;  %6380 = vmatprep.subr.bf16.mxu1 %v8514_v55  ;;  %v7969_v4 = vcombine.low %v161_v51, %v177_v54 }
  0x2c   :  { %v673_v57 = vld [vmem:[#allocation3 + $0x1000] sm:$0xff]  ;;  %6357 = vmatprep.mubr.bf16.mxu0 %v9068_v56  ;;  %6381 = vmatpush1.bf16.msra.mxu1 %v8513_v61 }
  0x2d   :  { %v689_v58 = vld [vmem:[#allocation3 + $0x1080] sm:$0xff]  ;;  %6339 = vmatprep.subr.bf16.mxu0 %v7970_v62 }
  0x2e   :  { %v8482_v63 = vcombine.high %v673_v57, %v689_v58  ;;  %v641_v0 = vld [vmem:[#allocation3 + $0xf00] sm:$0xff]  ;;  %v8481_v5 = vcombine.low %v673_v57, %v689_v58  ;;  %6340 = vmatpush1.bf16.msra.mxu0 %v7969_v4  ;;  %v898_v4 = vld [vmem:[#allocation3 + $0x1708] sm:$0xff] }
  0x2f   :  { %v657_v1 = vld [vmem:[#allocation3 + $0xf80] sm:$0xff] }
  0x30   :  { %v1153_v2 = vld [vmem:[#allocation3 + $0x1f00] sm:$0xff]  ;;  %v8450_v6 = vcombine.high %v641_v0, %v657_v1  ;;  %6382 = vmatprep.subr.bf16.mxu1 %v8482_v63  ;;  %v8449_v12 = vcombine.low %v641_v0, %v657_v1 }
  0x31   :  { %v1169_v3 = vld [vmem:[#allocation3 + $0x1f80] sm:$0xff]  ;;  %6383 = vmatpush1.bf16.msra.mxu1 %v8481_v5  ;;  %v914_v5 = vld [vmem:[#allocation3 + $0x1788] sm:$0xff] }
  0x32   :  { %v8962_v7 = vcombine.high %v1153_v2, %v1169_v3  ;;  %v609_v8 = vld [vmem:[#allocation3 + $0xe00] sm:$0xff]  ;;  %6341 = vmatprep.subr.bf16.mxu0 %v8450_v6  ;;  %v8961_v13 = vcombine.low %v1153_v2, %v1169_v3  ;;  %v386_v2 = vld [vmem:[#allocation3 + $0x708] sm:$0xff] }
  0x33   :  { %v625_v9 = vld [vmem:[#allocation3 + $0xe80] sm:$0xff]  ;;  %6342 = vmatpush2.bf16.msra.mxu0 %v8449_v12  ;;  %v402_v3 = vld [vmem:[#allocation3 + $0x788] sm:$0xff] }
  0x34   :  { %v1121_v10 = vld [vmem:[#allocation3 + $0x1e00] sm:$0xff]  ;;  %v8418_v14 = vcombine.high %v609_v8, %v625_v9  ;;  %6384 = vmatprep.subr.bf16.mxu1 %v8962_v7  ;;  %v8417_v20 = vcombine.low %v609_v8, %v625_v9  ;;  %v8196_v8 = vcombine.high %v386_v2, %v402_v3  ;;  %v8708_v9 = vcombine.high %v898_v4, %v914_v5 }
  0x35   :  { %v1137_v11 = vld [vmem:[#allocation3 + $0x1e80] sm:$0xff]  ;;  %6385 = vmatpush2.bf16.msra.mxu1 %v8961_v13  ;;  %v866_v13 = vld [vmem:[#allocation3 + $0x1608] sm:$0xff] }
  0x36   :  { %v8930_v15 = vcombine.high %v1121_v10, %v1137_v11  ;;  %v577_v16 = vld [vmem:[#allocation3 + $0xd00] sm:$0xff]  ;;  %6343 = vmatprep.subr.bf16.mxu0 %v8418_v14  ;;  %v8929_v21 = vcombine.low %v1121_v10, %v1137_v11  ;;  %v354_v10 = vld [vmem:[#allocation3 + $0x608] sm:$0xff] }
  0x37   :  { %v593_v17 = vld [vmem:[#allocation3 + $0xd80] sm:$0xff]  ;;  %6344 = vmatpush2.bf16.msra.mxu0 %v8417_v20  ;;  %v370_v11 = vld [vmem:[#allocation3 + $0x688] sm:$0xff] }
  0x38   :  { %v1089_v18 = vld [vmem:[#allocation3 + $0x1d00] sm:$0xff]  ;;  %v8386_v22 = vcombine.high %v577_v16, %v593_v17  ;;  %6386 = vmatprep.subr.bf16.mxu1 %v8930_v15  ;;  %v8385_v28 = vcombine.low %v577_v16, %v593_v17  ;;  %v882_v14 = vld [vmem:[#allocation3 + $0x1688] sm:$0xff]  ;;  %v8195_v16 = vcombine.low %v386_v2, %v402_v3  ;;  %v8707_v17 = vcombine.low %v898_v4, %v914_v5 }
  0x39   :  { %v1105_v19 = vld [vmem:[#allocation3 + $0x1d80] sm:$0xff]  ;;  %6387 = vmatpush2.bf16.msra.mxu1 %v8929_v21  ;;  %v9085_v15 = vld [vmem:[%s9429_s0 + $0x8] ss:$16 sps:$4 sm:$0xff]  }
  0x3a   :  { %v8898_v23 = vcombine.high %v1089_v18, %v1105_v19  ;;  %v545_v24 = vld [vmem:[#allocation3 + $0xc00] sm:$0xff]  ;;  %6345 = vmatprep.subr.bf16.mxu0 %v8386_v22  ;;  %v8897_v29 = vcombine.low %v1089_v18, %v1105_v19  ;;  %v8164_v18 = vcombine.high %v354_v10, %v370_v11  ;;  %v8676_v19 = vcombine.high %v866_v13, %v882_v14  ;;  %v322_v20 = vld [vmem:[#allocation3 + $0x508] sm:$0xff] }
  0x3b   :  { %v561_v25 = vld [vmem:[#allocation3 + $0xc80] sm:$0xff]  ;;  %6346 = vmatpush2.bf16.msra.mxu0 %v8385_v28  ;;  %v338_v21 = vld [vmem:[#allocation3 + $0x588] sm:$0xff] }
  0x3c   :  { %v1057_v26 = vld [vmem:[#allocation3 + $0x1c00] sm:$0xff]  ;;  %v8354_v30 = vcombine.high %v545_v24, %v561_v25  ;;  %6388 = vmatprep.subr.bf16.mxu1 %v8898_v23  ;;  %v8353_v36 = vcombine.low %v545_v24, %v561_v25  ;;  %v834_v22 = vld [vmem:[#allocation3 + $0x1508] sm:$0xff]  ;;  %v8163_v24 = vcombine.low %v354_v10, %v370_v11  ;;  %v8675_v25 = vcombine.low %v866_v13, %v882_v14 }
  0x3d   :  { %v1073_v27 = vld [vmem:[#allocation3 + $0x1c80] sm:$0xff]  ;;  %6389 = vmatpush2.bf16.msra.mxu1 %v8897_v29  ;;  %v850_v23 = vld [vmem:[#allocation3 + $0x1588] sm:$0xff] }
  0x3e   :  { %v8866_v31 = vcombine.high %v1057_v26, %v1073_v27  ;;  %v513_v32 = vld [vmem:[#allocation3 + $0xb00] sm:$0xff]  ;;  %6347 = vmatprep.subr.bf16.mxu0 %v8354_v30  ;;  %v8865_v37 = vcombine.low %v1057_v26, %v1073_v27  ;;  %v8132_v26 = vcombine.high %v322_v20, %v338_v21  ;;  %v8644_v27 = vcombine.high %v834_v22, %v850_v23  ;;  %v290_v28 = vld [vmem:[#allocation3 + $0x408] sm:$0xff] }
  0x3f   :  { %v529_v33 = vld [vmem:[#allocation3 + $0xb80] sm:$0xff]  ;;  %6348 = vmatpush2.bf16.msra.mxu0 %v8353_v36  ;;  %v306_v29 = vld [vmem:[#allocation3 + $0x488] sm:$0xff] }
  0x40   :  { %v1025_v34 = vld [vmem:[#allocation3 + $0x1b00] sm:$0xff]  ;;  %v8322_v38 = vcombine.high %v513_v32, %v529_v33  ;;  %6390 = vmatprep.subr.bf16.mxu1 %v8866_v31  ;;  %v8321_v44 = vcombine.low %v513_v32, %v529_v33  ;;  %v802_v30 = vld [vmem:[#allocation3 + $0x1408] sm:$0xff]  ;;  %v8131_v32 = vcombine.low %v322_v20, %v338_v21  ;;  %v8643_v33 = vcombine.low %v834_v22, %v850_v23 }
  0x41   :  { %v1041_v35 = vld [vmem:[#allocation3 + $0x1b80] sm:$0xff]  ;;  %6391 = vmatpush2.bf16.msra.mxu1 %v8865_v37  ;;  %v818_v31 = vld [vmem:[#allocation3 + $0x1488] sm:$0xff] }
  0x42   :  { %v8834_v39 = vcombine.high %v1025_v34, %v1041_v35  ;;  %v481_v40 = vld [vmem:[#allocation3 + $0xa00] sm:$0xff]  ;;  %6349 = vmatprep.subr.bf16.mxu0 %v8322_v38  ;;  %v8833_v45 = vcombine.low %v1025_v34, %v1041_v35  ;;  %v8100_v34 = vcombine.high %v290_v28, %v306_v29  ;;  %v8612_v35 = vcombine.high %v802_v30, %v818_v31  ;;  %v258_v36 = vld [vmem:[#allocation3 + $0x308] sm:$0xff] }
  0x43   :  { %v497_v41 = vld [vmem:[#allocation3 + $0xa80] sm:$0xff]  ;;  %6350 = vmatpush2.bf16.msra.mxu0 %v8321_v44  ;;  %v274_v37 = vld [vmem:[#allocation3 + $0x388] sm:$0xff] }
  0x44   :  { %v993_v42 = vld [vmem:[#allocation3 + $0x1a00] sm:$0xff]  ;;  %v8290_v46 = vcombine.high %v481_v40, %v497_v41  ;;  %6392 = vmatprep.subr.bf16.mxu1 %v8834_v39  ;;  %v8289_v52 = vcombine.low %v481_v40, %v497_v41  ;;  %v770_v38 = vld [vmem:[#allocation3 + $0x1308] sm:$0xff]  ;;  %v8099_v40 = vcombine.low %v290_v28, %v306_v29  ;;  %v8611_v41 = vcombine.low %v802_v30, %v818_v31 }
  0x45   :  { %v1009_v43 = vld [vmem:[#allocation3 + $0x1a80] sm:$0xff]  ;;  %6393 = vmatpush2.bf16.msra.mxu1 %v8833_v45  ;;  %v786_v39 = vld [vmem:[#allocation3 + $0x1388] sm:$0xff] }
  0x46   :  { %v8802_v47 = vcombine.high %v993_v42, %v1009_v43  ;;  %v449_v48 = vld [vmem:[#allocation3 + $0x900] sm:$0xff]  ;;  %6351 = vmatprep.subr.bf16.mxu0 %v8290_v46  ;;  %v8801_v53 = vcombine.low %v993_v42, %v1009_v43  ;;  %v8068_v42 = vcombine.high %v258_v36, %v274_v37  ;;  %v8580_v43 = vcombine.high %v770_v38, %v786_v39  ;;  %v226_v44 = vld [vmem:[#allocation3 + $0x208] sm:$0xff] }
  0x47   :  { %v465_v49 = vld [vmem:[#allocation3 + $0x980] sm:$0xff]  ;;  %6352 = vmatpush2.bf16.msra.mxu0 %v8289_v52  ;;  %v242_v45 = vld [vmem:[#allocation3 + $0x288] sm:$0xff] }
  0x48   :  { %v961_v50 = vld [vmem:[#allocation3 + $0x1900] sm:$0xff]  ;;  %v8258_v54 = vcombine.high %v449_v48, %v465_v49  ;;  %6394 = vmatprep.subr.bf16.mxu1 %v8802_v47  ;;  %v8257_v62 = vcombine.low %v449_v48, %v465_v49  ;;  %v738_v46 = vld [vmem:[#allocation3 + $0x1208] sm:$0xff]  ;;  %v8067_v48 = vcombine.low %v258_v36, %v274_v37  ;;  %v8579_v49 = vcombine.low %v770_v38, %v786_v39 }
  0x49   :  { %v977_v51 = vld [vmem:[#allocation3 + $0x1980] sm:$0xff]  ;;  %6395 = vmatpush2.bf16.msra.mxu1 %v8801_v53  ;;  %v754_v47 = vld [vmem:[#allocation3 + $0x1288] sm:$0xff] }
  0x4a   :  { %v8770_v55 = vcombine.high %v961_v50, %v977_v51  ;;  %v417_v57 = vld [vmem:[#allocation3 + $0x800] sm:$0xff]  ;;  %6353 = vmatprep.subr.bf16.mxu0 %v8258_v54  ;;  %v8769_v63 = vcombine.low %v961_v50, %v977_v51  ;;  %v8036_v50 = vcombine.high %v226_v44, %v242_v45  ;;  %v8548_v51 = vcombine.high %v738_v46, %v754_v47  ;;  %v194_v52 = vld [vmem:[#allocation3 + $0x108] sm:$0xff] }
  0x4b   :  { %v433_v58 = vld [vmem:[#allocation3 + $0x880] sm:$0xff]  ;;  %6354 = vmatpush2.bf16.msra.mxu0 %v8257_v62  ;;  %v210_v53 = vld [vmem:[#allocation3 + $0x188] sm:$0xff] }
  0x4c   :  { %v929_v60 = vld [vmem:[#allocation3 + $0x1800] sm:$0xff]  ;;  %v8226_v0 = vcombine.high %v417_v57, %v433_v58  ;;  %6396 = vmatprep.subr.bf16.mxu1 %v8770_v55  ;;  %v8225_v6 = vcombine.low %v417_v57, %v433_v58  ;;  %v706_v54 = vld [vmem:[#allocation3 + $0x1108] sm:$0xff]  ;;  %v8035_v57 = vcombine.low %v226_v44, %v242_v45  ;;  %v8547_v58 = vcombine.low %v738_v46, %v754_v47 }
  0x4d   :  { %v945_v61 = vld [vmem:[#allocation3 + $0x1880] sm:$0xff]  ;;  %6397 = vmatpush2.bf16.msra.mxu1 %v8769_v63  ;;  %v722_v55 = vld [vmem:[#allocation3 + $0x1188] sm:$0xff]  ;;  %v8003_v2 = vcombine.low %v194_v52, %v210_v53 }
  0x4e   :  { %v8738_v1 = vcombine.high %v929_v60, %v945_v61  ;;  %6355 = vmatprep.subr.bf16.mxu0 %v8226_v0  ;;  %v8737_v7 = vcombine.low %v929_v60, %v945_v61  ;;  %v9080_v12 = vld [vmem:[%s9429_s0] ss:$16 sps:$4 sm:$0xff]   ;;  %v8004_v60 = vcombine.high %v194_v52, %v210_v53  ;;  %v8516_v61 = vcombine.high %v706_v54, %v722_v55  ;;  %v162_v62 = vld [vmem:[#allocation3 + $0x8] sm:$0xff] }
  0x4f   :  { %6356 = vmatpush2.bf16.msra.mxu0 %v8225_v6  ;;  %v178_v63 = vld [vmem:[#allocation3 + $0x88] sm:$0xff]  ;;  %v8515_v3 = vcombine.low %v706_v54, %v722_v55 }
  0x50   :  { %6398 = vmatprep.subr.bf16.mxu1 %v8738_v1  ;;  %6411 = vmatprep.subr.bf16.mxu0 %v8196_v8  ;;  %v674_v0 = vld [vmem:[#allocation3 + $0x1008] sm:$0xff]  ;;  %v7972_v4 = vcombine.high %v162_v62, %v178_v63  ;;  %v7971_v10 = vcombine.low %v162_v62, %v178_v63 }
  0x51   :  { %6399 = vmatpush2.bf16.msra.mxu1 %v8737_v7  ;;  %v690_v1 = vld [vmem:[#allocation3 + $0x1088] sm:$0xff] }
  0x52   :  { %6454 = vmatprep.subr.bf16.mxu1 %v8708_v9  ;;  %6358 = vmatmul.mubr.bf16.vlgmr.msra.gmra.mxu0 %v9080_v12  ;;  %v8484_v5 = vcombine.high %v674_v0, %v690_v1  ;;  %v642_v6 = vld [vmem:[#allocation3 + $0xf08] sm:$0xff]  ;;  %v8483_v11 = vcombine.low %v674_v0, %v690_v1 }
  0x53   :  { %6412 = vmatpush1.bf16.msra.mxu0 %v8195_v16  ;;  %6443 = vmatprep.mubr.bf16.mxu0 %v9068_v56  ;;  %v658_v7 = vld [vmem:[#allocation3 + $0xf88] sm:$0xff] }
  0x54   :  { %6401 = vmatmul.mubr.bf16.vlgmr.msra.gmra.mxu1 %v9085_v15  ;;  %6413 = vmatprep.subr.bf16.mxu0 %v8164_v18  ;;  %v1154_v8 = vld [vmem:[#allocation3 + $0x1f08] sm:$0xff]  ;;  %v8452_v13 = vcombine.high %v642_v6, %v658_v7  ;;  %v8451_v20 = vcombine.low %v642_v6, %v658_v7 }
  0x55   :  { %6455 = vmatpush1.bf16.msra.mxu1 %v8707_v17  ;;  %6486 = vmatprep.mubr.bf16.mxu1 %v9073_v59  ;;  %v1170_v9 = vld [vmem:[#allocation3 + $0x1f88] sm:$0xff] }
  0x56   :  { %6456 = vmatprep.subr.bf16.mxu1 %v8676_v19  ;;  %v8964_v14 = vcombine.high %v1154_v8, %v1170_v9  ;;  %v610_v16 = vld [vmem:[#allocation3 + $0xe08] sm:$0xff]  ;;  %v8963_v21 = vcombine.low %v1154_v8, %v1170_v9 }
  0x57   :  { %6414 = vmatpush1.bf16.msra.mxu0 %v8163_v24  ;;  %v626_v17 = vld [vmem:[#allocation3 + $0xe88] sm:$0xff] }
  0x58   :  { %6415 = vmatprep.subr.bf16.mxu0 %v8132_v26  ;;  %v1122_v18 = vld [vmem:[#allocation3 + $0x1e08] sm:$0xff]  ;;  %v8420_v22 = vcombine.high %v610_v16, %v626_v17  ;;  %v8419_v28 = vcombine.low %v610_v16, %v626_v17 }
  0x59   :  { %6457 = vmatpush1.bf16.msra.mxu1 %v8675_v25  ;;  %v1138_v19 = vld [vmem:[#allocation3 + $0x1e88] sm:$0xff] }
  0x5a   :  { %6458 = vmatprep.subr.bf16.mxu1 %v8644_v27  ;;  %v8932_v23 = vcombine.high %v1122_v18, %v1138_v19  ;;  %v578_v24 = vld [vmem:[#allocation3 + $0xd08] sm:$0xff]  ;;  %v8931_v29 = vcombine.low %v1122_v18, %v1138_v19 }
  0x5b   :  { %6416 = vmatpush1.bf16.msra.mxu0 %v8131_v32  ;;  %v594_v25 = vld [vmem:[#allocation3 + $0xd88] sm:$0xff] }
  0x5c   :  { %6417 = vmatprep.subr.bf16.mxu0 %v8100_v34  ;;  %v1090_v26 = vld [vmem:[#allocation3 + $0x1d08] sm:$0xff]  ;;  %v8388_v30 = vcombine.high %v578_v24, %v594_v25  ;;  %v8387_v36 = vcombine.low %v578_v24, %v594_v25 }
  0x5d   :  { %6459 = vmatpush1.bf16.msra.mxu1 %v8643_v33  ;;  %v1106_v27 = vld [vmem:[#allocation3 + $0x1d88] sm:$0xff] }
  0x5e   :  { %6460 = vmatprep.subr.bf16.mxu1 %v8612_v35  ;;  %v8900_v31 = vcombine.high %v1090_v26, %v1106_v27  ;;  %v546_v32 = vld [vmem:[#allocation3 + $0xc08] sm:$0xff]  ;;  %v8899_v37 = vcombine.low %v1090_v26, %v1106_v27 }
  0x5f   :  { %6418 = vmatpush1.bf16.msra.mxu0 %v8099_v40  ;;  %v562_v33 = vld [vmem:[#allocation3 + $0xc88] sm:$0xff] }
  0x60   :  { %6419 = vmatprep.subr.bf16.mxu0 %v8068_v42  ;;  %v1058_v34 = vld [vmem:[#allocation3 + $0x1c08] sm:$0xff]  ;;  %v8356_v38 = vcombine.high %v546_v32, %v562_v33  ;;  %v8355_v44 = vcombine.low %v546_v32, %v562_v33 }
  0x61   :  { %6461 = vmatpush1.bf16.msra.mxu1 %v8611_v41  ;;  %v1074_v35 = vld [vmem:[#allocation3 + $0x1c88] sm:$0xff] }
  0x62   :  { %6462 = vmatprep.subr.bf16.mxu1 %v8580_v43  ;;  %v8868_v39 = vcombine.high %v1058_v34, %v1074_v35  ;;  %v514_v40 = vld [vmem:[#allocation3 + $0xb08] sm:$0xff]  ;;  %v8867_v45 = vcombine.low %v1058_v34, %v1074_v35 }
  0x63   :  { %6420 = vmatpush1.bf16.msra.mxu0 %v8067_v48  ;;  %v530_v41 = vld [vmem:[#allocation3 + $0xb88] sm:$0xff] }
  0x64   :  { %6421 = vmatprep.subr.bf16.mxu0 %v8036_v50  ;;  %v1026_v42 = vld [vmem:[#allocation3 + $0x1b08] sm:$0xff]  ;;  %v8324_v46 = vcombine.high %v514_v40, %v530_v41  ;;  %v8323_v52 = vcombine.low %v514_v40, %v530_v41 }
  0x65   :  { %6463 = vmatpush1.bf16.msra.mxu1 %v8579_v49  ;;  %v1042_v43 = vld [vmem:[#allocation3 + $0x1b88] sm:$0xff] }
  0x66   :  { %6464 = vmatprep.subr.bf16.mxu1 %v8548_v51  ;;  %v8836_v47 = vcombine.high %v1026_v42, %v1042_v43  ;;  %v482_v48 = vld [vmem:[#allocation3 + $0xa08] sm:$0xff]  ;;  %v8835_v53 = vcombine.low %v1026_v42, %v1042_v43 }
  0x67   :  { %6422 = vmatpush1.bf16.msra.mxu0 %v8035_v57  ;;  %v498_v49 = vld [vmem:[#allocation3 + $0xa88] sm:$0xff] }
  0x68   :  { %6423 = vmatprep.subr.bf16.mxu0 %v8004_v60  ;;  %v994_v50 = vld [vmem:[#allocation3 + $0x1a08] sm:$0xff]  ;;  %v8292_v54 = vcombine.high %v482_v48, %v498_v49  ;;  %v8291_v62 = vcombine.low %v482_v48, %v498_v49 }
  0x69   :  { %6465 = vmatpush1.bf16.msra.mxu1 %v8547_v58  ;;  %v1010_v51 = vld [vmem:[#allocation3 + $0x1a88] sm:$0xff] }
  0x6a   :  { %6466 = vmatprep.subr.bf16.mxu1 %v8516_v61  ;;  %v8804_v55 = vcombine.high %v994_v50, %v1010_v51  ;;  %v450_v57 = vld [vmem:[#allocation3 + $0x908] sm:$0xff]  ;;  %v8803_v63 = vcombine.low %v994_v50, %v1010_v51  ;;  %v227_v50 = vld [vmem:[#allocation3 + $0x210] sm:$0xff] }
  0x6b   :  { %6424 = vmatpush1.bf16.msra.mxu0 %v8003_v2  ;;  %v466_v58 = vld [vmem:[#allocation3 + $0x988] sm:$0xff]  ;;  %v243_v51 = vld [vmem:[#allocation3 + $0x290] sm:$0xff] }
  0x6c   :  { %6425 = vmatprep.subr.bf16.mxu0 %v7972_v4  ;;  %v962_v60 = vld [vmem:[#allocation3 + $0x1908] sm:$0xff]  ;;  %v8260_v0 = vcombine.high %v450_v57, %v466_v58  ;;  %v8259_v6 = vcombine.low %v450_v57, %v466_v58  ;;  %v8038_v57 = vcombine.high %v227_v50, %v243_v51 }
  0x6d   :  { %6467 = vmatpush1.bf16.msra.mxu1 %v8515_v3  ;;  %v978_v61 = vld [vmem:[#allocation3 + $0x1988] sm:$0xff] }
  0x6e   :  { %6468 = vmatprep.subr.bf16.mxu1 %v8484_v5  ;;  %v8772_v1 = vcombine.high %v962_v60, %v978_v61  ;;  %v418_v2 = vld [vmem:[#allocation3 + $0x808] sm:$0xff]  ;;  %v8771_v7 = vcombine.low %v962_v60, %v978_v61  ;;  %v195_v60 = vld [vmem:[#allocation3 + $0x110] sm:$0xff] }
  0x6f   :  { %6426 = vmatpush1.bf16.msra.mxu0 %v7971_v10  ;;  %v434_v3 = vld [vmem:[#allocation3 + $0x888] sm:$0xff]  ;;  %v387_v10 = vld [vmem:[#allocation3 + $0x710] sm:$0xff] }
  0x70   :  { %6427 = vmatprep.subr.bf16.mxu0 %v8452_v13  ;;  %v930_v4 = vld [vmem:[#allocation3 + $0x1808] sm:$0xff]  ;;  %v8228_v8 = vcombine.high %v418_v2, %v434_v3  ;;  %v899_v13 = vld [vmem:[#allocation3 + $0x1710] sm:$0xff]  ;;  %v8227_v16 = vcombine.low %v418_v2, %v434_v3 }
  0x71   :  { %6469 = vmatpush1.bf16.msra.mxu1 %v8483_v11  ;;  %v946_v5 = vld [vmem:[#allocation3 + $0x1888] sm:$0xff]  ;;  %v403_v11 = vld [vmem:[#allocation3 + $0x790] sm:$0xff] }
  0x72   :  { %6470 = vmatprep.subr.bf16.mxu1 %v8964_v14  ;;  %v8740_v9 = vcombine.high %v930_v4, %v946_v5  ;;  %v915_v14 = vld [vmem:[#allocation3 + $0x1790] sm:$0xff]  ;;  %v8739_v17 = vcombine.low %v930_v4, %v946_v5  ;;  %v8198_v18 = vcombine.high %v387_v10, %v403_v11  ;;  %v8197_v24 = vcombine.low %v387_v10, %v403_v11 }
  0x73   :  { %6428 = vmatpush2.bf16.msra.mxu0 %v8451_v20  ;;  %v8710_v19 = vcombine.high %v899_v13, %v915_v14  ;;  %v355_v20 = vld [vmem:[#allocation3 + $0x610] sm:$0xff]  ;;  %v8709_v25 = vcombine.low %v899_v13, %v915_v14 }
  0x74   :  { %6429 = vmatprep.subr.bf16.mxu0 %v8420_v22  ;;  %v867_v22 = vld [vmem:[#allocation3 + $0x1610] sm:$0xff] }
  0x75   :  { %6471 = vmatpush2.bf16.msra.mxu1 %v8963_v21  ;;  %v371_v21 = vld [vmem:[#allocation3 + $0x690] sm:$0xff] }
  0x76   :  { %6472 = vmatprep.subr.bf16.mxu1 %v8932_v23  ;;  %v883_v23 = vld [vmem:[#allocation3 + $0x1690] sm:$0xff]  ;;  %v8166_v26 = vcombine.high %v355_v20, %v371_v21  ;;  %v8165_v32 = vcombine.low %v355_v20, %v371_v21 }
  0x77   :  { %6430 = vmatpush2.bf16.msra.mxu0 %v8419_v28  ;;  %v8678_v27 = vcombine.high %v867_v22, %v883_v23  ;;  %v323_v28 = vld [vmem:[#allocation3 + $0x510] sm:$0xff]  ;;  %v8677_v33 = vcombine.low %v867_v22, %v883_v23 }
  0x78   :  { %6431 = vmatprep.subr.bf16.mxu0 %v8388_v30  ;;  %v835_v30 = vld [vmem:[#allocation3 + $0x1510] sm:$0xff] }
  0x79   :  { %6473 = vmatpush2.bf16.msra.mxu1 %v8931_v29  ;;  %v339_v29 = vld [vmem:[#allocation3 + $0x590] sm:$0xff] }
  0x7a   :  { %6474 = vmatprep.subr.bf16.mxu1 %v8900_v31  ;;  %v851_v31 = vld [vmem:[#allocation3 + $0x1590] sm:$0xff]  ;;  %v8134_v34 = vcombine.high %v323_v28, %v339_v29  ;;  %v8133_v40 = vcombine.low %v323_v28, %v339_v29 }
  0x7b   :  { %6432 = vmatpush2.bf16.msra.mxu0 %v8387_v36  ;;  %v8646_v35 = vcombine.high %v835_v30, %v851_v31  ;;  %v291_v36 = vld [vmem:[#allocation3 + $0x410] sm:$0xff]  ;;  %v8645_v41 = vcombine.low %v835_v30, %v851_v31 }
  0x7c   :  { %6433 = vmatprep.subr.bf16.mxu0 %v8356_v38  ;;  %v803_v38 = vld [vmem:[#allocation3 + $0x1410] sm:$0xff] }
  0x7d   :  { %6475 = vmatpush2.bf16.msra.mxu1 %v8899_v37  ;;  %v307_v37 = vld [vmem:[#allocation3 + $0x490] sm:$0xff] }
  0x7e   :  { %6476 = vmatprep.subr.bf16.mxu1 %v8868_v39  ;;  %v819_v39 = vld [vmem:[#allocation3 + $0x1490] sm:$0xff]  ;;  %v8102_v42 = vcombine.high %v291_v36, %v307_v37  ;;  %v8101_v48 = vcombine.low %v291_v36, %v307_v37 }
  0x7f   :  { %6434 = vmatpush2.bf16.msra.mxu0 %v8355_v44  ;;  %v8614_v43 = vcombine.high %v803_v38, %v819_v39  ;;  %v259_v44 = vld [vmem:[#allocation3 + $0x310] sm:$0xff] }
  0x80   :  { %6435 = vmatprep.subr.bf16.mxu0 %v8324_v46  ;;  %v771_v46 = vld [vmem:[#allocation3 + $0x1310] sm:$0xff] }
  0x81   :  { %6477 = vmatpush2.bf16.msra.mxu1 %v8867_v45  ;;  %v275_v45 = vld [vmem:[#allocation3 + $0x390] sm:$0xff] }
  0x82   :  { %6478 = vmatprep.subr.bf16.mxu1 %v8836_v47  ;;  %v787_v47 = vld [vmem:[#allocation3 + $0x1390] sm:$0xff]  ;;  %v8070_v49 = vcombine.high %v259_v44, %v275_v45 }
  0x83   :  { %6436 = vmatpush2.bf16.msra.mxu0 %v8323_v52  ;;  %v739_v52 = vld [vmem:[#allocation3 + $0x1210] sm:$0xff] }
  0x84   :  { %6437 = vmatprep.subr.bf16.mxu0 %v8292_v54  ;;  %v8069_v54 = vcombine.low %v259_v44, %v275_v45  ;;  %v211_v61 = vld [vmem:[#allocation3 + $0x190] sm:$0xff] }
  0x85   :  { %6479 = vmatpush2.bf16.msra.mxu1 %v8835_v53  ;;  %v755_v53 = vld [vmem:[#allocation3 + $0x1290] sm:$0xff]  ;;  %v8006_v2 = vcombine.high %v195_v60, %v211_v61 }
  0x86   :  { %6480 = vmatprep.subr.bf16.mxu1 %v8804_v55  ;;  %v8581_v55 = vcombine.low %v771_v46, %v787_v47  ;;  %v8550_v58 = vcombine.high %v739_v52, %v755_v53  ;;  %v163_v4 = vld [vmem:[#allocation3 + $0x10] sm:$0xff] }
  0x87   :  { %6438 = vmatpush2.bf16.msra.mxu0 %v8291_v62  ;;  %v707_v62 = vld [vmem:[#allocation3 + $0x1110] sm:$0xff] }
  0x88   :  { %6439 = vmatprep.subr.bf16.mxu0 %v8260_v0  ;;  %v8037_v0 = vcombine.low %v227_v50, %v243_v51  ;;  %v179_v5 = vld [vmem:[#allocation3 + $0x90] sm:$0xff] }
  0x89   :  { %6481 = vmatpush2.bf16.msra.mxu1 %v8803_v63  ;;  %v723_v63 = vld [vmem:[#allocation3 + $0x1190] sm:$0xff]  ;;  %v7974_v10 = vcombine.high %v163_v4, %v179_v5 }
  0x8a   :  { %6482 = vmatprep.subr.bf16.mxu1 %v8772_v1  ;;  %v8549_v1 = vcombine.low %v739_v52, %v755_v53  ;;  %v8518_v3 = vcombine.high %v707_v62, %v723_v63  ;;  %v643_v13 = vld [vmem:[#allocation3 + $0xf10] sm:$0xff] }
  0x8b   :  { %6440 = vmatpush2.bf16.msra.mxu0 %v8259_v6  ;;  %v675_v6 = vld [vmem:[#allocation3 + $0x1010] sm:$0xff] }
  0x8c   :  { %6441 = vmatprep.subr.bf16.mxu0 %v8228_v8  ;;  %v8005_v8 = vcombine.low %v195_v60, %v211_v61  ;;  %v659_v14 = vld [vmem:[#allocation3 + $0xf90] sm:$0xff] }
  0x8d   :  { %6483 = vmatpush2.bf16.msra.mxu1 %v8771_v7  ;;  %v691_v7 = vld [vmem:[#allocation3 + $0x1090] sm:$0xff]  ;;  %v8454_v20 = vcombine.high %v643_v13, %v659_v14 }
  0x8e   :  { %6484 = vmatprep.subr.bf16.mxu1 %v8740_v9  ;;  %v8517_v9 = vcombine.low %v707_v62, %v723_v63  ;;  %v8486_v11 = vcombine.high %v675_v6, %v691_v7  ;;  %v611_v22 = vld [vmem:[#allocation3 + $0xe10] sm:$0xff] }
  0x8f   :  { %6442 = vmatpush2.bf16.msra.mxu0 %v8227_v16  ;;  %v1155_v16 = vld [vmem:[#allocation3 + $0x1f10] sm:$0xff] }
  0x90   :  { %6497 = vmatprep.subr.bf16.mxu0 %v8198_v18  ;;  %v7973_v18 = vcombine.low %v163_v4, %v179_v5  ;;  %v627_v23 = vld [vmem:[#allocation3 + $0xe90] sm:$0xff] }
  0x91   :  { %6485 = vmatpush2.bf16.msra.mxu1 %v8739_v17  ;;  %v1171_v17 = vld [vmem:[#allocation3 + $0x1f90] sm:$0xff]  ;;  %v8422_v28 = vcombine.high %v611_v22, %v627_v23 }
  0x92   :  { %6540 = vmatprep.subr.bf16.mxu1 %v8710_v19  ;;  %6444 = vmatmul.mubr.bf16.vlgmr.msra.gmra.mxu0 %v9080_v12  ;;  %v8485_v19 = vcombine.low %v675_v6, %v691_v7  ;;  %v8966_v21 = vcombine.high %v1155_v16, %v1171_v17  ;;  %v579_v30 = vld [vmem:[#allocation3 + $0xd10] sm:$0xff] }
  0x93   :  { %6498 = vmatpush1.bf16.msra.mxu0 %v8197_v24  ;;  %6529 = vmatprep.mubr.bf16.mxu0 %v9068_v56  ;;  %v8613_v56 = vcombine.low %v803_v38, %v819_v39  ;;  %v1123_v24 = vld [vmem:[#allocation3 + $0x1e10] sm:$0xff] }
  0x94   :  { %6487 = vmatmul.mubr.bf16.vlgmr.msra.gmra.mxu1 %v9085_v15  ;;  %6499 = vmatprep.subr.bf16.mxu0 %v8166_v26  ;;  %v8453_v26 = vcombine.low %v643_v13, %v659_v14  ;;  %v595_v31 = vld [vmem:[#allocation3 + $0xd90] sm:$0xff] }
  0x95   :  { %6541 = vmatpush1.bf16.msra.mxu1 %v8709_v25  ;;  %6572 = vmatprep.mubr.bf16.mxu1 %v9073_v59  ;;  %v8582_v59 = vcombine.high %v771_v46, %v787_v47  ;;  %v1139_v25 = vld [vmem:[#allocation3 + $0x1e90] sm:$0xff]  ;;  %v8390_v36 = vcombine.high %v579_v30, %v595_v31 }
  0x96   :  { %6542 = vmatprep.subr.bf16.mxu1 %v8678_v27  ;;  %v8965_v27 = vcombine.low %v1155_v16, %v1171_v17  ;;  %v8934_v29 = vcombine.high %v1123_v24, %v1139_v25  ;;  %v547_v38 = vld [vmem:[#allocation3 + $0xc10] sm:$0xff]  ;;  %v388_v16 = vld [vmem:[#allocation3 + $0x718] sm:$0xff] }
  0x97   :  { %6500 = vmatpush1.bf16.msra.mxu0 %v8165_v32  ;;  %v1091_v32 = vld [vmem:[#allocation3 + $0x1d10] sm:$0xff]  ;;  %v404_v17 = vld [vmem:[#allocation3 + $0x798] sm:$0xff] }
  0x98   :  { %6501 = vmatprep.subr.bf16.mxu0 %v8134_v34  ;;  %v8421_v34 = vcombine.low %v611_v22, %v627_v23  ;;  %v563_v39 = vld [vmem:[#allocation3 + $0xc90] sm:$0xff]  ;;  %v8200_v22 = vcombine.high %v388_v16, %v404_v17 }
  0x99   :  { %6543 = vmatpush1.bf16.msra.mxu1 %v8677_v33  ;;  %v1107_v33 = vld [vmem:[#allocation3 + $0x1d90] sm:$0xff]  ;;  %v8358_v44 = vcombine.high %v547_v38, %v563_v39 }
  0x9a   :  { %6544 = vmatprep.subr.bf16.mxu1 %v8646_v35  ;;  %v8933_v35 = vcombine.low %v1123_v24, %v1139_v25  ;;  %v8902_v37 = vcombine.high %v1091_v32, %v1107_v33  ;;  %v515_v46 = vld [vmem:[#allocation3 + $0xb10] sm:$0xff]  ;;  %v356_v24 = vld [vmem:[#allocation3 + $0x618] sm:$0xff] }
  0x9b   :  { %6502 = vmatpush1.bf16.msra.mxu0 %v8133_v40  ;;  %v1059_v40 = vld [vmem:[#allocation3 + $0x1c10] sm:$0xff]  ;;  %v372_v25 = vld [vmem:[#allocation3 + $0x698] sm:$0xff] }
  0x9c   :  { %6503 = vmatprep.subr.bf16.mxu0 %v8102_v42  ;;  %v8389_v42 = vcombine.low %v579_v30, %v595_v31  ;;  %v531_v47 = vld [vmem:[#allocation3 + $0xb90] sm:$0xff]  ;;  %v8168_v30 = vcombine.high %v356_v24, %v372_v25 }
  0x9d   :  { %6545 = vmatpush1.bf16.msra.mxu1 %v8645_v41  ;;  %v1075_v41 = vld [vmem:[#allocation3 + $0x1c90] sm:$0xff]  ;;  %v8326_v50 = vcombine.high %v515_v46, %v531_v47 }
  0x9e   :  { %6546 = vmatprep.subr.bf16.mxu1 %v8614_v43  ;;  %v8901_v43 = vcombine.low %v1091_v32, %v1107_v33  ;;  %v8870_v45 = vcombine.high %v1059_v40, %v1075_v41  ;;  %v483_v52 = vld [vmem:[#allocation3 + $0xa10] sm:$0xff]  ;;  %v324_v32 = vld [vmem:[#allocation3 + $0x518] sm:$0xff] }
  0x9f   :  { %6504 = vmatpush1.bf16.msra.mxu0 %v8101_v48  ;;  %v1027_v48 = vld [vmem:[#allocation3 + $0x1b10] sm:$0xff]  ;;  %v340_v33 = vld [vmem:[#allocation3 + $0x598] sm:$0xff] }
  0xa0   :  { %6505 = vmatprep.subr.bf16.mxu0 %v8070_v49  ;;  %v8357_v49 = vcombine.low %v547_v38, %v563_v39  ;;  %v499_v53 = vld [vmem:[#allocation3 + $0xa90] sm:$0xff]  ;;  %v8136_v38 = vcombine.high %v324_v32, %v340_v33 }
  0xa1   :  { %6547 = vmatpush1.bf16.msra.mxu1 %v8613_v56  ;;  %v1043_v56 = vld [vmem:[#allocation3 + $0x1b90] sm:$0xff]  ;;  %v8294_v60 = vcombine.high %v483_v52, %v499_v53 }
  0xa2   :  { %6548 = vmatprep.subr.bf16.mxu1 %v8582_v59  ;;  %v8869_v59 = vcombine.low %v1059_v40, %v1075_v41  ;;  %v8838_v51 = vcombine.high %v1027_v48, %v1043_v56  ;;  %v451_v62 = vld [vmem:[#allocation3 + $0x910] sm:$0xff]  ;;  %v292_v40 = vld [vmem:[#allocation3 + $0x418] sm:$0xff] }
  0xa3   :  { %6506 = vmatpush1.bf16.msra.mxu0 %v8069_v54  ;;  %v995_v54 = vld [vmem:[#allocation3 + $0x1a10] sm:$0xff]  ;;  %v308_v41 = vld [vmem:[#allocation3 + $0x498] sm:$0xff] }
  0xa4   :  { %6507 = vmatprep.subr.bf16.mxu0 %v8038_v57  ;;  %v8325_v57 = vcombine.low %v515_v46, %v531_v47  ;;  %v467_v63 = vld [vmem:[#allocation3 + $0x990] sm:$0xff]  ;;  %v8104_v46 = vcombine.high %v292_v40, %v308_v41 }
  0xa5   :  { %6549 = vmatpush1.bf16.msra.mxu1 %v8581_v55  ;;  %v1011_v55 = vld [vmem:[#allocation3 + $0x1a90] sm:$0xff]  ;;  %v8262_v4 = vcombine.high %v451_v62, %v467_v63 }
  0xa6   :  { %6550 = vmatprep.subr.bf16.mxu1 %v8550_v58  ;;  %v8837_v58 = vcombine.low %v1027_v48, %v1043_v56  ;;  %v8806_v61 = vcombine.high %v995_v54, %v1011_v55  ;;  %v419_v6 = vld [vmem:[#allocation3 + $0x810] sm:$0xff]  ;;  %v260_v48 = vld [vmem:[#allocation3 + $0x318] sm:$0xff] }
  0xa7   :  { %6508 = vmatpush1.bf16.msra.mxu0 %v8037_v0  ;;  %v963_v0 = vld [vmem:[#allocation3 + $0x1910] sm:$0xff]  ;;  %v276_v56 = vld [vmem:[#allocation3 + $0x398] sm:$0xff] }
  0xa8   :  { %6509 = vmatprep.subr.bf16.mxu0 %v8006_v2  ;;  %v8293_v2 = vcombine.low %v483_v52, %v499_v53  ;;  %v435_v7 = vld [vmem:[#allocation3 + $0x890] sm:$0xff]  ;;  %v8072_v52 = vcombine.high %v260_v48, %v276_v56 }
  0xa9   :  { %6551 = vmatpush1.bf16.msra.mxu1 %v8549_v1  ;;  %v979_v1 = vld [vmem:[#allocation3 + $0x1990] sm:$0xff]  ;;  %v8230_v13 = vcombine.high %v419_v6, %v435_v7 }
  0xaa   :  { %6552 = vmatprep.subr.bf16.mxu1 %v8518_v3  ;;  %v8805_v3 = vcombine.low %v995_v54, %v1011_v55  ;;  %v8774_v5 = vcombine.high %v963_v0, %v979_v1  ;;  %v228_v54 = vld [vmem:[#allocation3 + $0x218] sm:$0xff] }
  0xab   :  { %6510 = vmatpush1.bf16.msra.mxu0 %v8005_v8  ;;  %v931_v8 = vld [vmem:[#allocation3 + $0x1810] sm:$0xff]  ;;  %v244_v55 = vld [vmem:[#allocation3 + $0x298] sm:$0xff] }
  0xac   :  { %6511 = vmatprep.subr.bf16.mxu0 %v7974_v10  ;;  %v8261_v10 = vcombine.low %v451_v62, %v467_v63  ;;  %v8040_v62 = vcombine.high %v228_v54, %v244_v55 }
  0xad   :  { %6553 = vmatpush1.bf16.msra.mxu1 %v8517_v9  ;;  %v947_v9 = vld [vmem:[#allocation3 + $0x1890] sm:$0xff] }
  0xae   :  { %6554 = vmatprep.subr.bf16.mxu1 %v8486_v11  ;;  %v8773_v11 = vcombine.low %v963_v0, %v979_v1  ;;  %v8742_v14 = vcombine.high %v931_v8, %v947_v9  ;;  %v196_v0 = vld [vmem:[#allocation3 + $0x118] sm:$0xff] }
  0xaf   :  { %6512 = vmatpush1.bf16.msra.mxu0 %v7973_v18  ;;  %v900_v18 = vld [vmem:[#allocation3 + $0x1718] sm:$0xff] }
  0xb0   :  { %6513 = vmatprep.subr.bf16.mxu0 %v8454_v20  ;;  %v8229_v20 = vcombine.low %v419_v6, %v435_v7  ;;  %v212_v1 = vld [vmem:[#allocation3 + $0x198] sm:$0xff] }
  0xb1   :  { %6555 = vmatpush1.bf16.msra.mxu1 %v8485_v19  ;;  %v916_v19 = vld [vmem:[#allocation3 + $0x1798] sm:$0xff]  ;;  %v8008_v6 = vcombine.high %v196_v0, %v212_v1 }
  0xb2   :  { %6556 = vmatprep.subr.bf16.mxu1 %v8966_v21  ;;  %v8741_v21 = vcombine.low %v931_v8, %v947_v9  ;;  %v8712_v23 = vcombine.high %v900_v18, %v916_v19  ;;  %v164_v8 = vld [vmem:[#allocation3 + $0x18] sm:$0xff] }
  0xb3   :  { %6514 = vmatpush2.bf16.msra.mxu0 %v8453_v26  ;;  %v868_v26 = vld [vmem:[#allocation3 + $0x1618] sm:$0xff] }
  0xb4   :  { %6515 = vmatprep.subr.bf16.mxu0 %v8422_v28  ;;  %v8199_v28 = vcombine.low %v388_v16, %v404_v17  ;;  %v180_v9 = vld [vmem:[#allocation3 + $0x98] sm:$0xff] }
  0xb5   :  { %6557 = vmatpush2.bf16.msra.mxu1 %v8965_v27  ;;  %v884_v27 = vld [vmem:[#allocation3 + $0x1698] sm:$0xff]  ;;  %v7976_v16 = vcombine.high %v164_v8, %v180_v9 }
  0xb6   :  { %6558 = vmatprep.subr.bf16.mxu1 %v8934_v29  ;;  %v8711_v29 = vcombine.low %v900_v18, %v916_v19  ;;  %v8680_v31 = vcombine.high %v868_v26, %v884_v27  ;;  %v644_v18 = vld [vmem:[#allocation3 + $0xf18] sm:$0xff] }
  0xb7   :  { %6516 = vmatpush2.bf16.msra.mxu0 %v8421_v34  ;;  %v836_v34 = vld [vmem:[#allocation3 + $0x1518] sm:$0xff] }
  0xb8   :  { %6517 = vmatprep.subr.bf16.mxu0 %v8390_v36  ;;  %v8167_v36 = vcombine.low %v356_v24, %v372_v25  ;;  %v660_v19 = vld [vmem:[#allocation3 + $0xf98] sm:$0xff] }
  0xb9   :  { %6559 = vmatpush2.bf16.msra.mxu1 %v8933_v35  ;;  %v852_v35 = vld [vmem:[#allocation3 + $0x1598] sm:$0xff]  ;;  %v8456_v24 = vcombine.high %v644_v18, %v660_v19 }
  0xba   :  { %6560 = vmatprep.subr.bf16.mxu1 %v8902_v37  ;;  %v8679_v37 = vcombine.low %v868_v26, %v884_v27  ;;  %v8648_v39 = vcombine.high %v836_v34, %v852_v35  ;;  %v612_v26 = vld [vmem:[#allocation3 + $0xe18] sm:$0xff] }
  0xbb   :  { %6518 = vmatpush2.bf16.msra.mxu0 %v8389_v42  ;;  %v9100_v42 = vld [vmem:[%s9429_s0 + $0x4] ss:$16 sps:$4 sm:$0xff]   ;;  %v628_v27 = vld [vmem:[#allocation3 + $0xe98] sm:$0xff] }
  0xbc   :  { %6519 = vmatprep.subr.bf16.mxu0 %v8358_v44  ;;  %v8135_v44 = vcombine.low %v324_v32, %v340_v33  ;;  %v8424_v32 = vcombine.high %v612_v26, %v628_v27 }
  0xbd   :  { %6561 = vmatpush2.bf16.msra.mxu1 %v8901_v43  ;;  %v820_v43 = vld [vmem:[#allocation3 + $0x1498] sm:$0xff] }
  0xbe   :  { %6562 = vmatprep.subr.bf16.mxu1 %v8870_v45  ;;  %v8647_v45 = vcombine.low %v836_v34, %v852_v35  ;;  %v580_v34 = vld [vmem:[#allocation3 + $0xd18] sm:$0xff] }
  0xbf   :  { %6520 = vmatpush2.bf16.msra.mxu0 %v8357_v49  ;;  %v772_v49 = vld [vmem:[#allocation3 + $0x1318] sm:$0xff] }
  0xc0   :  { %6521 = vmatprep.subr.bf16.mxu0 %v8326_v50  ;;  %v8103_v50 = vcombine.low %v292_v40, %v308_v41  ;;  %v596_v35 = vld [vmem:[#allocation3 + $0xd98] sm:$0xff] }
  0xc1   :  { %6563 = vmatpush2.bf16.msra.mxu1 %v8869_v59  ;;  %v788_v59 = vld [vmem:[#allocation3 + $0x1398] sm:$0xff]  ;;  %v8392_v40 = vcombine.high %v580_v34, %v596_v35 }
  0xc2   :  { %6564 = vmatprep.subr.bf16.mxu1 %v8838_v51  ;;  %v8584_v53 = vcombine.high %v772_v49, %v788_v59 }
  0xc3   :  { %6522 = vmatpush2.bf16.msra.mxu0 %v8325_v57  ;;  %v740_v57 = vld [vmem:[#allocation3 + $0x1218] sm:$0xff] }
  0xc4   :  { %6523 = vmatprep.subr.bf16.mxu0 %v8294_v60  ;;  %v8071_v60 = vcombine.low %v260_v48, %v276_v56 }
  0xc5   :  { %6565 = vmatpush2.bf16.msra.mxu1 %v8837_v58  ;;  %v756_v58 = vld [vmem:[#allocation3 + $0x1298] sm:$0xff] }
  0xc6   :  { %6566 = vmatprep.subr.bf16.mxu1 %v8806_v61  ;;  %v8583_v61 = vcombine.low %v772_v49, %v788_v59  ;;  %v8552_v63 = vcombine.high %v740_v57, %v756_v58  ;;  %v516_v49 = vld [vmem:[#allocation3 + $0xb18] sm:$0xff] }
  0xc7   :  { %6524 = vmatpush2.bf16.msra.mxu0 %v8293_v2  ;;  %v708_v2 = vld [vmem:[#allocation3 + $0x1118] sm:$0xff] }
  0xc8   :  { %6525 = vmatprep.subr.bf16.mxu0 %v8262_v4  ;;  %v8039_v4 = vcombine.low %v228_v54, %v244_v55  ;;  %v532_v59 = vld [vmem:[#allocation3 + $0xb98] sm:$0xff] }
  0xc9   :  { %6567 = vmatpush2.bf16.msra.mxu1 %v8805_v3  ;;  %v724_v3 = vld [vmem:[#allocation3 + $0x1198] sm:$0xff]  ;;  %v8328_v54 = vcombine.high %v516_v49, %v532_v59 }
  0xca   :  { %6568 = vmatprep.subr.bf16.mxu1 %v8774_v5  ;;  %v8551_v5 = vcombine.low %v740_v57, %v756_v58  ;;  %v8520_v7 = vcombine.high %v708_v2, %v724_v3  ;;  %v484_v57 = vld [vmem:[#allocation3 + $0xa18] sm:$0xff] }
  0xcb   :  { %6526 = vmatpush2.bf16.msra.mxu0 %v8261_v10  ;;  %v676_v10 = vld [vmem:[#allocation3 + $0x1018] sm:$0xff] }
  0xcc   :  { %6527 = vmatprep.subr.bf16.mxu0 %v8230_v13  ;;  %v8007_v13 = vcombine.low %v196_v0, %v212_v1  ;;  %v500_v58 = vld [vmem:[#allocation3 + $0xa98] sm:$0xff] }
  0xcd   :  { %6569 = vmatpush2.bf16.msra.mxu1 %v8773_v11  ;;  %v692_v11 = vld [vmem:[#allocation3 + $0x1098] sm:$0xff]  ;;  %v8296_v0 = vcombine.high %v484_v57, %v500_v58 }
  0xce   :  { %6570 = vmatprep.subr.bf16.mxu1 %v8742_v14  ;;  %v8519_v14 = vcombine.low %v708_v2, %v724_v3  ;;  %v8488_v17 = vcombine.high %v676_v10, %v692_v11  ;;  %v452_v2 = vld [vmem:[#allocation3 + $0x918] sm:$0xff] }
  0xcf   :  { %6528 = vmatpush2.bf16.msra.mxu0 %v8229_v20  ;;  %v1156_v20 = vld [vmem:[#allocation3 + $0x1f18] sm:$0xff] }
  0xd0   :  { %6583 = vmatprep.subr.bf16.mxu0 %v8200_v22  ;;  %v7975_v22 = vcombine.low %v164_v8, %v180_v9  ;;  %v468_v3 = vld [vmem:[#allocation3 + $0x998] sm:$0xff] }
  0xd1   :  { %6571 = vmatpush2.bf16.msra.mxu1 %v8741_v21  ;;  %v1172_v21 = vld [vmem:[#allocation3 + $0x1f98] sm:$0xff]  ;;  %v8264_v8 = vcombine.high %v452_v2, %v468_v3 }
  0xd2   :  { %6626 = vmatprep.subr.bf16.mxu1 %v8712_v23  ;;  %6530 = vmatmul.mubr.bf16.vlgmr.msra.gmra.mxu0 %v9080_v12  ;;  %v804_v12 = vld [vmem:[#allocation3 + $0x1418] sm:$0xff]  ;;  %v8487_v23 = vcombine.low %v676_v10, %v692_v11  ;;  %v8968_v25 = vcombine.high %v1156_v20, %v1172_v21 }
  0xd3   :  { %6584 = vmatpush1.bf16.msra.mxu0 %v8199_v28  ;;  %6615 = vmatprep.mubr.bf16.mxu0 %v9100_v42  ;;  %v8616_v47 = vcombine.high %v804_v12, %v820_v43  ;;  %v8615_v51 = vcombine.low %v804_v12, %v820_v43  ;;  %v1124_v28 = vld [vmem:[#allocation3 + $0x1e18] sm:$0xff] }
  0xd4   :  { %6573 = vmatmul.mubr.bf16.vlgmr.msra.gmra.mxu1 %v9085_v15  ;;  %6585 = vmatprep.subr.bf16.mxu0 %v8168_v30  ;;  %v9106_v15 = vld [vmem:[%s9429_s0 + $0xc] ss:$16 sps:$4 sm:$0xff]   ;;  %v8455_v30 = vcombine.low %v644_v18, %v660_v19 }
  0xd5   :  { %6627 = vmatpush1.bf16.msra.mxu1 %v8711_v29  ;;  %6658 = vmatprep.mubr.bf16.mxu1 %v9106_v15  ;;  %v1140_v29 = vld [vmem:[#allocation3 + $0x1e98] sm:$0xff] }
  0xd6   :  { %6628 = vmatprep.subr.bf16.mxu1 %v8680_v31  ;;  %v8967_v31 = vcombine.low %v1156_v20, %v1172_v21  ;;  %v8936_v33 = vcombine.high %v1124_v28, %v1140_v29  ;;  %v548_v12 = vld [vmem:[#allocation3 + $0xc18] sm:$0xff]  ;;  %v389_v20 = vld [vmem:[#allocation3 + $0x720] sm:$0xff] }
  0xd7   :  { %6586 = vmatpush1.bf16.msra.mxu0 %v8167_v36  ;;  %v1092_v36 = vld [vmem:[#allocation3 + $0x1d18] sm:$0xff]  ;;  %v405_v21 = vld [vmem:[#allocation3 + $0x7a0] sm:$0xff] }
  0xd8   :  { %6587 = vmatprep.subr.bf16.mxu0 %v8136_v38  ;;  %v8423_v38 = vcombine.low %v612_v26, %v628_v27  ;;  %v564_v43 = vld [vmem:[#allocation3 + $0xc98] sm:$0xff]  ;;  %v8202_v26 = vcombine.high %v389_v20, %v405_v21 }
  0xd9   :  { %6629 = vmatpush1.bf16.msra.mxu1 %v8679_v37  ;;  %v1108_v37 = vld [vmem:[#allocation3 + $0x1d98] sm:$0xff]  ;;  %v8360_v48 = vcombine.high %v548_v12, %v564_v43 }
  0xda   :  { %6630 = vmatprep.subr.bf16.mxu1 %v8648_v39  ;;  %v8935_v39 = vcombine.low %v1124_v28, %v1140_v29  ;;  %v8904_v41 = vcombine.high %v1092_v36, %v1108_v37  ;;  %v420_v10 = vld [vmem:[#allocation3 + $0x818] sm:$0xff]  ;;  %v357_v28 = vld [vmem:[#allocation3 + $0x620] sm:$0xff] }
  0xdb   :  { %6588 = vmatpush1.bf16.msra.mxu0 %v8135_v44  ;;  %v1060_v44 = vld [vmem:[#allocation3 + $0x1c18] sm:$0xff]  ;;  %v373_v29 = vld [vmem:[#allocation3 + $0x6a0] sm:$0xff] }
  0xdc   :  { %6589 = vmatprep.subr.bf16.mxu0 %v8104_v46  ;;  %v8391_v46 = vcombine.low %v580_v34, %v596_v35  ;;  %v436_v11 = vld [vmem:[#allocation3 + $0x898] sm:$0xff]  ;;  %v8170_v34 = vcombine.high %v357_v28, %v373_v29 }
  0xdd   :  { %6631 = vmatpush1.bf16.msra.mxu1 %v8647_v45  ;;  %v1076_v45 = vld [vmem:[#allocation3 + $0x1c98] sm:$0xff]  ;;  %v8232_v18 = vcombine.high %v420_v10, %v436_v11 }
  0xde   :  { %6632 = vmatprep.subr.bf16.mxu1 %v8616_v47  ;;  %v8903_v47 = vcombine.low %v1092_v36, %v1108_v37  ;;  %v8872_v56 = vcombine.high %v1060_v44, %v1076_v45  ;;  %v325_v36 = vld [vmem:[#allocation3 + $0x520] sm:$0xff] }
  0xdf   :  { %6590 = vmatpush1.bf16.msra.mxu0 %v8103_v50  ;;  %v1028_v50 = vld [vmem:[#allocation3 + $0x1b18] sm:$0xff]  ;;  %v341_v37 = vld [vmem:[#allocation3 + $0x5a0] sm:$0xff] }
  0xe0   :  { %6591 = vmatprep.subr.bf16.mxu0 %v8072_v52  ;;  %v8359_v52 = vcombine.low %v548_v12, %v564_v43  ;;  %v9118_v43 = vld [vmem:[%s9429_s0 + $0x8] ss:$16 sps:$4 sm:$0xff]  }
  0xe1   :  { %6633 = vmatpush1.bf16.msra.mxu1 %v8615_v51  ;;  %v1044_v51 = vld [vmem:[#allocation3 + $0x1b98] sm:$0xff] }
  0xe2   :  { %6634 = vmatprep.subr.bf16.mxu1 %v8584_v53  ;;  %v8871_v53 = vcombine.low %v1060_v44, %v1076_v45  ;;  %v8840_v55 = vcombine.high %v1028_v50, %v1044_v51  ;;  %v8169_v44 = vcombine.low %v357_v28, %v373_v29  ;;  %v165_v28 = vld [vmem:[#allocation3 + $0x20] sm:$0xff] }
  0xe3   :  { %6592 = vmatpush1.bf16.msra.mxu0 %v8071_v60  ;;  %v996_v60 = vld [vmem:[#allocation3 + $0x1a18] sm:$0xff]  ;;  %v181_v29 = vld [vmem:[#allocation3 + $0xa0] sm:$0xff] }
  0xe4   :  { %6593 = vmatprep.subr.bf16.mxu0 %v8040_v62  ;;  %v8327_v62 = vcombine.low %v516_v49, %v532_v59  ;;  %v293_v59 = vld [vmem:[#allocation3 + $0x420] sm:$0xff] }
  0xe5   :  { %6635 = vmatpush1.bf16.msra.mxu1 %v8583_v61  ;;  %v1012_v61 = vld [vmem:[#allocation3 + $0x1a98] sm:$0xff] }
  0xe6   :  { %6636 = vmatprep.subr.bf16.mxu1 %v8552_v63  ;;  %v8839_v63 = vcombine.low %v1028_v50, %v1044_v51  ;;  %v8808_v1 = vcombine.high %v996_v60, %v1012_v61  ;;  %v309_v50 = vld [vmem:[#allocation3 + $0x4a0] sm:$0xff] }
  0xe7   :  { %6594 = vmatpush1.bf16.msra.mxu0 %v8039_v4  ;;  %v964_v4 = vld [vmem:[#allocation3 + $0x1918] sm:$0xff] }
  0xe8   :  { %6595 = vmatprep.subr.bf16.mxu0 %v8008_v6  ;;  %v8295_v6 = vcombine.low %v484_v57, %v500_v58  ;;  %v8137_v57 = vcombine.low %v325_v36, %v341_v37 }
  0xe9   :  { %6637 = vmatpush1.bf16.msra.mxu1 %v8551_v5  ;;  %v980_v5 = vld [vmem:[#allocation3 + $0x1998] sm:$0xff] }
  0xea   :  { %6638 = vmatprep.subr.bf16.mxu1 %v8520_v7  ;;  %v8807_v7 = vcombine.low %v996_v60, %v1012_v61  ;;  %v8776_v9 = vcombine.high %v964_v4, %v980_v5 }
  0xeb   :  { %6596 = vmatpush1.bf16.msra.mxu0 %v8007_v13  ;;  %v932_v13 = vld [vmem:[#allocation3 + $0x1818] sm:$0xff] }
  0xec   :  { %6597 = vmatprep.subr.bf16.mxu0 %v7976_v16  ;;  %v8263_v16 = vcombine.low %v452_v2, %v468_v3  ;;  %v277_v2 = vld [vmem:[#allocation3 + $0x3a0] sm:$0xff] }
  0xed   :  { %6639 = vmatpush1.bf16.msra.mxu1 %v8519_v14  ;;  %v948_v14 = vld [vmem:[#allocation3 + $0x1898] sm:$0xff] }
  0xee   :  { %6640 = vmatprep.subr.bf16.mxu1 %v8488_v17  ;;  %v8775_v17 = vcombine.low %v964_v4, %v980_v5  ;;  %v8744_v19 = vcombine.high %v932_v13, %v948_v14  ;;  %v773_v4 = vld [vmem:[#allocation3 + $0x1320] sm:$0xff] }
  0xef   :  { %6598 = vmatpush1.bf16.msra.mxu0 %v7975_v22  ;;  %v901_v22 = vld [vmem:[#allocation3 + $0x1720] sm:$0xff] }
  0xf0   :  { %6599 = vmatprep.subr.bf16.mxu0 %v8456_v24  ;;  %v8231_v24 = vcombine.low %v420_v10, %v436_v11  ;;  %v789_v5 = vld [vmem:[#allocation3 + $0x13a0] sm:$0xff] }
  0xf1   :  { %6641 = vmatpush1.bf16.msra.mxu1 %v8487_v23  ;;  %v917_v23 = vld [vmem:[#allocation3 + $0x17a0] sm:$0xff] }
  0xf2   :  { %6642 = vmatprep.subr.bf16.mxu1 %v8968_v25  ;;  %v8743_v25 = vcombine.low %v932_v13, %v948_v14  ;;  %v8714_v27 = vcombine.high %v901_v22, %v917_v23  ;;  %v229_v10 = vld [vmem:[#allocation3 + $0x220] sm:$0xff] }
  0xf3   :  { %6600 = vmatpush2.bf16.msra.mxu0 %v8455_v30  ;;  %v869_v30 = vld [vmem:[#allocation3 + $0x1620] sm:$0xff] }
  0xf4   :  { %6601 = vmatprep.subr.bf16.mxu0 %v8424_v32  ;;  %v8201_v32 = vcombine.low %v389_v20, %v405_v21  ;;  %v245_v11 = vld [vmem:[#allocation3 + $0x2a0] sm:$0xff] }
  0xf5   :  { %6643 = vmatpush2.bf16.msra.mxu1 %v8967_v31  ;;  %v885_v31 = vld [vmem:[#allocation3 + $0x16a0] sm:$0xff] }
  0xf6   :  { %6644 = vmatprep.subr.bf16.mxu1 %v8936_v33  ;;  %v8713_v33 = vcombine.low %v901_v22, %v917_v23  ;;  %v8682_v35 = vcombine.high %v869_v30, %v885_v31  ;;  %v741_v13 = vld [vmem:[#allocation3 + $0x1220] sm:$0xff] }
  0xf7   :  { %6602 = vmatpush2.bf16.msra.mxu0 %v8423_v38  ;;  %v757_v14 = vld [vmem:[#allocation3 + $0x12a0] sm:$0xff] }
  0xf8   :  { %6603 = vmatprep.subr.bf16.mxu0 %v8392_v40  ;;  %v837_v40 = vld [vmem:[#allocation3 + $0x1520] sm:$0xff] }
  0xf9   :  { %6645 = vmatpush2.bf16.msra.mxu1 %v8935_v39  ;;  %v9112_v39 = vld [vmem:[%s9429_s0] ss:$16 sps:$4 sm:$0xff]  }
  0xfa   :  { %6646 = vmatprep.subr.bf16.mxu1 %v8904_v41  ;;  %v853_v41 = vld [vmem:[#allocation3 + $0x15a0] sm:$0xff] }
  0xfb   :  { %6604 = vmatpush2.bf16.msra.mxu0 %v8391_v46  ;;  %v8650_v49 = vcombine.high %v837_v40, %v853_v41  ;;  %v8649_v61 = vcombine.low %v837_v40, %v853_v41  ;;  %v197_v20 = vld [vmem:[#allocation3 + $0x120] sm:$0xff]  ;;  %v7977_v41 = vcombine.low %v165_v28, %v181_v29 }
  0xfc   :  { %6605 = vmatprep.subr.bf16.mxu0 %v8360_v48  ;;  %v8138_v48 = vcombine.high %v325_v36, %v341_v37  ;;  %v213_v21 = vld [vmem:[#allocation3 + $0x1a0] sm:$0xff] }
  0xfd   :  { %6647 = vmatpush2.bf16.msra.mxu1 %v8903_v47  ;;  %v8681_v47 = vcombine.low %v869_v30, %v885_v31  ;;  %v709_v22 = vld [vmem:[#allocation3 + $0x1120] sm:$0xff] }
  0xfe   :  { %6648 = vmatprep.subr.bf16.mxu1 %v8872_v56  ;;  %v725_v23 = vld [vmem:[#allocation3 + $0x11a0] sm:$0xff] }
  0xff   :  { %6606 = vmatpush2.bf16.msra.mxu0 %v8359_v52  ;;  %v677_v30 = vld [vmem:[#allocation3 + $0x1020] sm:$0xff] }
 0x100   :  { %6607 = vmatprep.subr.bf16.mxu0 %v8328_v54  ;;  %v821_v54 = vld [vmem:[#allocation3 + $0x14a0] sm:$0xff] }
 0x101   :  { %6649 = vmatpush2.bf16.msra.mxu1 %v8871_v53  ;;  %v805_v53 = vld [vmem:[#allocation3 + $0x1420] sm:$0xff] }
 0x102   :  { %6650 = vmatprep.subr.bf16.mxu1 %v8840_v55  ;;  %v693_v31 = vld [vmem:[#allocation3 + $0x10a0] sm:$0xff] }
 0x103   :  { %6608 = vmatpush2.bf16.msra.mxu0 %v8327_v62  ;;  %v8106_v62 = vcombine.high %v293_v59, %v309_v50  ;;  %v645_v36 = vld [vmem:[#allocation3 + $0xf20] sm:$0xff] }
 0x104   :  { %6609 = vmatprep.subr.bf16.mxu0 %v8296_v0  ;;  %v8618_v0 = vcombine.high %v805_v53, %v821_v54  ;;  %v661_v37 = vld [vmem:[#allocation3 + $0xfa0] sm:$0xff] }
 0x105   :  { %6651 = vmatpush2.bf16.msra.mxu1 %v8839_v63  ;;  %v1173_v40 = vld [vmem:[#allocation3 + $0x1fa0] sm:$0xff] }
 0x106   :  { %6652 = vmatprep.subr.bf16.mxu1 %v8808_v1  ;;  %v261_v1 = vld [vmem:[#allocation3 + $0x320] sm:$0xff] }
 0x107   :  { %6610 = vmatpush2.bf16.msra.mxu0 %v8295_v6  ;;  %v8105_v6 = vcombine.low %v293_v59, %v309_v50 }
 0x108   :  { %6611 = vmatprep.subr.bf16.mxu0 %v8264_v8  ;;  %v8074_v8 = vcombine.high %v261_v1, %v277_v2 }
 0x109   :  { %6653 = vmatpush2.bf16.msra.mxu1 %v8807_v7  ;;  %v8617_v7 = vcombine.low %v805_v53, %v821_v54  ;;  %v597_v53 = vld [vmem:[#allocation3 + $0xda0] sm:$0xff] }
 0x10a   :  { %6654 = vmatprep.subr.bf16.mxu1 %v8776_v9  ;;  %v8586_v9 = vcombine.high %v773_v4, %v789_v5  ;;  %v1093_v54 = vld [vmem:[#allocation3 + $0x1d20] sm:$0xff] }
 0x10b   :  { %6612 = vmatpush2.bf16.msra.mxu0 %v8263_v16  ;;  %v8073_v16 = vcombine.low %v261_v1, %v277_v2  ;;  %v1077_v1 = vld [vmem:[#allocation3 + $0x1ca0] sm:$0xff] }
 0x10c   :  { %6613 = vmatprep.subr.bf16.mxu0 %v8232_v18  ;;  %v8042_v18 = vcombine.high %v229_v10, %v245_v11 }
 0x10d   :  { %6655 = vmatpush2.bf16.msra.mxu1 %v8775_v17  ;;  %v8585_v17 = vcombine.low %v773_v4, %v789_v5 }
 0x10e   :  { %6656 = vmatprep.subr.bf16.mxu1 %v8744_v19  ;;  %v8554_v19 = vcombine.high %v741_v13, %v757_v14 }
 0x10f   :  { %6614 = vmatpush2.bf16.msra.mxu0 %v8231_v24  ;;  %v8041_v24 = vcombine.low %v229_v10, %v245_v11 }
 0x110   :  { %6669 = vmatprep.subr.bf16.mxu0 %v8202_v26  ;;  %v8010_v26 = vcombine.high %v197_v20, %v213_v21 }
 0x111   :  { %6657 = vmatpush2.bf16.msra.mxu1 %v8743_v25  ;;  %v8553_v25 = vcombine.low %v741_v13, %v757_v14 }
 0x112   :  { %6712 = vmatprep.subr.bf16.mxu1 %v8714_v27  ;;  %v6359_v38 = vpop.f32.mrf.mxu0  ;;  %6616 = vmatmul.mubr.bf16.vlgmr.msra.gmra.mxu0 %v9112_v39  ;;  %v8522_v27 = vcombine.high %v709_v22, %v725_v23 }
 0x113   :  { %6670 = vmatpush1.bf16.msra.mxu0 %v8201_v32  ;;  %6701 = vmatprep.mubr.bf16.mxu0 %v9100_v42  ;;  %v8009_v32 = vcombine.low %v197_v20, %v213_v21 }
 0x114   :  { %v6402_v12 = vpop.f32.mrf.mxu1  ;;  %6659 = vmatmul.mubr.bf16.vlgmr.msra.gmra.mxu1 %v9118_v43  ;;  %v6361_v46 = vpop.f32.mrf.mxu0  ;;  %6671 = vmatprep.subr.bf16.mxu0 %v8170_v34  ;;  %v7978_v34 = vcombine.high %v165_v28, %v181_v29 }
 0x115   :  { %v6403_v45 = vadd.f32 %v6402_v12, %v6359_v38  ;;  %6713 = vmatpush1.bf16.msra.mxu1 %v8713_v33  ;;  %6744 = vmatprep.mubr.bf16.mxu1 %v9106_v15  ;;  %v8521_v33 = vcombine.low %v709_v22, %v725_v23  ;;  %v1157_v38 = vld [vmem:[#allocation3 + $0x1f20] sm:$0xff]  ;;  %v8489_v12 = vcombine.low %v677_v30, %v693_v31 }
 0x116   :  { %v6404_v56 = vpop.f32.mrf.mxu1  ;;  %6714 = vmatprep.subr.bf16.mxu1 %v8682_v35  ;;  %v6363_v52 = vpop.f32.mrf.mxu0  ;;  %v8490_v35 = vcombine.high %v677_v30, %v693_v31  ;;  %v8969_v59 = vcombine.low %v1157_v38, %v1173_v40 }
 0x117   :  { %7896 = vst [vmem:[%s9431_s2] sm:$0xff] %v6403_v45  ;;  %v6405_v51 = vadd.f32 %v6404_v56, %v6361_v46  ;;  %6672 = vmatpush1.bf16.msra.mxu0 %v8169_v44  ;;  %v8458_v44 = vcombine.high %v645_v36, %v661_v37  ;;  %v8970_v45 = vcombine.high %v1157_v38, %v1173_v40  ;;  %v613_v46 = vld [vmem:[#allocation3 + $0xe20] sm:$0xff] }
 0x118   :  { %v6406_v55 = vpop.f32.mrf.mxu1  ;;  %v6365_v60 = vpop.f32.mrf.mxu0  ;;  %6673 = vmatprep.subr.bf16.mxu0 %v8138_v48  ;;  %v1125_v48 = vld [vmem:[#allocation3 + $0x1e20] sm:$0xff] }
 0x119   :  { %7897 = vst [vmem:[%s9431_s2 + $0x8] sm:$0xff] %v6405_v51  ;;  %v6407_v58 = vadd.f32 %v6406_v55, %v6363_v52  ;;  %6715 = vmatpush1.bf16.msra.mxu1 %v8681_v47  ;;  %v629_v47 = vld [vmem:[#allocation3 + $0xea0] sm:$0xff] }
 0x11a   :  { %v6408_v63 = vpop.f32.mrf.mxu1  ;;  %6716 = vmatprep.subr.bf16.mxu1 %v8650_v49  ;;  %v1141_v56 = vld [vmem:[#allocation3 + $0x1ea0] sm:$0xff]  ;;  %v8457_v49 = vcombine.low %v645_v36, %v661_v37  ;;  %v8426_v50 = vcombine.high %v613_v46, %v629_v47 }
 0x11b   :  { %7928 = vst [vmem:[%s9431_s2 + $0x100] sm:$0xff] %v6407_v58  ;;  %v6409_v3 = vadd.f32 %v6408_v63, %v6365_v60  ;;  %6674 = vmatpush1.bf16.msra.mxu0 %v8137_v57  ;;  %v8938_v51 = vcombine.high %v1125_v48, %v1141_v56  ;;  %v581_v52 = vld [vmem:[#allocation3 + $0xd20] sm:$0xff]  ;;  %v8425_v57 = vcombine.low %v613_v46, %v629_v47 }
 0x11c   :  { %6675 = vmatprep.subr.bf16.mxu0 %v8106_v62  ;;  %v1109_v55 = vld [vmem:[#allocation3 + $0x1da0] sm:$0xff]  ;;  %v8937_v58 = vcombine.low %v1125_v48, %v1141_v56  ;;  %v8394_v60 = vcombine.high %v581_v52, %v597_v53  ;;  %v8393_v2 = vcombine.low %v581_v52, %v597_v53 }
 0x11d   :  { %7929 = vst [vmem:[%s9431_s2 + $0x108] sm:$0xff] %v6409_v3  ;;  %6717 = vmatpush1.bf16.msra.mxu1 %v8649_v61  ;;  %v8906_v61 = vcombine.high %v1093_v54, %v1109_v55  ;;  %v549_v62 = vld [vmem:[#allocation3 + $0xc20] sm:$0xff]  ;;  %v8905_v3 = vcombine.low %v1093_v54, %v1109_v55 }
 0x11e   :  { %6718 = vmatprep.subr.bf16.mxu1 %v8618_v0  ;;  %v565_v63 = vld [vmem:[#allocation3 + $0xca0] sm:$0xff] }
 0x11f   :  { %6676 = vmatpush1.bf16.msra.mxu0 %v8105_v6  ;;  %v1061_v0 = vld [vmem:[#allocation3 + $0x1c20] sm:$0xff]  ;;  %v8362_v4 = vcombine.high %v549_v62, %v565_v63  ;;  %v8361_v10 = vcombine.low %v549_v62, %v565_v63  ;;  %v854_v62 = vld [vmem:[#allocation3 + $0x15a8] sm:$0xff] }
 0x120   :  { %6677 = vmatprep.subr.bf16.mxu0 %v8074_v8  ;;  %v8874_v5 = vcombine.high %v1061_v0, %v1077_v1  ;;  %v517_v6 = vld [vmem:[#allocation3 + $0xb20] sm:$0xff]  ;;  %v8873_v11 = vcombine.low %v1061_v0, %v1077_v1 }
 0x121   :  { %6719 = vmatpush1.bf16.msra.mxu1 %v8617_v7  ;;  %v533_v7 = vld [vmem:[#allocation3 + $0xba0] sm:$0xff] }
 0x122   :  { %6720 = vmatprep.subr.bf16.mxu1 %v8586_v9  ;;  %v1029_v8 = vld [vmem:[#allocation3 + $0x1b20] sm:$0xff]  ;;  %v8330_v13 = vcombine.high %v517_v6, %v533_v7  ;;  %v8329_v20 = vcombine.low %v517_v6, %v533_v7  ;;  %v294_v7 = vld [vmem:[#allocation3 + $0x428] sm:$0xff] }
 0x123   :  { %6678 = vmatpush1.bf16.msra.mxu0 %v8073_v16  ;;  %v1045_v9 = vld [vmem:[#allocation3 + $0x1ba0] sm:$0xff] }
 0x124   :  { %6679 = vmatprep.subr.bf16.mxu0 %v8042_v18  ;;  %v8842_v14 = vcombine.high %v1029_v8, %v1045_v9  ;;  %v485_v16 = vld [vmem:[#allocation3 + $0xa20] sm:$0xff]  ;;  %v8841_v21 = vcombine.low %v1029_v8, %v1045_v9  ;;  %v310_v8 = vld [vmem:[#allocation3 + $0x4a8] sm:$0xff] }
 0x125   :  { %6721 = vmatpush1.bf16.msra.mxu1 %v8585_v17  ;;  %v501_v17 = vld [vmem:[#allocation3 + $0xaa0] sm:$0xff] }
 0x126   :  { %6722 = vmatprep.subr.bf16.mxu1 %v8554_v19  ;;  %v997_v18 = vld [vmem:[#allocation3 + $0x1a20] sm:$0xff]  ;;  %v8298_v22 = vcombine.high %v485_v16, %v501_v17  ;;  %v8297_v28 = vcombine.low %v485_v16, %v501_v17 }
 0x127   :  { %6680 = vmatpush1.bf16.msra.mxu0 %v8041_v24  ;;  %v1013_v19 = vld [vmem:[#allocation3 + $0x1aa0] sm:$0xff] }
 0x128   :  { %6681 = vmatprep.subr.bf16.mxu0 %v8010_v26  ;;  %v8810_v23 = vcombine.high %v997_v18, %v1013_v19  ;;  %v453_v24 = vld [vmem:[#allocation3 + $0x920] sm:$0xff]  ;;  %v8809_v29 = vcombine.low %v997_v18, %v1013_v19  ;;  %v8108_v19 = vcombine.high %v294_v7, %v310_v8 }
 0x129   :  { %6723 = vmatpush1.bf16.msra.mxu1 %v8553_v25  ;;  %v469_v25 = vld [vmem:[#allocation3 + $0x9a0] sm:$0xff] }
 0x12a   :  { %6724 = vmatprep.subr.bf16.mxu1 %v8522_v27  ;;  %v965_v26 = vld [vmem:[#allocation3 + $0x1920] sm:$0xff]  ;;  %v8266_v30 = vcombine.high %v453_v24, %v469_v25  ;;  %v8265_v36 = vcombine.low %v453_v24, %v469_v25  ;;  %v774_v24 = vld [vmem:[#allocation3 + $0x1328] sm:$0xff] }
 0x12b   :  { %6682 = vmatpush1.bf16.msra.mxu0 %v8009_v32  ;;  %v981_v27 = vld [vmem:[#allocation3 + $0x19a0] sm:$0xff]  ;;  %v790_v25 = vld [vmem:[#allocation3 + $0x13a8] sm:$0xff] }
 0x12c   :  { %6683 = vmatprep.subr.bf16.mxu0 %v7978_v34  ;;  %v8778_v31 = vcombine.high %v965_v26, %v981_v27  ;;  %v421_v32 = vld [vmem:[#allocation3 + $0x820] sm:$0xff]  ;;  %v8777_v37 = vcombine.low %v965_v26, %v981_v27  ;;  %v8107_v26 = vcombine.low %v294_v7, %v310_v8  ;;  %v582_v8 = vld [vmem:[#allocation3 + $0xd28] sm:$0xff] }
 0x12d   :  { %6725 = vmatpush1.bf16.msra.mxu1 %v8521_v33  ;;  %v437_v33 = vld [vmem:[#allocation3 + $0x8a0] sm:$0xff] }
 0x12e   :  { %6726 = vmatprep.subr.bf16.mxu1 %v8490_v35  ;;  %v933_v34 = vld [vmem:[#allocation3 + $0x1820] sm:$0xff]  ;;  %v8234_v38 = vcombine.high %v421_v32, %v437_v33  ;;  %v8233_v46 = vcombine.low %v421_v32, %v437_v33  ;;  %v742_v32 = vld [vmem:[#allocation3 + $0x1228] sm:$0xff] }
 0x12f   :  { %6684 = vmatpush1.bf16.msra.mxu0 %v7977_v41  ;;  %v949_v35 = vld [vmem:[#allocation3 + $0x18a0] sm:$0xff]  ;;  %v390_v41 = vld [vmem:[#allocation3 + $0x728] sm:$0xff] }
 0x130   :  { %6685 = vmatprep.subr.bf16.mxu0 %v8458_v44  ;;  %v8746_v40 = vcombine.high %v933_v34, %v949_v35  ;;  %v902_v44 = vld [vmem:[#allocation3 + $0x1728] sm:$0xff]  ;;  %v8745_v47 = vcombine.low %v933_v34, %v949_v35  ;;  %v8587_v35 = vcombine.low %v774_v24, %v790_v25 }
 0x131   :  { %6727 = vmatpush1.bf16.msra.mxu1 %v8489_v12  ;;  %v406_v12 = vld [vmem:[#allocation3 + $0x7a8] sm:$0xff] }
 0x132   :  { %6728 = vmatprep.subr.bf16.mxu1 %v8970_v45  ;;  %v918_v45 = vld [vmem:[#allocation3 + $0x17a8] sm:$0xff]  ;;  %v8204_v48 = vcombine.high %v390_v41, %v406_v12  ;;  %v8203_v52 = vcombine.low %v390_v41, %v406_v12 }
 0x133   :  { %6686 = vmatpush2.bf16.msra.mxu0 %v8457_v49  ;;  %v8716_v56 = vcombine.high %v902_v44, %v918_v45  ;;  %v358_v49 = vld [vmem:[#allocation3 + $0x628] sm:$0xff]  ;;  %v8715_v53 = vcombine.low %v902_v44, %v918_v45 }
 0x134   :  { %6687 = vmatprep.subr.bf16.mxu0 %v8426_v50  ;;  %v870_v50 = vld [vmem:[#allocation3 + $0x1628] sm:$0xff] }
 0x135   :  { %6729 = vmatpush2.bf16.msra.mxu1 %v8969_v59  ;;  %v374_v59 = vld [vmem:[#allocation3 + $0x6a8] sm:$0xff] }
 0x136   :  { %6730 = vmatprep.subr.bf16.mxu1 %v8938_v51  ;;  %v886_v51 = vld [vmem:[#allocation3 + $0x16a8] sm:$0xff]  ;;  %v8172_v54 = vcombine.high %v358_v49, %v374_v59  ;;  %v8171_v0 = vcombine.low %v358_v49, %v374_v59 }
 0x137   :  { %6688 = vmatpush2.bf16.msra.mxu0 %v8425_v57  ;;  %v8684_v55 = vcombine.high %v870_v50, %v886_v51  ;;  %v326_v57 = vld [vmem:[#allocation3 + $0x528] sm:$0xff] }
 0x138   :  { %6689 = vmatprep.subr.bf16.mxu0 %v8394_v60  ;;  %v758_v33 = vld [vmem:[#allocation3 + $0x12a8] sm:$0xff] }
 0x139   :  { %6731 = vmatpush2.bf16.msra.mxu1 %v8937_v58  ;;  %v342_v58 = vld [vmem:[#allocation3 + $0x5a8] sm:$0xff]  ;;  %v8555_v45 = vcombine.low %v742_v32, %v758_v33 }
 0x13a   :  { %6732 = vmatprep.subr.bf16.mxu1 %v8906_v61  ;;  %v838_v61 = vld [vmem:[#allocation3 + $0x1528] sm:$0xff]  ;;  %v8139_v16 = vcombine.low %v326_v57, %v342_v58 }
 0x13b   :  { %6690 = vmatpush2.bf16.msra.mxu0 %v8393_v2  ;;  %v8652_v6 = vcombine.high %v838_v61, %v854_v62  ;;  %v8651_v18 = vcombine.low %v838_v61, %v854_v62  ;;  %v710_v41 = vld [vmem:[#allocation3 + $0x1128] sm:$0xff] }
 0x13c   :  { %6691 = vmatprep.subr.bf16.mxu0 %v8362_v4  ;;  %v8140_v4 = vcombine.high %v326_v57, %v342_v58  ;;  %v726_v12 = vld [vmem:[#allocation3 + $0x11a8] sm:$0xff] }
 0x13d   :  { %6733 = vmatpush2.bf16.msra.mxu1 %v8905_v3  ;;  %v8683_v3 = vcombine.low %v870_v50, %v886_v51  ;;  %v678_v49 = vld [vmem:[#allocation3 + $0x1028] sm:$0xff]  ;;  %v8523_v51 = vcombine.low %v710_v41, %v726_v12 }
 0x13e   :  { %6734 = vmatprep.subr.bf16.mxu1 %v8874_v5  ;;  %v694_v59 = vld [vmem:[#allocation3 + $0x10a8] sm:$0xff] }
 0x13f   :  { %6692 = vmatpush2.bf16.msra.mxu0 %v8361_v10  ;;  %v1158_v57 = vld [vmem:[#allocation3 + $0x1f28] sm:$0xff]  ;;  %v8491_v61 = vcombine.low %v678_v49, %v694_v59 }
 0x140   :  { %6693 = vmatprep.subr.bf16.mxu0 %v8330_v13  ;;  %v822_v13 = vld [vmem:[#allocation3 + $0x14a8] sm:$0xff] }
 0x141   :  { %6735 = vmatpush2.bf16.msra.mxu1 %v8873_v11  ;;  %v806_v11 = vld [vmem:[#allocation3 + $0x1428] sm:$0xff] }
 0x142   :  { %6736 = vmatprep.subr.bf16.mxu1 %v8842_v14  ;;  %v8619_v27 = vcombine.low %v806_v11, %v822_v13  ;;  %v1174_v58 = vld [vmem:[#allocation3 + $0x1fa8] sm:$0xff] }
 0x143   :  { %6694 = vmatpush2.bf16.msra.mxu0 %v8329_v20 }
 0x144   :  { %6695 = vmatprep.subr.bf16.mxu0 %v8298_v22  ;;  %v262_v22 = vld [vmem:[#allocation3 + $0x328] sm:$0xff] }
 0x145   :  { %6737 = vmatpush2.bf16.msra.mxu1 %v8841_v21  ;;  %v8620_v21 = vcombine.high %v806_v11, %v822_v13  ;;  %v1110_v11 = vld [vmem:[#allocation3 + $0x1da8] sm:$0xff] }
 0x146   :  { %6738 = vmatprep.subr.bf16.mxu1 %v8810_v23  ;;  %v278_v23 = vld [vmem:[#allocation3 + $0x3a8] sm:$0xff] }
 0x147   :  { %6696 = vmatpush2.bf16.msra.mxu0 %v8297_v28  ;;  %v8076_v28 = vcombine.high %v262_v22, %v278_v23  ;;  %v8075_v34 = vcombine.low %v262_v22, %v278_v23 }
 0x148   :  { %6697 = vmatprep.subr.bf16.mxu0 %v8266_v30  ;;  %v230_v30 = vld [vmem:[#allocation3 + $0x228] sm:$0xff] }
 0x149   :  { %6739 = vmatpush2.bf16.msra.mxu1 %v8809_v29  ;;  %v8588_v29 = vcombine.high %v774_v24, %v790_v25  ;;  %v518_v24 = vld [vmem:[#allocation3 + $0xb28] sm:$0xff] }
 0x14a   :  { %6740 = vmatprep.subr.bf16.mxu1 %v8778_v31  ;;  %v246_v31 = vld [vmem:[#allocation3 + $0x2a8] sm:$0xff] }
 0x14b   :  { %6698 = vmatpush2.bf16.msra.mxu0 %v8265_v36  ;;  %v8044_v36 = vcombine.high %v230_v30, %v246_v31  ;;  %v8043_v44 = vcombine.low %v230_v30, %v246_v31  ;;  %v534_v25 = vld [vmem:[#allocation3 + $0xba8] sm:$0xff] }
 0x14c   :  { %6699 = vmatprep.subr.bf16.mxu0 %v8234_v38  ;;  %v198_v38 = vld [vmem:[#allocation3 + $0x128] sm:$0xff]  ;;  %v8332_v30 = vcombine.high %v518_v24, %v534_v25 }
 0x14d   :  { %6741 = vmatpush2.bf16.msra.mxu1 %v8777_v37  ;;  %v8556_v37 = vcombine.high %v742_v32, %v758_v33  ;;  %v486_v32 = vld [vmem:[#allocation3 + $0xa28] sm:$0xff] }
 0x14e   :  { %6742 = vmatprep.subr.bf16.mxu1 %v8746_v40  ;;  %v214_v40 = vld [vmem:[#allocation3 + $0x1a8] sm:$0xff] }
 0x14f   :  { %6700 = vmatpush2.bf16.msra.mxu0 %v8233_v46  ;;  %v8012_v46 = vcombine.high %v198_v38, %v214_v40  ;;  %v8011_v50 = vcombine.low %v198_v38, %v214_v40  ;;  %v502_v33 = vld [vmem:[#allocation3 + $0xaa8] sm:$0xff] }
 0x150   :  { %6755 = vmatprep.subr.bf16.mxu0 %v8204_v48  ;;  %v166_v48 = vld [vmem:[#allocation3 + $0x28] sm:$0xff]  ;;  %v8300_v38 = vcombine.high %v486_v32, %v502_v33 }
 0x151   :  { %6743 = vmatpush2.bf16.msra.mxu1 %v8745_v47  ;;  %v8524_v47 = vcombine.high %v710_v41, %v726_v12  ;;  %v454_v41 = vld [vmem:[#allocation3 + $0x928] sm:$0xff] }
 0x152   :  { %6798 = vmatprep.subr.bf16.mxu1 %v8716_v56  ;;  %v6445_v60 = vpop.f32.mrf.mxu0  ;;  %6702 = vmatmul.mubr.bf16.vlgmr.msra.gmra.mxu0 %v9112_v39  ;;  %v182_v56 = vld [vmem:[#allocation3 + $0xa8] sm:$0xff] }
 0x153   :  { %6756 = vmatpush1.bf16.msra.mxu0 %v8203_v52  ;;  %6787 = vmatprep.mubr.bf16.mxu0 %v9100_v42  ;;  %v7980_v52 = vcombine.high %v166_v48, %v182_v56  ;;  %v470_v12 = vld [vmem:[#allocation3 + $0x9a8] sm:$0xff] }
 0x154   :  { %v6488_v63 = vpop.f32.mrf.mxu1  ;;  %6745 = vmatmul.mubr.bf16.vlgmr.msra.gmra.mxu1 %v9118_v43  ;;  %v6447_v2 = vpop.f32.mrf.mxu0  ;;  %6757 = vmatprep.subr.bf16.mxu0 %v8172_v54  ;;  %v646_v54 = vld [vmem:[#allocation3 + $0xf28] sm:$0xff] }
 0x155   :  { %v6489_v1 = vadd.f32 %v6488_v63, %v6445_v60  ;;  %6799 = vmatpush1.bf16.msra.mxu1 %v8715_v53  ;;  %6830 = vmatprep.mubr.bf16.mxu1 %v9106_v15  ;;  %v8492_v53 = vcombine.high %v678_v49, %v694_v59  ;;  %v7979_v60 = vcombine.low %v166_v48, %v182_v56  ;;  %v422_v49 = vld [vmem:[#allocation3 + $0x828] sm:$0xff] }
 0x156   :  { %v6490_v5 = vpop.f32.mrf.mxu1  ;;  %6800 = vmatprep.subr.bf16.mxu1 %v8684_v55  ;;  %v6449_v10 = vpop.f32.mrf.mxu0  ;;  %v662_v55 = vld [vmem:[#allocation3 + $0xfa8] sm:$0xff]  ;;  %v8972_v63 = vcombine.high %v1158_v57, %v1174_v58  ;;  %v8268_v48 = vcombine.high %v454_v41, %v470_v12 }
 0x157   :  { %7898 = vst [vmem:[%s9431_s2 + $0x10] sm:$0xff] %v6489_v1  ;;  %v6491_v9 = vadd.f32 %v6490_v5, %v6447_v2  ;;  %6758 = vmatpush1.bf16.msra.mxu0 %v8171_v0  ;;  %v8460_v62 = vcombine.high %v646_v54, %v662_v55  ;;  %v614_v0 = vld [vmem:[#allocation3 + $0xe28] sm:$0xff]  ;;  %v8971_v5 = vcombine.low %v1158_v57, %v1174_v58  ;;  %v391_v57 = vld [vmem:[#allocation3 + $0x730] sm:$0xff] }
 0x158   :  { %v6492_v14 = vpop.f32.mrf.mxu1  ;;  %v6451_v42 = vpop.f32.mrf.mxu0  ;;  %6759 = vmatprep.subr.bf16.mxu0 %v8140_v4  ;;  %v630_v1 = vld [vmem:[#allocation3 + $0xea8] sm:$0xff]  ;;  %v8459_v4 = vcombine.low %v646_v54, %v662_v55  ;;  %v407_v58 = vld [vmem:[#allocation3 + $0x7b0] sm:$0xff] }
 0x159   :  { %7899 = vst [vmem:[%s9431_s2 + $0x18] sm:$0xff] %v6491_v9  ;;  %v6493_v17 = vadd.f32 %v6492_v14, %v6449_v10  ;;  %6801 = vmatpush1.bf16.msra.mxu1 %v8683_v3  ;;  %v1126_v2 = vld [vmem:[#allocation3 + $0x1e28] sm:$0xff]  ;;  %v8427_v13 = vcombine.low %v614_v0, %v630_v1 }
 0x15a   :  { %v6494_v20 = vpop.f32.mrf.mxu1  ;;  %6802 = vmatprep.subr.bf16.mxu1 %v8652_v6  ;;  %v1142_v3 = vld [vmem:[#allocation3 + $0x1ea8] sm:$0xff]  ;;  %v8428_v6 = vcombine.high %v614_v0, %v630_v1  ;;  %v8206_v0 = vcombine.high %v391_v57, %v407_v58 }
 0x15b   :  { %7930 = vst [vmem:[%s9431_s2 + $0x110] sm:$0xff] %v6493_v17  ;;  %v6495_v15 = vadd.f32 %v6494_v20, %v6451_v42  ;;  %6760 = vmatpush1.bf16.msra.mxu0 %v8139_v16  ;;  %v8940_v7 = vcombine.high %v1126_v2, %v1142_v3  ;;  %v598_v9 = vld [vmem:[#allocation3 + $0xda8] sm:$0xff]  ;;  %v8939_v14 = vcombine.low %v1126_v2, %v1142_v3  ;;  %v359_v2 = vld [vmem:[#allocation3 + $0x630] sm:$0xff] }
 0x15c   :  { %6761 = vmatprep.subr.bf16.mxu0 %v8108_v19  ;;  %v1094_v10 = vld [vmem:[#allocation3 + $0x1d28] sm:$0xff]  ;;  %v8396_v16 = vcombine.high %v582_v8, %v598_v9  ;;  %v375_v3 = vld [vmem:[#allocation3 + $0x6b0] sm:$0xff] }
 0x15d   :  { %7931 = vst [vmem:[%s9431_s2 + $0x118] sm:$0xff] %v6495_v15  ;;  %6803 = vmatpush1.bf16.msra.mxu1 %v8651_v18  ;;  %v8908_v17 = vcombine.high %v1094_v10, %v1110_v11  ;;  %v550_v42 = vld [vmem:[#allocation3 + $0xc28] sm:$0xff]  ;;  %v8907_v22 = vcombine.low %v1094_v10, %v1110_v11  ;;  %v327_v10 = vld [vmem:[#allocation3 + $0x530] sm:$0xff] }
 0x15e   :  { %6804 = vmatprep.subr.bf16.mxu1 %v8620_v21  ;;  %v566_v18 = vld [vmem:[#allocation3 + $0xca8] sm:$0xff]  ;;  %v8395_v21 = vcombine.low %v582_v8, %v598_v9  ;;  %v8174_v8 = vcombine.high %v359_v2, %v375_v3  ;;  %v343_v11 = vld [vmem:[#allocation3 + $0x5b0] sm:$0xff] }
 0x15f   :  { %6762 = vmatpush1.bf16.msra.mxu0 %v8107_v26  ;;  %v1062_v19 = vld [vmem:[#allocation3 + $0x1c28] sm:$0xff]  ;;  %v8364_v23 = vcombine.high %v550_v42, %v566_v18 }
 0x160   :  { %6763 = vmatprep.subr.bf16.mxu0 %v8076_v28  ;;  %v1078_v20 = vld [vmem:[#allocation3 + $0x1ca8] sm:$0xff]  ;;  %v8363_v28 = vcombine.low %v550_v42, %v566_v18  ;;  %v8173_v42 = vcombine.low %v359_v2, %v375_v3  ;;  %v679_v2 = vld [vmem:[#allocation3 + $0x1030] sm:$0xff] }
 0x161   :  { %6805 = vmatpush1.bf16.msra.mxu1 %v8619_v27  ;;  %v8876_v15 = vcombine.high %v1062_v19, %v1078_v20  ;;  %v1030_v26 = vld [vmem:[#allocation3 + $0x1b28] sm:$0xff]  ;;  %v695_v3 = vld [vmem:[#allocation3 + $0x10b0] sm:$0xff] }
 0x162   :  { %6806 = vmatprep.subr.bf16.mxu1 %v8588_v29  ;;  %v1046_v27 = vld [vmem:[#allocation3 + $0x1ba8] sm:$0xff]  ;;  %v8875_v29 = vcombine.low %v1062_v19, %v1078_v20 }
 0x163   :  { %6764 = vmatpush1.bf16.msra.mxu0 %v8075_v34  ;;  %v8844_v31 = vcombine.high %v1030_v26, %v1046_v27  ;;  %v998_v34 = vld [vmem:[#allocation3 + $0x1a28] sm:$0xff] }
 0x164   :  { %6765 = vmatprep.subr.bf16.mxu0 %v8044_v36  ;;  %v8331_v36 = vcombine.low %v518_v24, %v534_v25  ;;  %v438_v59 = vld [vmem:[#allocation3 + $0x8a8] sm:$0xff]  ;;  %v311_v24 = vld [vmem:[#allocation3 + $0x4b0] sm:$0xff] }
 0x165   :  { %6807 = vmatpush1.bf16.msra.mxu1 %v8587_v35  ;;  %v1014_v35 = vld [vmem:[#allocation3 + $0x1aa8] sm:$0xff]  ;;  %v8236_v54 = vcombine.high %v422_v49, %v438_v59 }
 0x166   :  { %6808 = vmatprep.subr.bf16.mxu1 %v8556_v37  ;;  %v8843_v37 = vcombine.low %v1030_v26, %v1046_v27  ;;  %v8812_v40 = vcombine.high %v998_v34, %v1014_v35  ;;  %v807_v26 = vld [vmem:[#allocation3 + $0x1430] sm:$0xff] }
 0x167   :  { %6766 = vmatpush1.bf16.msra.mxu0 %v8043_v44  ;;  %v966_v44 = vld [vmem:[#allocation3 + $0x1928] sm:$0xff]  ;;  %v823_v27 = vld [vmem:[#allocation3 + $0x14b0] sm:$0xff] }
 0x168   :  { %6767 = vmatprep.subr.bf16.mxu0 %v8012_v46  ;;  %v8299_v46 = vcombine.low %v486_v32, %v502_v33 }
 0x169   :  { %6809 = vmatpush1.bf16.msra.mxu1 %v8555_v45  ;;  %v982_v45 = vld [vmem:[#allocation3 + $0x19a8] sm:$0xff] }
 0x16a   :  { %6810 = vmatprep.subr.bf16.mxu1 %v8524_v47  ;;  %v8811_v47 = vcombine.low %v998_v34, %v1014_v35  ;;  %v8780_v56 = vcombine.high %v966_v44, %v982_v45 }
 0x16b   :  { %6768 = vmatpush1.bf16.msra.mxu0 %v8011_v50  ;;  %v934_v50 = vld [vmem:[#allocation3 + $0x1828] sm:$0xff] }
 0x16c   :  { %6769 = vmatprep.subr.bf16.mxu0 %v7980_v52  ;;  %v8267_v52 = vcombine.low %v454_v41, %v470_v12  ;;  %v775_v41 = vld [vmem:[#allocation3 + $0x1330] sm:$0xff] }
 0x16d   :  { %6811 = vmatpush1.bf16.msra.mxu1 %v8523_v51  ;;  %v950_v51 = vld [vmem:[#allocation3 + $0x18a8] sm:$0xff]  ;;  %v791_v12 = vld [vmem:[#allocation3 + $0x13b0] sm:$0xff] }
 0x16e   :  { %6812 = vmatprep.subr.bf16.mxu1 %v8492_v53  ;;  %v8779_v53 = vcombine.low %v966_v44, %v982_v45  ;;  %v8748_v55 = vcombine.high %v934_v50, %v950_v51  ;;  %v8621_v45 = vcombine.low %v807_v26, %v823_v27 }
 0x16f   :  { %6770 = vmatpush1.bf16.msra.mxu0 %v7979_v60  ;;  %v903_v60 = vld [vmem:[#allocation3 + $0x1730] sm:$0xff] }
 0x170   :  { %6771 = vmatprep.subr.bf16.mxu0 %v8460_v62  ;;  %v8235_v62 = vcombine.low %v422_v49, %v438_v59  ;;  %v743_v49 = vld [vmem:[#allocation3 + $0x1230] sm:$0xff] }
 0x171   :  { %6813 = vmatpush1.bf16.msra.mxu1 %v8491_v61  ;;  %v919_v61 = vld [vmem:[#allocation3 + $0x17b0] sm:$0xff] }
 0x172   :  { %6814 = vmatprep.subr.bf16.mxu1 %v8972_v63  ;;  %v8747_v63 = vcombine.low %v934_v50, %v950_v51  ;;  %v8718_v1 = vcombine.high %v903_v60, %v919_v61  ;;  %v759_v59 = vld [vmem:[#allocation3 + $0x12b0] sm:$0xff]  ;;  %v8589_v51 = vcombine.low %v775_v41, %v791_v12 }
 0x173   :  { %6772 = vmatpush2.bf16.msra.mxu0 %v8459_v4  ;;  %v871_v4 = vld [vmem:[#allocation3 + $0x1630] sm:$0xff] }
 0x174   :  { %6773 = vmatprep.subr.bf16.mxu0 %v8428_v6  ;;  %v8205_v6 = vcombine.low %v391_v57, %v407_v58  ;;  %v711_v57 = vld [vmem:[#allocation3 + $0x1130] sm:$0xff] }
 0x175   :  { %6815 = vmatpush2.bf16.msra.mxu1 %v8971_v5  ;;  %v887_v5 = vld [vmem:[#allocation3 + $0x16b0] sm:$0xff] }
 0x176   :  { %6816 = vmatprep.subr.bf16.mxu1 %v8940_v7  ;;  %v8717_v7 = vcombine.low %v903_v60, %v919_v61  ;;  %v8686_v9 = vcombine.high %v871_v4, %v887_v5  ;;  %v8685_v20 = vcombine.low %v871_v4, %v887_v5  ;;  %v727_v58 = vld [vmem:[#allocation3 + $0x11b0] sm:$0xff]  ;;  %v8557_v61 = vcombine.low %v743_v49, %v759_v59 }
 0x177   :  { %6774 = vmatpush2.bf16.msra.mxu0 %v8427_v13  ;;  %v8525_v5 = vcombine.low %v711_v57, %v727_v58 }
 0x178   :  { %6775 = vmatprep.subr.bf16.mxu0 %v8396_v16  ;;  %v855_v16 = vld [vmem:[#allocation3 + $0x15b0] sm:$0xff] }
 0x179   :  { %6817 = vmatpush2.bf16.msra.mxu1 %v8939_v14  ;;  %v839_v14 = vld [vmem:[#allocation3 + $0x1530] sm:$0xff] }
 0x17a   :  { %6818 = vmatprep.subr.bf16.mxu1 %v8908_v17  ;;  %v8653_v33 = vcombine.low %v839_v14, %v855_v16 }
 0x17b   :  { %6776 = vmatpush2.bf16.msra.mxu0 %v8395_v21  ;;  %v8142_v21 = vcombine.high %v327_v10, %v343_v11 }
 0x17c   :  { %6777 = vmatprep.subr.bf16.mxu0 %v8364_v23  ;;  %v8654_v23 = vcombine.high %v839_v14, %v855_v16  ;;  %v8493_v14 = vcombine.low %v679_v2, %v695_v3 }
 0x17d   :  { %6819 = vmatpush2.bf16.msra.mxu1 %v8907_v22 }
 0x17e   :  { %6820 = vmatprep.subr.bf16.mxu1 %v8876_v15  ;;  %v295_v15 = vld [vmem:[#allocation3 + $0x430] sm:$0xff] }
 0x17f   :  { %6778 = vmatpush2.bf16.msra.mxu0 %v8363_v28  ;;  %v9165_v28 = vld [vmem:[%s9429_s0 + $0xc] ss:$16 sps:$4 sm:$0xff]   ;;  %v8110_v34 = vcombine.high %v295_v15, %v311_v24  ;;  %v8109_v44 = vcombine.low %v295_v15, %v311_v24  ;;  %v583_v24 = vld [vmem:[#allocation3 + $0xd30] sm:$0xff] }
 0x180   :  { %6779 = vmatprep.subr.bf16.mxu0 %v8332_v30  ;;  %v8141_v30 = vcombine.low %v327_v10, %v343_v11  ;;  %v1159_v10 = vld [vmem:[#allocation3 + $0x1f30] sm:$0xff] }
 0x181   :  { %6821 = vmatpush2.bf16.msra.mxu1 %v8875_v29  ;;  %v1175_v11 = vld [vmem:[#allocation3 + $0x1fb0] sm:$0xff] }
 0x182   :  { %6822 = vmatprep.subr.bf16.mxu1 %v8844_v31 }
 0x183   :  { %6780 = vmatpush2.bf16.msra.mxu0 %v8331_v36  ;;  %v8622_v36 = vcombine.high %v807_v26, %v823_v27  ;;  %v1111_v26 = vld [vmem:[#allocation3 + $0x1db0] sm:$0xff] }
 0x184   :  { %6781 = vmatprep.subr.bf16.mxu0 %v8300_v38  ;;  %v279_v38 = vld [vmem:[#allocation3 + $0x3b0] sm:$0xff] }
 0x185   :  { %6823 = vmatpush2.bf16.msra.mxu1 %v8843_v37  ;;  %v263_v37 = vld [vmem:[#allocation3 + $0x330] sm:$0xff] }
 0x186   :  { %6824 = vmatprep.subr.bf16.mxu1 %v8812_v40  ;;  %v8077_v50 = vcombine.low %v263_v37, %v279_v38 }
 0x187   :  { %6782 = vmatpush2.bf16.msra.mxu0 %v8299_v46  ;;  %v8078_v46 = vcombine.high %v263_v37, %v279_v38 }
 0x188   :  { %6783 = vmatprep.subr.bf16.mxu0 %v8268_v48  ;;  %v231_v48 = vld [vmem:[#allocation3 + $0x230] sm:$0xff] }
 0x189   :  { %6825 = vmatpush2.bf16.msra.mxu1 %v8811_v47  ;;  %v8590_v47 = vcombine.high %v775_v41, %v791_v12  ;;  %v519_v41 = vld [vmem:[#allocation3 + $0xb30] sm:$0xff] }
 0x18a   :  { %6826 = vmatprep.subr.bf16.mxu1 %v8780_v56  ;;  %v247_v56 = vld [vmem:[#allocation3 + $0x2b0] sm:$0xff] }
 0x18b   :  { %6784 = vmatpush2.bf16.msra.mxu0 %v8267_v52  ;;  %v8046_v52 = vcombine.high %v231_v48, %v247_v56  ;;  %v8045_v60 = vcombine.low %v231_v48, %v247_v56  ;;  %v535_v12 = vld [vmem:[#allocation3 + $0xbb0] sm:$0xff] }
 0x18c   :  { %6785 = vmatprep.subr.bf16.mxu0 %v8236_v54  ;;  %v199_v54 = vld [vmem:[#allocation3 + $0x130] sm:$0xff]  ;;  %v8334_v48 = vcombine.high %v519_v41, %v535_v12 }
 0x18d   :  { %6827 = vmatpush2.bf16.msra.mxu1 %v8779_v53  ;;  %v8558_v53 = vcombine.high %v743_v49, %v759_v59  ;;  %v487_v49 = vld [vmem:[#allocation3 + $0xa30] sm:$0xff] }
 0x18e   :  { %6828 = vmatprep.subr.bf16.mxu1 %v8748_v55  ;;  %v215_v55 = vld [vmem:[#allocation3 + $0x1b0] sm:$0xff] }
 0x18f   :  { %6786 = vmatpush2.bf16.msra.mxu0 %v8235_v62  ;;  %v8014_v62 = vcombine.high %v199_v54, %v215_v55  ;;  %v8013_v4 = vcombine.low %v199_v54, %v215_v55  ;;  %v503_v59 = vld [vmem:[#allocation3 + $0xab0] sm:$0xff] }
 0x190   :  { %6841 = vmatprep.subr.bf16.mxu0 %v8206_v0  ;;  %v167_v0 = vld [vmem:[#allocation3 + $0x30] sm:$0xff]  ;;  %v8302_v54 = vcombine.high %v487_v49, %v503_v59 }
 0x191   :  { %6829 = vmatpush2.bf16.msra.mxu1 %v8747_v63  ;;  %v8526_v63 = vcombine.high %v711_v57, %v727_v58  ;;  %v455_v57 = vld [vmem:[#allocation3 + $0x930] sm:$0xff] }
 0x192   :  { %6884 = vmatprep.subr.bf16.mxu1 %v8718_v1  ;;  %v6531_v13 = vpop.f32.mrf.mxu0  ;;  %6788 = vmatmul.mubr.bf16.vlgmr.msra.gmra.mxu0 %v9112_v39  ;;  %v9156_v39 = vld [vmem:[%s9429_s0 + $0x4] ss:$16 sps:$4 sm:$0xff]  }
 0x193   :  { %6842 = vmatpush1.bf16.msra.mxu0 %v8205_v6  ;;  %6873 = vmatprep.mubr.bf16.mxu0 %v9156_v39  ;;  %v183_v1 = vld [vmem:[#allocation3 + $0xb0] sm:$0xff] }
 0x194   :  { %v6574_v17 = vpop.f32.mrf.mxu1  ;;  %6831 = vmatmul.mubr.bf16.vlgmr.msra.gmra.mxu1 %v9118_v43  ;;  %v6533_v19 = vpop.f32.mrf.mxu0  ;;  %6843 = vmatprep.subr.bf16.mxu0 %v8174_v8  ;;  %v7982_v6 = vcombine.high %v167_v0, %v183_v1  ;;  %v647_v8 = vld [vmem:[#allocation3 + $0xf30] sm:$0xff] }
 0x195   :  { %v6575_v18 = vadd.f32 %v6574_v17, %v6531_v13  ;;  %6885 = vmatpush1.bf16.msra.mxu1 %v8717_v7  ;;  %6916 = vmatprep.mubr.bf16.mxu1 %v9165_v28  ;;  %v8494_v7 = vcombine.high %v679_v2, %v695_v3  ;;  %v7981_v13 = vcombine.low %v167_v0, %v183_v1  ;;  %v471_v58 = vld [vmem:[#allocation3 + $0x9b0] sm:$0xff] }
 0x196   :  { %v6576_v22 = vpop.f32.mrf.mxu1  ;;  %6886 = vmatprep.subr.bf16.mxu1 %v8686_v9  ;;  %v6535_v25 = vpop.f32.mrf.mxu0  ;;  %v663_v9 = vld [vmem:[#allocation3 + $0xfb0] sm:$0xff]  ;;  %v8974_v17 = vcombine.high %v1159_v10, %v1175_v11  ;;  %v8270_v0 = vcombine.high %v455_v57, %v471_v58 }
 0x197   :  { %7900 = vst [vmem:[%s9431_s2 + $0x20] sm:$0xff] %v6575_v18  ;;  %v6577_v43 = vadd.f32 %v6576_v22, %v6533_v19  ;;  %6844 = vmatpush1.bf16.msra.mxu0 %v8173_v42  ;;  %v8462_v16 = vcombine.high %v647_v8, %v663_v9  ;;  %v615_v42 = vld [vmem:[#allocation3 + $0xe30] sm:$0xff]  ;;  %v8973_v22 = vcombine.low %v1159_v10, %v1175_v11  ;;  %v392_v10 = vld [vmem:[#allocation3 + $0x738] sm:$0xff] }
 0x198   :  { %v6578_v29 = vpop.f32.mrf.mxu1  ;;  %v6537_v32 = vpop.f32.mrf.mxu0  ;;  %6845 = vmatprep.subr.bf16.mxu0 %v8142_v21  ;;  %v631_v18 = vld [vmem:[#allocation3 + $0xeb0] sm:$0xff]  ;;  %v8461_v21 = vcombine.low %v647_v8, %v663_v9  ;;  %v408_v11 = vld [vmem:[#allocation3 + $0x7b8] sm:$0xff] }
 0x199   :  { %7901 = vst [vmem:[%s9431_s2 + $0x28] sm:$0xff] %v6577_v43  ;;  %v6579_v31 = vadd.f32 %v6578_v29, %v6535_v25  ;;  %6887 = vmatpush1.bf16.msra.mxu1 %v8685_v20  ;;  %v1127_v19 = vld [vmem:[#allocation3 + $0x1e30] sm:$0xff]  ;;  %v8429_v27 = vcombine.low %v615_v42, %v631_v18 }
 0x19a   :  { %v6580_v35 = vpop.f32.mrf.mxu1  ;;  %6888 = vmatprep.subr.bf16.mxu1 %v8654_v23  ;;  %v1143_v20 = vld [vmem:[#allocation3 + $0x1eb0] sm:$0xff]  ;;  %v8430_v23 = vcombine.high %v615_v42, %v631_v18  ;;  %v8208_v42 = vcombine.high %v392_v10, %v408_v11 }
 0x19b   :  { %7932 = vst [vmem:[%s9431_s2 + $0x120] sm:$0xff] %v6579_v31  ;;  %v6581_v40 = vadd.f32 %v6580_v35, %v6537_v32  ;;  %6846 = vmatpush1.bf16.msra.mxu0 %v8141_v30  ;;  %v8942_v15 = vcombine.high %v1127_v19, %v1143_v20  ;;  %v599_v43 = vld [vmem:[#allocation3 + $0xdb0] sm:$0xff]  ;;  %v8941_v29 = vcombine.low %v1127_v19, %v1143_v20  ;;  %v360_v19 = vld [vmem:[#allocation3 + $0x638] sm:$0xff] }
 0x19c   :  { %6847 = vmatprep.subr.bf16.mxu0 %v8110_v34  ;;  %v1095_v25 = vld [vmem:[#allocation3 + $0x1d30] sm:$0xff]  ;;  %v8398_v30 = vcombine.high %v583_v24, %v599_v43  ;;  %v376_v20 = vld [vmem:[#allocation3 + $0x6b8] sm:$0xff] }
 0x19d   :  { %7933 = vst [vmem:[%s9431_s2 + $0x128] sm:$0xff] %v6581_v40  ;;  %6889 = vmatpush1.bf16.msra.mxu1 %v8653_v33  ;;  %v8910_v31 = vcombine.high %v1095_v25, %v1111_v26  ;;  %v551_v32 = vld [vmem:[#allocation3 + $0xc30] sm:$0xff]  ;;  %v8909_v37 = vcombine.low %v1095_v25, %v1111_v26  ;;  %v328_v25 = vld [vmem:[#allocation3 + $0x538] sm:$0xff] }
 0x19e   :  { %6890 = vmatprep.subr.bf16.mxu1 %v8622_v36  ;;  %v567_v33 = vld [vmem:[#allocation3 + $0xcb0] sm:$0xff]  ;;  %v8397_v36 = vcombine.low %v583_v24, %v599_v43  ;;  %v8176_v24 = vcombine.high %v360_v19, %v376_v20  ;;  %v344_v26 = vld [vmem:[#allocation3 + $0x5b8] sm:$0xff] }
 0x19f   :  { %6848 = vmatpush1.bf16.msra.mxu0 %v8109_v44  ;;  %v1063_v34 = vld [vmem:[#allocation3 + $0x1c30] sm:$0xff]  ;;  %v8366_v38 = vcombine.high %v551_v32, %v567_v33 }
 0x1a0   :  { %6849 = vmatprep.subr.bf16.mxu0 %v8078_v46  ;;  %v1079_v35 = vld [vmem:[#allocation3 + $0x1cb0] sm:$0xff]  ;;  %v8365_v46 = vcombine.low %v551_v32, %v567_v33  ;;  %v9186_v33 = vld [vmem:[%s9429_s0 + $0x8] ss:$16 sps:$4 sm:$0xff]  }
 0x1a1   :  { %6891 = vmatpush1.bf16.msra.mxu1 %v8621_v45  ;;  %v8878_v40 = vcombine.high %v1063_v34, %v1079_v35  ;;  %v1031_v44 = vld [vmem:[#allocation3 + $0x1b30] sm:$0xff] }
 0x1a2   :  { %6892 = vmatprep.subr.bf16.mxu1 %v8590_v47  ;;  %v1047_v45 = vld [vmem:[#allocation3 + $0x1bb0] sm:$0xff]  ;;  %v8877_v47 = vcombine.low %v1063_v34, %v1079_v35  ;;  %v8175_v34 = vcombine.low %v360_v19, %v376_v20  ;;  %v168_v19 = vld [vmem:[#allocation3 + $0x38] sm:$0xff] }
 0x1a3   :  { %6850 = vmatpush1.bf16.msra.mxu0 %v8077_v50  ;;  %v8846_v56 = vcombine.high %v1031_v44, %v1047_v45  ;;  %v999_v50 = vld [vmem:[#allocation3 + $0x1a30] sm:$0xff]  ;;  %v184_v20 = vld [vmem:[#allocation3 + $0xb8] sm:$0xff] }
 0x1a4   :  { %6851 = vmatprep.subr.bf16.mxu0 %v8046_v52  ;;  %v8333_v52 = vcombine.low %v519_v41, %v535_v12  ;;  %v423_v2 = vld [vmem:[#allocation3 + $0x830] sm:$0xff]  ;;  %v296_v12 = vld [vmem:[#allocation3 + $0x438] sm:$0xff] }
 0x1a5   :  { %6893 = vmatpush1.bf16.msra.mxu1 %v8589_v51  ;;  %v1015_v51 = vld [vmem:[#allocation3 + $0x1ab0] sm:$0xff] }
 0x1a6   :  { %6894 = vmatprep.subr.bf16.mxu1 %v8558_v53  ;;  %v8845_v53 = vcombine.low %v1031_v44, %v1047_v45  ;;  %v8814_v55 = vcombine.high %v999_v50, %v1015_v51  ;;  %v439_v3 = vld [vmem:[#allocation3 + $0x8b0] sm:$0xff]  ;;  %v312_v44 = vld [vmem:[#allocation3 + $0x4b8] sm:$0xff] }
 0x1a7   :  { %6852 = vmatpush1.bf16.msra.mxu0 %v8045_v60  ;;  %v967_v60 = vld [vmem:[#allocation3 + $0x1930] sm:$0xff]  ;;  %v8238_v8 = vcombine.high %v423_v2, %v439_v3 }
 0x1a8   :  { %6853 = vmatprep.subr.bf16.mxu0 %v8014_v62  ;;  %v8301_v62 = vcombine.low %v487_v49, %v503_v59  ;;  %v8143_v49 = vcombine.low %v328_v25, %v344_v26 }
 0x1a9   :  { %6895 = vmatpush1.bf16.msra.mxu1 %v8557_v61  ;;  %v983_v61 = vld [vmem:[#allocation3 + $0x19b0] sm:$0xff] }
 0x1aa   :  { %6896 = vmatprep.subr.bf16.mxu1 %v8526_v63  ;;  %v8813_v63 = vcombine.low %v999_v50, %v1015_v51  ;;  %v8782_v1 = vcombine.high %v967_v60, %v983_v61 }
 0x1ab   :  { %6854 = vmatpush1.bf16.msra.mxu0 %v8013_v4  ;;  %v935_v4 = vld [vmem:[#allocation3 + $0x1830] sm:$0xff] }
 0x1ac   :  { %6855 = vmatprep.subr.bf16.mxu0 %v7982_v6  ;;  %v8269_v6 = vcombine.low %v455_v57, %v471_v58  ;;  %v280_v57 = vld [vmem:[#allocation3 + $0x3b8] sm:$0xff] }
 0x1ad   :  { %6897 = vmatpush1.bf16.msra.mxu1 %v8525_v5  ;;  %v951_v5 = vld [vmem:[#allocation3 + $0x18b0] sm:$0xff] }
 0x1ae   :  { %6898 = vmatprep.subr.bf16.mxu1 %v8494_v7  ;;  %v8781_v7 = vcombine.low %v967_v60, %v983_v61  ;;  %v8750_v9 = vcombine.high %v935_v4, %v951_v5  ;;  %v776_v60 = vld [vmem:[#allocation3 + $0x1338] sm:$0xff] }
 0x1af   :  { %6856 = vmatpush1.bf16.msra.mxu0 %v7981_v13  ;;  %v904_v13 = vld [vmem:[#allocation3 + $0x1738] sm:$0xff] }
 0x1b0   :  { %6857 = vmatprep.subr.bf16.mxu0 %v8462_v16  ;;  %v8237_v16 = vcombine.low %v423_v2, %v439_v3  ;;  %v792_v61 = vld [vmem:[#allocation3 + $0x13b8] sm:$0xff] }
 0x1b1   :  { %6899 = vmatpush1.bf16.msra.mxu1 %v8493_v14  ;;  %v920_v14 = vld [vmem:[#allocation3 + $0x17b8] sm:$0xff] }
 0x1b2   :  { %6900 = vmatprep.subr.bf16.mxu1 %v8974_v17  ;;  %v8749_v17 = vcombine.low %v935_v4, %v951_v5  ;;  %v8720_v18 = vcombine.high %v904_v13, %v920_v14  ;;  %v232_v2 = vld [vmem:[#allocation3 + $0x238] sm:$0xff] }
 0x1b3   :  { %6858 = vmatpush2.bf16.msra.mxu0 %v8461_v21  ;;  %v872_v21 = vld [vmem:[#allocation3 + $0x1638] sm:$0xff] }
 0x1b4   :  { %6859 = vmatprep.subr.bf16.mxu0 %v8430_v23  ;;  %v8207_v23 = vcombine.low %v392_v10, %v408_v11  ;;  %v248_v3 = vld [vmem:[#allocation3 + $0x2b8] sm:$0xff] }
 0x1b5   :  { %6901 = vmatpush2.bf16.msra.mxu1 %v8973_v22  ;;  %v888_v22 = vld [vmem:[#allocation3 + $0x16b8] sm:$0xff] }
 0x1b6   :  { %6902 = vmatprep.subr.bf16.mxu1 %v8942_v15  ;;  %v8719_v15 = vcombine.low %v904_v13, %v920_v14  ;;  %v8688_v43 = vcombine.high %v872_v21, %v888_v22  ;;  %v744_v4 = vld [vmem:[#allocation3 + $0x1238] sm:$0xff] }
 0x1b7   :  { %6860 = vmatpush2.bf16.msra.mxu0 %v8429_v27  ;;  %v760_v5 = vld [vmem:[#allocation3 + $0x12b8] sm:$0xff] }
 0x1b8   :  { %6861 = vmatprep.subr.bf16.mxu0 %v8398_v30  ;;  %v840_v30 = vld [vmem:[#allocation3 + $0x1538] sm:$0xff] }
 0x1b9   :  { %6903 = vmatpush2.bf16.msra.mxu1 %v8941_v29  ;;  %v9180_v29 = vld [vmem:[%s9429_s0] ss:$16 sps:$4 sm:$0xff]   ;;  %v200_v10 = vld [vmem:[#allocation3 + $0x138] sm:$0xff] }
 0x1ba   :  { %6904 = vmatprep.subr.bf16.mxu1 %v8910_v31  ;;  %v856_v31 = vld [vmem:[#allocation3 + $0x15b8] sm:$0xff] }
 0x1bb   :  { %6862 = vmatpush2.bf16.msra.mxu0 %v8397_v36  ;;  %v8656_v41 = vcombine.high %v840_v30, %v856_v31  ;;  %v8655_v51 = vcombine.low %v840_v30, %v856_v31  ;;  %v216_v11 = vld [vmem:[#allocation3 + $0x1b8] sm:$0xff]  ;;  %v7983_v31 = vcombine.low %v168_v19, %v184_v20 }
 0x1bc   :  { %6863 = vmatprep.subr.bf16.mxu0 %v8366_v38  ;;  %v8144_v38 = vcombine.high %v328_v25, %v344_v26  ;;  %v712_v13 = vld [vmem:[#allocation3 + $0x1138] sm:$0xff] }
 0x1bd   :  { %6905 = vmatpush2.bf16.msra.mxu1 %v8909_v37  ;;  %v8687_v37 = vcombine.low %v872_v21, %v888_v22  ;;  %v728_v14 = vld [vmem:[#allocation3 + $0x11b8] sm:$0xff] }
 0x1be   :  { %6906 = vmatprep.subr.bf16.mxu1 %v8878_v40  ;;  %v680_v21 = vld [vmem:[#allocation3 + $0x1038] sm:$0xff] }
 0x1bf   :  { %6864 = vmatpush2.bf16.msra.mxu0 %v8365_v46  ;;  %v696_v22 = vld [vmem:[#allocation3 + $0x10b8] sm:$0xff] }
 0x1c0   :  { %6865 = vmatprep.subr.bf16.mxu0 %v8334_v48  ;;  %v824_v48 = vld [vmem:[#allocation3 + $0x14b8] sm:$0xff] }
 0x1c1   :  { %6907 = vmatpush2.bf16.msra.mxu1 %v8877_v47  ;;  %v808_v47 = vld [vmem:[#allocation3 + $0x1438] sm:$0xff] }
 0x1c2   :  { %6908 = vmatprep.subr.bf16.mxu1 %v8846_v56  ;;  %v648_v25 = vld [vmem:[#allocation3 + $0xf38] sm:$0xff] }
 0x1c3   :  { %6866 = vmatpush2.bf16.msra.mxu0 %v8333_v52  ;;  %v8112_v52 = vcombine.high %v296_v12, %v312_v44  ;;  %v664_v26 = vld [vmem:[#allocation3 + $0xfb8] sm:$0xff] }
 0x1c4   :  { %6867 = vmatprep.subr.bf16.mxu0 %v8302_v54  ;;  %v8624_v54 = vcombine.high %v808_v47, %v824_v48  ;;  %v1176_v30 = vld [vmem:[#allocation3 + $0x1fb8] sm:$0xff] }
 0x1c5   :  { %6909 = vmatpush2.bf16.msra.mxu1 %v8845_v53 }
 0x1c6   :  { %6910 = vmatprep.subr.bf16.mxu1 %v8814_v55  ;;  %v264_v55 = vld [vmem:[#allocation3 + $0x338] sm:$0xff] }
 0x1c7   :  { %6868 = vmatpush2.bf16.msra.mxu0 %v8301_v62  ;;  %v8111_v62 = vcombine.low %v296_v12, %v312_v44 }
 0x1c8   :  { %6869 = vmatprep.subr.bf16.mxu0 %v8270_v0  ;;  %v8080_v0 = vcombine.high %v264_v55, %v280_v57 }
 0x1c9   :  { %6911 = vmatpush2.bf16.msra.mxu1 %v8813_v63  ;;  %v8623_v63 = vcombine.low %v808_v47, %v824_v48  ;;  %v600_v47 = vld [vmem:[#allocation3 + $0xdb8] sm:$0xff] }
 0x1ca   :  { %6912 = vmatprep.subr.bf16.mxu1 %v8782_v1  ;;  %v8592_v1 = vcombine.high %v776_v60, %v792_v61  ;;  %v1096_v48 = vld [vmem:[#allocation3 + $0x1d38] sm:$0xff] }
 0x1cb   :  { %6870 = vmatpush2.bf16.msra.mxu0 %v8269_v6  ;;  %v8079_v6 = vcombine.low %v264_v55, %v280_v57  ;;  %v1080_v55 = vld [vmem:[#allocation3 + $0x1cb8] sm:$0xff] }
 0x1cc   :  { %6871 = vmatprep.subr.bf16.mxu0 %v8238_v8  ;;  %v8048_v8 = vcombine.high %v232_v2, %v248_v3 }
 0x1cd   :  { %6913 = vmatpush2.bf16.msra.mxu1 %v8781_v7  ;;  %v8591_v7 = vcombine.low %v776_v60, %v792_v61 }
 0x1ce   :  { %6914 = vmatprep.subr.bf16.mxu1 %v8750_v9  ;;  %v8560_v9 = vcombine.high %v744_v4, %v760_v5 }
 0x1cf   :  { %6872 = vmatpush2.bf16.msra.mxu0 %v8237_v16  ;;  %v8047_v16 = vcombine.low %v232_v2, %v248_v3 }
 0x1d0   :  { %6927 = vmatprep.subr.bf16.mxu0 %v8208_v42  ;;  %v8016_v42 = vcombine.high %v200_v10, %v216_v11 }
 0x1d1   :  { %6915 = vmatpush2.bf16.msra.mxu1 %v8749_v17  ;;  %v8559_v17 = vcombine.low %v744_v4, %v760_v5 }
 0x1d2   :  { %6970 = vmatprep.subr.bf16.mxu1 %v8720_v18  ;;  %v6617_v27 = vpop.f32.mrf.mxu0  ;;  %6874 = vmatmul.mubr.bf16.vlgmr.msra.gmra.mxu0 %v9180_v29  ;;  %v8528_v18 = vcombine.high %v712_v13, %v728_v14 }
 0x1d3   :  { %6928 = vmatpush1.bf16.msra.mxu0 %v8207_v23  ;;  %6959 = vmatprep.mubr.bf16.mxu0 %v9156_v39  ;;  %v8015_v23 = vcombine.low %v200_v10, %v216_v11 }
 0x1d4   :  { %v6660_v32 = vpop.f32.mrf.mxu1  ;;  %6917 = vmatmul.mubr.bf16.vlgmr.msra.gmra.mxu1 %v9186_v33  ;;  %v6619_v36 = vpop.f32.mrf.mxu0  ;;  %6929 = vmatprep.subr.bf16.mxu0 %v8176_v24  ;;  %v7984_v24 = vcombine.high %v168_v19, %v184_v20 }
 0x1d5   :  { %v6661_v35 = vadd.f32 %v6660_v32, %v6617_v27  ;;  %6971 = vmatpush1.bf16.msra.mxu1 %v8719_v15  ;;  %7002 = vmatprep.mubr.bf16.mxu1 %v9165_v28  ;;  %v8527_v15 = vcombine.low %v712_v13, %v728_v14  ;;  %v1160_v27 = vld [vmem:[#allocation3 + $0x1f38] sm:$0xff]  ;;  %v8495_v32 = vcombine.low %v680_v21, %v696_v22 }
 0x1d6   :  { %v6662_v40 = vpop.f32.mrf.mxu1  ;;  %6972 = vmatprep.subr.bf16.mxu1 %v8688_v43  ;;  %v6621_v46 = vpop.f32.mrf.mxu0  ;;  %v8496_v43 = vcombine.high %v680_v21, %v696_v22  ;;  %v8975_v12 = vcombine.low %v1160_v27, %v1176_v30 }
 0x1d7   :  { %7902 = vst [vmem:[%s9431_s2 + $0x30] sm:$0xff] %v6661_v35  ;;  %v6663_v45 = vadd.f32 %v6662_v40, %v6619_v36  ;;  %6930 = vmatpush1.bf16.msra.mxu0 %v8175_v34  ;;  %v8464_v34 = vcombine.high %v648_v25, %v664_v26  ;;  %v8976_v35 = vcombine.high %v1160_v27, %v1176_v30  ;;  %v616_v36 = vld [vmem:[#allocation3 + $0xe38] sm:$0xff] }
 0x1d8   :  { %v6664_v56 = vpop.f32.mrf.mxu1  ;;  %v6623_v50 = vpop.f32.mrf.mxu0  ;;  %6931 = vmatprep.subr.bf16.mxu0 %v8144_v38  ;;  %v1128_v38 = vld [vmem:[#allocation3 + $0x1e38] sm:$0xff] }
 0x1d9   :  { %7903 = vst [vmem:[%s9431_s2 + $0x38] sm:$0xff] %v6663_v45  ;;  %v6665_v59 = vadd.f32 %v6664_v56, %v6621_v46  ;;  %6973 = vmatpush1.bf16.msra.mxu1 %v8687_v37  ;;  %v632_v37 = vld [vmem:[#allocation3 + $0xeb8] sm:$0xff] }
 0x1da   :  { %v6666_v53 = vpop.f32.mrf.mxu1  ;;  %6974 = vmatprep.subr.bf16.mxu1 %v8656_v41  ;;  %v1144_v40 = vld [vmem:[#allocation3 + $0x1eb8] sm:$0xff]  ;;  %v8463_v41 = vcombine.low %v648_v25, %v664_v26  ;;  %v8432_v44 = vcombine.high %v616_v36, %v632_v37 }
 0x1db   :  { %7934 = vst [vmem:[%s9431_s2 + $0x130] sm:$0xff] %v6665_v59  ;;  %v6667_v58 = vadd.f32 %v6666_v53, %v6623_v50  ;;  %6932 = vmatpush1.bf16.msra.mxu0 %v8143_v49  ;;  %v8944_v45 = vcombine.high %v1128_v38, %v1144_v40  ;;  %v584_v46 = vld [vmem:[#allocation3 + $0xd38] sm:$0xff]  ;;  %v8431_v49 = vcombine.low %v616_v36, %v632_v37 }
 0x1dc   :  { %6933 = vmatprep.subr.bf16.mxu0 %v8112_v52  ;;  %v1112_v56 = vld [vmem:[#allocation3 + $0x1db8] sm:$0xff]  ;;  %v8943_v59 = vcombine.low %v1128_v38, %v1144_v40  ;;  %v8400_v50 = vcombine.high %v584_v46, %v600_v47  ;;  %v8399_v57 = vcombine.low %v584_v46, %v600_v47 }
 0x1dd   :  { %7935 = vst [vmem:[%s9431_s2 + $0x138] sm:$0xff] %v6667_v58  ;;  %6975 = vmatpush1.bf16.msra.mxu1 %v8655_v51  ;;  %v8912_v51 = vcombine.high %v1096_v48, %v1112_v56  ;;  %v552_v52 = vld [vmem:[#allocation3 + $0xc38] sm:$0xff]  ;;  %v8911_v58 = vcombine.low %v1096_v48, %v1112_v56 }
 0x1de   :  { %6976 = vmatprep.subr.bf16.mxu1 %v8624_v54  ;;  %v568_v53 = vld [vmem:[#allocation3 + $0xcb8] sm:$0xff] }
 0x1df   :  { %6934 = vmatpush1.bf16.msra.mxu0 %v8111_v62  ;;  %v1064_v54 = vld [vmem:[#allocation3 + $0x1c38] sm:$0xff]  ;;  %v8368_v60 = vcombine.high %v552_v52, %v568_v53  ;;  %v8367_v2 = vcombine.low %v552_v52, %v568_v53  ;;  %v857_v52 = vld [vmem:[#allocation3 + $0x15c0] sm:$0xff] }
 0x1e0   :  { %6935 = vmatprep.subr.bf16.mxu0 %v8080_v0  ;;  %v8880_v61 = vcombine.high %v1064_v54, %v1080_v55  ;;  %v520_v62 = vld [vmem:[#allocation3 + $0xb38] sm:$0xff]  ;;  %v8879_v3 = vcombine.low %v1064_v54, %v1080_v55 }
 0x1e1   :  { %6977 = vmatpush1.bf16.msra.mxu1 %v8623_v63  ;;  %v536_v63 = vld [vmem:[#allocation3 + $0xbb8] sm:$0xff] }
 0x1e2   :  { %6978 = vmatprep.subr.bf16.mxu1 %v8592_v1  ;;  %v1032_v0 = vld [vmem:[#allocation3 + $0x1b38] sm:$0xff]  ;;  %v8336_v4 = vcombine.high %v520_v62, %v536_v63  ;;  %v8335_v10 = vcombine.low %v520_v62, %v536_v63  ;;  %v297_v63 = vld [vmem:[#allocation3 + $0x440] sm:$0xff] }
 0x1e3   :  { %6936 = vmatpush1.bf16.msra.mxu0 %v8079_v6  ;;  %v1048_v1 = vld [vmem:[#allocation3 + $0x1bb8] sm:$0xff] }
 0x1e4   :  { %6937 = vmatprep.subr.bf16.mxu0 %v8048_v8  ;;  %v8848_v5 = vcombine.high %v1032_v0, %v1048_v1  ;;  %v488_v6 = vld [vmem:[#allocation3 + $0xa38] sm:$0xff]  ;;  %v8847_v11 = vcombine.low %v1032_v0, %v1048_v1  ;;  %v313_v0 = vld [vmem:[#allocation3 + $0x4c0] sm:$0xff] }
 0x1e5   :  { %6979 = vmatpush1.bf16.msra.mxu1 %v8591_v7  ;;  %v504_v7 = vld [vmem:[#allocation3 + $0xab8] sm:$0xff] }
 0x1e6   :  { %6980 = vmatprep.subr.bf16.mxu1 %v8560_v9  ;;  %v1000_v8 = vld [vmem:[#allocation3 + $0x1a38] sm:$0xff]  ;;  %v8304_v13 = vcombine.high %v488_v6, %v504_v7  ;;  %v8303_v19 = vcombine.low %v488_v6, %v504_v7 }
 0x1e7   :  { %6938 = vmatpush1.bf16.msra.mxu0 %v8047_v16  ;;  %v1016_v9 = vld [vmem:[#allocation3 + $0x1ab8] sm:$0xff] }
 0x1e8   :  { %6939 = vmatprep.subr.bf16.mxu0 %v8016_v42  ;;  %v8816_v14 = vcombine.high %v1000_v8, %v1016_v9  ;;  %v456_v16 = vld [vmem:[#allocation3 + $0x938] sm:$0xff]  ;;  %v8815_v20 = vcombine.low %v1000_v8, %v1016_v9  ;;  %v8114_v9 = vcombine.high %v297_v63, %v313_v0 }
 0x1e9   :  { %6981 = vmatpush1.bf16.msra.mxu1 %v8559_v17  ;;  %v472_v17 = vld [vmem:[#allocation3 + $0x9b8] sm:$0xff] }
 0x1ea   :  { %6982 = vmatprep.subr.bf16.mxu1 %v8528_v18  ;;  %v968_v42 = vld [vmem:[#allocation3 + $0x1938] sm:$0xff]  ;;  %v8272_v21 = vcombine.high %v456_v16, %v472_v17  ;;  %v8271_v25 = vcombine.low %v456_v16, %v472_v17  ;;  %v777_v16 = vld [vmem:[#allocation3 + $0x1340] sm:$0xff] }
 0x1eb   :  { %6940 = vmatpush1.bf16.msra.mxu0 %v8015_v23  ;;  %v984_v18 = vld [vmem:[#allocation3 + $0x19b8] sm:$0xff]  ;;  %v793_v17 = vld [vmem:[#allocation3 + $0x13c0] sm:$0xff] }
 0x1ec   :  { %6941 = vmatprep.subr.bf16.mxu0 %v7984_v24  ;;  %v8784_v22 = vcombine.high %v968_v42, %v984_v18  ;;  %v424_v23 = vld [vmem:[#allocation3 + $0x838] sm:$0xff]  ;;  %v8783_v26 = vcombine.low %v968_v42, %v984_v18  ;;  %v8113_v42 = vcombine.low %v297_v63, %v313_v0  ;;  %v585_v0 = vld [vmem:[#allocation3 + $0xd40] sm:$0xff] }
 0x1ed   :  { %6983 = vmatpush1.bf16.msra.mxu1 %v8527_v15  ;;  %v440_v15 = vld [vmem:[#allocation3 + $0x8b8] sm:$0xff] }
 0x1ee   :  { %6984 = vmatprep.subr.bf16.mxu1 %v8496_v43  ;;  %v936_v24 = vld [vmem:[#allocation3 + $0x1838] sm:$0xff]  ;;  %v8240_v27 = vcombine.high %v424_v23, %v440_v15  ;;  %v8239_v36 = vcombine.low %v424_v23, %v440_v15  ;;  %v745_v23 = vld [vmem:[#allocation3 + $0x1240] sm:$0xff] }
 0x1ef   :  { %6942 = vmatpush1.bf16.msra.mxu0 %v7983_v31  ;;  %v952_v43 = vld [vmem:[#allocation3 + $0x18b8] sm:$0xff]  ;;  %v393_v31 = vld [vmem:[#allocation3 + $0x740] sm:$0xff] }
 0x1f0   :  { %6943 = vmatprep.subr.bf16.mxu0 %v8464_v34  ;;  %v8752_v30 = vcombine.high %v936_v24, %v952_v43  ;;  %v905_v34 = vld [vmem:[#allocation3 + $0x1740] sm:$0xff]  ;;  %v8751_v37 = vcombine.low %v936_v24, %v952_v43  ;;  %v8593_v43 = vcombine.low %v777_v16, %v793_v17 }
 0x1f1   :  { %6985 = vmatpush1.bf16.msra.mxu1 %v8495_v32  ;;  %v409_v32 = vld [vmem:[#allocation3 + $0x7c0] sm:$0xff] }
 0x1f2   :  { %6986 = vmatprep.subr.bf16.mxu1 %v8976_v35  ;;  %v921_v35 = vld [vmem:[#allocation3 + $0x17c0] sm:$0xff]  ;;  %v8210_v38 = vcombine.high %v393_v31, %v409_v32  ;;  %v8209_v46 = vcombine.low %v393_v31, %v409_v32 }
 0x1f3   :  { %6944 = vmatpush2.bf16.msra.mxu0 %v8463_v41  ;;  %v8722_v40 = vcombine.high %v905_v34, %v921_v35  ;;  %v361_v41 = vld [vmem:[#allocation3 + $0x640] sm:$0xff]  ;;  %v8721_v47 = vcombine.low %v905_v34, %v921_v35 }
 0x1f4   :  { %6945 = vmatprep.subr.bf16.mxu0 %v8432_v44  ;;  %v873_v44 = vld [vmem:[#allocation3 + $0x1640] sm:$0xff] }
 0x1f5   :  { %6987 = vmatpush2.bf16.msra.mxu1 %v8975_v12  ;;  %v377_v12 = vld [vmem:[#allocation3 + $0x6c0] sm:$0xff] }
 0x1f6   :  { %6988 = vmatprep.subr.bf16.mxu1 %v8944_v45  ;;  %v889_v45 = vld [vmem:[#allocation3 + $0x16c0] sm:$0xff]  ;;  %v8178_v48 = vcombine.high %v361_v41, %v377_v12  ;;  %v8177_v54 = vcombine.low %v361_v41, %v377_v12 }
 0x1f7   :  { %6946 = vmatpush2.bf16.msra.mxu0 %v8431_v49  ;;  %v8690_v56 = vcombine.high %v873_v44, %v889_v45  ;;  %v329_v49 = vld [vmem:[#allocation3 + $0x540] sm:$0xff] }
 0x1f8   :  { %6947 = vmatprep.subr.bf16.mxu0 %v8400_v50  ;;  %v761_v15 = vld [vmem:[#allocation3 + $0x12c0] sm:$0xff] }
 0x1f9   :  { %6989 = vmatpush2.bf16.msra.mxu1 %v8943_v59  ;;  %v345_v59 = vld [vmem:[#allocation3 + $0x5c0] sm:$0xff]  ;;  %v8561_v35 = vcombine.low %v745_v23, %v761_v15 }
 0x1fa   :  { %6990 = vmatprep.subr.bf16.mxu1 %v8912_v51  ;;  %v841_v51 = vld [vmem:[#allocation3 + $0x1540] sm:$0xff]  ;;  %v8145_v6 = vcombine.low %v329_v49, %v345_v59 }
 0x1fb   :  { %6948 = vmatpush2.bf16.msra.mxu0 %v8399_v57  ;;  %v8658_v62 = vcombine.high %v841_v51, %v857_v52  ;;  %v8657_v8 = vcombine.low %v841_v51, %v857_v52  ;;  %v713_v31 = vld [vmem:[#allocation3 + $0x1140] sm:$0xff] }
 0x1fc   :  { %6949 = vmatprep.subr.bf16.mxu0 %v8368_v60  ;;  %v8146_v60 = vcombine.high %v329_v49, %v345_v59  ;;  %v729_v32 = vld [vmem:[#allocation3 + $0x11c0] sm:$0xff] }
 0x1fd   :  { %6991 = vmatpush2.bf16.msra.mxu1 %v8911_v58  ;;  %v8689_v58 = vcombine.low %v873_v44, %v889_v45  ;;  %v681_v41 = vld [vmem:[#allocation3 + $0x1040] sm:$0xff]  ;;  %v8529_v45 = vcombine.low %v713_v31, %v729_v32 }
 0x1fe   :  { %6992 = vmatprep.subr.bf16.mxu1 %v8880_v61  ;;  %v697_v12 = vld [vmem:[#allocation3 + $0x10c0] sm:$0xff] }
 0x1ff   :  { %6950 = vmatpush2.bf16.msra.mxu0 %v8367_v2  ;;  %v1161_v49 = vld [vmem:[#allocation3 + $0x1f40] sm:$0xff]  ;;  %v8497_v51 = vcombine.low %v681_v41, %v697_v12 }
 0x200   :  { %6951 = vmatprep.subr.bf16.mxu0 %v8336_v4  ;;  %v825_v4 = vld [vmem:[#allocation3 + $0x14c0] sm:$0xff] }
 0x201   :  { %6993 = vmatpush2.bf16.msra.mxu1 %v8879_v3  ;;  %v809_v3 = vld [vmem:[#allocation3 + $0x1440] sm:$0xff] }
 0x202   :  { %6994 = vmatprep.subr.bf16.mxu1 %v8848_v5  ;;  %v8625_v18 = vcombine.low %v809_v3, %v825_v4  ;;  %v1177_v59 = vld [vmem:[#allocation3 + $0x1fc0] sm:$0xff] }
 0x203   :  { %6952 = vmatpush2.bf16.msra.mxu0 %v8335_v10 }
 0x204   :  { %6953 = vmatprep.subr.bf16.mxu0 %v8304_v13  ;;  %v265_v13 = vld [vmem:[#allocation3 + $0x340] sm:$0xff] }
 0x205   :  { %6995 = vmatpush2.bf16.msra.mxu1 %v8847_v11  ;;  %v8626_v11 = vcombine.high %v809_v3, %v825_v4  ;;  %v1113_v3 = vld [vmem:[#allocation3 + $0x1dc0] sm:$0xff] }
 0x206   :  { %6996 = vmatprep.subr.bf16.mxu1 %v8816_v14  ;;  %v281_v14 = vld [vmem:[#allocation3 + $0x3c0] sm:$0xff] }
 0x207   :  { %6954 = vmatpush2.bf16.msra.mxu0 %v8303_v19  ;;  %v8082_v19 = vcombine.high %v265_v13, %v281_v14  ;;  %v8081_v24 = vcombine.low %v265_v13, %v281_v14 }
 0x208   :  { %6955 = vmatprep.subr.bf16.mxu0 %v8272_v21  ;;  %v233_v21 = vld [vmem:[#allocation3 + $0x240] sm:$0xff] }
 0x209   :  { %6997 = vmatpush2.bf16.msra.mxu1 %v8815_v20  ;;  %v8594_v20 = vcombine.high %v777_v16, %v793_v17  ;;  %v521_v16 = vld [vmem:[#allocation3 + $0xb40] sm:$0xff] }
 0x20a   :  { %6998 = vmatprep.subr.bf16.mxu1 %v8784_v22  ;;  %v249_v22 = vld [vmem:[#allocation3 + $0x2c0] sm:$0xff] }
 0x20b   :  { %6956 = vmatpush2.bf16.msra.mxu0 %v8271_v25  ;;  %v8050_v25 = vcombine.high %v233_v21, %v249_v22  ;;  %v8049_v34 = vcombine.low %v233_v21, %v249_v22  ;;  %v537_v17 = vld [vmem:[#allocation3 + $0xbc0] sm:$0xff] }
 0x20c   :  { %6957 = vmatprep.subr.bf16.mxu0 %v8240_v27  ;;  %v201_v27 = vld [vmem:[#allocation3 + $0x140] sm:$0xff]  ;;  %v8338_v21 = vcombine.high %v521_v16, %v537_v17 }
 0x20d   :  { %6999 = vmatpush2.bf16.msra.mxu1 %v8783_v26  ;;  %v8562_v26 = vcombine.high %v745_v23, %v761_v15  ;;  %v489_v23 = vld [vmem:[#allocation3 + $0xa40] sm:$0xff] }
 0x20e   :  { %7000 = vmatprep.subr.bf16.mxu1 %v8752_v30  ;;  %v217_v30 = vld [vmem:[#allocation3 + $0x1c0] sm:$0xff] }
 0x20f   :  { %6958 = vmatpush2.bf16.msra.mxu0 %v8239_v36  ;;  %v8018_v36 = vcombine.high %v201_v27, %v217_v30  ;;  %v8017_v44 = vcombine.low %v201_v27, %v217_v30  ;;  %v505_v15 = vld [vmem:[#allocation3 + $0xac0] sm:$0xff] }
 0x210   :  { %7013 = vmatprep.subr.bf16.mxu0 %v8210_v38  ;;  %v169_v38 = vld [vmem:[#allocation3 + $0x40] sm:$0xff]  ;;  %v8306_v27 = vcombine.high %v489_v23, %v505_v15 }
 0x211   :  { %7001 = vmatpush2.bf16.msra.mxu1 %v8751_v37  ;;  %v8530_v37 = vcombine.high %v713_v31, %v729_v32  ;;  %v457_v31 = vld [vmem:[#allocation3 + $0x940] sm:$0xff] }
 0x212   :  { %7056 = vmatprep.subr.bf16.mxu1 %v8722_v40  ;;  %v6703_v50 = vpop.f32.mrf.mxu0  ;;  %6960 = vmatmul.mubr.bf16.vlgmr.msra.gmra.mxu0 %v9180_v29  ;;  %v185_v40 = vld [vmem:[#allocation3 + $0xc0] sm:$0xff] }
 0x213   :  { %7014 = vmatpush1.bf16.msra.mxu0 %v8209_v46  ;;  %7045 = vmatprep.mubr.bf16.mxu0 %v9156_v39  ;;  %v7986_v46 = vcombine.high %v169_v38, %v185_v40  ;;  %v473_v32 = vld [vmem:[#allocation3 + $0x9c0] sm:$0xff] }
 0x214   :  { %v6746_v53 = vpop.f32.mrf.mxu1  ;;  %7003 = vmatmul.mubr.bf16.vlgmr.msra.gmra.mxu1 %v9186_v33  ;;  %v6705_v57 = vpop.f32.mrf.mxu0  ;;  %7015 = vmatprep.subr.bf16.mxu0 %v8178_v48  ;;  %v649_v48 = vld [vmem:[#allocation3 + $0xf40] sm:$0xff] }
 0x215   :  { %v6747_v55 = vadd.f32 %v6746_v53, %v6703_v50  ;;  %7057 = vmatpush1.bf16.msra.mxu1 %v8721_v47  ;;  %7088 = vmatprep.mubr.bf16.mxu1 %v9165_v28  ;;  %v8498_v47 = vcombine.high %v681_v41, %v697_v12  ;;  %v7985_v50 = vcombine.low %v169_v38, %v185_v40  ;;  %v425_v41 = vld [vmem:[#allocation3 + $0x840] sm:$0xff] }
 0x216   :  { %v6748_v61 = vpop.f32.mrf.mxu1  ;;  %7058 = vmatprep.subr.bf16.mxu1 %v8690_v56  ;;  %v6707_v2 = vpop.f32.mrf.mxu0  ;;  %v665_v56 = vld [vmem:[#allocation3 + $0xfc0] sm:$0xff]  ;;  %v8978_v53 = vcombine.high %v1161_v49, %v1177_v59  ;;  %v8274_v38 = vcombine.high %v457_v31, %v473_v32 }
 0x217   :  { %7904 = vst [vmem:[%s9431_s2 + $0x40] sm:$0xff] %v6747_v55  ;;  %v6749_v1 = vadd.f32 %v6748_v61, %v6705_v57  ;;  %7016 = vmatpush1.bf16.msra.mxu0 %v8177_v54  ;;  %v8466_v52 = vcombine.high %v649_v48, %v665_v56  ;;  %v617_v54 = vld [vmem:[#allocation3 + $0xe40] sm:$0xff]  ;;  %v8977_v61 = vcombine.low %v1161_v49, %v1177_v59  ;;  %v394_v49 = vld [vmem:[#allocation3 + $0x748] sm:$0xff] }
 0x218   :  { %v6750_v5 = vpop.f32.mrf.mxu1  ;;  %v6709_v39 = vpop.f32.mrf.mxu0  ;;  %7017 = vmatprep.subr.bf16.mxu0 %v8146_v60  ;;  %v633_v55 = vld [vmem:[#allocation3 + $0xec0] sm:$0xff]  ;;  %v8465_v60 = vcombine.low %v649_v48, %v665_v56  ;;  %v410_v59 = vld [vmem:[#allocation3 + $0x7c8] sm:$0xff] }
 0x219   :  { %7905 = vst [vmem:[%s9431_s2 + $0x48] sm:$0xff] %v6749_v1  ;;  %v6751_v7 = vadd.f32 %v6750_v5, %v6707_v2  ;;  %7059 = vmatpush1.bf16.msra.mxu1 %v8689_v58  ;;  %v1129_v57 = vld [vmem:[#allocation3 + $0x1e40] sm:$0xff]  ;;  %v8433_v4 = vcombine.low %v617_v54, %v633_v55 }
 0x21a   :  { %v6752_v10 = vpop.f32.mrf.mxu1  ;;  %7060 = vmatprep.subr.bf16.mxu1 %v8658_v62  ;;  %v1145_v58 = vld [vmem:[#allocation3 + $0x1ec0] sm:$0xff]  ;;  %v8434_v62 = vcombine.high %v617_v54, %v633_v55  ;;  %v8212_v54 = vcombine.high %v394_v49, %v410_v59 }
 0x21b   :  { %7936 = vst [vmem:[%s9431_s2 + $0x140] sm:$0xff] %v6751_v7  ;;  %v6753_v28 = vadd.f32 %v6752_v10, %v6709_v39  ;;  %7018 = vmatpush1.bf16.msra.mxu0 %v8145_v6  ;;  %v8946_v63 = vcombine.high %v1129_v57, %v1145_v58  ;;  %v601_v1 = vld [vmem:[#allocation3 + $0xdc0] sm:$0xff]  ;;  %v8945_v5 = vcombine.low %v1129_v57, %v1145_v58  ;;  %v362_v57 = vld [vmem:[#allocation3 + $0x648] sm:$0xff] }
 0x21c   :  { %7019 = vmatprep.subr.bf16.mxu0 %v8114_v9  ;;  %v1097_v2 = vld [vmem:[#allocation3 + $0x1d40] sm:$0xff]  ;;  %v8402_v6 = vcombine.high %v585_v0, %v601_v1  ;;  %v378_v58 = vld [vmem:[#allocation3 + $0x6c8] sm:$0xff] }
 0x21d   :  { %7937 = vst [vmem:[%s9431_s2 + $0x148] sm:$0xff] %v6753_v28  ;;  %7061 = vmatpush1.bf16.msra.mxu1 %v8657_v8  ;;  %v8914_v7 = vcombine.high %v1097_v2, %v1113_v3  ;;  %v553_v39 = vld [vmem:[#allocation3 + $0xc40] sm:$0xff]  ;;  %v8913_v13 = vcombine.low %v1097_v2, %v1113_v3  ;;  %v330_v2 = vld [vmem:[#allocation3 + $0x548] sm:$0xff] }
 0x21e   :  { %7062 = vmatprep.subr.bf16.mxu1 %v8626_v11  ;;  %v569_v8 = vld [vmem:[#allocation3 + $0xcc0] sm:$0xff]  ;;  %v8401_v11 = vcombine.low %v585_v0, %v601_v1  ;;  %v8180_v0 = vcombine.high %v362_v57, %v378_v58  ;;  %v346_v3 = vld [vmem:[#allocation3 + $0x5c8] sm:$0xff] }
 0x21f   :  { %7020 = vmatpush1.bf16.msra.mxu0 %v8113_v42  ;;  %v1065_v9 = vld [vmem:[#allocation3 + $0x1c40] sm:$0xff]  ;;  %v8370_v14 = vcombine.high %v553_v39, %v569_v8 }
 0x220   :  { %7021 = vmatprep.subr.bf16.mxu0 %v8082_v19  ;;  %v1081_v10 = vld [vmem:[#allocation3 + $0x1cc0] sm:$0xff]  ;;  %v8369_v19 = vcombine.low %v553_v39, %v569_v8  ;;  %v8179_v39 = vcombine.low %v362_v57, %v378_v58  ;;  %v682_v57 = vld [vmem:[#allocation3 + $0x1048] sm:$0xff] }
 0x221   :  { %7063 = vmatpush1.bf16.msra.mxu1 %v8625_v18  ;;  %v8882_v28 = vcombine.high %v1065_v9, %v1081_v10  ;;  %v1033_v42 = vld [vmem:[#allocation3 + $0x1b40] sm:$0xff]  ;;  %v698_v58 = vld [vmem:[#allocation3 + $0x10c8] sm:$0xff] }
 0x222   :  { %7064 = vmatprep.subr.bf16.mxu1 %v8594_v20  ;;  %v1049_v18 = vld [vmem:[#allocation3 + $0x1bc0] sm:$0xff]  ;;  %v8881_v20 = vcombine.low %v1065_v9, %v1081_v10 }
 0x223   :  { %7022 = vmatpush1.bf16.msra.mxu0 %v8081_v24  ;;  %v8850_v22 = vcombine.high %v1033_v42, %v1049_v18  ;;  %v1001_v24 = vld [vmem:[#allocation3 + $0x1a40] sm:$0xff] }
 0x224   :  { %7023 = vmatprep.subr.bf16.mxu0 %v8050_v25  ;;  %v8337_v25 = vcombine.low %v521_v16, %v537_v17  ;;  %v441_v12 = vld [vmem:[#allocation3 + $0x8c0] sm:$0xff]  ;;  %v314_v16 = vld [vmem:[#allocation3 + $0x4c8] sm:$0xff] }
 0x225   :  { %7065 = vmatpush1.bf16.msra.mxu1 %v8593_v43  ;;  %v1017_v43 = vld [vmem:[#allocation3 + $0x1ac0] sm:$0xff]  ;;  %v8242_v48 = vcombine.high %v425_v41, %v441_v12 }
 0x226   :  { %7066 = vmatprep.subr.bf16.mxu1 %v8562_v26  ;;  %v8849_v26 = vcombine.low %v1033_v42, %v1049_v18  ;;  %v8818_v30 = vcombine.high %v1001_v24, %v1017_v43  ;;  %v810_v42 = vld [vmem:[#allocation3 + $0x1448] sm:$0xff] }
 0x227   :  { %7024 = vmatpush1.bf16.msra.mxu0 %v8049_v34  ;;  %v969_v34 = vld [vmem:[#allocation3 + $0x1940] sm:$0xff]  ;;  %v826_v18 = vld [vmem:[#allocation3 + $0x14c8] sm:$0xff] }
 0x228   :  { %7025 = vmatprep.subr.bf16.mxu0 %v8018_v36  ;;  %v8305_v36 = vcombine.low %v489_v23, %v505_v15 }
 0x229   :  { %7067 = vmatpush1.bf16.msra.mxu1 %v8561_v35  ;;  %v985_v35 = vld [vmem:[#allocation3 + $0x19c0] sm:$0xff] }
 0x22a   :  { %7068 = vmatprep.subr.bf16.mxu1 %v8530_v37  ;;  %v8817_v37 = vcombine.low %v1001_v24, %v1017_v43  ;;  %v8786_v40 = vcombine.high %v969_v34, %v985_v35 }
 0x22b   :  { %7026 = vmatpush1.bf16.msra.mxu0 %v8017_v44  ;;  %v937_v44 = vld [vmem:[#allocation3 + $0x1840] sm:$0xff] }
 0x22c   :  { %7027 = vmatprep.subr.bf16.mxu0 %v7986_v46  ;;  %v8273_v46 = vcombine.low %v457_v31, %v473_v32  ;;  %v778_v31 = vld [vmem:[#allocation3 + $0x1348] sm:$0xff] }
 0x22d   :  { %7069 = vmatpush1.bf16.msra.mxu1 %v8529_v45  ;;  %v953_v45 = vld [vmem:[#allocation3 + $0x18c0] sm:$0xff]  ;;  %v794_v32 = vld [vmem:[#allocation3 + $0x13c8] sm:$0xff] }
 0x22e   :  { %7070 = vmatprep.subr.bf16.mxu1 %v8498_v47  ;;  %v8785_v47 = vcombine.low %v969_v34, %v985_v35  ;;  %v8754_v56 = vcombine.high %v937_v44, %v953_v45  ;;  %v8627_v35 = vcombine.low %v810_v42, %v826_v18 }
 0x22f   :  { %7028 = vmatpush1.bf16.msra.mxu0 %v7985_v50  ;;  %v906_v50 = vld [vmem:[#allocation3 + $0x1748] sm:$0xff] }
 0x230   :  { %7029 = vmatprep.subr.bf16.mxu0 %v8466_v52  ;;  %v8241_v52 = vcombine.low %v425_v41, %v441_v12  ;;  %v746_v41 = vld [vmem:[#allocation3 + $0x1248] sm:$0xff] }
 0x231   :  { %7071 = vmatpush1.bf16.msra.mxu1 %v8497_v51  ;;  %v922_v51 = vld [vmem:[#allocation3 + $0x17c8] sm:$0xff] }
 0x232   :  { %7072 = vmatprep.subr.bf16.mxu1 %v8978_v53  ;;  %v8753_v53 = vcombine.low %v937_v44, %v953_v45  ;;  %v8724_v55 = vcombine.high %v906_v50, %v922_v51  ;;  %v762_v12 = vld [vmem:[#allocation3 + $0x12c8] sm:$0xff]  ;;  %v8595_v45 = vcombine.low %v778_v31, %v794_v32 }
 0x233   :  { %7030 = vmatpush2.bf16.msra.mxu0 %v8465_v60  ;;  %v874_v60 = vld [vmem:[#allocation3 + $0x1648] sm:$0xff] }
 0x234   :  { %7031 = vmatprep.subr.bf16.mxu0 %v8434_v62  ;;  %v8211_v62 = vcombine.low %v394_v49, %v410_v59  ;;  %v714_v49 = vld [vmem:[#allocation3 + $0x1148] sm:$0xff] }
 0x235   :  { %7073 = vmatpush2.bf16.msra.mxu1 %v8977_v61  ;;  %v890_v61 = vld [vmem:[#allocation3 + $0x16c8] sm:$0xff] }
 0x236   :  { %7074 = vmatprep.subr.bf16.mxu1 %v8946_v63  ;;  %v8723_v63 = vcombine.low %v906_v50, %v922_v51  ;;  %v8692_v1 = vcombine.high %v874_v60, %v890_v61  ;;  %v8691_v10 = vcombine.low %v874_v60, %v890_v61  ;;  %v730_v59 = vld [vmem:[#allocation3 + $0x11c8] sm:$0xff]  ;;  %v8563_v51 = vcombine.low %v746_v41, %v762_v12 }
 0x237   :  { %7032 = vmatpush2.bf16.msra.mxu0 %v8433_v4  ;;  %v8531_v61 = vcombine.low %v714_v49, %v730_v59 }
 0x238   :  { %7033 = vmatprep.subr.bf16.mxu0 %v8402_v6  ;;  %v858_v6 = vld [vmem:[#allocation3 + $0x15c8] sm:$0xff] }
 0x239   :  { %7075 = vmatpush2.bf16.msra.mxu1 %v8945_v5  ;;  %v842_v5 = vld [vmem:[#allocation3 + $0x1548] sm:$0xff] }
 0x23a   :  { %7076 = vmatprep.subr.bf16.mxu1 %v8914_v7  ;;  %v8659_v15 = vcombine.low %v842_v5, %v858_v6 }
 0x23b   :  { %7034 = vmatpush2.bf16.msra.mxu0 %v8401_v11  ;;  %v8148_v11 = vcombine.high %v330_v2, %v346_v3 }
 0x23c   :  { %7035 = vmatprep.subr.bf16.mxu0 %v8370_v14  ;;  %v8660_v14 = vcombine.high %v842_v5, %v858_v6  ;;  %v8499_v5 = vcombine.low %v682_v57, %v698_v58 }
 0x23d   :  { %7077 = vmatpush2.bf16.msra.mxu1 %v8913_v13 }
 0x23e   :  { %7078 = vmatprep.subr.bf16.mxu1 %v8882_v28  ;;  %v298_v28 = vld [vmem:[#allocation3 + $0x448] sm:$0xff] }
 0x23f   :  { %7036 = vmatpush2.bf16.msra.mxu0 %v8369_v19  ;;  %v9233_v19 = vld [vmem:[%s9429_s0 + $0xc] ss:$16 sps:$4 sm:$0xff]   ;;  %v8116_v24 = vcombine.high %v298_v28, %v314_v16  ;;  %v8115_v34 = vcombine.low %v298_v28, %v314_v16 }
 0x240   :  { %7037 = vmatprep.subr.bf16.mxu0 %v8338_v21  ;;  %v8147_v21 = vcombine.low %v330_v2, %v346_v3  ;;  %v1162_v2 = vld [vmem:[#allocation3 + $0x1f48] sm:$0xff] }
 0x241   :  { %7079 = vmatpush2.bf16.msra.mxu1 %v8881_v20  ;;  %v1178_v3 = vld [vmem:[#allocation3 + $0x1fc8] sm:$0xff] }
 0x242   :  { %7080 = vmatprep.subr.bf16.mxu1 %v8850_v22  ;;  %v586_v16 = vld [vmem:[#allocation3 + $0xd48] sm:$0xff] }
 0x243   :  { %7038 = vmatpush2.bf16.msra.mxu0 %v8337_v25  ;;  %v8628_v25 = vcombine.high %v810_v42, %v826_v18  ;;  %v1114_v42 = vld [vmem:[#allocation3 + $0x1dc8] sm:$0xff] }
 0x244   :  { %7039 = vmatprep.subr.bf16.mxu0 %v8306_v27  ;;  %v282_v27 = vld [vmem:[#allocation3 + $0x3c8] sm:$0xff] }
 0x245   :  { %7081 = vmatpush2.bf16.msra.mxu1 %v8849_v26  ;;  %v266_v26 = vld [vmem:[#allocation3 + $0x348] sm:$0xff] }
 0x246   :  { %7082 = vmatprep.subr.bf16.mxu1 %v8818_v30  ;;  %v8083_v44 = vcombine.low %v266_v26, %v282_v27 }
 0x247   :  { %7040 = vmatpush2.bf16.msra.mxu0 %v8305_v36  ;;  %v8084_v36 = vcombine.high %v266_v26, %v282_v27 }
 0x248   :  { %7041 = vmatprep.subr.bf16.mxu0 %v8274_v38  ;;  %v234_v38 = vld [vmem:[#allocation3 + $0x248] sm:$0xff] }
 0x249   :  { %7083 = vmatpush2.bf16.msra.mxu1 %v8817_v37  ;;  %v8596_v37 = vcombine.high %v778_v31, %v794_v32  ;;  %v522_v31 = vld [vmem:[#allocation3 + $0xb48] sm:$0xff] }
 0x24a   :  { %7084 = vmatprep.subr.bf16.mxu1 %v8786_v40  ;;  %v250_v40 = vld [vmem:[#allocation3 + $0x2c8] sm:$0xff] }
 0x24b   :  { %7042 = vmatpush2.bf16.msra.mxu0 %v8273_v46  ;;  %v8052_v46 = vcombine.high %v234_v38, %v250_v40  ;;  %v8051_v50 = vcombine.low %v234_v38, %v250_v40  ;;  %v538_v32 = vld [vmem:[#allocation3 + $0xbc8] sm:$0xff] }
 0x24c   :  { %7043 = vmatprep.subr.bf16.mxu0 %v8242_v48  ;;  %v202_v48 = vld [vmem:[#allocation3 + $0x148] sm:$0xff]  ;;  %v8340_v38 = vcombine.high %v522_v31, %v538_v32 }
 0x24d   :  { %7085 = vmatpush2.bf16.msra.mxu1 %v8785_v47  ;;  %v8564_v47 = vcombine.high %v746_v41, %v762_v12  ;;  %v490_v41 = vld [vmem:[#allocation3 + $0xa48] sm:$0xff] }
 0x24e   :  { %7086 = vmatprep.subr.bf16.mxu1 %v8754_v56  ;;  %v218_v56 = vld [vmem:[#allocation3 + $0x1c8] sm:$0xff] }
 0x24f   :  { %7044 = vmatpush2.bf16.msra.mxu0 %v8241_v52  ;;  %v8020_v52 = vcombine.high %v202_v48, %v218_v56  ;;  %v8019_v60 = vcombine.low %v202_v48, %v218_v56  ;;  %v506_v12 = vld [vmem:[#allocation3 + $0xac8] sm:$0xff] }
 0x250   :  { %7099 = vmatprep.subr.bf16.mxu0 %v8212_v54  ;;  %v170_v54 = vld [vmem:[#allocation3 + $0x48] sm:$0xff]  ;;  %v8308_v48 = vcombine.high %v490_v41, %v506_v12 }
 0x251   :  { %7087 = vmatpush2.bf16.msra.mxu1 %v8753_v53  ;;  %v8532_v53 = vcombine.high %v714_v49, %v730_v59  ;;  %v458_v49 = vld [vmem:[#allocation3 + $0x948] sm:$0xff] }
 0x252   :  { %7142 = vmatprep.subr.bf16.mxu1 %v8724_v55  ;;  %v6789_v4 = vpop.f32.mrf.mxu0  ;;  %7046 = vmatmul.mubr.bf16.vlgmr.msra.gmra.mxu0 %v9180_v29  ;;  %v9224_v29 = vld [vmem:[%s9429_s0 + $0x4] ss:$16 sps:$4 sm:$0xff]   ;;  %v186_v55 = vld [vmem:[#allocation3 + $0xc8] sm:$0xff] }
 0x253   :  { %7100 = vmatpush1.bf16.msra.mxu0 %v8211_v62  ;;  %7131 = vmatprep.mubr.bf16.mxu0 %v9224_v29  ;;  %v7988_v62 = vcombine.high %v170_v54, %v186_v55  ;;  %v474_v59 = vld [vmem:[#allocation3 + $0x9c8] sm:$0xff] }
 0x254   :  { %v6832_v7 = vpop.f32.mrf.mxu1  ;;  %7089 = vmatmul.mubr.bf16.vlgmr.msra.gmra.mxu1 %v9186_v33  ;;  %v6791_v9 = vpop.f32.mrf.mxu0  ;;  %7101 = vmatprep.subr.bf16.mxu0 %v8180_v0  ;;  %v650_v0 = vld [vmem:[#allocation3 + $0xf48] sm:$0xff] }
 0x255   :  { %v6833_v8 = vadd.f32 %v6832_v7, %v6789_v4  ;;  %7143 = vmatpush1.bf16.msra.mxu1 %v8723_v63  ;;  %7174 = vmatprep.mubr.bf16.mxu1 %v9233_v19  ;;  %v8500_v63 = vcombine.high %v682_v57, %v698_v58  ;;  %v7987_v4 = vcombine.low %v170_v54, %v186_v55  ;;  %v426_v57 = vld [vmem:[#allocation3 + $0x848] sm:$0xff] }
 0x256   :  { %v6834_v13 = vpop.f32.mrf.mxu1  ;;  %7144 = vmatprep.subr.bf16.mxu1 %v8692_v1  ;;  %v6793_v17 = vpop.f32.mrf.mxu0  ;;  %v666_v1 = vld [vmem:[#allocation3 + $0xfc8] sm:$0xff]  ;;  %v8980_v7 = vcombine.high %v1162_v2, %v1178_v3  ;;  %v8276_v54 = vcombine.high %v458_v49, %v474_v59 }
 0x257   :  { %7906 = vst [vmem:[%s9431_s2 + $0x50] sm:$0xff] %v6833_v8  ;;  %v6835_v33 = vadd.f32 %v6834_v13, %v6791_v9  ;;  %7102 = vmatpush1.bf16.msra.mxu0 %v8179_v39  ;;  %v8468_v6 = vcombine.high %v650_v0, %v666_v1  ;;  %v618_v39 = vld [vmem:[#allocation3 + $0xe48] sm:$0xff]  ;;  %v8979_v13 = vcombine.low %v1162_v2, %v1178_v3  ;;  %v395_v2 = vld [vmem:[#allocation3 + $0x750] sm:$0xff] }
 0x258   :  { %v6836_v20 = vpop.f32.mrf.mxu1  ;;  %v6795_v23 = vpop.f32.mrf.mxu0  ;;  %7103 = vmatprep.subr.bf16.mxu0 %v8148_v11  ;;  %v634_v8 = vld [vmem:[#allocation3 + $0xec8] sm:$0xff]  ;;  %v8467_v11 = vcombine.low %v650_v0, %v666_v1  ;;  %v411_v3 = vld [vmem:[#allocation3 + $0x7d0] sm:$0xff] }
 0x259   :  { %7907 = vst [vmem:[%s9431_s2 + $0x58] sm:$0xff] %v6835_v33  ;;  %v6837_v22 = vadd.f32 %v6836_v20, %v6793_v17  ;;  %7145 = vmatpush1.bf16.msra.mxu1 %v8691_v10  ;;  %v1130_v9 = vld [vmem:[#allocation3 + $0x1e48] sm:$0xff]  ;;  %v8435_v18 = vcombine.low %v618_v39, %v634_v8 }
 0x25a   :  { %v6838_v43 = vpop.f32.mrf.mxu1  ;;  %7146 = vmatprep.subr.bf16.mxu1 %v8660_v14  ;;  %v1146_v10 = vld [vmem:[#allocation3 + $0x1ec8] sm:$0xff]  ;;  %v8436_v14 = vcombine.high %v618_v39, %v634_v8  ;;  %v8214_v39 = vcombine.high %v395_v2, %v411_v3 }
 0x25b   :  { %7938 = vst [vmem:[%s9431_s2 + $0x150] sm:$0xff] %v6837_v22  ;;  %v6839_v30 = vadd.f32 %v6838_v43, %v6795_v23  ;;  %7104 = vmatpush1.bf16.msra.mxu0 %v8147_v21  ;;  %v8948_v28 = vcombine.high %v1130_v9, %v1146_v10  ;;  %v602_v33 = vld [vmem:[#allocation3 + $0xdc8] sm:$0xff]  ;;  %v8947_v20 = vcombine.low %v1130_v9, %v1146_v10  ;;  %v363_v9 = vld [vmem:[#allocation3 + $0x650] sm:$0xff] }
 0x25c   :  { %7105 = vmatprep.subr.bf16.mxu0 %v8116_v24  ;;  %v1098_v17 = vld [vmem:[#allocation3 + $0x1d48] sm:$0xff]  ;;  %v8404_v21 = vcombine.high %v586_v16, %v602_v33  ;;  %v379_v10 = vld [vmem:[#allocation3 + $0x6d0] sm:$0xff] }
 0x25d   :  { %7939 = vst [vmem:[%s9431_s2 + $0x158] sm:$0xff] %v6839_v30  ;;  %7147 = vmatpush1.bf16.msra.mxu1 %v8659_v15  ;;  %v8916_v22 = vcombine.high %v1098_v17, %v1114_v42  ;;  %v554_v23 = vld [vmem:[#allocation3 + $0xc48] sm:$0xff]  ;;  %v8915_v26 = vcombine.low %v1098_v17, %v1114_v42  ;;  %v331_v17 = vld [vmem:[#allocation3 + $0x550] sm:$0xff] }
 0x25e   :  { %7148 = vmatprep.subr.bf16.mxu1 %v8628_v25  ;;  %v570_v15 = vld [vmem:[#allocation3 + $0xcc8] sm:$0xff]  ;;  %v8403_v25 = vcombine.low %v586_v16, %v602_v33  ;;  %v8182_v16 = vcombine.high %v363_v9, %v379_v10  ;;  %v347_v42 = vld [vmem:[#allocation3 + $0x5d0] sm:$0xff] }
 0x25f   :  { %7106 = vmatpush1.bf16.msra.mxu0 %v8115_v34  ;;  %v1066_v24 = vld [vmem:[#allocation3 + $0x1c48] sm:$0xff]  ;;  %v8372_v27 = vcombine.high %v554_v23, %v570_v15 }
 0x260   :  { %7107 = vmatprep.subr.bf16.mxu0 %v8084_v36  ;;  %v1082_v43 = vld [vmem:[#allocation3 + $0x1cc8] sm:$0xff]  ;;  %v8371_v36 = vcombine.low %v554_v23, %v570_v15 }
 0x261   :  { %7149 = vmatpush1.bf16.msra.mxu1 %v8627_v35  ;;  %v8884_v30 = vcombine.high %v1066_v24, %v1082_v43  ;;  %v1034_v34 = vld [vmem:[#allocation3 + $0x1b48] sm:$0xff] }
 0x262   :  { %7150 = vmatprep.subr.bf16.mxu1 %v8596_v37  ;;  %v1050_v35 = vld [vmem:[#allocation3 + $0x1bc8] sm:$0xff]  ;;  %v8883_v37 = vcombine.low %v1066_v24, %v1082_v43  ;;  %v8181_v24 = vcombine.low %v363_v9, %v379_v10  ;;  %v171_v9 = vld [vmem:[#allocation3 + $0x50] sm:$0xff] }
 0x263   :  { %7108 = vmatpush1.bf16.msra.mxu0 %v8083_v44  ;;  %v8852_v40 = vcombine.high %v1034_v34, %v1050_v35  ;;  %v1002_v44 = vld [vmem:[#allocation3 + $0x1a48] sm:$0xff]  ;;  %v187_v10 = vld [vmem:[#allocation3 + $0xd0] sm:$0xff] }
 0x264   :  { %7109 = vmatprep.subr.bf16.mxu0 %v8052_v46  ;;  %v8339_v46 = vcombine.low %v522_v31, %v538_v32  ;;  %v442_v58 = vld [vmem:[#allocation3 + $0x8c8] sm:$0xff]  ;;  %v299_v32 = vld [vmem:[#allocation3 + $0x450] sm:$0xff] }
 0x265   :  { %7151 = vmatpush1.bf16.msra.mxu1 %v8595_v45  ;;  %v1018_v45 = vld [vmem:[#allocation3 + $0x1ac8] sm:$0xff]  ;;  %v8244_v0 = vcombine.high %v426_v57, %v442_v58 }
 0x266   :  { %7152 = vmatprep.subr.bf16.mxu1 %v8564_v47  ;;  %v8851_v47 = vcombine.low %v1034_v34, %v1050_v35  ;;  %v8820_v56 = vcombine.high %v1002_v44, %v1018_v45  ;;  %v9254_v15 = vld [vmem:[%s9429_s0 + $0x8] ss:$16 sps:$4 sm:$0xff]   ;;  %v315_v34 = vld [vmem:[#allocation3 + $0x4d0] sm:$0xff] }
 0x267   :  { %7110 = vmatpush1.bf16.msra.mxu0 %v8051_v50  ;;  %v970_v50 = vld [vmem:[#allocation3 + $0x1948] sm:$0xff] }
 0x268   :  { %7111 = vmatprep.subr.bf16.mxu0 %v8020_v52  ;;  %v8307_v52 = vcombine.low %v490_v41, %v506_v12  ;;  %v8149_v41 = vcombine.low %v331_v17, %v347_v42 }
 0x269   :  { %7153 = vmatpush1.bf16.msra.mxu1 %v8563_v51  ;;  %v986_v51 = vld [vmem:[#allocation3 + $0x19c8] sm:$0xff] }
 0x26a   :  { %7154 = vmatprep.subr.bf16.mxu1 %v8532_v53  ;;  %v8819_v53 = vcombine.low %v1002_v44, %v1018_v45  ;;  %v8788_v55 = vcombine.high %v970_v50, %v986_v51 }
 0x26b   :  { %7112 = vmatpush1.bf16.msra.mxu0 %v8019_v60  ;;  %v938_v60 = vld [vmem:[#allocation3 + $0x1848] sm:$0xff] }
 0x26c   :  { %7113 = vmatprep.subr.bf16.mxu0 %v7988_v62  ;;  %v8275_v62 = vcombine.low %v458_v49, %v474_v59  ;;  %v283_v49 = vld [vmem:[#allocation3 + $0x3d0] sm:$0xff] }
 0x26d   :  { %7155 = vmatpush1.bf16.msra.mxu1 %v8531_v61  ;;  %v954_v61 = vld [vmem:[#allocation3 + $0x18c8] sm:$0xff] }
 0x26e   :  { %7156 = vmatprep.subr.bf16.mxu1 %v8500_v63  ;;  %v8787_v63 = vcombine.low %v970_v50, %v986_v51  ;;  %v8756_v1 = vcombine.high %v938_v60, %v954_v61  ;;  %v779_v50 = vld [vmem:[#allocation3 + $0x1350] sm:$0xff] }
 0x26f   :  { %7114 = vmatpush1.bf16.msra.mxu0 %v7987_v4  ;;  %v907_v4 = vld [vmem:[#allocation3 + $0x1750] sm:$0xff] }
 0x270   :  { %7115 = vmatprep.subr.bf16.mxu0 %v8468_v6  ;;  %v8243_v6 = vcombine.low %v426_v57, %v442_v58  ;;  %v795_v51 = vld [vmem:[#allocation3 + $0x13d0] sm:$0xff] }
 0x271   :  { %7157 = vmatpush1.bf16.msra.mxu1 %v8499_v5  ;;  %v923_v5 = vld [vmem:[#allocation3 + $0x17d0] sm:$0xff] }
 0x272   :  { %7158 = vmatprep.subr.bf16.mxu1 %v8980_v7  ;;  %v8755_v7 = vcombine.low %v938_v60, %v954_v61  ;;  %v8726_v8 = vcombine.high %v907_v4, %v923_v5  ;;  %v235_v57 = vld [vmem:[#allocation3 + $0x250] sm:$0xff] }
 0x273   :  { %7116 = vmatpush2.bf16.msra.mxu0 %v8467_v11  ;;  %v875_v11 = vld [vmem:[#allocation3 + $0x1650] sm:$0xff] }
 0x274   :  { %7117 = vmatprep.subr.bf16.mxu0 %v8436_v14  ;;  %v8213_v14 = vcombine.low %v395_v2, %v411_v3  ;;  %v251_v58 = vld [vmem:[#allocation3 + $0x2d0] sm:$0xff] }
 0x275   :  { %7159 = vmatpush2.bf16.msra.mxu1 %v8979_v13  ;;  %v891_v13 = vld [vmem:[#allocation3 + $0x16d0] sm:$0xff] }
 0x276   :  { %7160 = vmatprep.subr.bf16.mxu1 %v8948_v28  ;;  %v8725_v28 = vcombine.low %v907_v4, %v923_v5  ;;  %v8694_v33 = vcombine.high %v875_v11, %v891_v13  ;;  %v747_v60 = vld [vmem:[#allocation3 + $0x1250] sm:$0xff] }
 0x277   :  { %7118 = vmatpush2.bf16.msra.mxu0 %v8435_v18  ;;  %v763_v61 = vld [vmem:[#allocation3 + $0x12d0] sm:$0xff] }
 0x278   :  { %7119 = vmatprep.subr.bf16.mxu0 %v8404_v21  ;;  %v843_v21 = vld [vmem:[#allocation3 + $0x1550] sm:$0xff] }
 0x279   :  { %7161 = vmatpush2.bf16.msra.mxu1 %v8947_v20  ;;  %v9248_v20 = vld [vmem:[%s9429_s0] ss:$16 sps:$4 sm:$0xff]  }
 0x27a   :  { %7162 = vmatprep.subr.bf16.mxu1 %v8916_v22  ;;  %v859_v22 = vld [vmem:[#allocation3 + $0x15d0] sm:$0xff] }
 0x27b   :  { %7120 = vmatpush2.bf16.msra.mxu0 %v8403_v25  ;;  %v8662_v31 = vcombine.high %v843_v21, %v859_v22  ;;  %v8661_v45 = vcombine.low %v843_v21, %v859_v22  ;;  %v203_v2 = vld [vmem:[#allocation3 + $0x150] sm:$0xff]  ;;  %v7989_v22 = vcombine.low %v171_v9, %v187_v10 }
 0x27c   :  { %7121 = vmatprep.subr.bf16.mxu0 %v8372_v27  ;;  %v8150_v27 = vcombine.high %v331_v17, %v347_v42  ;;  %v219_v3 = vld [vmem:[#allocation3 + $0x1d0] sm:$0xff] }
 0x27d   :  { %7163 = vmatpush2.bf16.msra.mxu1 %v8915_v26  ;;  %v8693_v26 = vcombine.low %v875_v11, %v891_v13  ;;  %v715_v4 = vld [vmem:[#allocation3 + $0x1150] sm:$0xff] }
 0x27e   :  { %7164 = vmatprep.subr.bf16.mxu1 %v8884_v30  ;;  %v731_v5 = vld [vmem:[#allocation3 + $0x11d0] sm:$0xff] }
 0x27f   :  { %7122 = vmatpush2.bf16.msra.mxu0 %v8371_v36  ;;  %v683_v11 = vld [vmem:[#allocation3 + $0x1050] sm:$0xff] }
 0x280   :  { %7123 = vmatprep.subr.bf16.mxu0 %v8340_v38  ;;  %v827_v38 = vld [vmem:[#allocation3 + $0x14d0] sm:$0xff] }
 0x281   :  { %7165 = vmatpush2.bf16.msra.mxu1 %v8883_v37  ;;  %v811_v37 = vld [vmem:[#allocation3 + $0x1450] sm:$0xff] }
 0x282   :  { %7166 = vmatprep.subr.bf16.mxu1 %v8852_v40  ;;  %v699_v13 = vld [vmem:[#allocation3 + $0x10d0] sm:$0xff] }
 0x283   :  { %7124 = vmatpush2.bf16.msra.mxu0 %v8339_v46  ;;  %v8118_v46 = vcombine.high %v299_v32, %v315_v34  ;;  %v651_v17 = vld [vmem:[#allocation3 + $0xf50] sm:$0xff] }
 0x284   :  { %7125 = vmatprep.subr.bf16.mxu0 %v8308_v48  ;;  %v8630_v48 = vcombine.high %v811_v37, %v827_v38  ;;  %v667_v42 = vld [vmem:[#allocation3 + $0xfd0] sm:$0xff] }
 0x285   :  { %7167 = vmatpush2.bf16.msra.mxu1 %v8851_v47  ;;  %v1179_v21 = vld [vmem:[#allocation3 + $0x1fd0] sm:$0xff] }
 0x286   :  { %7168 = vmatprep.subr.bf16.mxu1 %v8820_v56  ;;  %v267_v56 = vld [vmem:[#allocation3 + $0x350] sm:$0xff] }
 0x287   :  { %7126 = vmatpush2.bf16.msra.mxu0 %v8307_v52  ;;  %v8117_v52 = vcombine.low %v299_v32, %v315_v34 }
 0x288   :  { %7127 = vmatprep.subr.bf16.mxu0 %v8276_v54  ;;  %v8086_v54 = vcombine.high %v267_v56, %v283_v49 }
 0x289   :  { %7169 = vmatpush2.bf16.msra.mxu1 %v8819_v53  ;;  %v8629_v53 = vcombine.low %v811_v37, %v827_v38  ;;  %v603_v37 = vld [vmem:[#allocation3 + $0xdd0] sm:$0xff] }
 0x28a   :  { %7170 = vmatprep.subr.bf16.mxu1 %v8788_v55  ;;  %v8598_v55 = vcombine.high %v779_v50, %v795_v51  ;;  %v1099_v38 = vld [vmem:[#allocation3 + $0x1d50] sm:$0xff] }
 0x28b   :  { %7128 = vmatpush2.bf16.msra.mxu0 %v8275_v62  ;;  %v8085_v62 = vcombine.low %v267_v56, %v283_v49  ;;  %v1083_v56 = vld [vmem:[#allocation3 + $0x1cd0] sm:$0xff] }
 0x28c   :  { %7129 = vmatprep.subr.bf16.mxu0 %v8244_v0  ;;  %v8054_v0 = vcombine.high %v235_v57, %v251_v58 }
 0x28d   :  { %7171 = vmatpush2.bf16.msra.mxu1 %v8787_v63  ;;  %v8597_v63 = vcombine.low %v779_v50, %v795_v51 }
 0x28e   :  { %7172 = vmatprep.subr.bf16.mxu1 %v8756_v1  ;;  %v8566_v1 = vcombine.high %v747_v60, %v763_v61 }
 0x28f   :  { %7130 = vmatpush2.bf16.msra.mxu0 %v8243_v6  ;;  %v8053_v6 = vcombine.low %v235_v57, %v251_v58 }
 0x290   :  { %7185 = vmatprep.subr.bf16.mxu0 %v8214_v39  ;;  %v8022_v39 = vcombine.high %v203_v2, %v219_v3 }
 0x291   :  { %7173 = vmatpush2.bf16.msra.mxu1 %v8755_v7  ;;  %v8565_v7 = vcombine.low %v747_v60, %v763_v61 }
 0x292   :  { %7228 = vmatprep.subr.bf16.mxu1 %v8726_v8  ;;  %v6875_v18 = vpop.f32.mrf.mxu0  ;;  %7132 = vmatmul.mubr.bf16.vlgmr.msra.gmra.mxu0 %v9248_v20  ;;  %v8534_v8 = vcombine.high %v715_v4, %v731_v5 }
 0x293   :  { %7186 = vmatpush1.bf16.msra.mxu0 %v8213_v14  ;;  %7217 = vmatprep.mubr.bf16.mxu0 %v9224_v29  ;;  %v8021_v14 = vcombine.low %v203_v2, %v219_v3 }
 0x294   :  { %v6918_v23 = vpop.f32.mrf.mxu1  ;;  %7175 = vmatmul.mubr.bf16.vlgmr.msra.gmra.mxu1 %v9254_v15  ;;  %v6877_v25 = vpop.f32.mrf.mxu0  ;;  %7187 = vmatprep.subr.bf16.mxu0 %v8182_v16  ;;  %v7990_v16 = vcombine.high %v171_v9, %v187_v10 }
 0x295   :  { %v6919_v43 = vadd.f32 %v6918_v23, %v6875_v18  ;;  %7229 = vmatpush1.bf16.msra.mxu1 %v8725_v28  ;;  %7260 = vmatprep.mubr.bf16.mxu1 %v9233_v19  ;;  %v8533_v28 = vcombine.low %v715_v4, %v731_v5  ;;  %v1163_v18 = vld [vmem:[#allocation3 + $0x1f50] sm:$0xff]  ;;  %v8501_v23 = vcombine.low %v683_v11, %v699_v13 }
 0x296   :  { %v6920_v30 = vpop.f32.mrf.mxu1  ;;  %7230 = vmatprep.subr.bf16.mxu1 %v8694_v33  ;;  %v6879_v36 = vpop.f32.mrf.mxu0  ;;  %v8502_v33 = vcombine.high %v683_v11, %v699_v13  ;;  %v8981_v32 = vcombine.low %v1163_v18, %v1179_v21 }
 0x297   :  { %7908 = vst [vmem:[%s9431_s2 + $0x60] sm:$0xff] %v6919_v43  ;;  %v6921_v35 = vadd.f32 %v6920_v30, %v6877_v25  ;;  %7188 = vmatpush1.bf16.msra.mxu0 %v8181_v24  ;;  %v8470_v24 = vcombine.high %v651_v17, %v667_v42  ;;  %v8982_v43 = vcombine.high %v1163_v18, %v1179_v21  ;;  %v619_v25 = vld [vmem:[#allocation3 + $0xe50] sm:$0xff] }
 0x298   :  { %v6922_v40 = vpop.f32.mrf.mxu1  ;;  %v6881_v44 = vpop.f32.mrf.mxu0  ;;  %7189 = vmatprep.subr.bf16.mxu0 %v8150_v27  ;;  %v1131_v27 = vld [vmem:[#allocation3 + $0x1e50] sm:$0xff] }
 0x299   :  { %7909 = vst [vmem:[%s9431_s2 + $0x68] sm:$0xff] %v6921_v35  ;;  %v6923_v12 = vadd.f32 %v6922_v40, %v6879_v36  ;;  %7231 = vmatpush1.bf16.msra.mxu1 %v8693_v26  ;;  %v635_v26 = vld [vmem:[#allocation3 + $0xed0] sm:$0xff] }
 0x29a   :  { %v6924_v47 = vpop.f32.mrf.mxu1  ;;  %7232 = vmatprep.subr.bf16.mxu1 %v8662_v31  ;;  %v1147_v30 = vld [vmem:[#allocation3 + $0x1ed0] sm:$0xff]  ;;  %v8469_v31 = vcombine.low %v651_v17, %v667_v42  ;;  %v8438_v34 = vcombine.high %v619_v25, %v635_v26 }
 0x29b   :  { %7940 = vst [vmem:[%s9431_s2 + $0x160] sm:$0xff] %v6923_v12  ;;  %v6925_v59 = vadd.f32 %v6924_v47, %v6881_v44  ;;  %7190 = vmatpush1.bf16.msra.mxu0 %v8149_v41  ;;  %v8950_v35 = vcombine.high %v1131_v27, %v1147_v30  ;;  %v587_v36 = vld [vmem:[#allocation3 + $0xd50] sm:$0xff]  ;;  %v8437_v41 = vcombine.low %v619_v25, %v635_v26 }
 0x29c   :  { %7191 = vmatprep.subr.bf16.mxu0 %v8118_v46  ;;  %v1115_v40 = vld [vmem:[#allocation3 + $0x1dd0] sm:$0xff]  ;;  %v8949_v12 = vcombine.low %v1131_v27, %v1147_v30  ;;  %v8406_v44 = vcombine.high %v587_v36, %v603_v37  ;;  %v8405_v49 = vcombine.low %v587_v36, %v603_v37 }
 0x29d   :  { %7941 = vst [vmem:[%s9431_s2 + $0x168] sm:$0xff] %v6925_v59  ;;  %7233 = vmatpush1.bf16.msra.mxu1 %v8661_v45  ;;  %v8918_v45 = vcombine.high %v1099_v38, %v1115_v40  ;;  %v555_v46 = vld [vmem:[#allocation3 + $0xc50] sm:$0xff]  ;;  %v8917_v59 = vcombine.low %v1099_v38, %v1115_v40 }
 0x29e   :  { %7234 = vmatprep.subr.bf16.mxu1 %v8630_v48  ;;  %v571_v47 = vld [vmem:[#allocation3 + $0xcd0] sm:$0xff] }
 0x29f   :  { %7192 = vmatpush1.bf16.msra.mxu0 %v8117_v52  ;;  %v1067_v48 = vld [vmem:[#allocation3 + $0x1c50] sm:$0xff]  ;;  %v8374_v50 = vcombine.high %v555_v46, %v571_v47  ;;  %v8373_v57 = vcombine.low %v555_v46, %v571_v47  ;;  %v860_v46 = vld [vmem:[#allocation3 + $0x15d8] sm:$0xff] }
 0x2a0   :  { %7193 = vmatprep.subr.bf16.mxu0 %v8086_v54  ;;  %v8886_v51 = vcombine.high %v1067_v48, %v1083_v56  ;;  %v523_v52 = vld [vmem:[#allocation3 + $0xb50] sm:$0xff]  ;;  %v8885_v58 = vcombine.low %v1067_v48, %v1083_v56 }
 0x2a1   :  { %7235 = vmatpush1.bf16.msra.mxu1 %v8629_v53  ;;  %v539_v53 = vld [vmem:[#allocation3 + $0xbd0] sm:$0xff] }
 0x2a2   :  { %7236 = vmatprep.subr.bf16.mxu1 %v8598_v55  ;;  %v1035_v54 = vld [vmem:[#allocation3 + $0x1b50] sm:$0xff]  ;;  %v8342_v60 = vcombine.high %v523_v52, %v539_v53  ;;  %v8341_v2 = vcombine.low %v523_v52, %v539_v53  ;;  %v300_v53 = vld [vmem:[#allocation3 + $0x458] sm:$0xff] }
 0x2a3   :  { %7194 = vmatpush1.bf16.msra.mxu0 %v8085_v62  ;;  %v1051_v55 = vld [vmem:[#allocation3 + $0x1bd0] sm:$0xff] }
 0x2a4   :  { %7195 = vmatprep.subr.bf16.mxu0 %v8054_v0  ;;  %v8854_v61 = vcombine.high %v1035_v54, %v1051_v55  ;;  %v491_v62 = vld [vmem:[#allocation3 + $0xa50] sm:$0xff]  ;;  %v8853_v3 = vcombine.low %v1035_v54, %v1051_v55  ;;  %v316_v54 = vld [vmem:[#allocation3 + $0x4d8] sm:$0xff] }
 0x2a5   :  { %7237 = vmatpush1.bf16.msra.mxu1 %v8597_v63  ;;  %v507_v63 = vld [vmem:[#allocation3 + $0xad0] sm:$0xff] }
 0x2a6   :  { %7238 = vmatprep.subr.bf16.mxu1 %v8566_v1  ;;  %v1003_v0 = vld [vmem:[#allocation3 + $0x1a50] sm:$0xff]  ;;  %v8310_v4 = vcombine.high %v491_v62, %v507_v63  ;;  %v8309_v9 = vcombine.low %v491_v62, %v507_v63 }
 0x2a7   :  { %7196 = vmatpush1.bf16.msra.mxu0 %v8053_v6  ;;  %v1019_v1 = vld [vmem:[#allocation3 + $0x1ad0] sm:$0xff] }
 0x2a8   :  { %7197 = vmatprep.subr.bf16.mxu0 %v8022_v39  ;;  %v8822_v5 = vcombine.high %v1003_v0, %v1019_v1  ;;  %v459_v6 = vld [vmem:[#allocation3 + $0x950] sm:$0xff]  ;;  %v8821_v10 = vcombine.low %v1003_v0, %v1019_v1  ;;  %v8120_v1 = vcombine.high %v300_v53, %v316_v54 }
 0x2a9   :  { %7239 = vmatpush1.bf16.msra.mxu1 %v8565_v7  ;;  %v475_v7 = vld [vmem:[#allocation3 + $0x9d0] sm:$0xff] }
 0x2aa   :  { %7240 = vmatprep.subr.bf16.mxu1 %v8534_v8  ;;  %v971_v39 = vld [vmem:[#allocation3 + $0x1950] sm:$0xff]  ;;  %v8278_v11 = vcombine.high %v459_v6, %v475_v7  ;;  %v8277_v17 = vcombine.low %v459_v6, %v475_v7  ;;  %v780_v6 = vld [vmem:[#allocation3 + $0x1358] sm:$0xff] }
 0x2ab   :  { %7198 = vmatpush1.bf16.msra.mxu0 %v8021_v14  ;;  %v987_v8 = vld [vmem:[#allocation3 + $0x19d0] sm:$0xff]  ;;  %v796_v7 = vld [vmem:[#allocation3 + $0x13d8] sm:$0xff] }
 0x2ac   :  { %7199 = vmatprep.subr.bf16.mxu0 %v7990_v16  ;;  %v8790_v13 = vcombine.high %v971_v39, %v987_v8  ;;  %v427_v14 = vld [vmem:[#allocation3 + $0x850] sm:$0xff]  ;;  %v8789_v42 = vcombine.low %v971_v39, %v987_v8  ;;  %v8119_v39 = vcombine.low %v300_v53, %v316_v54  ;;  %v588_v54 = vld [vmem:[#allocation3 + $0xd58] sm:$0xff] }
 0x2ad   :  { %7241 = vmatpush1.bf16.msra.mxu1 %v8533_v28  ;;  %v443_v28 = vld [vmem:[#allocation3 + $0x8d0] sm:$0xff] }
 0x2ae   :  { %7242 = vmatprep.subr.bf16.mxu1 %v8502_v33  ;;  %v939_v16 = vld [vmem:[#allocation3 + $0x1850] sm:$0xff]  ;;  %v8246_v18 = vcombine.high %v427_v14, %v443_v28  ;;  %v8245_v25 = vcombine.low %v427_v14, %v443_v28  ;;  %v748_v14 = vld [vmem:[#allocation3 + $0x1258] sm:$0xff] }
 0x2af   :  { %7200 = vmatpush1.bf16.msra.mxu0 %v7989_v22  ;;  %v955_v33 = vld [vmem:[#allocation3 + $0x18d0] sm:$0xff]  ;;  %v396_v22 = vld [vmem:[#allocation3 + $0x758] sm:$0xff] }
 0x2b0   :  { %7201 = vmatprep.subr.bf16.mxu0 %v8470_v24  ;;  %v8758_v21 = vcombine.high %v939_v16, %v955_v33  ;;  %v908_v24 = vld [vmem:[#allocation3 + $0x1758] sm:$0xff]  ;;  %v8757_v26 = vcombine.low %v939_v16, %v955_v33  ;;  %v8599_v33 = vcombine.low %v780_v6, %v796_v7 }
 0x2b1   :  { %7243 = vmatpush1.bf16.msra.mxu1 %v8501_v23  ;;  %v412_v23 = vld [vmem:[#allocation3 + $0x7d8] sm:$0xff] }
 0x2b2   :  { %7244 = vmatprep.subr.bf16.mxu1 %v8982_v43  ;;  %v924_v43 = vld [vmem:[#allocation3 + $0x17d8] sm:$0xff]  ;;  %v8216_v27 = vcombine.high %v396_v22, %v412_v23  ;;  %v8215_v36 = vcombine.low %v396_v22, %v412_v23 }
 0x2b3   :  { %7202 = vmatpush2.bf16.msra.mxu0 %v8469_v31  ;;  %v8728_v30 = vcombine.high %v908_v24, %v924_v43  ;;  %v364_v31 = vld [vmem:[#allocation3 + $0x658] sm:$0xff]  ;;  %v8727_v37 = vcombine.low %v908_v24, %v924_v43 }
 0x2b4   :  { %7203 = vmatprep.subr.bf16.mxu0 %v8438_v34  ;;  %v876_v34 = vld [vmem:[#allocation3 + $0x1658] sm:$0xff] }
 0x2b5   :  { %7245 = vmatpush2.bf16.msra.mxu1 %v8981_v32  ;;  %v380_v32 = vld [vmem:[#allocation3 + $0x6d8] sm:$0xff] }
 0x2b6   :  { %7246 = vmatprep.subr.bf16.mxu1 %v8950_v35  ;;  %v892_v35 = vld [vmem:[#allocation3 + $0x16d8] sm:$0xff]  ;;  %v8184_v38 = vcombine.high %v364_v31, %v380_v32  ;;  %v8183_v48 = vcombine.low %v364_v31, %v380_v32 }
 0x2b7   :  { %7204 = vmatpush2.bf16.msra.mxu0 %v8437_v41  ;;  %v8696_v40 = vcombine.high %v876_v34, %v892_v35  ;;  %v332_v41 = vld [vmem:[#allocation3 + $0x558] sm:$0xff] }
 0x2b8   :  { %7205 = vmatprep.subr.bf16.mxu0 %v8406_v44  ;;  %v764_v28 = vld [vmem:[#allocation3 + $0x12d8] sm:$0xff] }
 0x2b9   :  { %7247 = vmatpush2.bf16.msra.mxu1 %v8949_v12  ;;  %v348_v12 = vld [vmem:[#allocation3 + $0x5d8] sm:$0xff]  ;;  %v8567_v43 = vcombine.low %v748_v14, %v764_v28 }
 0x2ba   :  { %7248 = vmatprep.subr.bf16.mxu1 %v8918_v45  ;;  %v844_v45 = vld [vmem:[#allocation3 + $0x1558] sm:$0xff]  ;;  %v8151_v62 = vcombine.low %v332_v41, %v348_v12 }
 0x2bb   :  { %7206 = vmatpush2.bf16.msra.mxu0 %v8405_v49  ;;  %v8664_v52 = vcombine.high %v844_v45, %v860_v46  ;;  %v8663_v0 = vcombine.low %v844_v45, %v860_v46  ;;  %v716_v22 = vld [vmem:[#allocation3 + $0x1158] sm:$0xff] }
 0x2bc   :  { %7207 = vmatprep.subr.bf16.mxu0 %v8374_v50  ;;  %v8152_v50 = vcombine.high %v332_v41, %v348_v12  ;;  %v732_v23 = vld [vmem:[#allocation3 + $0x11d8] sm:$0xff] }
 0x2bd   :  { %7249 = vmatpush2.bf16.msra.mxu1 %v8917_v59  ;;  %v8695_v59 = vcombine.low %v876_v34, %v892_v35  ;;  %v684_v31 = vld [vmem:[#allocation3 + $0x1058] sm:$0xff]  ;;  %v8535_v35 = vcombine.low %v716_v22, %v732_v23 }
 0x2be   :  { %7250 = vmatprep.subr.bf16.mxu1 %v8886_v51  ;;  %v700_v32 = vld [vmem:[#allocation3 + $0x10d8] sm:$0xff] }
 0x2bf   :  { %7208 = vmatpush2.bf16.msra.mxu0 %v8373_v57  ;;  %v1164_v41 = vld [vmem:[#allocation3 + $0x1f58] sm:$0xff]  ;;  %v8503_v45 = vcombine.low %v684_v31, %v700_v32 }
 0x2c0   :  { %7209 = vmatprep.subr.bf16.mxu0 %v8342_v60  ;;  %v828_v60 = vld [vmem:[#allocation3 + $0x14d8] sm:$0xff] }
 0x2c1   :  { %7251 = vmatpush2.bf16.msra.mxu1 %v8885_v58  ;;  %v812_v58 = vld [vmem:[#allocation3 + $0x1458] sm:$0xff] }
 0x2c2   :  { %7252 = vmatprep.subr.bf16.mxu1 %v8854_v61  ;;  %v8631_v8 = vcombine.low %v812_v58, %v828_v60  ;;  %v1180_v12 = vld [vmem:[#allocation3 + $0x1fd8] sm:$0xff] }
 0x2c3   :  { %7210 = vmatpush2.bf16.msra.mxu0 %v8341_v2 }
 0x2c4   :  { %7211 = vmatprep.subr.bf16.mxu0 %v8310_v4  ;;  %v268_v4 = vld [vmem:[#allocation3 + $0x358] sm:$0xff] }
 0x2c5   :  { %7253 = vmatpush2.bf16.msra.mxu1 %v8853_v3  ;;  %v8632_v3 = vcombine.high %v812_v58, %v828_v60  ;;  %v1116_v58 = vld [vmem:[#allocation3 + $0x1dd8] sm:$0xff] }
 0x2c6   :  { %7254 = vmatprep.subr.bf16.mxu1 %v8822_v5  ;;  %v284_v5 = vld [vmem:[#allocation3 + $0x3d8] sm:$0xff] }
 0x2c7   :  { %7212 = vmatpush2.bf16.msra.mxu0 %v8309_v9  ;;  %v8088_v9 = vcombine.high %v268_v4, %v284_v5  ;;  %v8087_v16 = vcombine.low %v268_v4, %v284_v5 }
 0x2c8   :  { %7213 = vmatprep.subr.bf16.mxu0 %v8278_v11  ;;  %v236_v11 = vld [vmem:[#allocation3 + $0x258] sm:$0xff] }
 0x2c9   :  { %7255 = vmatpush2.bf16.msra.mxu1 %v8821_v10  ;;  %v8600_v10 = vcombine.high %v780_v6, %v796_v7  ;;  %v524_v6 = vld [vmem:[#allocation3 + $0xb58] sm:$0xff] }
 0x2ca   :  { %7256 = vmatprep.subr.bf16.mxu1 %v8790_v13  ;;  %v252_v13 = vld [vmem:[#allocation3 + $0x2d8] sm:$0xff] }
 0x2cb   :  { %7214 = vmatpush2.bf16.msra.mxu0 %v8277_v17  ;;  %v8056_v17 = vcombine.high %v236_v11, %v252_v13  ;;  %v8055_v24 = vcombine.low %v236_v11, %v252_v13  ;;  %v540_v7 = vld [vmem:[#allocation3 + $0xbd8] sm:$0xff] }
 0x2cc   :  { %7215 = vmatprep.subr.bf16.mxu0 %v8246_v18  ;;  %v204_v18 = vld [vmem:[#allocation3 + $0x158] sm:$0xff]  ;;  %v8344_v11 = vcombine.high %v524_v6, %v540_v7 }
 0x2cd   :  { %7257 = vmatpush2.bf16.msra.mxu1 %v8789_v42  ;;  %v8568_v42 = vcombine.high %v748_v14, %v764_v28  ;;  %v492_v14 = vld [vmem:[#allocation3 + $0xa58] sm:$0xff] }
 0x2ce   :  { %7258 = vmatprep.subr.bf16.mxu1 %v8758_v21  ;;  %v220_v21 = vld [vmem:[#allocation3 + $0x1d8] sm:$0xff] }
 0x2cf   :  { %7216 = vmatpush2.bf16.msra.mxu0 %v8245_v25  ;;  %v8024_v25 = vcombine.high %v204_v18, %v220_v21  ;;  %v8023_v34 = vcombine.low %v204_v18, %v220_v21  ;;  %v508_v28 = vld [vmem:[#allocation3 + $0xad8] sm:$0xff] }
 0x2d0   :  { %7271 = vmatprep.subr.bf16.mxu0 %v8216_v27  ;;  %v172_v27 = vld [vmem:[#allocation3 + $0x58] sm:$0xff]  ;;  %v8312_v18 = vcombine.high %v492_v14, %v508_v28 }
 0x2d1   :  { %7259 = vmatpush2.bf16.msra.mxu1 %v8757_v26  ;;  %v8536_v26 = vcombine.high %v716_v22, %v732_v23  ;;  %v460_v22 = vld [vmem:[#allocation3 + $0x958] sm:$0xff] }
 0x2d2   :  { %7314 = vmatprep.subr.bf16.mxu1 %v8728_v30  ;;  %v6961_v44 = vpop.f32.mrf.mxu0  ;;  %7218 = vmatmul.mubr.bf16.vlgmr.msra.gmra.mxu0 %v9248_v20  ;;  %v188_v30 = vld [vmem:[#allocation3 + $0xd8] sm:$0xff] }
 0x2d3   :  { %7272 = vmatpush1.bf16.msra.mxu0 %v8215_v36  ;;  %7303 = vmatprep.mubr.bf16.mxu0 %v9224_v29  ;;  %v7992_v36 = vcombine.high %v172_v27, %v188_v30  ;;  %v476_v23 = vld [vmem:[#allocation3 + $0x9d8] sm:$0xff] }
 0x2d4   :  { %v7004_v47 = vpop.f32.mrf.mxu1  ;;  %7261 = vmatmul.mubr.bf16.vlgmr.msra.gmra.mxu1 %v9254_v15  ;;  %v6963_v49 = vpop.f32.mrf.mxu0  ;;  %7273 = vmatprep.subr.bf16.mxu0 %v8184_v38  ;;  %v652_v38 = vld [vmem:[#allocation3 + $0xf58] sm:$0xff] }
 0x2d5   :  { %v7005_v56 = vadd.f32 %v7004_v47, %v6961_v44  ;;  %7315 = vmatpush1.bf16.msra.mxu1 %v8727_v37  ;;  %7346 = vmatprep.mubr.bf16.mxu1 %v9233_v19  ;;  %v8504_v37 = vcombine.high %v684_v31, %v700_v32  ;;  %v7991_v44 = vcombine.low %v172_v27, %v188_v30  ;;  %v428_v31 = vld [vmem:[#allocation3 + $0x858] sm:$0xff] }
 0x2d6   :  { %v7006_v51 = vpop.f32.mrf.mxu1  ;;  %7316 = vmatprep.subr.bf16.mxu1 %v8696_v40  ;;  %v6965_v57 = vpop.f32.mrf.mxu0  ;;  %v668_v40 = vld [vmem:[#allocation3 + $0xfd8] sm:$0xff]  ;;  %v8984_v47 = vcombine.high %v1164_v41, %v1180_v12  ;;  %v8280_v27 = vcombine.high %v460_v22, %v476_v23 }
 0x2d7   :  { %7910 = vst [vmem:[%s9431_s2 + $0x70] sm:$0xff] %v7005_v56  ;;  %v7007_v55 = vadd.f32 %v7006_v51, %v6963_v49  ;;  %7274 = vmatpush1.bf16.msra.mxu0 %v8183_v48  ;;  %v8472_v46 = vcombine.high %v652_v38, %v668_v40  ;;  %v620_v48 = vld [vmem:[#allocation3 + $0xe58] sm:$0xff]  ;;  %v8983_v51 = vcombine.low %v1164_v41, %v1180_v12  ;;  %v397_v41 = vld [vmem:[#allocation3 + $0x760] sm:$0xff] }
 0x2d8   :  { %v7008_v61 = vpop.f32.mrf.mxu1  ;;  %v6967_v29 = vpop.f32.mrf.mxu0  ;;  %7275 = vmatprep.subr.bf16.mxu0 %v8152_v50  ;;  %v636_v56 = vld [vmem:[#allocation3 + $0xed8] sm:$0xff]  ;;  %v8471_v50 = vcombine.low %v652_v38, %v668_v40  ;;  %v413_v12 = vld [vmem:[#allocation3 + $0x7e0] sm:$0xff] }
 0x2d9   :  { %7911 = vst [vmem:[%s9431_s2 + $0x78] sm:$0xff] %v7007_v55  ;;  %v7009_v63 = vadd.f32 %v7008_v61, %v6965_v57  ;;  %7317 = vmatpush1.bf16.msra.mxu1 %v8695_v59  ;;  %v1132_v49 = vld [vmem:[#allocation3 + $0x1e58] sm:$0xff]  ;;  %v8439_v60 = vcombine.low %v620_v48, %v636_v56 }
 0x2da   :  { %v7010_v2 = vpop.f32.mrf.mxu1  ;;  %7318 = vmatprep.subr.bf16.mxu1 %v8664_v52  ;;  %v1148_v59 = vld [vmem:[#allocation3 + $0x1ed8] sm:$0xff]  ;;  %v8440_v52 = vcombine.high %v620_v48, %v636_v56  ;;  %v8218_v48 = vcombine.high %v397_v41, %v413_v12 }
 0x2db   :  { %7942 = vst [vmem:[%s9431_s2 + $0x170] sm:$0xff] %v7009_v63  ;;  %v7011_v19 = vadd.f32 %v7010_v2, %v6967_v29  ;;  %7276 = vmatpush1.bf16.msra.mxu0 %v8151_v62  ;;  %v8952_v53 = vcombine.high %v1132_v49, %v1148_v59  ;;  %v604_v55 = vld [vmem:[#allocation3 + $0xdd8] sm:$0xff]  ;;  %v8951_v61 = vcombine.low %v1132_v49, %v1148_v59  ;;  %v365_v49 = vld [vmem:[#allocation3 + $0x660] sm:$0xff] }
 0x2dc   :  { %7277 = vmatprep.subr.bf16.mxu0 %v8120_v1  ;;  %v1100_v57 = vld [vmem:[#allocation3 + $0x1d58] sm:$0xff]  ;;  %v8408_v62 = vcombine.high %v588_v54, %v604_v55  ;;  %v381_v59 = vld [vmem:[#allocation3 + $0x6e0] sm:$0xff] }
 0x2dd   :  { %7943 = vst [vmem:[%s9431_s2 + $0x178] sm:$0xff] %v7011_v19  ;;  %7319 = vmatpush1.bf16.msra.mxu1 %v8663_v0  ;;  %v8920_v63 = vcombine.high %v1100_v57, %v1116_v58  ;;  %v556_v29 = vld [vmem:[#allocation3 + $0xc58] sm:$0xff]  ;;  %v8919_v4 = vcombine.low %v1100_v57, %v1116_v58  ;;  %v333_v57 = vld [vmem:[#allocation3 + $0x560] sm:$0xff] }
 0x2de   :  { %7320 = vmatprep.subr.bf16.mxu1 %v8632_v3  ;;  %v572_v0 = vld [vmem:[#allocation3 + $0xcd8] sm:$0xff]  ;;  %v8407_v3 = vcombine.low %v588_v54, %v604_v55  ;;  %v8186_v54 = vcombine.high %v365_v49, %v381_v59  ;;  %v349_v58 = vld [vmem:[#allocation3 + $0x5e0] sm:$0xff] }
 0x2df   :  { %7278 = vmatpush1.bf16.msra.mxu0 %v8119_v39  ;;  %v1068_v1 = vld [vmem:[#allocation3 + $0x1c58] sm:$0xff]  ;;  %v8376_v5 = vcombine.high %v556_v29, %v572_v0 }
 0x2e0   :  { %7279 = vmatprep.subr.bf16.mxu0 %v8088_v9  ;;  %v1084_v2 = vld [vmem:[#allocation3 + $0x1cd8] sm:$0xff]  ;;  %v8375_v9 = vcombine.low %v556_v29, %v572_v0  ;;  %v8185_v29 = vcombine.low %v365_v49, %v381_v59  ;;  %v685_v49 = vld [vmem:[#allocation3 + $0x1060] sm:$0xff] }
 0x2e1   :  { %7321 = vmatpush1.bf16.msra.mxu1 %v8631_v8  ;;  %v8888_v19 = vcombine.high %v1068_v1, %v1084_v2  ;;  %v1036_v39 = vld [vmem:[#allocation3 + $0x1b58] sm:$0xff]  ;;  %v701_v59 = vld [vmem:[#allocation3 + $0x10e0] sm:$0xff] }
 0x2e2   :  { %7322 = vmatprep.subr.bf16.mxu1 %v8600_v10  ;;  %v1052_v8 = vld [vmem:[#allocation3 + $0x1bd8] sm:$0xff]  ;;  %v8887_v10 = vcombine.low %v1068_v1, %v1084_v2 }
 0x2e3   :  { %7280 = vmatpush1.bf16.msra.mxu0 %v8087_v16  ;;  %v8856_v13 = vcombine.high %v1036_v39, %v1052_v8  ;;  %v1004_v16 = vld [vmem:[#allocation3 + $0x1a58] sm:$0xff] }
 0x2e4   :  { %7281 = vmatprep.subr.bf16.mxu0 %v8056_v17  ;;  %v8343_v17 = vcombine.low %v524_v6, %v540_v7  ;;  %v444_v32 = vld [vmem:[#allocation3 + $0x8d8] sm:$0xff]  ;;  %v317_v6 = vld [vmem:[#allocation3 + $0x4e0] sm:$0xff] }
 0x2e5   :  { %7323 = vmatpush1.bf16.msra.mxu1 %v8599_v33  ;;  %v1020_v33 = vld [vmem:[#allocation3 + $0x1ad8] sm:$0xff]  ;;  %v8248_v38 = vcombine.high %v428_v31, %v444_v32 }
 0x2e6   :  { %7324 = vmatprep.subr.bf16.mxu1 %v8568_v42  ;;  %v8855_v42 = vcombine.low %v1036_v39, %v1052_v8  ;;  %v8824_v21 = vcombine.high %v1004_v16, %v1020_v33  ;;  %v813_v39 = vld [vmem:[#allocation3 + $0x1460] sm:$0xff] }
 0x2e7   :  { %7282 = vmatpush1.bf16.msra.mxu0 %v8055_v24  ;;  %v972_v24 = vld [vmem:[#allocation3 + $0x1958] sm:$0xff]  ;;  %v829_v8 = vld [vmem:[#allocation3 + $0x14e0] sm:$0xff] }
 0x2e8   :  { %7283 = vmatprep.subr.bf16.mxu0 %v8024_v25  ;;  %v8311_v25 = vcombine.low %v492_v14, %v508_v28 }
 0x2e9   :  { %7325 = vmatpush1.bf16.msra.mxu1 %v8567_v43  ;;  %v988_v43 = vld [vmem:[#allocation3 + $0x19d8] sm:$0xff] }
 0x2ea   :  { %7326 = vmatprep.subr.bf16.mxu1 %v8536_v26  ;;  %v8823_v26 = vcombine.low %v1004_v16, %v1020_v33  ;;  %v8792_v30 = vcombine.high %v972_v24, %v988_v43 }
 0x2eb   :  { %7284 = vmatpush1.bf16.msra.mxu0 %v8023_v34  ;;  %v940_v34 = vld [vmem:[#allocation3 + $0x1858] sm:$0xff] }
 0x2ec   :  { %7285 = vmatprep.subr.bf16.mxu0 %v7992_v36  ;;  %v8279_v36 = vcombine.low %v460_v22, %v476_v23  ;;  %v781_v22 = vld [vmem:[#allocation3 + $0x1360] sm:$0xff] }
 0x2ed   :  { %7327 = vmatpush1.bf16.msra.mxu1 %v8535_v35  ;;  %v956_v35 = vld [vmem:[#allocation3 + $0x18d8] sm:$0xff]  ;;  %v797_v23 = vld [vmem:[#allocation3 + $0x13e0] sm:$0xff] }
 0x2ee   :  { %7328 = vmatprep.subr.bf16.mxu1 %v8504_v37  ;;  %v8791_v37 = vcombine.low %v972_v24, %v988_v43  ;;  %v8760_v40 = vcombine.high %v940_v34, %v956_v35  ;;  %v8633_v43 = vcombine.low %v813_v39, %v829_v8 }
 0x2ef   :  { %7286 = vmatpush1.bf16.msra.mxu0 %v7991_v44  ;;  %v909_v44 = vld [vmem:[#allocation3 + $0x1760] sm:$0xff] }
 0x2f0   :  { %7287 = vmatprep.subr.bf16.mxu0 %v8472_v46  ;;  %v8247_v46 = vcombine.low %v428_v31, %v444_v32  ;;  %v749_v31 = vld [vmem:[#allocation3 + $0x1260] sm:$0xff] }
 0x2f1   :  { %7329 = vmatpush1.bf16.msra.mxu1 %v8503_v45  ;;  %v925_v45 = vld [vmem:[#allocation3 + $0x17e0] sm:$0xff] }
 0x2f2   :  { %7330 = vmatprep.subr.bf16.mxu1 %v8984_v47  ;;  %v8759_v47 = vcombine.low %v940_v34, %v956_v35  ;;  %v8730_v56 = vcombine.high %v909_v44, %v925_v45  ;;  %v765_v32 = vld [vmem:[#allocation3 + $0x12e0] sm:$0xff]  ;;  %v8601_v35 = vcombine.low %v781_v22, %v797_v23 }
 0x2f3   :  { %7288 = vmatpush2.bf16.msra.mxu0 %v8471_v50  ;;  %v877_v50 = vld [vmem:[#allocation3 + $0x1660] sm:$0xff] }
 0x2f4   :  { %7289 = vmatprep.subr.bf16.mxu0 %v8440_v52  ;;  %v8217_v52 = vcombine.low %v397_v41, %v413_v12  ;;  %v717_v41 = vld [vmem:[#allocation3 + $0x1160] sm:$0xff] }
 0x2f5   :  { %7331 = vmatpush2.bf16.msra.mxu1 %v8983_v51  ;;  %v893_v51 = vld [vmem:[#allocation3 + $0x16e0] sm:$0xff] }
 0x2f6   :  { %7332 = vmatprep.subr.bf16.mxu1 %v8952_v53  ;;  %v8729_v53 = vcombine.low %v909_v44, %v925_v45  ;;  %v8698_v55 = vcombine.high %v877_v50, %v893_v51  ;;  %v8697_v2 = vcombine.low %v877_v50, %v893_v51  ;;  %v733_v12 = vld [vmem:[#allocation3 + $0x11e0] sm:$0xff]  ;;  %v8569_v45 = vcombine.low %v749_v31, %v765_v32 }
 0x2f7   :  { %7290 = vmatpush2.bf16.msra.mxu0 %v8439_v60  ;;  %v8537_v51 = vcombine.low %v717_v41, %v733_v12 }
 0x2f8   :  { %7291 = vmatprep.subr.bf16.mxu0 %v8408_v62  ;;  %v861_v62 = vld [vmem:[#allocation3 + $0x15e0] sm:$0xff] }
 0x2f9   :  { %7333 = vmatpush2.bf16.msra.mxu1 %v8951_v61  ;;  %v845_v61 = vld [vmem:[#allocation3 + $0x1560] sm:$0xff] }
 0x2fa   :  { %7334 = vmatprep.subr.bf16.mxu1 %v8920_v63  ;;  %v8665_v28 = vcombine.low %v845_v61, %v861_v62 }
 0x2fb   :  { %7292 = vmatpush2.bf16.msra.mxu0 %v8407_v3  ;;  %v8154_v3 = vcombine.high %v333_v57, %v349_v58 }
 0x2fc   :  { %7293 = vmatprep.subr.bf16.mxu0 %v8376_v5  ;;  %v8666_v5 = vcombine.high %v845_v61, %v861_v62  ;;  %v8505_v61 = vcombine.low %v685_v49, %v701_v59 }
 0x2fd   :  { %7335 = vmatpush2.bf16.msra.mxu1 %v8919_v4 }
 0x2fe   :  { %7336 = vmatprep.subr.bf16.mxu1 %v8888_v19  ;;  %v301_v19 = vld [vmem:[#allocation3 + $0x460] sm:$0xff] }
 0x2ff   :  { %7294 = vmatpush2.bf16.msra.mxu0 %v8375_v9  ;;  %v9301_v9 = vld [vmem:[%s9429_s0 + $0xc] ss:$16 sps:$4 sm:$0xff]   ;;  %v8122_v16 = vcombine.high %v301_v19, %v317_v6  ;;  %v8121_v24 = vcombine.low %v301_v19, %v317_v6  ;;  %v589_v6 = vld [vmem:[#allocation3 + $0xd60] sm:$0xff] }
 0x300   :  { %7295 = vmatprep.subr.bf16.mxu0 %v8344_v11  ;;  %v8153_v11 = vcombine.low %v333_v57, %v349_v58  ;;  %v1165_v57 = vld [vmem:[#allocation3 + $0x1f60] sm:$0xff] }
 0x301   :  { %7337 = vmatpush2.bf16.msra.mxu1 %v8887_v10  ;;  %v1181_v58 = vld [vmem:[#allocation3 + $0x1fe0] sm:$0xff] }
 0x302   :  { %7338 = vmatprep.subr.bf16.mxu1 %v8856_v13 }
 0x303   :  { %7296 = vmatpush2.bf16.msra.mxu0 %v8343_v17  ;;  %v8634_v17 = vcombine.high %v813_v39, %v829_v8  ;;  %v1117_v39 = vld [vmem:[#allocation3 + $0x1de0] sm:$0xff] }
 0x304   :  { %7297 = vmatprep.subr.bf16.mxu0 %v8312_v18  ;;  %v285_v18 = vld [vmem:[#allocation3 + $0x3e0] sm:$0xff] }
 0x305   :  { %7339 = vmatpush2.bf16.msra.mxu1 %v8855_v42  ;;  %v269_v42 = vld [vmem:[#allocation3 + $0x360] sm:$0xff] }
 0x306   :  { %7340 = vmatprep.subr.bf16.mxu1 %v8824_v21  ;;  %v8089_v34 = vcombine.low %v269_v42, %v285_v18 }
 0x307   :  { %7298 = vmatpush2.bf16.msra.mxu0 %v8311_v25  ;;  %v8090_v25 = vcombine.high %v269_v42, %v285_v18 }
 0x308   :  { %7299 = vmatprep.subr.bf16.mxu0 %v8280_v27  ;;  %v237_v27 = vld [vmem:[#allocation3 + $0x260] sm:$0xff] }
 0x309   :  { %7341 = vmatpush2.bf16.msra.mxu1 %v8823_v26  ;;  %v8602_v26 = vcombine.high %v781_v22, %v797_v23  ;;  %v525_v22 = vld [vmem:[#allocation3 + $0xb60] sm:$0xff] }
 0x30a   :  { %7342 = vmatprep.subr.bf16.mxu1 %v8792_v30  ;;  %v253_v30 = vld [vmem:[#allocation3 + $0x2e0] sm:$0xff] }
 0x30b   :  { %7300 = vmatpush2.bf16.msra.mxu0 %v8279_v36  ;;  %v8058_v36 = vcombine.high %v237_v27, %v253_v30  ;;  %v8057_v44 = vcombine.low %v237_v27, %v253_v30  ;;  %v541_v23 = vld [vmem:[#allocation3 + $0xbe0] sm:$0xff] }
 0x30c   :  { %7301 = vmatprep.subr.bf16.mxu0 %v8248_v38  ;;  %v205_v38 = vld [vmem:[#allocation3 + $0x160] sm:$0xff]  ;;  %v8346_v27 = vcombine.high %v525_v22, %v541_v23 }
 0x30d   :  { %7343 = vmatpush2.bf16.msra.mxu1 %v8791_v37  ;;  %v8570_v37 = vcombine.high %v749_v31, %v765_v32  ;;  %v493_v31 = vld [vmem:[#allocation3 + $0xa60] sm:$0xff] }
 0x30e   :  { %7344 = vmatprep.subr.bf16.mxu1 %v8760_v40  ;;  %v221_v40 = vld [vmem:[#allocation3 + $0x1e0] sm:$0xff] }
 0x30f   :  { %7302 = vmatpush2.bf16.msra.mxu0 %v8247_v46  ;;  %v8026_v46 = vcombine.high %v205_v38, %v221_v40  ;;  %v8025_v50 = vcombine.low %v205_v38, %v221_v40  ;;  %v509_v32 = vld [vmem:[#allocation3 + $0xae0] sm:$0xff] }
 0x310   :  { %7357 = vmatprep.subr.bf16.mxu0 %v8218_v48  ;;  %v173_v48 = vld [vmem:[#allocation3 + $0x60] sm:$0xff]  ;;  %v8314_v38 = vcombine.high %v493_v31, %v509_v32 }
 0x311   :  { %7345 = vmatpush2.bf16.msra.mxu1 %v8759_v47  ;;  %v8538_v47 = vcombine.high %v717_v41, %v733_v12  ;;  %v461_v41 = vld [vmem:[#allocation3 + $0x960] sm:$0xff] }
 0x312   :  { %7400 = vmatprep.subr.bf16.mxu1 %v8730_v56  ;;  %v7047_v60 = vpop.f32.mrf.mxu0  ;;  %7304 = vmatmul.mubr.bf16.vlgmr.msra.gmra.mxu0 %v9248_v20  ;;  %v9292_v20 = vld [vmem:[%s9429_s0 + $0x4] ss:$16 sps:$4 sm:$0xff]  }
 0x313   :  { %7358 = vmatpush1.bf16.msra.mxu0 %v8217_v52  ;;  %7389 = vmatprep.mubr.bf16.mxu0 %v9292_v20  ;;  %v189_v56 = vld [vmem:[#allocation3 + $0xe0] sm:$0xff] }
 0x314   :  { %v7090_v63 = vpop.f32.mrf.mxu1  ;;  %7347 = vmatmul.mubr.bf16.vlgmr.msra.gmra.mxu1 %v9254_v15  ;;  %v7049_v1 = vpop.f32.mrf.mxu0  ;;  %7359 = vmatprep.subr.bf16.mxu0 %v8186_v54  ;;  %v7994_v52 = vcombine.high %v173_v48, %v189_v56  ;;  %v653_v54 = vld [vmem:[#allocation3 + $0xf60] sm:$0xff] }
 0x315   :  { %v7091_v0 = vadd.f32 %v7090_v63, %v7047_v60  ;;  %7401 = vmatpush1.bf16.msra.mxu1 %v8729_v53  ;;  %7432 = vmatprep.mubr.bf16.mxu1 %v9301_v9  ;;  %v8506_v53 = vcombine.high %v685_v49, %v701_v59  ;;  %v7993_v60 = vcombine.low %v173_v48, %v189_v56  ;;  %v477_v12 = vld [vmem:[#allocation3 + $0x9e0] sm:$0xff] }
 0x316   :  { %v7092_v4 = vpop.f32.mrf.mxu1  ;;  %7402 = vmatprep.subr.bf16.mxu1 %v8698_v55  ;;  %v7051_v7 = vpop.f32.mrf.mxu0  ;;  %v669_v55 = vld [vmem:[#allocation3 + $0xfe0] sm:$0xff]  ;;  %v8986_v63 = vcombine.high %v1165_v57, %v1181_v58  ;;  %v8282_v48 = vcombine.high %v461_v41, %v477_v12 }
 0x317   :  { %7912 = vst [vmem:[%s9431_s2 + $0x80] sm:$0xff] %v7091_v0  ;;  %v7093_v15 = vadd.f32 %v7092_v4, %v7049_v1  ;;  %7360 = vmatpush1.bf16.msra.mxu0 %v8185_v29  ;;  %v8474_v62 = vcombine.high %v653_v54, %v669_v55  ;;  %v621_v29 = vld [vmem:[#allocation3 + $0xe60] sm:$0xff]  ;;  %v8985_v4 = vcombine.low %v1165_v57, %v1181_v58  ;;  %v398_v57 = vld [vmem:[#allocation3 + $0x768] sm:$0xff] }
 0x318   :  { %v7094_v10 = vpop.f32.mrf.mxu1  ;;  %v7053_v14 = vpop.f32.mrf.mxu0  ;;  %7361 = vmatprep.subr.bf16.mxu0 %v8154_v3  ;;  %v637_v0 = vld [vmem:[#allocation3 + $0xee0] sm:$0xff]  ;;  %v8473_v3 = vcombine.low %v653_v54, %v669_v55  ;;  %v414_v58 = vld [vmem:[#allocation3 + $0x7e8] sm:$0xff] }
 0x319   :  { %7913 = vst [vmem:[%s9431_s2 + $0x88] sm:$0xff] %v7093_v15  ;;  %v7095_v13 = vadd.f32 %v7094_v10, %v7051_v7  ;;  %7403 = vmatpush1.bf16.msra.mxu1 %v8697_v2  ;;  %v1133_v1 = vld [vmem:[#allocation3 + $0x1e60] sm:$0xff]  ;;  %v8441_v8 = vcombine.low %v621_v29, %v637_v0 }
 0x31a   :  { %v7096_v33 = vpop.f32.mrf.mxu1  ;;  %7404 = vmatprep.subr.bf16.mxu1 %v8666_v5  ;;  %v1149_v2 = vld [vmem:[#allocation3 + $0x1ee0] sm:$0xff]  ;;  %v8442_v5 = vcombine.high %v621_v29, %v637_v0  ;;  %v8220_v29 = vcombine.high %v398_v57, %v414_v58 }
 0x31b   :  { %7944 = vst [vmem:[%s9431_s2 + $0x180] sm:$0xff] %v7095_v13  ;;  %v7097_v21 = vadd.f32 %v7096_v33, %v7053_v14  ;;  %7362 = vmatpush1.bf16.msra.mxu0 %v8153_v11  ;;  %v8954_v19 = vcombine.high %v1133_v1, %v1149_v2  ;;  %v605_v15 = vld [vmem:[#allocation3 + $0xde0] sm:$0xff]  ;;  %v8953_v10 = vcombine.low %v1133_v1, %v1149_v2  ;;  %v366_v1 = vld [vmem:[#allocation3 + $0x668] sm:$0xff] }
 0x31c   :  { %7363 = vmatprep.subr.bf16.mxu0 %v8122_v16  ;;  %v1101_v7 = vld [vmem:[#allocation3 + $0x1d60] sm:$0xff]  ;;  %v8410_v11 = vcombine.high %v589_v6, %v605_v15  ;;  %v382_v2 = vld [vmem:[#allocation3 + $0x6e8] sm:$0xff] }
 0x31d   :  { %7945 = vst [vmem:[%s9431_s2 + $0x188] sm:$0xff] %v7097_v21  ;;  %7405 = vmatpush1.bf16.msra.mxu1 %v8665_v28  ;;  %v8922_v13 = vcombine.high %v1101_v7, %v1117_v39  ;;  %v557_v14 = vld [vmem:[#allocation3 + $0xc60] sm:$0xff]  ;;  %v8921_v42 = vcombine.low %v1101_v7, %v1117_v39  ;;  %v334_v7 = vld [vmem:[#allocation3 + $0x568] sm:$0xff] }
 0x31e   :  { %7406 = vmatprep.subr.bf16.mxu1 %v8634_v17  ;;  %v573_v28 = vld [vmem:[#allocation3 + $0xce0] sm:$0xff]  ;;  %v8409_v17 = vcombine.low %v589_v6, %v605_v15  ;;  %v8188_v6 = vcombine.high %v366_v1, %v382_v2  ;;  %v350_v39 = vld [vmem:[#allocation3 + $0x5e8] sm:$0xff] }
 0x31f   :  { %7364 = vmatpush1.bf16.msra.mxu0 %v8121_v24  ;;  %v1069_v16 = vld [vmem:[#allocation3 + $0x1c60] sm:$0xff]  ;;  %v8378_v18 = vcombine.high %v557_v14, %v573_v28 }
 0x320   :  { %7365 = vmatprep.subr.bf16.mxu0 %v8090_v25  ;;  %v1085_v33 = vld [vmem:[#allocation3 + $0x1ce0] sm:$0xff]  ;;  %v8377_v25 = vcombine.low %v557_v14, %v573_v28  ;;  %v9322_v28 = vld [vmem:[%s9429_s0 + $0x8] ss:$16 sps:$4 sm:$0xff]  }
 0x321   :  { %7407 = vmatpush1.bf16.msra.mxu1 %v8633_v43  ;;  %v8890_v21 = vcombine.high %v1069_v16, %v1085_v33  ;;  %v1037_v24 = vld [vmem:[#allocation3 + $0x1b60] sm:$0xff] }
 0x322   :  { %7408 = vmatprep.subr.bf16.mxu1 %v8602_v26  ;;  %v1053_v43 = vld [vmem:[#allocation3 + $0x1be0] sm:$0xff]  ;;  %v8889_v26 = vcombine.low %v1069_v16, %v1085_v33  ;;  %v8187_v16 = vcombine.low %v366_v1, %v382_v2  ;;  %v174_v1 = vld [vmem:[#allocation3 + $0x68] sm:$0xff] }
 0x323   :  { %7366 = vmatpush1.bf16.msra.mxu0 %v8089_v34  ;;  %v8858_v30 = vcombine.high %v1037_v24, %v1053_v43  ;;  %v1005_v34 = vld [vmem:[#allocation3 + $0x1a60] sm:$0xff]  ;;  %v190_v2 = vld [vmem:[#allocation3 + $0xe8] sm:$0xff] }
 0x324   :  { %7367 = vmatprep.subr.bf16.mxu0 %v8058_v36  ;;  %v8345_v36 = vcombine.low %v525_v22, %v541_v23  ;;  %v429_v49 = vld [vmem:[#allocation3 + $0x860] sm:$0xff]  ;;  %v302_v23 = vld [vmem:[#allocation3 + $0x468] sm:$0xff] }
 0x325   :  { %7409 = vmatpush1.bf16.msra.mxu1 %v8601_v35  ;;  %v1021_v35 = vld [vmem:[#allocation3 + $0x1ae0] sm:$0xff] }
 0x326   :  { %7410 = vmatprep.subr.bf16.mxu1 %v8570_v37  ;;  %v8857_v37 = vcombine.low %v1037_v24, %v1053_v43  ;;  %v8826_v40 = vcombine.high %v1005_v34, %v1021_v35  ;;  %v445_v59 = vld [vmem:[#allocation3 + $0x8e0] sm:$0xff]  ;;  %v318_v24 = vld [vmem:[#allocation3 + $0x4e8] sm:$0xff] }
 0x327   :  { %7368 = vmatpush1.bf16.msra.mxu0 %v8057_v44  ;;  %v973_v44 = vld [vmem:[#allocation3 + $0x1960] sm:$0xff]  ;;  %v8250_v54 = vcombine.high %v429_v49, %v445_v59 }
 0x328   :  { %7369 = vmatprep.subr.bf16.mxu0 %v8026_v46  ;;  %v8313_v46 = vcombine.low %v493_v31, %v509_v32  ;;  %v8155_v31 = vcombine.low %v334_v7, %v350_v39 }
 0x329   :  { %7411 = vmatpush1.bf16.msra.mxu1 %v8569_v45  ;;  %v989_v45 = vld [vmem:[#allocation3 + $0x19e0] sm:$0xff] }
 0x32a   :  { %7412 = vmatprep.subr.bf16.mxu1 %v8538_v47  ;;  %v8825_v47 = vcombine.low %v1005_v34, %v1021_v35  ;;  %v8794_v56 = vcombine.high %v973_v44, %v989_v45 }
 0x32b   :  { %7370 = vmatpush1.bf16.msra.mxu0 %v8025_v50  ;;  %v941_v50 = vld [vmem:[#allocation3 + $0x1860] sm:$0xff] }
 0x32c   :  { %7371 = vmatprep.subr.bf16.mxu0 %v7994_v52  ;;  %v8281_v52 = vcombine.low %v461_v41, %v477_v12  ;;  %v286_v41 = vld [vmem:[#allocation3 + $0x3e8] sm:$0xff] }
 0x32d   :  { %7413 = vmatpush1.bf16.msra.mxu1 %v8537_v51  ;;  %v957_v51 = vld [vmem:[#allocation3 + $0x18e0] sm:$0xff] }
 0x32e   :  { %7414 = vmatprep.subr.bf16.mxu1 %v8506_v53  ;;  %v8793_v53 = vcombine.low %v973_v44, %v989_v45  ;;  %v8762_v55 = vcombine.high %v941_v50, %v957_v51  ;;  %v782_v44 = vld [vmem:[#allocation3 + $0x1368] sm:$0xff] }
 0x32f   :  { %7372 = vmatpush1.bf16.msra.mxu0 %v7993_v60  ;;  %v910_v60 = vld [vmem:[#allocation3 + $0x1768] sm:$0xff] }
 0x330   :  { %7373 = vmatprep.subr.bf16.mxu0 %v8474_v62  ;;  %v8249_v62 = vcombine.low %v429_v49, %v445_v59  ;;  %v798_v45 = vld [vmem:[#allocation3 + $0x13e8] sm:$0xff] }
 0x331   :  { %7415 = vmatpush1.bf16.msra.mxu1 %v8505_v61  ;;  %v926_v61 = vld [vmem:[#allocation3 + $0x17e8] sm:$0xff] }
 0x332   :  { %7416 = vmatprep.subr.bf16.mxu1 %v8986_v63  ;;  %v8761_v63 = vcombine.low %v941_v50, %v957_v51  ;;  %v8732_v0 = vcombine.high %v910_v60, %v926_v61  ;;  %v238_v49 = vld [vmem:[#allocation3 + $0x268] sm:$0xff] }
 0x333   :  { %7374 = vmatpush2.bf16.msra.mxu0 %v8473_v3  ;;  %v878_v3 = vld [vmem:[#allocation3 + $0x1668] sm:$0xff] }
 0x334   :  { %7375 = vmatprep.subr.bf16.mxu0 %v8442_v5  ;;  %v8219_v5 = vcombine.low %v398_v57, %v414_v58  ;;  %v254_v59 = vld [vmem:[#allocation3 + $0x2e8] sm:$0xff] }
 0x335   :  { %7417 = vmatpush2.bf16.msra.mxu1 %v8985_v4  ;;  %v894_v4 = vld [vmem:[#allocation3 + $0x16e8] sm:$0xff] }
 0x336   :  { %7418 = vmatprep.subr.bf16.mxu1 %v8954_v19  ;;  %v8731_v19 = vcombine.low %v910_v60, %v926_v61  ;;  %v8700_v15 = vcombine.high %v878_v3, %v894_v4  ;;  %v750_v50 = vld [vmem:[#allocation3 + $0x1268] sm:$0xff] }
 0x337   :  { %7376 = vmatpush2.bf16.msra.mxu0 %v8441_v8  ;;  %v766_v51 = vld [vmem:[#allocation3 + $0x12e8] sm:$0xff] }
 0x338   :  { %7377 = vmatprep.subr.bf16.mxu0 %v8410_v11  ;;  %v846_v11 = vld [vmem:[#allocation3 + $0x1568] sm:$0xff] }
 0x339   :  { %7419 = vmatpush2.bf16.msra.mxu1 %v8953_v10  ;;  %v9316_v10 = vld [vmem:[%s9429_s0] ss:$16 sps:$4 sm:$0xff]   ;;  %v206_v57 = vld [vmem:[#allocation3 + $0x168] sm:$0xff] }
 0x33a   :  { %7420 = vmatprep.subr.bf16.mxu1 %v8922_v13  ;;  %v862_v13 = vld [vmem:[#allocation3 + $0x15e8] sm:$0xff] }
 0x33b   :  { %7378 = vmatpush2.bf16.msra.mxu0 %v8409_v17  ;;  %v8668_v22 = vcombine.high %v846_v11, %v862_v13  ;;  %v8667_v35 = vcombine.low %v846_v11, %v862_v13  ;;  %v222_v58 = vld [vmem:[#allocation3 + $0x1e8] sm:$0xff]  ;;  %v7995_v13 = vcombine.low %v174_v1, %v190_v2 }
 0x33c   :  { %7379 = vmatprep.subr.bf16.mxu0 %v8378_v18  ;;  %v8156_v18 = vcombine.high %v334_v7, %v350_v39  ;;  %v718_v60 = vld [vmem:[#allocation3 + $0x1168] sm:$0xff] }
 0x33d   :  { %7421 = vmatpush2.bf16.msra.mxu1 %v8921_v42  ;;  %v8699_v42 = vcombine.low %v878_v3, %v894_v4  ;;  %v734_v61 = vld [vmem:[#allocation3 + $0x11e8] sm:$0xff] }
 0x33e   :  { %7422 = vmatprep.subr.bf16.mxu1 %v8890_v21  ;;  %v686_v3 = vld [vmem:[#allocation3 + $0x1068] sm:$0xff] }
 0x33f   :  { %7380 = vmatpush2.bf16.msra.mxu0 %v8377_v25  ;;  %v702_v4 = vld [vmem:[#allocation3 + $0x10e8] sm:$0xff] }
 0x340   :  { %7381 = vmatprep.subr.bf16.mxu0 %v8346_v27  ;;  %v830_v27 = vld [vmem:[#allocation3 + $0x14e8] sm:$0xff] }
 0x341   :  { %7423 = vmatpush2.bf16.msra.mxu1 %v8889_v26  ;;  %v814_v26 = vld [vmem:[#allocation3 + $0x1468] sm:$0xff] }
 0x342   :  { %7424 = vmatprep.subr.bf16.mxu1 %v8858_v30  ;;  %v654_v7 = vld [vmem:[#allocation3 + $0xf68] sm:$0xff] }
 0x343   :  { %7382 = vmatpush2.bf16.msra.mxu0 %v8345_v36  ;;  %v8124_v36 = vcombine.high %v302_v23, %v318_v24  ;;  %v670_v39 = vld [vmem:[#allocation3 + $0xfe8] sm:$0xff] }
 0x344   :  { %7383 = vmatprep.subr.bf16.mxu0 %v8314_v38  ;;  %v8636_v38 = vcombine.high %v814_v26, %v830_v27  ;;  %v1182_v11 = vld [vmem:[#allocation3 + $0x1fe8] sm:$0xff] }
 0x345   :  { %7425 = vmatpush2.bf16.msra.mxu1 %v8857_v37 }
 0x346   :  { %7426 = vmatprep.subr.bf16.mxu1 %v8826_v40  ;;  %v270_v40 = vld [vmem:[#allocation3 + $0x368] sm:$0xff] }
 0x347   :  { %7384 = vmatpush2.bf16.msra.mxu0 %v8313_v46  ;;  %v8123_v46 = vcombine.low %v302_v23, %v318_v24 }
 0x348   :  { %7385 = vmatprep.subr.bf16.mxu0 %v8282_v48  ;;  %v8092_v48 = vcombine.high %v270_v40, %v286_v41 }
 0x349   :  { %7427 = vmatpush2.bf16.msra.mxu1 %v8825_v47  ;;  %v8635_v47 = vcombine.low %v814_v26, %v830_v27  ;;  %v606_v26 = vld [vmem:[#allocation3 + $0xde8] sm:$0xff] }
 0x34a   :  { %7428 = vmatprep.subr.bf16.mxu1 %v8794_v56  ;;  %v8604_v56 = vcombine.high %v782_v44, %v798_v45  ;;  %v1102_v27 = vld [vmem:[#allocation3 + $0x1d68] sm:$0xff] }
 0x34b   :  { %7386 = vmatpush2.bf16.msra.mxu0 %v8281_v52  ;;  %v8091_v52 = vcombine.low %v270_v40, %v286_v41  ;;  %v1086_v40 = vld [vmem:[#allocation3 + $0x1ce8] sm:$0xff] }
 0x34c   :  { %7387 = vmatprep.subr.bf16.mxu0 %v8250_v54  ;;  %v8060_v54 = vcombine.high %v238_v49, %v254_v59 }
 0x34d   :  { %7429 = vmatpush2.bf16.msra.mxu1 %v8793_v53  ;;  %v8603_v53 = vcombine.low %v782_v44, %v798_v45 }
 0x34e   :  { %7430 = vmatprep.subr.bf16.mxu1 %v8762_v55  ;;  %v8572_v55 = vcombine.high %v750_v50, %v766_v51 }
 0x34f   :  { %7388 = vmatpush2.bf16.msra.mxu0 %v8249_v62  ;;  %v8059_v62 = vcombine.low %v238_v49, %v254_v59 }
 0x350   :  { %7443 = vmatprep.subr.bf16.mxu0 %v8220_v29  ;;  %v8028_v29 = vcombine.high %v206_v57, %v222_v58 }
 0x351   :  { %7431 = vmatpush2.bf16.msra.mxu1 %v8761_v63  ;;  %v8571_v63 = vcombine.low %v750_v50, %v766_v51 }
 0x352   :  { %7486 = vmatprep.subr.bf16.mxu1 %v8732_v0  ;;  %v7133_v8 = vpop.f32.mrf.mxu0  ;;  %7390 = vmatmul.mubr.bf16.vlgmr.msra.gmra.mxu0 %v9316_v10  ;;  %v8540_v0 = vcombine.high %v718_v60, %v734_v61 }
 0x353   :  { %7444 = vmatpush1.bf16.msra.mxu0 %v8219_v5  ;;  %7475 = vmatprep.mubr.bf16.mxu0 %v9292_v20  ;;  %v8027_v5 = vcombine.low %v206_v57, %v222_v58 }
 0x354   :  { %v7176_v14 = vpop.f32.mrf.mxu1  ;;  %7433 = vmatmul.mubr.bf16.vlgmr.msra.gmra.mxu1 %v9322_v28  ;;  %v7135_v17 = vpop.f32.mrf.mxu0  ;;  %7445 = vmatprep.subr.bf16.mxu0 %v8188_v6  ;;  %v7996_v6 = vcombine.high %v174_v1, %v190_v2 }
 0x355   :  { %v7177_v33 = vadd.f32 %v7176_v14, %v7133_v8  ;;  %7487 = vmatpush1.bf16.msra.mxu1 %v8731_v19  ;;  %7518 = vmatprep.mubr.bf16.mxu1 %v9301_v9  ;;  %v8539_v19 = vcombine.low %v718_v60, %v734_v61  ;;  %v1166_v8 = vld [vmem:[#allocation3 + $0x1f68] sm:$0xff]  ;;  %v8507_v14 = vcombine.low %v686_v3, %v702_v4 }
 0x356   :  { %v7178_v21 = vpop.f32.mrf.mxu1  ;;  %7488 = vmatprep.subr.bf16.mxu1 %v8700_v15  ;;  %v7137_v25 = vpop.f32.mrf.mxu0  ;;  %v8508_v15 = vcombine.high %v686_v3, %v702_v4  ;;  %v8987_v23 = vcombine.low %v1166_v8, %v1182_v11 }
 0x357   :  { %7914 = vst [vmem:[%s9431_s2 + $0x90] sm:$0xff] %v7177_v33  ;;  %v7179_v43 = vadd.f32 %v7178_v21, %v7135_v17  ;;  %7446 = vmatpush1.bf16.msra.mxu0 %v8187_v16  ;;  %v8476_v16 = vcombine.high %v654_v7, %v670_v39  ;;  %v8988_v33 = vcombine.high %v1166_v8, %v1182_v11  ;;  %v622_v17 = vld [vmem:[#allocation3 + $0xe68] sm:$0xff] }
 0x358   :  { %v7180_v30 = vpop.f32.mrf.mxu1  ;;  %v7139_v34 = vpop.f32.mrf.mxu0  ;;  %7447 = vmatprep.subr.bf16.mxu0 %v8156_v18  ;;  %v1134_v18 = vld [vmem:[#allocation3 + $0x1e68] sm:$0xff] }
 0x359   :  { %7915 = vst [vmem:[%s9431_s2 + $0x98] sm:$0xff] %v7179_v43  ;;  %v7181_v32 = vadd.f32 %v7180_v30, %v7137_v25  ;;  %7489 = vmatpush1.bf16.msra.mxu1 %v8699_v42  ;;  %v638_v42 = vld [vmem:[#allocation3 + $0xee8] sm:$0xff] }
 0x35a   :  { %v7182_v37 = vpop.f32.mrf.mxu1  ;;  %7490 = vmatprep.subr.bf16.mxu1 %v8668_v22  ;;  %v1150_v21 = vld [vmem:[#allocation3 + $0x1ee8] sm:$0xff]  ;;  %v8475_v22 = vcombine.low %v654_v7, %v670_v39  ;;  %v8444_v24 = vcombine.high %v622_v17, %v638_v42 }
 0x35b   :  { %7946 = vst [vmem:[%s9431_s2 + $0x190] sm:$0xff] %v7181_v32  ;;  %v7183_v12 = vadd.f32 %v7182_v37, %v7139_v34  ;;  %7448 = vmatpush1.bf16.msra.mxu0 %v8155_v31  ;;  %v8956_v43 = vcombine.high %v1134_v18, %v1150_v21  ;;  %v590_v25 = vld [vmem:[#allocation3 + $0xd68] sm:$0xff]  ;;  %v8443_v31 = vcombine.low %v622_v17, %v638_v42 }
 0x35c   :  { %7449 = vmatprep.subr.bf16.mxu0 %v8124_v36  ;;  %v1118_v30 = vld [vmem:[#allocation3 + $0x1de8] sm:$0xff]  ;;  %v8955_v32 = vcombine.low %v1134_v18, %v1150_v21  ;;  %v8412_v34 = vcombine.high %v590_v25, %v606_v26  ;;  %v8411_v41 = vcombine.low %v590_v25, %v606_v26 }
 0x35d   :  { %7947 = vst [vmem:[%s9431_s2 + $0x198] sm:$0xff] %v7183_v12  ;;  %7491 = vmatpush1.bf16.msra.mxu1 %v8667_v35  ;;  %v8924_v35 = vcombine.high %v1102_v27, %v1118_v30  ;;  %v558_v36 = vld [vmem:[#allocation3 + $0xc68] sm:$0xff]  ;;  %v8923_v12 = vcombine.low %v1102_v27, %v1118_v30 }
 0x35e   :  { %7492 = vmatprep.subr.bf16.mxu1 %v8636_v38  ;;  %v574_v37 = vld [vmem:[#allocation3 + $0xce8] sm:$0xff] }
 0x35f   :  { %7450 = vmatpush1.bf16.msra.mxu0 %v8123_v46  ;;  %v1070_v38 = vld [vmem:[#allocation3 + $0x1c68] sm:$0xff]  ;;  %v8380_v44 = vcombine.high %v558_v36, %v574_v37  ;;  %v8379_v49 = vcombine.low %v558_v36, %v574_v37  ;;  %v863_v36 = vld [vmem:[#allocation3 + $0x15f0] sm:$0xff] }
 0x360   :  { %7451 = vmatprep.subr.bf16.mxu0 %v8092_v48  ;;  %v8892_v45 = vcombine.high %v1070_v38, %v1086_v40  ;;  %v526_v46 = vld [vmem:[#allocation3 + $0xb68] sm:$0xff]  ;;  %v8891_v59 = vcombine.low %v1070_v38, %v1086_v40 }
 0x361   :  { %7493 = vmatpush1.bf16.msra.mxu1 %v8635_v47  ;;  %v542_v47 = vld [vmem:[#allocation3 + $0xbe8] sm:$0xff] }
 0x362   :  { %7494 = vmatprep.subr.bf16.mxu1 %v8604_v56  ;;  %v1038_v48 = vld [vmem:[#allocation3 + $0x1b68] sm:$0xff]  ;;  %v8348_v50 = vcombine.high %v526_v46, %v542_v47  ;;  %v8347_v57 = vcombine.low %v526_v46, %v542_v47  ;;  %v303_v47 = vld [vmem:[#allocation3 + $0x470] sm:$0xff] }
 0x363   :  { %7452 = vmatpush1.bf16.msra.mxu0 %v8091_v52  ;;  %v1054_v56 = vld [vmem:[#allocation3 + $0x1be8] sm:$0xff] }
 0x364   :  { %7453 = vmatprep.subr.bf16.mxu0 %v8060_v54  ;;  %v8860_v51 = vcombine.high %v1038_v48, %v1054_v56  ;;  %v494_v52 = vld [vmem:[#allocation3 + $0xa68] sm:$0xff]  ;;  %v8859_v58 = vcombine.low %v1038_v48, %v1054_v56  ;;  %v319_v48 = vld [vmem:[#allocation3 + $0x4f0] sm:$0xff] }
 0x365   :  { %7495 = vmatpush1.bf16.msra.mxu1 %v8603_v53  ;;  %v510_v53 = vld [vmem:[#allocation3 + $0xae8] sm:$0xff] }
 0x366   :  { %7496 = vmatprep.subr.bf16.mxu1 %v8572_v55  ;;  %v1006_v54 = vld [vmem:[#allocation3 + $0x1a68] sm:$0xff]  ;;  %v8316_v60 = vcombine.high %v494_v52, %v510_v53  ;;  %v8315_v1 = vcombine.low %v494_v52, %v510_v53 }
 0x367   :  { %7454 = vmatpush1.bf16.msra.mxu0 %v8059_v62  ;;  %v1022_v55 = vld [vmem:[#allocation3 + $0x1ae8] sm:$0xff] }
 0x368   :  { %7455 = vmatprep.subr.bf16.mxu0 %v8028_v29  ;;  %v8828_v61 = vcombine.high %v1006_v54, %v1022_v55  ;;  %v462_v62 = vld [vmem:[#allocation3 + $0x968] sm:$0xff]  ;;  %v8827_v2 = vcombine.low %v1006_v54, %v1022_v55  ;;  %v8126_v55 = vcombine.high %v303_v47, %v319_v48 }
 0x369   :  { %7497 = vmatpush1.bf16.msra.mxu1 %v8571_v63  ;;  %v478_v63 = vld [vmem:[#allocation3 + $0x9e8] sm:$0xff] }
 0x36a   :  { %7498 = vmatprep.subr.bf16.mxu1 %v8540_v0  ;;  %v974_v29 = vld [vmem:[#allocation3 + $0x1968] sm:$0xff]  ;;  %v8284_v3 = vcombine.high %v462_v62, %v478_v63  ;;  %v8283_v7 = vcombine.low %v462_v62, %v478_v63  ;;  %v783_v62 = vld [vmem:[#allocation3 + $0x1370] sm:$0xff] }
 0x36b   :  { %7456 = vmatpush1.bf16.msra.mxu0 %v8027_v5  ;;  %v990_v0 = vld [vmem:[#allocation3 + $0x19e8] sm:$0xff]  ;;  %v799_v63 = vld [vmem:[#allocation3 + $0x13f0] sm:$0xff] }
 0x36c   :  { %7457 = vmatprep.subr.bf16.mxu0 %v7996_v6  ;;  %v8796_v4 = vcombine.high %v974_v29, %v990_v0  ;;  %v430_v5 = vld [vmem:[#allocation3 + $0x868] sm:$0xff]  ;;  %v8795_v39 = vcombine.low %v974_v29, %v990_v0  ;;  %v8125_v29 = vcombine.low %v303_v47, %v319_v48  ;;  %v591_v48 = vld [vmem:[#allocation3 + $0xd70] sm:$0xff] }
 0x36d   :  { %7499 = vmatpush1.bf16.msra.mxu1 %v8539_v19  ;;  %v446_v19 = vld [vmem:[#allocation3 + $0x8e8] sm:$0xff] }
 0x36e   :  { %7500 = vmatprep.subr.bf16.mxu1 %v8508_v15  ;;  %v942_v6 = vld [vmem:[#allocation3 + $0x1868] sm:$0xff]  ;;  %v8252_v8 = vcombine.high %v430_v5, %v446_v19  ;;  %v8251_v17 = vcombine.low %v430_v5, %v446_v19  ;;  %v751_v5 = vld [vmem:[#allocation3 + $0x1270] sm:$0xff] }
 0x36f   :  { %7458 = vmatpush1.bf16.msra.mxu0 %v7995_v13  ;;  %v958_v15 = vld [vmem:[#allocation3 + $0x18e8] sm:$0xff]  ;;  %v399_v13 = vld [vmem:[#allocation3 + $0x770] sm:$0xff] }
 0x370   :  { %7459 = vmatprep.subr.bf16.mxu0 %v8476_v16  ;;  %v8764_v11 = vcombine.high %v942_v6, %v958_v15  ;;  %v911_v16 = vld [vmem:[#allocation3 + $0x1770] sm:$0xff]  ;;  %v8763_v42 = vcombine.low %v942_v6, %v958_v15  ;;  %v8605_v15 = vcombine.low %v783_v62, %v799_v63 }
 0x371   :  { %7501 = vmatpush1.bf16.msra.mxu1 %v8507_v14  ;;  %v415_v14 = vld [vmem:[#allocation3 + $0x7f0] sm:$0xff] }
 0x372   :  { %7502 = vmatprep.subr.bf16.mxu1 %v8988_v33  ;;  %v927_v33 = vld [vmem:[#allocation3 + $0x17f0] sm:$0xff]  ;;  %v8222_v18 = vcombine.high %v399_v13, %v415_v14  ;;  %v8221_v25 = vcombine.low %v399_v13, %v415_v14 }
 0x373   :  { %7460 = vmatpush2.bf16.msra.mxu0 %v8475_v22  ;;  %v8734_v21 = vcombine.high %v911_v16, %v927_v33  ;;  %v367_v22 = vld [vmem:[#allocation3 + $0x670] sm:$0xff]  ;;  %v8733_v26 = vcombine.low %v911_v16, %v927_v33 }
 0x374   :  { %7461 = vmatprep.subr.bf16.mxu0 %v8444_v24  ;;  %v879_v24 = vld [vmem:[#allocation3 + $0x1670] sm:$0xff] }
 0x375   :  { %7503 = vmatpush2.bf16.msra.mxu1 %v8987_v23  ;;  %v383_v23 = vld [vmem:[#allocation3 + $0x6f0] sm:$0xff] }
 0x376   :  { %7504 = vmatprep.subr.bf16.mxu1 %v8956_v43  ;;  %v895_v43 = vld [vmem:[#allocation3 + $0x16f0] sm:$0xff]  ;;  %v8190_v27 = vcombine.high %v367_v22, %v383_v23  ;;  %v8189_v38 = vcombine.low %v367_v22, %v383_v23 }
 0x377   :  { %7462 = vmatpush2.bf16.msra.mxu0 %v8443_v31  ;;  %v8702_v30 = vcombine.high %v879_v24, %v895_v43  ;;  %v335_v31 = vld [vmem:[#allocation3 + $0x570] sm:$0xff] }
 0x378   :  { %7463 = vmatprep.subr.bf16.mxu0 %v8412_v34  ;;  %v767_v19 = vld [vmem:[#allocation3 + $0x12f0] sm:$0xff] }
 0x379   :  { %7505 = vmatpush2.bf16.msra.mxu1 %v8955_v32  ;;  %v351_v32 = vld [vmem:[#allocation3 + $0x5f0] sm:$0xff]  ;;  %v8573_v33 = vcombine.low %v751_v5, %v767_v19 }
 0x37a   :  { %7506 = vmatprep.subr.bf16.mxu1 %v8924_v35  ;;  %v847_v35 = vld [vmem:[#allocation3 + $0x1570] sm:$0xff]  ;;  %v8157_v52 = vcombine.low %v335_v31, %v351_v32 }
 0x37b   :  { %7464 = vmatpush2.bf16.msra.mxu0 %v8411_v41  ;;  %v8670_v46 = vcombine.high %v847_v35, %v863_v36  ;;  %v8669_v54 = vcombine.low %v847_v35, %v863_v36  ;;  %v719_v13 = vld [vmem:[#allocation3 + $0x1170] sm:$0xff] }
 0x37c   :  { %7465 = vmatprep.subr.bf16.mxu0 %v8380_v44  ;;  %v8158_v44 = vcombine.high %v335_v31, %v351_v32  ;;  %v735_v14 = vld [vmem:[#allocation3 + $0x11f0] sm:$0xff] }
 0x37d   :  { %7507 = vmatpush2.bf16.msra.mxu1 %v8923_v12  ;;  %v8701_v12 = vcombine.low %v879_v24, %v895_v43  ;;  %v687_v22 = vld [vmem:[#allocation3 + $0x1070] sm:$0xff]  ;;  %v8541_v43 = vcombine.low %v719_v13, %v735_v14 }
 0x37e   :  { %7508 = vmatprep.subr.bf16.mxu1 %v8892_v45  ;;  %v703_v23 = vld [vmem:[#allocation3 + $0x10f0] sm:$0xff] }
 0x37f   :  { %7466 = vmatpush2.bf16.msra.mxu0 %v8379_v49  ;;  %v1167_v31 = vld [vmem:[#allocation3 + $0x1f70] sm:$0xff]  ;;  %v8509_v35 = vcombine.low %v687_v22, %v703_v23 }
 0x380   :  { %7467 = vmatprep.subr.bf16.mxu0 %v8348_v50  ;;  %v831_v50 = vld [vmem:[#allocation3 + $0x14f0] sm:$0xff] }
 0x381   :  { %7509 = vmatpush2.bf16.msra.mxu1 %v8891_v59  ;;  %v815_v59 = vld [vmem:[#allocation3 + $0x1470] sm:$0xff] }
 0x382   :  { %7510 = vmatprep.subr.bf16.mxu1 %v8860_v51  ;;  %v8637_v0 = vcombine.low %v815_v59, %v831_v50  ;;  %v1183_v32 = vld [vmem:[#allocation3 + $0x1ff0] sm:$0xff] }
 0x383   :  { %7468 = vmatpush2.bf16.msra.mxu0 %v8347_v57 }
 0x384   :  { %7469 = vmatprep.subr.bf16.mxu0 %v8316_v60  ;;  %v271_v60 = vld [vmem:[#allocation3 + $0x370] sm:$0xff] }
 0x385   :  { %7511 = vmatpush2.bf16.msra.mxu1 %v8859_v58  ;;  %v8638_v58 = vcombine.high %v815_v59, %v831_v50  ;;  %v1119_v59 = vld [vmem:[#allocation3 + $0x1df0] sm:$0xff] }
 0x386   :  { %7512 = vmatprep.subr.bf16.mxu1 %v8828_v61  ;;  %v287_v61 = vld [vmem:[#allocation3 + $0x3f0] sm:$0xff] }
 0x387   :  { %7470 = vmatpush2.bf16.msra.mxu0 %v8315_v1  ;;  %v8094_v1 = vcombine.high %v271_v60, %v287_v61  ;;  %v8093_v6 = vcombine.low %v271_v60, %v287_v61 }
 0x388   :  { %7471 = vmatprep.subr.bf16.mxu0 %v8284_v3  ;;  %v239_v3 = vld [vmem:[#allocation3 + $0x270] sm:$0xff] }
 0x389   :  { %7513 = vmatpush2.bf16.msra.mxu1 %v8827_v2  ;;  %v8606_v2 = vcombine.high %v783_v62, %v799_v63  ;;  %v527_v62 = vld [vmem:[#allocation3 + $0xb70] sm:$0xff] }
 0x38a   :  { %7514 = vmatprep.subr.bf16.mxu1 %v8796_v4  ;;  %v255_v4 = vld [vmem:[#allocation3 + $0x2f0] sm:$0xff] }
 0x38b   :  { %7472 = vmatpush2.bf16.msra.mxu0 %v8283_v7  ;;  %v8062_v7 = vcombine.high %v239_v3, %v255_v4  ;;  %v8061_v16 = vcombine.low %v239_v3, %v255_v4  ;;  %v543_v63 = vld [vmem:[#allocation3 + $0xbf0] sm:$0xff] }
 0x38c   :  { %7473 = vmatprep.subr.bf16.mxu0 %v8252_v8  ;;  %v207_v8 = vld [vmem:[#allocation3 + $0x170] sm:$0xff]  ;;  %v8350_v3 = vcombine.high %v527_v62, %v543_v63 }
 0x38d   :  { %7515 = vmatpush2.bf16.msra.mxu1 %v8795_v39  ;;  %v8574_v39 = vcombine.high %v751_v5, %v767_v19  ;;  %v495_v5 = vld [vmem:[#allocation3 + $0xa70] sm:$0xff] }
 0x38e   :  { %7516 = vmatprep.subr.bf16.mxu1 %v8764_v11  ;;  %v223_v11 = vld [vmem:[#allocation3 + $0x1f0] sm:$0xff] }
 0x38f   :  { %7474 = vmatpush2.bf16.msra.mxu0 %v8251_v17  ;;  %v8030_v17 = vcombine.high %v207_v8, %v223_v11  ;;  %v8029_v24 = vcombine.low %v207_v8, %v223_v11  ;;  %v511_v19 = vld [vmem:[#allocation3 + $0xaf0] sm:$0xff] }
 0x390   :  { %7529 = vmatprep.subr.bf16.mxu0 %v8222_v18  ;;  %v175_v18 = vld [vmem:[#allocation3 + $0x70] sm:$0xff]  ;;  %v8318_v8 = vcombine.high %v495_v5, %v511_v19 }
 0x391   :  { %7517 = vmatpush2.bf16.msra.mxu1 %v8763_v42  ;;  %v8542_v42 = vcombine.high %v719_v13, %v735_v14  ;;  %v463_v13 = vld [vmem:[#allocation3 + $0x970] sm:$0xff] }
 0x392   :  { %7572 = vmatprep.subr.bf16.mxu1 %v8734_v21  ;;  %v7219_v34 = vpop.f32.mrf.mxu0  ;;  %7476 = vmatmul.mubr.bf16.vlgmr.msra.gmra.mxu0 %v9316_v10  ;;  %v191_v21 = vld [vmem:[#allocation3 + $0xf0] sm:$0xff] }
 0x393   :  { %7530 = vmatpush1.bf16.msra.mxu0 %v8221_v25  ;;  %7561 = vmatprep.mubr.bf16.mxu0 %v9292_v20  ;;  %v7998_v25 = vcombine.high %v175_v18, %v191_v21  ;;  %v479_v14 = vld [vmem:[#allocation3 + $0x9f0] sm:$0xff] }
 0x394   :  { %v7262_v37 = vpop.f32.mrf.mxu1  ;;  %7519 = vmatmul.mubr.bf16.vlgmr.msra.gmra.mxu1 %v9322_v28  ;;  %v7221_v41 = vpop.f32.mrf.mxu0  ;;  %7531 = vmatprep.subr.bf16.mxu0 %v8190_v27  ;;  %v655_v27 = vld [vmem:[#allocation3 + $0xf70] sm:$0xff] }
 0x395   :  { %v7263_v40 = vadd.f32 %v7262_v37, %v7219_v34  ;;  %7573 = vmatpush1.bf16.msra.mxu1 %v8733_v26  ;;  %7604 = vmatprep.mubr.bf16.mxu1 %v9301_v9  ;;  %v8510_v26 = vcombine.high %v687_v22, %v703_v23  ;;  %v7997_v34 = vcombine.low %v175_v18, %v191_v21  ;;  %v431_v22 = vld [vmem:[#allocation3 + $0x870] sm:$0xff] }
 0x396   :  { %v7264_v45 = vpop.f32.mrf.mxu1  ;;  %7574 = vmatprep.subr.bf16.mxu1 %v8702_v30  ;;  %v7223_v49 = vpop.f32.mrf.mxu0  ;;  %v671_v30 = vld [vmem:[#allocation3 + $0xff0] sm:$0xff]  ;;  %v8990_v37 = vcombine.high %v1167_v31, %v1183_v32  ;;  %v8286_v18 = vcombine.high %v463_v13, %v479_v14 }
 0x397   :  { %7916 = vst [vmem:[%s9431_s2 + $0xa0] sm:$0xff] %v7263_v40  ;;  %v7265_v56 = vadd.f32 %v7264_v45, %v7221_v41  ;;  %7532 = vmatpush1.bf16.msra.mxu0 %v8189_v38  ;;  %v8478_v36 = vcombine.high %v655_v27, %v671_v30  ;;  %v623_v38 = vld [vmem:[#allocation3 + $0xe70] sm:$0xff]  ;;  %v8989_v45 = vcombine.low %v1167_v31, %v1183_v32  ;;  %v400_v31 = vld [vmem:[#allocation3 + $0x778] sm:$0xff] }
 0x398   :  { %v7266_v51 = vpop.f32.mrf.mxu1  ;;  %v7225_v20 = vpop.f32.mrf.mxu0  ;;  %7533 = vmatprep.subr.bf16.mxu0 %v8158_v44  ;;  %v639_v40 = vld [vmem:[#allocation3 + $0xef0] sm:$0xff]  ;;  %v8477_v44 = vcombine.low %v655_v27, %v671_v30  ;;  %v416_v32 = vld [vmem:[#allocation3 + $0x7f8] sm:$0xff] }
 0x399   :  { %7917 = vst [vmem:[%s9431_s2 + $0xa8] sm:$0xff] %v7265_v56  ;;  %v7267_v53 = vadd.f32 %v7266_v51, %v7223_v49  ;;  %7575 = vmatpush1.bf16.msra.mxu1 %v8701_v12  ;;  %v1135_v41 = vld [vmem:[#allocation3 + $0x1e70] sm:$0xff]  ;;  %v8445_v50 = vcombine.low %v623_v38, %v639_v40 }
 0x39a   :  { %v7268_v57 = vpop.f32.mrf.mxu1  ;;  %7576 = vmatprep.subr.bf16.mxu1 %v8670_v46  ;;  %v1151_v12 = vld [vmem:[#allocation3 + $0x1ef0] sm:$0xff]  ;;  %v8446_v46 = vcombine.high %v623_v38, %v639_v40  ;;  %v8224_v38 = vcombine.high %v400_v31, %v416_v32 }
 0x39b   :  { %7948 = vst [vmem:[%s9431_s2 + $0x1a0] sm:$0xff] %v7267_v53  ;;  %v7269_v9 = vadd.f32 %v7268_v57, %v7225_v20  ;;  %7534 = vmatpush1.bf16.msra.mxu0 %v8157_v52  ;;  %v8958_v47 = vcombine.high %v1135_v41, %v1151_v12  ;;  %v607_v56 = vld [vmem:[#allocation3 + $0xdf0] sm:$0xff]  ;;  %v8957_v51 = vcombine.low %v1135_v41, %v1151_v12  ;;  %v368_v41 = vld [vmem:[#allocation3 + $0x678] sm:$0xff] }
 0x39c   :  { %7535 = vmatprep.subr.bf16.mxu0 %v8126_v55  ;;  %v1103_v49 = vld [vmem:[#allocation3 + $0x1d70] sm:$0xff]  ;;  %v8414_v52 = vcombine.high %v591_v48, %v607_v56  ;;  %v384_v12 = vld [vmem:[#allocation3 + $0x6f8] sm:$0xff] }
 0x39d   :  { %7949 = vst [vmem:[%s9431_s2 + $0x1a8] sm:$0xff] %v7269_v9  ;;  %7577 = vmatpush1.bf16.msra.mxu1 %v8669_v54  ;;  %v8926_v53 = vcombine.high %v1103_v49, %v1119_v59  ;;  %v559_v20 = vld [vmem:[#allocation3 + $0xc70] sm:$0xff]  ;;  %v8925_v60 = vcombine.low %v1103_v49, %v1119_v59  ;;  %v336_v49 = vld [vmem:[#allocation3 + $0x578] sm:$0xff] }
 0x39e   :  { %7578 = vmatprep.subr.bf16.mxu1 %v8638_v58  ;;  %v575_v54 = vld [vmem:[#allocation3 + $0xcf0] sm:$0xff]  ;;  %v8413_v58 = vcombine.low %v591_v48, %v607_v56  ;;  %v8192_v48 = vcombine.high %v368_v41, %v384_v12  ;;  %v352_v59 = vld [vmem:[#allocation3 + $0x5f8] sm:$0xff] }
 0x39f   :  { %7536 = vmatpush1.bf16.msra.mxu0 %v8125_v29  ;;  %v1071_v55 = vld [vmem:[#allocation3 + $0x1c70] sm:$0xff]  ;;  %v8382_v61 = vcombine.high %v559_v20, %v575_v54 }
 0x3a0   :  { %7537 = vmatprep.subr.bf16.mxu0 %v8094_v1  ;;  %v1087_v57 = vld [vmem:[#allocation3 + $0x1cf0] sm:$0xff]  ;;  %v8381_v1 = vcombine.low %v559_v20, %v575_v54  ;;  %v8191_v20 = vcombine.low %v368_v41, %v384_v12  ;;  %v688_v41 = vld [vmem:[#allocation3 + $0x1078] sm:$0xff] }
 0x3a1   :  { %7579 = vmatpush1.bf16.msra.mxu1 %v8637_v0  ;;  %v8894_v9 = vcombine.high %v1071_v55, %v1087_v57  ;;  %v1039_v29 = vld [vmem:[#allocation3 + $0x1b70] sm:$0xff]  ;;  %v704_v12 = vld [vmem:[#allocation3 + $0x10f8] sm:$0xff] }
 0x3a2   :  { %7580 = vmatprep.subr.bf16.mxu1 %v8606_v2  ;;  %v1055_v0 = vld [vmem:[#allocation3 + $0x1bf0] sm:$0xff]  ;;  %v8893_v2 = vcombine.low %v1071_v55, %v1087_v57 }
 0x3a3   :  { %7538 = vmatpush1.bf16.msra.mxu0 %v8093_v6  ;;  %v8862_v4 = vcombine.high %v1039_v29, %v1055_v0  ;;  %v1007_v6 = vld [vmem:[#allocation3 + $0x1a70] sm:$0xff] }
 0x3a4   :  { %7539 = vmatprep.subr.bf16.mxu0 %v8062_v7  ;;  %v8349_v7 = vcombine.low %v527_v62, %v543_v63  ;;  %v447_v23 = vld [vmem:[#allocation3 + $0x8f0] sm:$0xff]  ;;  %v320_v62 = vld [vmem:[#allocation3 + $0x4f8] sm:$0xff] }
 0x3a5   :  { %7581 = vmatpush1.bf16.msra.mxu1 %v8605_v15  ;;  %v1023_v15 = vld [vmem:[#allocation3 + $0x1af0] sm:$0xff]  ;;  %v8254_v27 = vcombine.high %v431_v22, %v447_v23 }
 0x3a6   :  { %7582 = vmatprep.subr.bf16.mxu1 %v8574_v39  ;;  %v8861_v39 = vcombine.low %v1039_v29, %v1055_v0  ;;  %v8830_v11 = vcombine.high %v1007_v6, %v1023_v15  ;;  %v816_v29 = vld [vmem:[#allocation3 + $0x1478] sm:$0xff] }
 0x3a7   :  { %7540 = vmatpush1.bf16.msra.mxu0 %v8061_v16  ;;  %v975_v16 = vld [vmem:[#allocation3 + $0x1970] sm:$0xff]  ;;  %v832_v0 = vld [vmem:[#allocation3 + $0x14f8] sm:$0xff] }
 0x3a8   :  { %7541 = vmatprep.subr.bf16.mxu0 %v8030_v17  ;;  %v8317_v17 = vcombine.low %v495_v5, %v511_v19 }
 0x3a9   :  { %7583 = vmatpush1.bf16.msra.mxu1 %v8573_v33  ;;  %v991_v33 = vld [vmem:[#allocation3 + $0x19f0] sm:$0xff] }
 0x3aa   :  { %7584 = vmatprep.subr.bf16.mxu1 %v8542_v42  ;;  %v8829_v42 = vcombine.low %v1007_v6, %v1023_v15  ;;  %v8798_v21 = vcombine.high %v975_v16, %v991_v33 }
 0x3ab   :  { %7542 = vmatpush1.bf16.msra.mxu0 %v8029_v24  ;;  %v943_v24 = vld [vmem:[#allocation3 + $0x1870] sm:$0xff] }
 0x3ac   :  { %7543 = vmatprep.subr.bf16.mxu0 %v7998_v25  ;;  %v8285_v25 = vcombine.low %v463_v13, %v479_v14  ;;  %v784_v13 = vld [vmem:[#allocation3 + $0x1378] sm:$0xff] }
 0x3ad   :  { %7585 = vmatpush1.bf16.msra.mxu1 %v8541_v43  ;;  %v959_v43 = vld [vmem:[#allocation3 + $0x18f0] sm:$0xff]  ;;  %v800_v14 = vld [vmem:[#allocation3 + $0x13f8] sm:$0xff] }
 0x3ae   :  { %7586 = vmatprep.subr.bf16.mxu1 %v8510_v26  ;;  %v8797_v26 = vcombine.low %v975_v16, %v991_v33  ;;  %v8766_v30 = vcombine.high %v943_v24, %v959_v43  ;;  %v8639_v33 = vcombine.low %v816_v29, %v832_v0 }
 0x3af   :  { %7544 = vmatpush1.bf16.msra.mxu0 %v7997_v34  ;;  %v912_v34 = vld [vmem:[#allocation3 + $0x1778] sm:$0xff] }
 0x3b0   :  { %7545 = vmatprep.subr.bf16.mxu0 %v8478_v36  ;;  %v8253_v36 = vcombine.low %v431_v22, %v447_v23  ;;  %v752_v22 = vld [vmem:[#allocation3 + $0x1278] sm:$0xff] }
 0x3b1   :  { %7587 = vmatpush1.bf16.msra.mxu1 %v8509_v35  ;;  %v928_v35 = vld [vmem:[#allocation3 + $0x17f8] sm:$0xff] }
 0x3b2   :  { %7588 = vmatprep.subr.bf16.mxu1 %v8990_v37  ;;  %v8765_v37 = vcombine.low %v943_v24, %v959_v43  ;;  %v8736_v40 = vcombine.high %v912_v34, %v928_v35  ;;  %v768_v23 = vld [vmem:[#allocation3 + $0x12f8] sm:$0xff]  ;;  %v8607_v43 = vcombine.low %v784_v13, %v800_v14 }
 0x3b3   :  { %7546 = vmatpush2.bf16.msra.mxu0 %v8477_v44  ;;  %v880_v44 = vld [vmem:[#allocation3 + $0x1678] sm:$0xff] }
 0x3b4   :  { %7547 = vmatprep.subr.bf16.mxu0 %v8446_v46  ;;  %v8223_v46 = vcombine.low %v400_v31, %v416_v32  ;;  %v720_v31 = vld [vmem:[#allocation3 + $0x1178] sm:$0xff] }
 0x3b5   :  { %7589 = vmatpush2.bf16.msra.mxu1 %v8989_v45  ;;  %v896_v45 = vld [vmem:[#allocation3 + $0x16f8] sm:$0xff] }
 0x3b6   :  { %7590 = vmatprep.subr.bf16.mxu1 %v8958_v47  ;;  %v8735_v47 = vcombine.low %v912_v34, %v928_v35  ;;  %v8704_v56 = vcombine.high %v880_v44, %v896_v45  ;;  %v8703_v57 = vcombine.low %v880_v44, %v896_v45  ;;  %v736_v32 = vld [vmem:[#allocation3 + $0x11f8] sm:$0xff]  ;;  %v8575_v35 = vcombine.low %v752_v22, %v768_v23 }
 0x3b7   :  { %7548 = vmatpush2.bf16.msra.mxu0 %v8445_v50  ;;  %v8543_v45 = vcombine.low %v720_v31, %v736_v32 }
 0x3b8   :  { %7549 = vmatprep.subr.bf16.mxu0 %v8414_v52  ;;  %v864_v52 = vld [vmem:[#allocation3 + $0x15f8] sm:$0xff] }
 0x3b9   :  { %7591 = vmatpush2.bf16.msra.mxu1 %v8957_v51  ;;  %v848_v51 = vld [vmem:[#allocation3 + $0x1578] sm:$0xff] }
 0x3ba   :  { %7592 = vmatprep.subr.bf16.mxu1 %v8926_v53  ;;  %v8671_v19 = vcombine.low %v848_v51, %v864_v52 }
 0x3bb   :  { %7550 = vmatpush2.bf16.msra.mxu0 %v8413_v58  ;;  %v8160_v58 = vcombine.high %v336_v49, %v352_v59 }
 0x3bc   :  { %7551 = vmatprep.subr.bf16.mxu0 %v8382_v61  ;;  %v8672_v61 = vcombine.high %v848_v51, %v864_v52  ;;  %v8511_v51 = vcombine.low %v688_v41, %v704_v12 }
 0x3bd   :  { %7593 = vmatpush2.bf16.msra.mxu1 %v8925_v60 }
 0x3be   :  { %7594 = vmatprep.subr.bf16.mxu1 %v8894_v9  ;;  %v304_v9 = vld [vmem:[#allocation3 + $0x478] sm:$0xff] }
 0x3bf   :  { %7552 = vmatpush2.bf16.msra.mxu0 %v8381_v1  ;;  %v9019_v1 = vld [vmem:[%s9429_s0 + $0xc] ss:$16 sps:$4 sm:$0xff]   ;;  %v8128_v6 = vcombine.high %v304_v9, %v320_v62  ;;  %v8127_v16 = vcombine.low %v304_v9, %v320_v62 }
 0x3c0   :  { %7553 = vmatprep.subr.bf16.mxu0 %v8350_v3  ;;  %v8159_v3 = vcombine.low %v336_v49, %v352_v59  ;;  %v1168_v49 = vld [vmem:[#allocation3 + $0x1f78] sm:$0xff] }
 0x3c1   :  { %7595 = vmatpush2.bf16.msra.mxu1 %v8893_v2  ;;  %v1184_v59 = vld [vmem:[#allocation3 + $0x1ff8] sm:$0xff] }
 0x3c2   :  { %7596 = vmatprep.subr.bf16.mxu1 %v8862_v4  ;;  %v592_v62 = vld [vmem:[#allocation3 + $0xd78] sm:$0xff] }
 0x3c3   :  { %7554 = vmatpush2.bf16.msra.mxu0 %v8349_v7  ;;  %v8640_v7 = vcombine.high %v816_v29, %v832_v0 }
 0x3c4   :  { %7555 = vmatprep.subr.bf16.mxu0 %v8318_v8  ;;  %v288_v8 = vld [vmem:[#allocation3 + $0x3f8] sm:$0xff] }
 0x3c5   :  { %7597 = vmatpush2.bf16.msra.mxu1 %v8861_v39  ;;  %v272_v39 = vld [vmem:[#allocation3 + $0x378] sm:$0xff] }
 0x3c6   :  { %7598 = vmatprep.subr.bf16.mxu1 %v8830_v11  ;;  %v8095_v24 = vcombine.low %v272_v39, %v288_v8 }
 0x3c7   :  { %7556 = vmatpush2.bf16.msra.mxu0 %v8317_v17  ;;  %v8096_v17 = vcombine.high %v272_v39, %v288_v8  ;;  %v528_v8 = vld [vmem:[#allocation3 + $0xb78] sm:$0xff] }
 0x3c8   :  { %7557 = vmatprep.subr.bf16.mxu0 %v8286_v18  ;;  %v240_v18 = vld [vmem:[#allocation3 + $0x278] sm:$0xff] }
 0x3c9   :  { %7599 = vmatpush2.bf16.msra.mxu1 %v8829_v42  ;;  %v8608_v42 = vcombine.high %v784_v13, %v800_v14  ;;  %v1040_v13 = vld [vmem:[#allocation3 + $0x1b78] sm:$0xff] }
 0x3ca   :  { %7600 = vmatprep.subr.bf16.mxu1 %v8798_v21  ;;  %v256_v21 = vld [vmem:[#allocation3 + $0x2f8] sm:$0xff] }
 0x3cb   :  { %7558 = vmatpush2.bf16.msra.mxu0 %v8285_v25  ;;  %v8064_v25 = vcombine.high %v240_v18, %v256_v21  ;;  %v8063_v34 = vcombine.low %v240_v18, %v256_v21  ;;  %v1056_v14 = vld [vmem:[#allocation3 + $0x1bf8] sm:$0xff] }
 0x3cc   :  { %7559 = vmatprep.subr.bf16.mxu0 %v8254_v27  ;;  %v208_v27 = vld [vmem:[#allocation3 + $0x178] sm:$0xff] }
 0x3cd   :  { %7601 = vmatpush2.bf16.msra.mxu1 %v8797_v26  ;;  %v8576_v26 = vcombine.high %v752_v22, %v768_v23  ;;  %v496_v18 = vld [vmem:[#allocation3 + $0xa78] sm:$0xff] }
 0x3ce   :  { %7602 = vmatprep.subr.bf16.mxu1 %v8766_v30  ;;  %v224_v30 = vld [vmem:[#allocation3 + $0x1f8] sm:$0xff] }
 0x3cf   :  { %7560 = vmatpush2.bf16.msra.mxu0 %v8253_v36  ;;  %v8032_v36 = vcombine.high %v208_v27, %v224_v30  ;;  %v8031_v44 = vcombine.low %v208_v27, %v224_v30  ;;  %v512_v21 = vld [vmem:[#allocation3 + $0xaf8] sm:$0xff] }
 0x3d0   :  { %7615 = vmatprep.subr.bf16.mxu0 %v8224_v38  ;;  %v176_v38 = vld [vmem:[#allocation3 + $0x78] sm:$0xff] }
 0x3d1   :  { %7603 = vmatpush2.bf16.msra.mxu1 %v8765_v37  ;;  %v8544_v37 = vcombine.high %v720_v31, %v736_v32  ;;  %v1008_v22 = vld [vmem:[#allocation3 + $0x1a78] sm:$0xff] }
 0x3d2   :  { %7658 = vmatprep.subr.bf16.mxu1 %v8736_v40  ;;  %v7305_v50 = vpop.f32.mrf.mxu0  ;;  %7562 = vmatmul.mubr.bf16.vlgmr.msra.gmra.mxu0 %v9316_v10  ;;  %v9018_v10 = vld [vmem:[%s9429_s0 + $0x4] ss:$16 sps:$4 sm:$0xff]   ;;  %v192_v40 = vld [vmem:[#allocation3 + $0xf8] sm:$0xff] }
 0x3d3   :  { %7616 = vmatpush1.bf16.msra.mxu0 %v8223_v46  ;;  %7647 = vmatprep.mubr.bf16.mxu0 %v9018_v10  ;;  %v8000_v46 = vcombine.high %v176_v38, %v192_v40  ;;  %v608_v10 = vld [vmem:[#allocation3 + $0xdf8] sm:$0xff] }
 0x3d4   :  { %v7348_v53 = vpop.f32.mrf.mxu1  ;;  %7605 = vmatmul.mubr.bf16.vlgmr.msra.gmra.mxu1 %v9322_v28  ;;  %v7307_v55 = vpop.f32.mrf.mxu0  ;;  %7617 = vmatprep.subr.bf16.mxu0 %v8192_v48  ;;  %v656_v48 = vld [vmem:[#allocation3 + $0xf78] sm:$0xff] }
 0x3d5   :  { %v7349_v54 = vadd.f32 %v7348_v53, %v7305_v50  ;;  %7659 = vmatpush1.bf16.msra.mxu1 %v8735_v47  ;;  %7690 = vmatprep.mubr.bf16.mxu1 %v9019_v1  ;;  %v8512_v47 = vcombine.high %v688_v41, %v704_v12  ;;  %v7999_v50 = vcombine.low %v176_v38, %v192_v40  ;;  %v1024_v23 = vld [vmem:[#allocation3 + $0x1af8] sm:$0xff] }
 0x3d6   :  { %v7350_v60 = vpop.f32.mrf.mxu1  ;;  %7660 = vmatprep.subr.bf16.mxu1 %v8704_v56  ;;  %v7309_v63 = vpop.f32.mrf.mxu0  ;;  %v672_v56 = vld [vmem:[#allocation3 + $0xff8] sm:$0xff]  ;;  %v8992_v53 = vcombine.high %v1168_v49, %v1184_v59  ;;  %v8416_v1 = vcombine.high %v592_v62, %v608_v10 }
 0x3d7   :  { %7918 = vst [vmem:[%s9431_s2 + $0xb0] sm:$0xff] %v7349_v54  ;;  %v7351_v28 = vadd.f32 %v7350_v60, %v7307_v55  ;;  %7618 = vmatpush1.bf16.msra.mxu0 %v8191_v20  ;;  %v8480_v52 = vcombine.high %v656_v48, %v672_v56  ;;  %v624_v20 = vld [vmem:[#allocation3 + $0xe78] sm:$0xff]  ;;  %v8991_v60 = vcombine.low %v1168_v49, %v1184_v59  ;;  %v9020_v59 = vld [vmem:[%s9429_s0] ss:$16 sps:$4 sm:$0xff]  }
 0x3d8   :  { %v7352_v2 = vpop.f32.mrf.mxu1  ;;  %v7311_v5 = vpop.f32.mrf.mxu0  ;;  %7619 = vmatprep.subr.bf16.mxu0 %v8160_v58  ;;  %v640_v54 = vld [vmem:[#allocation3 + $0xef8] sm:$0xff]  ;;  %v8479_v58 = vcombine.low %v656_v48, %v672_v56 }
 0x3d9   :  { %7919 = vst [vmem:[%s9431_s2 + $0xb8] sm:$0xff] %v7351_v28  ;;  %v7353_v4 = vadd.f32 %v7352_v2, %v7309_v63  ;;  %7661 = vmatpush1.bf16.msra.mxu1 %v8703_v57  ;;  %v1136_v55 = vld [vmem:[#allocation3 + $0x1e78] sm:$0xff]  ;;  %v8447_v29 = vcombine.low %v624_v20, %v640_v54 }
 0x3da   :  { %v7354_v15 = vpop.f32.mrf.mxu1  ;;  %7662 = vmatprep.subr.bf16.mxu1 %v8672_v61  ;;  %v1152_v57 = vld [vmem:[#allocation3 + $0x1ef8] sm:$0xff]  ;;  %v8448_v61 = vcombine.high %v624_v20, %v640_v54 }
 0x3db   :  { %7950 = vst [vmem:[%s9431_s2 + $0x1b0] sm:$0xff] %v7353_v4  ;;  %v7355_v11 = vadd.f32 %v7354_v15, %v7311_v5  ;;  %7620 = vmatpush1.bf16.msra.mxu0 %v8159_v3  ;;  %v8960_v9 = vcombine.high %v1136_v55, %v1152_v57  ;;  %v1104_v28 = vld [vmem:[#allocation3 + $0x1d78] sm:$0xff]  ;;  %v8959_v0 = vcombine.low %v1136_v55, %v1152_v57 }
 0x3dc   :  { %7621 = vmatprep.subr.bf16.mxu0 %v8128_v6  ;;  %v1120_v63 = vld [vmem:[#allocation3 + $0x1df8] sm:$0xff]  ;;  %v8415_v6 = vcombine.low %v592_v62, %v608_v10 }
 0x3dd   :  { %7951 = vst [vmem:[%s9431_s2 + $0x1b8] sm:$0xff] %v7355_v11  ;;  %7663 = vmatpush1.bf16.msra.mxu1 %v8671_v19  ;;  %v8928_v2 = vcombine.high %v1104_v28, %v1120_v63  ;;  %v560_v3 = vld [vmem:[#allocation3 + $0xc78] sm:$0xff]  ;;  %v8927_v15 = vcombine.low %v1104_v28, %v1120_v63 }
 0x3de   :  { %7664 = vmatprep.subr.bf16.mxu1 %v8640_v7  ;;  %v576_v4 = vld [vmem:[#allocation3 + $0xcf8] sm:$0xff] }
 0x3df   :  { %7622 = vmatpush1.bf16.msra.mxu0 %v8127_v16  ;;  %v1072_v5 = vld [vmem:[#allocation3 + $0x1c78] sm:$0xff]  ;;  %v8384_v7 = vcombine.high %v560_v3, %v576_v4  ;;  %v8383_v16 = vcombine.low %v560_v3, %v576_v4 }
 0x3e0   :  { %7623 = vmatprep.subr.bf16.mxu0 %v8096_v17  ;;  %v1088_v19 = vld [vmem:[#allocation3 + $0x1cf8] sm:$0xff] }
 0x3e1   :  { %7665 = vmatpush1.bf16.msra.mxu1 %v8639_v33  ;;  %v8896_v39 = vcombine.high %v1072_v5, %v1088_v19  ;;  %v544_v11 = vld [vmem:[#allocation3 + $0xbf8] sm:$0xff]  ;;  %v8895_v33 = vcombine.low %v1072_v5, %v1088_v19 }
 0x3e2   :  { %7666 = vmatprep.subr.bf16.mxu1 %v8608_v42  ;;  %v8352_v17 = vcombine.high %v528_v8, %v544_v11  ;;  %v8864_v42 = vcombine.high %v1040_v13, %v1056_v14  ;;  %v464_v27 = vld [vmem:[#allocation3 + $0x978] sm:$0xff] }
 0x3e3   :  { %7624 = vmatpush1.bf16.msra.mxu0 %v8095_v24  ;;  %v8351_v24 = vcombine.low %v528_v8, %v544_v11  ;;  %v480_v30 = vld [vmem:[#allocation3 + $0x9f8] sm:$0xff] }
 0x3e4   :  { %7625 = vmatprep.subr.bf16.mxu0 %v8064_v25  ;;  %v8320_v25 = vcombine.high %v496_v18, %v512_v21  ;;  %v976_v31 = vld [vmem:[#allocation3 + $0x1978] sm:$0xff] }
 0x3e5   :  { %7667 = vmatpush1.bf16.msra.mxu1 %v8607_v43  ;;  %v8863_v43 = vcombine.low %v1040_v13, %v1056_v14  ;;  %v992_v32 = vld [vmem:[#allocation3 + $0x19f8] sm:$0xff] }
 0x3e6   :  { %7668 = vmatprep.subr.bf16.mxu1 %v8576_v26  ;;  %v8832_v26 = vcombine.high %v1008_v22, %v1024_v23  ;;  %v432_v38 = vld [vmem:[#allocation3 + $0x878] sm:$0xff] }
 0x3e7   :  { %7626 = vmatpush1.bf16.msra.mxu0 %v8063_v34  ;;  %v8319_v34 = vcombine.low %v496_v18, %v512_v21  ;;  %v448_v40 = vld [vmem:[#allocation3 + $0x8f8] sm:$0xff] }
 0x3e8   :  { %7627 = vmatprep.subr.bf16.mxu0 %v8032_v36  ;;  %v8288_v36 = vcombine.high %v464_v27, %v480_v30  ;;  %v944_v41 = vld [vmem:[#allocation3 + $0x1878] sm:$0xff]  ;;  %v8255_v48 = vcombine.low %v432_v38, %v448_v40 }
 0x3e9   :  { %7669 = vmatpush1.bf16.msra.mxu1 %v8575_v35  ;;  %v8831_v35 = vcombine.low %v1008_v22, %v1024_v23  ;;  %v960_v12 = vld [vmem:[#allocation3 + $0x18f8] sm:$0xff] }
 0x3ea   :  { %7670 = vmatprep.subr.bf16.mxu1 %v8544_v37  ;;  %v8800_v37 = vcombine.high %v976_v31, %v992_v32  ;;  %v8767_v56 = vcombine.low %v944_v41, %v960_v12 }
 0x3eb   :  { %7628 = vmatpush1.bf16.msra.mxu0 %v8031_v44  ;;  %v8287_v44 = vcombine.low %v464_v27, %v480_v30 }
 0x3ec   :  { %7629 = vmatprep.subr.bf16.mxu0 %v8000_v46  ;;  %v8256_v46 = vcombine.high %v432_v38, %v448_v40 }
 0x3ed   :  { %7671 = vmatpush1.bf16.msra.mxu1 %v8543_v45  ;;  %v8799_v45 = vcombine.low %v976_v31, %v992_v32 }
 0x3ee   :  { %7672 = vmatprep.subr.bf16.mxu1 %v8512_v47  ;;  %v8768_v47 = vcombine.high %v944_v41, %v960_v12 }
 0x3ef   :  { %7630 = vmatpush1.bf16.msra.mxu0 %v7999_v50 }
 0x3f0   :  { %7631 = vmatprep.subr.bf16.mxu0 %v8480_v52 }
 0x3f1   :  { %7673 = vmatpush1.bf16.msra.mxu1 %v8511_v51  ;;  %v9021_v51 = vld [vmem:[%s9429_s0 + $0x8] ss:$16 sps:$4 sm:$0xff]  }
 0x3f2   :  { %7674 = vmatprep.subr.bf16.mxu1 %v8992_v53 }
 0x3f3   :  { %7632 = vmatpush2.bf16.msra.mxu0 %v8479_v58 }
 0x3f4   :  { %7633 = vmatprep.subr.bf16.mxu0 %v8448_v61 }
 0x3f5   :  { %7675 = vmatpush2.bf16.msra.mxu1 %v8991_v60 }
 0x3f6   :  { %7676 = vmatprep.subr.bf16.mxu1 %v8960_v9 }
 0x3f7   :  { %7634 = vmatpush2.bf16.msra.mxu0 %v8447_v29 }
 0x3f8   :  { %7635 = vmatprep.subr.bf16.mxu0 %v8416_v1 }
 0x3f9   :  { %7677 = vmatpush2.bf16.msra.mxu1 %v8959_v0 }
 0x3fa   :  { %7678 = vmatprep.subr.bf16.mxu1 %v8928_v2 }
 0x3fb   :  { %7636 = vmatpush2.bf16.msra.mxu0 %v8415_v6 }
 0x3fc   :  { %7637 = vmatprep.subr.bf16.mxu0 %v8384_v7 }
 0x3fd   :  { %7679 = vmatpush2.bf16.msra.mxu1 %v8927_v15 }
 0x3fe   :  { %7680 = vmatprep.subr.bf16.mxu1 %v8896_v39 }
 0x3ff   :  { %7638 = vmatpush2.bf16.msra.mxu0 %v8383_v16 }
 0x400   :  { %7639 = vmatprep.subr.bf16.mxu0 %v8352_v17 }
 0x401   :  { %7681 = vmatpush2.bf16.msra.mxu1 %v8895_v33 }
 0x402   :  { %7682 = vmatprep.subr.bf16.mxu1 %v8864_v42 }
 0x403   :  { %7640 = vmatpush2.bf16.msra.mxu0 %v8351_v24 }
 0x404   :  { %7641 = vmatprep.subr.bf16.mxu0 %v8320_v25 }
 0x405   :  { %7683 = vmatpush2.bf16.msra.mxu1 %v8863_v43 }
 0x406   :  { %7684 = vmatprep.subr.bf16.mxu1 %v8832_v26 }
 0x407   :  { %7642 = vmatpush2.bf16.msra.mxu0 %v8319_v34 }
 0x408   :  { %7643 = vmatprep.subr.bf16.mxu0 %v8288_v36 }
 0x409   :  { %7685 = vmatpush2.bf16.msra.mxu1 %v8831_v35 }
 0x40a   :  { %7686 = vmatprep.subr.bf16.mxu1 %v8800_v37 }
 0x40b   :  { %7644 = vmatpush2.bf16.msra.mxu0 %v8287_v44 }
 0x40c   :  { %7645 = vmatprep.subr.bf16.mxu0 %v8256_v46 }
 0x40d   :  { %7687 = vmatpush2.bf16.msra.mxu1 %v8799_v45 }
 0x40e   :  { %7688 = vmatprep.subr.bf16.mxu1 %v8768_v47 }
 0x40f   :  { %7646 = vmatpush2.bf16.msra.mxu0 %v8255_v48 }
 0x411   :  { %7689 = vmatpush2.bf16.msra.mxu1 %v8767_v56 }
 0x412   :  { %v7391_v49 = vpop.f32.mrf.mxu0  ;;  %7648 = vmatmul.mubr.bf16.vlgmr.msra.gmra.mxu0 %v9020_v59 }
 0x414   :  { %v7434_v50 = vpop.f32.mrf.mxu1  ;;  %7691 = vmatmul.mubr.bf16.vlgmr.msra.gmra.mxu1 %v9021_v51  ;;  %v7393_v53 = vpop.f32.mrf.mxu0 }
 0x415   :  { %v7435_v52 = vadd.f32 %v7434_v50, %v7391_v49 }
 0x416   :  { %v7436_v20 = vpop.f32.mrf.mxu1  ;;  %v7395_v55 = vpop.f32.mrf.mxu0 }
 0x417   :  { %7920 = vst [vmem:[%s9431_s2 + $0xc0] sm:$0xff] %v7435_v52  ;;  %v7437_v54 = vadd.f32 %v7436_v20, %v7393_v53 }
 0x418   :  { %v7438_v57 = vpop.f32.mrf.mxu1  ;;  %v7397_v60 = vpop.f32.mrf.mxu0 }
 0x419   :  { %7921 = vst [vmem:[%s9431_s2 + $0xc8] sm:$0xff] %v7437_v54  ;;  %v7439_v58 = vadd.f32 %v7438_v57, %v7395_v55 }
 0x41a   :  { %v7440_v61 = vpop.f32.mrf.mxu1 }
 0x41b   :  { %7952 = vst [vmem:[%s9431_s2 + $0x1c0] sm:$0xff] %v7439_v58  ;;  %v7441_v9 = vadd.f32 %v7440_v61, %v7397_v60 }
 0x41d   :  { %7953 = vst [vmem:[%s9431_s2 + $0x1c8] sm:$0xff] %v7441_v9 }
 0x452   :  { %v7477_v62 = vpop.f32.mrf.mxu0 }
 0x454   :  { %v7520_v10 = vpop.f32.mrf.mxu1  ;;  %v7479_v63 = vpop.f32.mrf.mxu0 }
 0x455   :  { %v7521_v28 = vadd.f32 %v7520_v10, %v7477_v62 }
 0x456   :  { %v7522_v29 = vpop.f32.mrf.mxu1  ;;  %v7481_v1 = vpop.f32.mrf.mxu0 }
 0x457   :  { %7922 = vst [vmem:[%s9431_s2 + $0xd0] sm:$0xff] %v7521_v28  ;;  %v7523_v0 = vadd.f32 %v7522_v29, %v7479_v63 }
 0x458   :  { %v7524_v2 = vpop.f32.mrf.mxu1  ;;  %v7483_v4 = vpop.f32.mrf.mxu0 }
 0x459   :  { %7923 = vst [vmem:[%s9431_s2 + $0xd8] sm:$0xff] %v7523_v0  ;;  %v7525_v3 = vadd.f32 %v7524_v2, %v7481_v1 }
 0x45a   :  { %v7526_v5 = vpop.f32.mrf.mxu1 }
 0x45b   :  { %7954 = vst [vmem:[%s9431_s2 + $0x1d0] sm:$0xff] %v7525_v3  ;;  %v7527_v19 = vadd.f32 %v7526_v5, %v7483_v4 }
 0x45d   :  { %7955 = vst [vmem:[%s9431_s2 + $0x1d8] sm:$0xff] %v7527_v19 }
 0x492   :  { %v7563_v6 = vpop.f32.mrf.mxu0 }
 0x494   :  { %v7606_v15 = vpop.f32.mrf.mxu1  ;;  %v7565_v39 = vpop.f32.mrf.mxu0 }
 0x495   :  { %v7607_v7 = vadd.f32 %v7606_v15, %v7563_v6 }
 0x496   :  { %v7608_v8 = vpop.f32.mrf.mxu1  ;;  %v7567_v13 = vpop.f32.mrf.mxu0 }
 0x497   :  { %7924 = vst [vmem:[%s9431_s2 + $0xe0] sm:$0xff] %v7607_v7  ;;  %v7609_v11 = vadd.f32 %v7608_v8, %v7565_v39 }
 0x498   :  { %v7610_v14 = vpop.f32.mrf.mxu1  ;;  %v7569_v33 = vpop.f32.mrf.mxu0 }
 0x499   :  { %7925 = vst [vmem:[%s9431_s2 + $0xe8] sm:$0xff] %v7609_v11  ;;  %v7611_v16 = vadd.f32 %v7610_v14, %v7567_v13 }
 0x49a   :  { %v7612_v17 = vpop.f32.mrf.mxu1 }
 0x49b   :  { %7956 = vst [vmem:[%s9431_s2 + $0x1e0] sm:$0xff] %v7611_v16  ;;  %v7613_v42 = vadd.f32 %v7612_v17, %v7569_v33 }
 0x49d   :  { %7957 = vst [vmem:[%s9431_s2 + $0x1e8] sm:$0xff] %v7613_v42 }
 0x4d2   :  { %v7649_v18 = vpop.f32.mrf.mxu0 }
 0x4d4   :  { %v7692_v21 = vpop.f32.mrf.mxu1  ;;  %v7651_v23 = vpop.f32.mrf.mxu0 }
 0x4d5   :  { %v7693_v22 = vadd.f32 %v7692_v21, %v7649_v18 }
 0x4d6   :  { %v7694_v24 = vpop.f32.mrf.mxu1  ;;  %v7653_v25 = vpop.f32.mrf.mxu0 }
 0x4d7   :  { %7926 = vst [vmem:[%s9431_s2 + $0xf0] sm:$0xff] %v7693_v22  ;;  %v7695_v43 = vadd.f32 %v7694_v24, %v7651_v23 }
 0x4d8   :  { %v7696_v26 = vpop.f32.mrf.mxu1  ;;  %v7655_v30 = vpop.f32.mrf.mxu0 }
 0x4d9   :  { %7927 = vst [vmem:[%s9431_s2 + $0xf8] sm:$0xff] %v7695_v43  ;;  %v7697_v27 = vadd.f32 %v7696_v26, %v7653_v25 }
 0x4da   :  { %v7698_v31 = vpop.f32.mrf.mxu1 }
 0x4db   :  { %7958 = vst [vmem:[%s9431_s2 + $0x1f0] sm:$0xff] %v7697_v27  ;;  %v7699_v32 = vadd.f32 %v7698_v31, %v7655_v30 }
 0x4dd   :  { %7959 = vst [vmem:[%s9431_s2 + $0x1f8] sm:$0xff] %v7699_v32 }
 0x4de   :  { %7964 = vsyncpa [#allocation4], 1 }

// kernel: segnet3d_rec_forward.10
= control target key start
LH: loop header
LB: loop body
LE: loop exit
PB: predicated region body
PF: predicated region fallthrough
CT: control target
= control target key end

     0   :  { %s536_s1 = inlined_call_operand.vmem [shape: bf16[128,128], index: 1, kind: input, shape index: {}]   ;;  %s537_s0 = inlined_call_operand.vmem [shape: f32[128,128], index: 0, kind: input, shape index: {}]   ;;  %s538_s2 = inlined_call_operand.vmem [shape: f32[1,128], index: 2, kind: input, shape index: {}]   ;;  %s539_s3 = inlined_call_operand.vmem [shape: f32[1,128], index: 3, kind: input, shape index: {}]   ;;  %s540_s4 = inlined_call_operand.vmem [shape: f32[128,128], index: 4, kind: output, shape index: {}]  }
   0x1   :  { %v359_v0 = vld [vmem:[%s536_s1 + $0x38] sm:$0xff]   ;;  %v360_v1 = vld [vmem:[%s536_s1 + $0x30] sm:$0xff]   ;;  %v361_v2 = vld [vmem:[%s536_s1 + $0x28] sm:$0xff]  }
   0x2   :  { %311 = vmatprep.subr.bf16.mxu0 %v359_v0  ;;  %343 = vmatprep.subr.bf16.mxu1 %v359_v0  ;;  %v362_v3 = vld [vmem:[%s536_s1 + $0x20] sm:$0xff]   ;;  %v19_v5 = vld [vmem:[%s537_s0 + $0x8] sm:$0xff]  ;;  %v363_v15 = vld [vmem:[%s536_s1 + $0x18] sm:$0xff]  }
   0x3   :  { %312 = vmatpush3.bf16.msra.mxu0 %v359_v0  ;;  %351 = vmatpush3.bf16.msra.mxu1 %v359_v0  ;;  %v18_v4 = vld [vmem:[%s537_s0] sm:$0xff]  ;;  %v27_v10 = vld [vmem:[%s537_s0 + $0x48] sm:$0xff]  ;;  %v364_v20 = vld [vmem:[%s536_s1 + $0x10] sm:$0xff]  }
   0x4   :  { %313 = vmatprep.subr.bf16.mxu0 %v360_v1  ;;  %344 = vmatprep.subr.bf16.mxu1 %v360_v1  ;;  %v413_v6 = vld [vmem:[%s538_s2] ss:$0 sm:$0xff]  ;;  %v365_v21 = vld [vmem:[%s536_s1 + $0x8] sm:$0xff]   ;;  %v20_v22 = vld [vmem:[%s537_s0 + $0x10] sm:$0xff] }
   0x5   :  { %v41_v7 = vadd.f32 %v413_v6, %v18_v4  ;;  %v42_v8 = vadd.f32 %v413_v6, %v19_v5  ;;  %v26_v9 = vld [vmem:[%s537_s0 + $0x40] sm:$0xff]  ;;  %v50_v12 = vadd.f32 %v413_v6, %v27_v10  ;;  %v21_v23 = vld [vmem:[%s537_s0 + $0x18] sm:$0xff]  ;;  %v28_v24 = vld [vmem:[%s537_s0 + $0x50] sm:$0xff]  ;;  %v43_v30 = vadd.f32 %v413_v6, %v20_v22 }
   0x6   :  { %v49_v11 = vadd.f32 %v413_v6, %v26_v9  ;;  %v29_v25 = vld [vmem:[%s537_s0 + $0x58] sm:$0xff]  ;;  %v22_v26 = vld [vmem:[%s537_s0 + $0x20] sm:$0xff]  ;;  %v23_v27 = vld [vmem:[%s537_s0 + $0x28] sm:$0xff]  ;;  %v44_v31 = vadd.f32 %v413_v6, %v21_v23  ;;  %v51_v32 = vadd.f32 %v413_v6, %v28_v24 }
   0x7   :  { %314 = vmatpush3.bf16.msra.mxu0 %v360_v1  ;;  %352 = vmatpush3.bf16.msra.mxu1 %v360_v1  ;;  %v57_v13 = vmax.f32 %v41_v7, 0.0  ;;  %v58_v14 = vmax.f32 %v42_v8, 0.0  ;;  %v66_v17 = vmax.f32 %v50_v12, 0.0  ;;  %v30_v28 = vld [vmem:[%s537_s0 + $0x60] sm:$0xff]  ;;  %v31_v29 = vld [vmem:[%s537_s0 + $0x68] sm:$0xff]  ;;  %v52_v33 = vadd.f32 %v413_v6, %v29_v25  ;;  %v24_v43 = vld [vmem:[%s537_s0 + $0x30] sm:$0xff] }
   0x8   :  { %315 = vmatprep.subr.bf16.mxu0 %v361_v2  ;;  %345 = vmatprep.subr.bf16.mxu1 %v361_v2  ;;  %v65_v16 = vmax.f32 %v49_v11, 0.0  ;;  %v45_v34 = vadd.f32 %v413_v6, %v22_v26  ;;  %v46_v35 = vadd.f32 %v413_v6, %v23_v27  ;;  %v53_v36 = vadd.f32 %v413_v6, %v30_v28  ;;  %v366_v38 = vld [vmem:[%s536_s1] sm:$0xff]   ;;  %v25_v44 = vld [vmem:[%s537_s0 + $0x38] sm:$0xff]  ;;  %v32_v49 = vld [vmem:[%s537_s0 + $0x70] sm:$0xff] }
   0x9   :  { %v73_v18 = vpack.c.bf16 %v58_v14, %v57_v13  ;;  %v54_v37 = vadd.f32 %v413_v6, %v31_v29  ;;  %v59_v39 = vmax.f32 %v43_v30, 0.0  ;;  %v60_v40 = vmax.f32 %v44_v31, 0.0  ;;  %v33_v50 = vld [vmem:[%s537_s0 + $0x78] sm:$0xff]  ;;  %v286_v1 = vld [vmem:[%s539_s3] ss:$0 sm:$0xff] }
   0xa   :  { %v77_v19 = vpack.c.bf16 %v66_v17, %v65_v16  ;;  %v67_v41 = vmax.f32 %v51_v32, 0.0  ;;  %v68_v42 = vmax.f32 %v52_v33, 0.0  ;;  %v61_v45 = vmax.f32 %v45_v34, 0.0 }
   0xb   :  { %316 = vmatpush3.bf16.msra.mxu0 %v361_v2  ;;  %353 = vmatpush3.bf16.msra.mxu1 %v361_v2  ;;  %v62_v46 = vmax.f32 %v46_v35, 0.0  ;;  %v69_v47 = vmax.f32 %v53_v36, 0.0  ;;  %v70_v48 = vmax.f32 %v54_v37, 0.0  ;;  %v74_v51 = vpack.c.bf16 %v60_v40, %v59_v39 }
   0xc   :  { %317 = vmatprep.subr.bf16.mxu0 %v362_v3  ;;  %346 = vmatprep.subr.bf16.mxu1 %v362_v3  ;;  %v47_v52 = vadd.f32 %v413_v6, %v24_v43  ;;  %v78_v53 = vpack.c.bf16 %v68_v42, %v67_v41  ;;  %v48_v54 = vadd.f32 %v413_v6, %v25_v44 }
   0xd   :  { %327 = vmatprep.mubr.bf16.mxu0 %v73_v18  ;;  %335 = vmatprep.mubr.bf16.mxu1 %v77_v19  ;;  %v55_v55 = vadd.f32 %v413_v6, %v32_v49  ;;  %v56_v56 = vadd.f32 %v413_v6, %v33_v50  ;;  %v75_v57 = vpack.c.bf16 %v62_v46, %v61_v45 }
   0xe   :  { %v79_v58 = vpack.c.bf16 %v70_v48, %v69_v47  ;;  %v63_v59 = vmax.f32 %v47_v52, 0.0  ;;  %v64_v60 = vmax.f32 %v48_v54, 0.0 }
   0xf   :  { %318 = vmatpush3.bf16.msra.mxu0 %v362_v3  ;;  %354 = vmatpush3.bf16.msra.mxu1 %v362_v3  ;;  %v71_v61 = vmax.f32 %v55_v55, 0.0  ;;  %v72_v62 = vmax.f32 %v56_v56, 0.0 }
  0x10   :  { %319 = vmatprep.subr.bf16.mxu0 %v363_v15  ;;  %347 = vmatprep.subr.bf16.mxu1 %v363_v15  ;;  %v76_v63 = vpack.c.bf16 %v64_v60, %v63_v59 }
  0x11   :  { %v80_v0 = vpack.c.bf16 %v72_v62, %v71_v61 }
  0x13   :  { %320 = vmatpush3.bf16.msra.mxu0 %v363_v15  ;;  %355 = vmatpush3.bf16.msra.mxu1 %v363_v15 }
  0x14   :  { %321 = vmatprep.subr.bf16.mxu0 %v364_v20  ;;  %348 = vmatprep.subr.bf16.mxu1 %v364_v20 }
  0x17   :  { %322 = vmatpush3.bf16.msra.mxu0 %v364_v20  ;;  %356 = vmatpush3.bf16.msra.mxu1 %v364_v20 }
  0x18   :  { %323 = vmatprep.subr.bf16.mxu0 %v365_v21  ;;  %349 = vmatprep.subr.bf16.mxu1 %v365_v21 }
  0x1b   :  { %324 = vmatpush3.bf16.msra.mxu0 %v365_v21  ;;  %357 = vmatpush3.bf16.msra.mxu1 %v365_v21 }
  0x1c   :  { %325 = vmatprep.subr.bf16.mxu0 %v366_v38  ;;  %350 = vmatprep.subr.bf16.mxu1 %v366_v38 }
  0x1f   :  { %326 = vmatpush3.bf16.msra.mxu0 %v366_v38  ;;  %358 = vmatpush3.bf16.msra.mxu1 %v366_v38 }
  0x22   :  { %328 = vmatmul.mubr.bf16.vlgmr.msra.gmra.mxu0 %v74_v51  ;;  %336 = vmatmul.mubr.bf16.vlgmr.msra.gmra.mxu1 %v78_v53 }
  0x23   :  { %331 = vmatprep.mubr.bf16.mxu0 %v75_v57  ;;  %339 = vmatprep.mubr.bf16.mxu1 %v79_v58 }
  0x2a   :  { %332 = vmatmul.mubr.bf16.gmra.mxu0 %v76_v63  ;;  %340 = vmatmul.mubr.bf16.gmra.mxu1 %v80_v0 }
  0xe2   :  { %v329_v2 = vpop.f32.mrf.mxu0  ;;  %v337_v3 = vpop.f32.mrf.mxu1 }
  0xe3   :  { %v195_v4 = vadd.f32 %v329_v2, %v286_v1  ;;  %v227_v5 = vadd.f32 %v337_v3, %v286_v1 }
  0xe4   :  { %v186_v6 = vpop.f32.mrf.mxu0  ;;  %v218_v7 = vpop.f32.mrf.mxu1 }
  0xe5   :  { %v251_v8 = vmax.f32 %v195_v4, 0.0  ;;  %v259_v9 = vmax.f32 %v227_v5, 0.0  ;;  %v187_v10 = vadd.f32 %v286_v1, %v186_v6  ;;  %v219_v11 = vadd.f32 %v286_v1, %v218_v7 }
  0xe6   :  { %v330_v12 = vpop.f32.mrf.mxu0  ;;  %v338_v13 = vpop.f32.mrf.mxu1 }
  0xe7   :  { %267 = vst [vmem:[%s540_s4 + $0x10] sm:$0xff] %v251_v8  ;;  %275 = vst [vmem:[%s540_s4 + $0x50] sm:$0xff] %v259_v9  ;;  %v249_v14 = vmax.f32 %v187_v10, 0.0  ;;  %v257_v15 = vmax.f32 %v219_v11, 0.0  ;;  %v198_v16 = vadd.f32 %v330_v12, %v286_v1  ;;  %v230_v17 = vadd.f32 %v338_v13, %v286_v1 }
  0xe8   :  { %v189_v18 = vpop.f32.mrf.mxu0  ;;  %v221_v19 = vpop.f32.mrf.mxu1 }
  0xe9   :  { %265 = vst [vmem:[%s540_s4] sm:$0xff] %v249_v14  ;;  %273 = vst [vmem:[%s540_s4 + $0x40] sm:$0xff] %v257_v15  ;;  %v252_v20 = vmax.f32 %v198_v16, 0.0  ;;  %v260_v21 = vmax.f32 %v230_v17, 0.0  ;;  %v190_v22 = vadd.f32 %v286_v1, %v189_v18  ;;  %v222_v23 = vadd.f32 %v286_v1, %v221_v19 }
  0xea   :  { %v333_v24 = vpop.f32.mrf.mxu0  ;;  %v341_v25 = vpop.f32.mrf.mxu1 }
  0xeb   :  { %268 = vst [vmem:[%s540_s4 + $0x18] sm:$0xff] %v252_v20  ;;  %276 = vst [vmem:[%s540_s4 + $0x58] sm:$0xff] %v260_v21  ;;  %v250_v26 = vmax.f32 %v190_v22, 0.0  ;;  %v258_v27 = vmax.f32 %v222_v23, 0.0  ;;  %v211_v28 = vadd.f32 %v333_v24, %v286_v1  ;;  %v243_v29 = vadd.f32 %v341_v25, %v286_v1 }
  0xec   :  { %v202_v30 = vpop.f32.mrf.mxu0  ;;  %v234_v31 = vpop.f32.mrf.mxu1 }
  0xed   :  { %266 = vst [vmem:[%s540_s4 + $0x8] sm:$0xff] %v250_v26  ;;  %274 = vst [vmem:[%s540_s4 + $0x48] sm:$0xff] %v258_v27  ;;  %v255_v32 = vmax.f32 %v211_v28, 0.0  ;;  %v263_v33 = vmax.f32 %v243_v29, 0.0  ;;  %v203_v34 = vadd.f32 %v286_v1, %v202_v30  ;;  %v235_v35 = vadd.f32 %v286_v1, %v234_v31 }
  0xee   :  { %v334_v36 = vpop.f32.mrf.mxu0  ;;  %v342_v37 = vpop.f32.mrf.mxu1 }
  0xef   :  { %271 = vst [vmem:[%s540_s4 + $0x30] sm:$0xff] %v255_v32  ;;  %279 = vst [vmem:[%s540_s4 + $0x70] sm:$0xff] %v263_v33  ;;  %v253_v38 = vmax.f32 %v203_v34, 0.0  ;;  %v261_v39 = vmax.f32 %v235_v35, 0.0  ;;  %v214_v40 = vadd.f32 %v334_v36, %v286_v1  ;;  %v246_v41 = vadd.f32 %v342_v37, %v286_v1 }
  0xf0   :  { %v205_v42 = vpop.f32.mrf.mxu0  ;;  %v237_v43 = vpop.f32.mrf.mxu1 }
  0xf1   :  { %269 = vst [vmem:[%s540_s4 + $0x20] sm:$0xff] %v253_v38  ;;  %277 = vst [vmem:[%s540_s4 + $0x60] sm:$0xff] %v261_v39  ;;  %v256_v44 = vmax.f32 %v214_v40, 0.0  ;;  %v264_v45 = vmax.f32 %v246_v41, 0.0  ;;  %v206_v46 = vadd.f32 %v286_v1, %v205_v42  ;;  %v238_v47 = vadd.f32 %v286_v1, %v237_v43 }
  0xf3   :  { %272 = vst [vmem:[%s540_s4 + $0x38] sm:$0xff] %v256_v44  ;;  %280 = vst [vmem:[%s540_s4 + $0x78] sm:$0xff] %v264_v45  ;;  %v254_v48 = vmax.f32 %v206_v46, 0.0  ;;  %v262_v49 = vmax.f32 %v238_v47, 0.0 }
  0xf5   :  { %270 = vst [vmem:[%s540_s4 + $0x28] sm:$0xff] %v254_v48  ;;  %278 = vst [vmem:[%s540_s4 + $0x68] sm:$0xff] %v262_v49 }

// kernel: segnet3d_rec_forward.11
= control target key start
LH: loop header
LB: loop body
LE: loop exit
PB: predicated region body
PF: predicated region fallthrough
CT: control target
= control target key end

     0   :  { %s1759_s1 = inlined_call_operand.vmem [shape: bf16[256,512], index: 1, kind: input, shape index: {}]   ;;  %s1760_s0 = inlined_call_operand.vmem [shape: bf16[128,256], index: 0, kind: input, shape index: {}]   ;;  %s1761_s2 = inlined_call_operand.vmem [shape: f32[128,512], index: 2, kind: output, shape index: {}]  }
   0x1   :  { %v1192_v0 = vld [vmem:[%s1759_s1 + $0xe4] ss:$16 sps:$4 sm:$0xff]   ;;  %v1194_v1 = vld [vmem:[%s1759_s1 + $0xec] ss:$16 sps:$4 sm:$0xff]   ;;  %v1196_v2 = vld [vmem:[%s1759_s1 + $0xe0] ss:$16 sps:$4 sm:$0xff]  }
   0x2   :  { %623 = vmatprep.subr.bf16.mxu0 %v1192_v0  ;;  %v1197_v3 = vld [vmem:[%s1759_s1 + $0xe8] ss:$16 sps:$4 sm:$0xff]   ;;  %736 = vmatprep.subr.bf16.mxu1 %v1194_v1  ;;  %v1198_v4 = vld [vmem:[%s1759_s1 + $0xc4] ss:$16 sps:$4 sm:$0xff]   ;;  %v1200_v5 = vld [vmem:[%s1759_s1 + $0xcc] ss:$16 sps:$4 sm:$0xff]  }
   0x3   :  { %624 = vmatpush1.bf16.msra.mxu0 %v1196_v2  ;;  %737 = vmatpush1.bf16.msra.mxu1 %v1197_v3  ;;  %v1202_v6 = vld [vmem:[%s1759_s1 + $0xc0] ss:$16 sps:$4 sm:$0xff]   ;;  %v1203_v7 = vld [vmem:[%s1759_s1 + $0xc8] ss:$16 sps:$4 sm:$0xff]   ;;  %v1204_v8 = vld [vmem:[%s1759_s1 + $0xa4] ss:$16 sps:$4 sm:$0xff]  }
   0x4   :  { %625 = vmatprep.subr.bf16.mxu0 %v1198_v4  ;;  %738 = vmatprep.subr.bf16.mxu1 %v1200_v5  ;;  %v1206_v9 = vld [vmem:[%s1759_s1 + $0xac] ss:$16 sps:$4 sm:$0xff]   ;;  %v1208_v10 = vld [vmem:[%s1759_s1 + $0xa0] ss:$16 sps:$4 sm:$0xff]   ;;  %v1209_v11 = vld [vmem:[%s1759_s1 + $0xa8] ss:$16 sps:$4 sm:$0xff]  }
   0x5   :  { %v1210_v12 = vld [vmem:[%s1759_s1 + $0x84] ss:$16 sps:$4 sm:$0xff]   ;;  %v1212_v13 = vld [vmem:[%s1759_s1 + $0x8c] ss:$16 sps:$4 sm:$0xff]   ;;  %v1214_v14 = vld [vmem:[%s1759_s1 + $0x80] ss:$16 sps:$4 sm:$0xff]  }
   0x6   :  { %v1215_v15 = vld [vmem:[%s1759_s1 + $0x88] ss:$16 sps:$4 sm:$0xff]   ;;  %v1216_v16 = vld [vmem:[%s1759_s1 + $0x64] ss:$16 sps:$4 sm:$0xff]   ;;  %v1218_v17 = vld [vmem:[%s1759_s1 + $0x6c] ss:$16 sps:$4 sm:$0xff]  }
   0x7   :  { %626 = vmatpush1.bf16.msra.mxu0 %v1202_v6  ;;  %739 = vmatpush1.bf16.msra.mxu1 %v1203_v7  ;;  %v1220_v18 = vld [vmem:[%s1759_s1 + $0x60] ss:$16 sps:$4 sm:$0xff]   ;;  %v1221_v19 = vld [vmem:[%s1759_s1 + $0x68] ss:$16 sps:$4 sm:$0xff]   ;;  %v1222_v20 = vld [vmem:[%s1759_s1 + $0x44] ss:$16 sps:$4 sm:$0xff]  }
   0x8   :  { %627 = vmatprep.subr.bf16.mxu0 %v1204_v8  ;;  %740 = vmatprep.subr.bf16.mxu1 %v1206_v9  ;;  %v1224_v21 = vld [vmem:[%s1759_s1 + $0x4c] ss:$16 sps:$4 sm:$0xff]   ;;  %v1226_v22 = vld [vmem:[%s1759_s1 + $0x40] ss:$16 sps:$4 sm:$0xff]   ;;  %v1227_v23 = vld [vmem:[%s1759_s1 + $0x48] ss:$16 sps:$4 sm:$0xff]  }
   0x9   :  { %v1228_v24 = vld [vmem:[%s1759_s1 + $0x24] ss:$16 sps:$4 sm:$0xff]   ;;  %v1230_v25 = vld [vmem:[%s1759_s1 + $0x2c] ss:$16 sps:$4 sm:$0xff]   ;;  %v1232_v26 = vld [vmem:[%s1759_s1 + $0x20] ss:$16 sps:$4 sm:$0xff]  }
   0xa   :  { %v1233_v27 = vld [vmem:[%s1759_s1 + $0x28] ss:$16 sps:$4 sm:$0xff]   ;;  %v1234_v28 = vld [vmem:[%s1759_s1 + $0x4] ss:$16 sps:$4 sm:$0xff]   ;;  %v1236_v29 = vld [vmem:[%s1759_s1 + $0xc] ss:$16 sps:$4 sm:$0xff]  }
   0xb   :  { %628 = vmatpush1.bf16.msra.mxu0 %v1208_v10  ;;  %741 = vmatpush1.bf16.msra.mxu1 %v1209_v11  ;;  %v1238_v30 = vld [vmem:[%s1759_s1] ss:$16 sps:$4 sm:$0xff]   ;;  %v1239_v31 = vld [vmem:[%s1759_s1 + $0x8] ss:$16 sps:$4 sm:$0xff]   ;;  %v1240_v32 = vld [vmem:[%s1759_s1 + $0x1e4] ss:$16 sps:$4 sm:$0xff]  }
   0xc   :  { %629 = vmatprep.subr.bf16.mxu0 %v1210_v12  ;;  %742 = vmatprep.subr.bf16.mxu1 %v1212_v13  ;;  %v1242_v33 = vld [vmem:[%s1759_s1 + $0x1ec] ss:$16 sps:$4 sm:$0xff]   ;;  %v1244_v34 = vld [vmem:[%s1759_s1 + $0x1e0] ss:$16 sps:$4 sm:$0xff]   ;;  %v1245_v35 = vld [vmem:[%s1759_s1 + $0x1e8] ss:$16 sps:$4 sm:$0xff]  }
   0xd   :  { %v1246_v36 = vld [vmem:[%s1759_s1 + $0x1c4] ss:$16 sps:$4 sm:$0xff]   ;;  %v1248_v37 = vld [vmem:[%s1759_s1 + $0x1cc] ss:$16 sps:$4 sm:$0xff]   ;;  %v1250_v38 = vld [vmem:[%s1759_s1 + $0x1c0] ss:$16 sps:$4 sm:$0xff]  }
   0xe   :  { %v1251_v39 = vld [vmem:[%s1759_s1 + $0x1c8] ss:$16 sps:$4 sm:$0xff]   ;;  %v1252_v40 = vld [vmem:[%s1759_s1 + $0x1a4] ss:$16 sps:$4 sm:$0xff]   ;;  %v1254_v41 = vld [vmem:[%s1759_s1 + $0x1ac] ss:$16 sps:$4 sm:$0xff]  }
   0xf   :  { %630 = vmatpush1.bf16.msra.mxu0 %v1214_v14  ;;  %743 = vmatpush1.bf16.msra.mxu1 %v1215_v15  ;;  %v1256_v42 = vld [vmem:[%s1759_s1 + $0x1a0] ss:$16 sps:$4 sm:$0xff]   ;;  %v1257_v43 = vld [vmem:[%s1759_s1 + $0x1a8] ss:$16 sps:$4 sm:$0xff]   ;;  %v1258_v44 = vld [vmem:[%s1759_s1 + $0x184] ss:$16 sps:$4 sm:$0xff]  }
  0x10   :  { %631 = vmatprep.subr.bf16.mxu0 %v1216_v16  ;;  %744 = vmatprep.subr.bf16.mxu1 %v1218_v17  ;;  %v1260_v45 = vld [vmem:[%s1759_s1 + $0x18c] ss:$16 sps:$4 sm:$0xff]   ;;  %v1262_v46 = vld [vmem:[%s1759_s1 + $0x180] ss:$16 sps:$4 sm:$0xff]   ;;  %v1263_v47 = vld [vmem:[%s1759_s1 + $0x188] ss:$16 sps:$4 sm:$0xff]  }
  0x11   :  { %v1290_v48 = vld [vmem:[%s1760_s0 + $0x4] ss:$8 sps:$4 sm:$0xff]   ;;  %v1268_v51 = vld [vmem:[%s1759_s1 + $0x160] ss:$16 sps:$4 sm:$0xff]   ;;  %v1269_v52 = vld [vmem:[%s1759_s1 + $0x168] ss:$16 sps:$4 sm:$0xff]  }
  0x12   :  { %v1264_v49 = vld [vmem:[%s1759_s1 + $0x164] ss:$16 sps:$4 sm:$0xff]   ;;  %v1266_v50 = vld [vmem:[%s1759_s1 + $0x16c] ss:$16 sps:$4 sm:$0xff]   ;;  %655 = vmatprep.mubr.bf16.mxu0 %v1290_v48  ;;  %768 = vmatprep.mubr.bf16.mxu1 %v1290_v48  ;;  %v1274_v55 = vld [vmem:[%s1759_s1 + $0x140] ss:$16 sps:$4 sm:$0xff]  }
  0x13   :  { %632 = vmatpush1.bf16.msra.mxu0 %v1220_v18  ;;  %745 = vmatpush1.bf16.msra.mxu1 %v1221_v19  ;;  %v1270_v53 = vld [vmem:[%s1759_s1 + $0x144] ss:$16 sps:$4 sm:$0xff]   ;;  %v1272_v54 = vld [vmem:[%s1759_s1 + $0x14c] ss:$16 sps:$4 sm:$0xff]   ;;  %v1275_v56 = vld [vmem:[%s1759_s1 + $0x148] ss:$16 sps:$4 sm:$0xff]  }
  0x14   :  { %633 = vmatprep.subr.bf16.mxu0 %v1222_v20  ;;  %746 = vmatprep.subr.bf16.mxu1 %v1224_v21  ;;  %v1276_v57 = vld [vmem:[%s1759_s1 + $0x124] ss:$16 sps:$4 sm:$0xff]   ;;  %v1278_v58 = vld [vmem:[%s1759_s1 + $0x12c] ss:$16 sps:$4 sm:$0xff]   ;;  %v1280_v59 = vld [vmem:[%s1759_s1 + $0x120] ss:$16 sps:$4 sm:$0xff]  }
  0x15   :  { %v1281_v60 = vld [vmem:[%s1759_s1 + $0x128] ss:$16 sps:$4 sm:$0xff]   ;;  %v1282_v61 = vld [vmem:[%s1759_s1 + $0x104] ss:$16 sps:$4 sm:$0xff]   ;;  %v1284_v62 = vld [vmem:[%s1759_s1 + $0x10c] ss:$16 sps:$4 sm:$0xff]  }
  0x16   :  { %v1286_v63 = vld [vmem:[%s1759_s1 + $0x100] ss:$16 sps:$4 sm:$0xff]   ;;  %v1287_v0 = vld [vmem:[%s1759_s1 + $0x108] ss:$16 sps:$4 sm:$0xff]   ;;  %v1291_v2 = vld [vmem:[%s1760_s0 + $0x14] ss:$8 sps:$4 sm:$0xff]  }
  0x17   :  { %634 = vmatpush1.bf16.msra.mxu0 %v1226_v22  ;;  %747 = vmatpush1.bf16.msra.mxu1 %v1227_v23  ;;  %v1288_v1 = vld [vmem:[%s1760_s0] ss:$8 sps:$4 sm:$0xff]   ;;  %v1293_v3 = vld [vmem:[%s1760_s0 + $0x10] ss:$8 sps:$4 sm:$0xff]   ;;  %v1294_v4 = vld [vmem:[%s1760_s0 + $0x24] ss:$8 sps:$4 sm:$0xff]  }
  0x18   :  { %635 = vmatprep.subr.bf16.mxu0 %v1228_v24  ;;  %748 = vmatprep.subr.bf16.mxu1 %v1230_v25  ;;  %v1296_v5 = vld [vmem:[%s1760_s0 + $0x20] ss:$8 sps:$4 sm:$0xff]   ;;  %v1297_v6 = vld [vmem:[%s1760_s0 + $0x34] ss:$8 sps:$4 sm:$0xff]   ;;  %v1299_v7 = vld [vmem:[%s1760_s0 + $0x30] ss:$8 sps:$4 sm:$0xff]  }
  0x19   :  { %v1300_v8 = vld [vmem:[%s1760_s0 + $0x44] ss:$8 sps:$4 sm:$0xff]   ;;  %v1302_v9 = vld [vmem:[%s1760_s0 + $0x40] ss:$8 sps:$4 sm:$0xff]   ;;  %v1303_v10 = vld [vmem:[%s1760_s0 + $0x54] ss:$8 sps:$4 sm:$0xff]  }
  0x1a   :  { %v1305_v11 = vld [vmem:[%s1760_s0 + $0x50] ss:$8 sps:$4 sm:$0xff]   ;;  %v1306_v12 = vld [vmem:[%s1760_s0 + $0x64] ss:$8 sps:$4 sm:$0xff]   ;;  %v1308_v13 = vld [vmem:[%s1760_s0 + $0x60] ss:$8 sps:$4 sm:$0xff]  }
  0x1b   :  { %636 = vmatpush1.bf16.msra.mxu0 %v1232_v26  ;;  %749 = vmatpush1.bf16.msra.mxu1 %v1233_v27  ;;  %v1309_v14 = vld [vmem:[%s1760_s0 + $0x74] ss:$8 sps:$4 sm:$0xff]   ;;  %v1311_v15 = vld [vmem:[%s1760_s0 + $0x70] ss:$8 sps:$4 sm:$0xff]  }
  0x1c   :  { %637 = vmatprep.subr.bf16.mxu0 %v1234_v28  ;;  %750 = vmatprep.subr.bf16.mxu1 %v1236_v29 }
  0x1f   :  { %638 = vmatpush1.bf16.msra.mxu0 %v1238_v30  ;;  %751 = vmatpush1.bf16.msra.mxu1 %v1239_v31 }
  0x20   :  { %639 = vmatprep.subr.bf16.mxu0 %v1240_v32  ;;  %752 = vmatprep.subr.bf16.mxu1 %v1242_v33 }
  0x23   :  { %640 = vmatpush2.bf16.msra.mxu0 %v1244_v34  ;;  %753 = vmatpush2.bf16.msra.mxu1 %v1245_v35 }
  0x24   :  { %641 = vmatprep.subr.bf16.mxu0 %v1246_v36  ;;  %754 = vmatprep.subr.bf16.mxu1 %v1248_v37 }
  0x27   :  { %642 = vmatpush2.bf16.msra.mxu0 %v1250_v38  ;;  %755 = vmatpush2.bf16.msra.mxu1 %v1251_v39 }
  0x28   :  { %643 = vmatprep.subr.bf16.mxu0 %v1252_v40  ;;  %756 = vmatprep.subr.bf16.mxu1 %v1254_v41 }
  0x2b   :  { %644 = vmatpush2.bf16.msra.mxu0 %v1256_v42  ;;  %757 = vmatpush2.bf16.msra.mxu1 %v1257_v43 }
  0x2c   :  { %645 = vmatprep.subr.bf16.mxu0 %v1258_v44  ;;  %758 = vmatprep.subr.bf16.mxu1 %v1260_v45 }
  0x2f   :  { %646 = vmatpush2.bf16.msra.mxu0 %v1262_v46  ;;  %759 = vmatpush2.bf16.msra.mxu1 %v1263_v47 }
  0x30   :  { %647 = vmatprep.subr.bf16.mxu0 %v1264_v49  ;;  %760 = vmatprep.subr.bf16.mxu1 %v1266_v50 }
  0x33   :  { %648 = vmatpush2.bf16.msra.mxu0 %v1268_v51  ;;  %761 = vmatpush2.bf16.msra.mxu1 %v1269_v52 }
  0x34   :  { %649 = vmatprep.subr.bf16.mxu0 %v1270_v53  ;;  %762 = vmatprep.subr.bf16.mxu1 %v1272_v54 }
  0x37   :  { %650 = vmatpush2.bf16.msra.mxu0 %v1274_v55  ;;  %763 = vmatpush2.bf16.msra.mxu1 %v1275_v56 }
  0x38   :  { %651 = vmatprep.subr.bf16.mxu0 %v1276_v57  ;;  %764 = vmatprep.subr.bf16.mxu1 %v1278_v58 }
  0x3b   :  { %652 = vmatpush2.bf16.msra.mxu0 %v1280_v59  ;;  %765 = vmatpush2.bf16.msra.mxu1 %v1281_v60 }
  0x3c   :  { %653 = vmatprep.subr.bf16.mxu0 %v1282_v61  ;;  %766 = vmatprep.subr.bf16.mxu1 %v1284_v62 }
  0x3f   :  { %654 = vmatpush2.bf16.msra.mxu0 %v1286_v63  ;;  %767 = vmatpush2.bf16.msra.mxu1 %v1287_v0 }
  0x42   :  { %656 = vmatmul.mubr.bf16.vlgmr.msra.gmra.mxu0 %v1288_v1  ;;  %769 = vmatmul.mubr.bf16.vlgmr.msra.gmra.mxu1 %v1288_v1 }
  0x43   :  { %665 = vmatprep.mubr.bf16.mxu0 %v1291_v2  ;;  %778 = vmatprep.mubr.bf16.mxu1 %v1291_v2 }
  0x4a   :  { %666 = vmatmul.mubr.bf16.gmra.mxu0 %v1293_v3  ;;  %779 = vmatmul.mubr.bf16.gmra.mxu1 %v1293_v3 }
  0x4b   :  { %675 = vmatprep.mubr.bf16.mxu0 %v1294_v4  ;;  %788 = vmatprep.mubr.bf16.mxu1 %v1294_v4 }
  0x52   :  { %676 = vmatmul.mubr.bf16.gmra.mxu0 %v1296_v5  ;;  %789 = vmatmul.mubr.bf16.gmra.mxu1 %v1296_v5 }
  0x53   :  { %685 = vmatprep.mubr.bf16.mxu0 %v1297_v6  ;;  %798 = vmatprep.mubr.bf16.mxu1 %v1297_v6 }
  0x5a   :  { %686 = vmatmul.mubr.bf16.gmra.mxu0 %v1299_v7  ;;  %799 = vmatmul.mubr.bf16.gmra.mxu1 %v1299_v7 }
  0x5b   :  { %695 = vmatprep.mubr.bf16.mxu0 %v1300_v8  ;;  %808 = vmatprep.mubr.bf16.mxu1 %v1300_v8 }
  0x62   :  { %696 = vmatmul.mubr.bf16.gmra.mxu0 %v1302_v9  ;;  %809 = vmatmul.mubr.bf16.gmra.mxu1 %v1302_v9 }
  0x63   :  { %705 = vmatprep.mubr.bf16.mxu0 %v1303_v10  ;;  %818 = vmatprep.mubr.bf16.mxu1 %v1303_v10 }
  0x6a   :  { %706 = vmatmul.mubr.bf16.gmra.mxu0 %v1305_v11  ;;  %819 = vmatmul.mubr.bf16.gmra.mxu1 %v1305_v11 }
  0x6b   :  { %715 = vmatprep.mubr.bf16.mxu0 %v1306_v12  ;;  %828 = vmatprep.mubr.bf16.mxu1 %v1306_v12 }
  0x72   :  { %716 = vmatmul.mubr.bf16.gmra.mxu0 %v1308_v13  ;;  %829 = vmatmul.mubr.bf16.gmra.mxu1 %v1308_v13 }
  0x73   :  { %725 = vmatprep.mubr.bf16.mxu0 %v1309_v14  ;;  %838 = vmatprep.mubr.bf16.mxu1 %v1309_v14 }
  0x7a   :  { %726 = vmatmul.mubr.bf16.gmra.mxu0 %v1311_v15  ;;  %839 = vmatmul.mubr.bf16.gmra.mxu1 %v1311_v15 }
 0x102   :  { %v657_v16 = vpop.f32.mrf.mxu0  ;;  %v770_v17 = vpop.f32.mrf.mxu1 }
 0x103   :  { %1044 = vst [vmem:[%s1761_s2] sm:$0xff] %v657_v16  ;;  %1046 = vst [vmem:[%s1761_s2 + $0x10] sm:$0xff] %v770_v17 }
 0x104   :  { %v659_v18 = vpop.f32.mrf.mxu0  ;;  %v772_v19 = vpop.f32.mrf.mxu1 }
 0x105   :  { %1045 = vst [vmem:[%s1761_s2 + $0x8] sm:$0xff] %v659_v18  ;;  %1047 = vst [vmem:[%s1761_s2 + $0x18] sm:$0xff] %v772_v19 }
 0x106   :  { %v661_v20 = vpop.f32.mrf.mxu0  ;;  %v774_v21 = vpop.f32.mrf.mxu1 }
 0x107   :  { %1048 = vst [vmem:[%s1761_s2 + $0x20] sm:$0xff] %v661_v20  ;;  %1050 = vst [vmem:[%s1761_s2 + $0x30] sm:$0xff] %v774_v21 }
 0x108   :  { %v663_v22 = vpop.f32.mrf.mxu0  ;;  %v776_v23 = vpop.f32.mrf.mxu1 }
 0x109   :  { %1049 = vst [vmem:[%s1761_s2 + $0x28] sm:$0xff] %v663_v22  ;;  %1051 = vst [vmem:[%s1761_s2 + $0x38] sm:$0xff] %v776_v23 }
 0x10a   :  { %v667_v24 = vpop.f32.mrf.mxu0  ;;  %v780_v25 = vpop.f32.mrf.mxu1 }
 0x10b   :  { %1052 = vst [vmem:[%s1761_s2 + $0x40] sm:$0xff] %v667_v24  ;;  %1054 = vst [vmem:[%s1761_s2 + $0x50] sm:$0xff] %v780_v25 }
 0x10c   :  { %v669_v26 = vpop.f32.mrf.mxu0  ;;  %v782_v27 = vpop.f32.mrf.mxu1 }
 0x10d   :  { %1053 = vst [vmem:[%s1761_s2 + $0x48] sm:$0xff] %v669_v26  ;;  %1055 = vst [vmem:[%s1761_s2 + $0x58] sm:$0xff] %v782_v27 }
 0x10e   :  { %v671_v28 = vpop.f32.mrf.mxu0  ;;  %v784_v29 = vpop.f32.mrf.mxu1 }
 0x10f   :  { %1056 = vst [vmem:[%s1761_s2 + $0x60] sm:$0xff] %v671_v28  ;;  %1058 = vst [vmem:[%s1761_s2 + $0x70] sm:$0xff] %v784_v29 }
 0x110   :  { %v673_v30 = vpop.f32.mrf.mxu0  ;;  %v786_v31 = vpop.f32.mrf.mxu1 }
 0x111   :  { %1057 = vst [vmem:[%s1761_s2 + $0x68] sm:$0xff] %v673_v30  ;;  %1059 = vst [vmem:[%s1761_s2 + $0x78] sm:$0xff] %v786_v31 }
 0x112   :  { %v677_v32 = vpop.f32.mrf.mxu0  ;;  %v790_v33 = vpop.f32.mrf.mxu1 }
 0x113   :  { %1060 = vst [vmem:[%s1761_s2 + $0x80] sm:$0xff] %v677_v32  ;;  %1062 = vst [vmem:[%s1761_s2 + $0x90] sm:$0xff] %v790_v33 }
 0x114   :  { %v679_v34 = vpop.f32.mrf.mxu0  ;;  %v792_v35 = vpop.f32.mrf.mxu1 }
 0x115   :  { %1061 = vst [vmem:[%s1761_s2 + $0x88] sm:$0xff] %v679_v34  ;;  %1063 = vst [vmem:[%s1761_s2 + $0x98] sm:$0xff] %v792_v35 }
 0x116   :  { %v681_v36 = vpop.f32.mrf.mxu0  ;;  %v794_v37 = vpop.f32.mrf.mxu1 }
 0x117   :  { %1064 = vst [vmem:[%s1761_s2 + $0xa0] sm:$0xff] %v681_v36  ;;  %1066 = vst [vmem:[%s1761_s2 + $0xb0] sm:$0xff] %v794_v37 }
 0x118   :  { %v683_v38 = vpop.f32.mrf.mxu0  ;;  %v796_v39 = vpop.f32.mrf.mxu1 }
 0x119   :  { %1065 = vst [vmem:[%s1761_s2 + $0xa8] sm:$0xff] %v683_v38  ;;  %1067 = vst [vmem:[%s1761_s2 + $0xb8] sm:$0xff] %v796_v39 }
 0x11a   :  { %v687_v40 = vpop.f32.mrf.mxu0  ;;  %v800_v41 = vpop.f32.mrf.mxu1 }
 0x11b   :  { %1068 = vst [vmem:[%s1761_s2 + $0xc0] sm:$0xff] %v687_v40  ;;  %1070 = vst [vmem:[%s1761_s2 + $0xd0] sm:$0xff] %v800_v41 }
 0x11c   :  { %v689_v42 = vpop.f32.mrf.mxu0  ;;  %v802_v43 = vpop.f32.mrf.mxu1 }
 0x11d   :  { %1069 = vst [vmem:[%s1761_s2 + $0xc8] sm:$0xff] %v689_v42  ;;  %1071 = vst [vmem:[%s1761_s2 + $0xd8] sm:$0xff] %v802_v43 }
 0x11e   :  { %v691_v44 = vpop.f32.mrf.mxu0  ;;  %v804_v45 = vpop.f32.mrf.mxu1 }
 0x11f   :  { %1072 = vst [vmem:[%s1761_s2 + $0xe0] sm:$0xff] %v691_v44  ;;  %1074 = vst [vmem:[%s1761_s2 + $0xf0] sm:$0xff] %v804_v45 }
 0x120   :  { %v693_v46 = vpop.f32.mrf.mxu0  ;;  %v806_v47 = vpop.f32.mrf.mxu1 }
 0x121   :  { %1073 = vst [vmem:[%s1761_s2 + $0xe8] sm:$0xff] %v693_v46  ;;  %1075 = vst [vmem:[%s1761_s2 + $0xf8] sm:$0xff] %v806_v47 }
 0x122   :  { %v697_v48 = vpop.f32.mrf.mxu0  ;;  %v810_v49 = vpop.f32.mrf.mxu1 }
 0x123   :  { %1076 = vst [vmem:[%s1761_s2 + $0x100] sm:$0xff] %v697_v48  ;;  %1078 = vst [vmem:[%s1761_s2 + $0x110] sm:$0xff] %v810_v49 }
 0x124   :  { %v699_v50 = vpop.f32.mrf.mxu0  ;;  %v812_v51 = vpop.f32.mrf.mxu1 }
 0x125   :  { %1077 = vst [vmem:[%s1761_s2 + $0x108] sm:$0xff] %v699_v50  ;;  %1079 = vst [vmem:[%s1761_s2 + $0x118] sm:$0xff] %v812_v51 }
 0x126   :  { %v701_v52 = vpop.f32.mrf.mxu0  ;;  %v814_v53 = vpop.f32.mrf.mxu1 }
 0x127   :  { %1080 = vst [vmem:[%s1761_s2 + $0x120] sm:$0xff] %v701_v52  ;;  %1082 = vst [vmem:[%s1761_s2 + $0x130] sm:$0xff] %v814_v53 }
 0x128   :  { %v703_v54 = vpop.f32.mrf.mxu0  ;;  %v816_v55 = vpop.f32.mrf.mxu1 }
 0x129   :  { %1081 = vst [vmem:[%s1761_s2 + $0x128] sm:$0xff] %v703_v54  ;;  %1083 = vst [vmem:[%s1761_s2 + $0x138] sm:$0xff] %v816_v55 }
 0x12a   :  { %v707_v56 = vpop.f32.mrf.mxu0  ;;  %v820_v57 = vpop.f32.mrf.mxu1 }
 0x12b   :  { %1084 = vst [vmem:[%s1761_s2 + $0x140] sm:$0xff] %v707_v56  ;;  %1086 = vst [vmem:[%s1761_s2 + $0x150] sm:$0xff] %v820_v57 }
 0x12c   :  { %v709_v58 = vpop.f32.mrf.mxu0  ;;  %v822_v59 = vpop.f32.mrf.mxu1 }
 0x12d   :  { %1085 = vst [vmem:[%s1761_s2 + $0x148] sm:$0xff] %v709_v58  ;;  %1087 = vst [vmem:[%s1761_s2 + $0x158] sm:$0xff] %v822_v59 }
 0x12e   :  { %v711_v60 = vpop.f32.mrf.mxu0  ;;  %v824_v61 = vpop.f32.mrf.mxu1 }
 0x12f   :  { %1088 = vst [vmem:[%s1761_s2 + $0x160] sm:$0xff] %v711_v60  ;;  %1090 = vst [vmem:[%s1761_s2 + $0x170] sm:$0xff] %v824_v61 }
 0x130   :  { %v713_v62 = vpop.f32.mrf.mxu0  ;;  %v826_v63 = vpop.f32.mrf.mxu1 }
 0x131   :  { %1089 = vst [vmem:[%s1761_s2 + $0x168] sm:$0xff] %v713_v62  ;;  %1091 = vst [vmem:[%s1761_s2 + $0x178] sm:$0xff] %v826_v63 }
 0x132   :  { %v717_v0 = vpop.f32.mrf.mxu0  ;;  %v830_v1 = vpop.f32.mrf.mxu1 }
 0x133   :  { %1092 = vst [vmem:[%s1761_s2 + $0x180] sm:$0xff] %v717_v0  ;;  %1094 = vst [vmem:[%s1761_s2 + $0x190] sm:$0xff] %v830_v1 }
 0x134   :  { %v719_v2 = vpop.f32.mrf.mxu0  ;;  %v832_v3 = vpop.f32.mrf.mxu1 }
 0x135   :  { %1093 = vst [vmem:[%s1761_s2 + $0x188] sm:$0xff] %v719_v2  ;;  %1095 = vst [vmem:[%s1761_s2 + $0x198] sm:$0xff] %v832_v3 }
 0x136   :  { %v721_v4 = vpop.f32.mrf.mxu0  ;;  %v834_v5 = vpop.f32.mrf.mxu1 }
 0x137   :  { %1096 = vst [vmem:[%s1761_s2 + $0x1a0] sm:$0xff] %v721_v4  ;;  %1098 = vst [vmem:[%s1761_s2 + $0x1b0] sm:$0xff] %v834_v5 }
 0x138   :  { %v723_v6 = vpop.f32.mrf.mxu0  ;;  %v836_v7 = vpop.f32.mrf.mxu1 }
 0x139   :  { %1097 = vst [vmem:[%s1761_s2 + $0x1a8] sm:$0xff] %v723_v6  ;;  %1099 = vst [vmem:[%s1761_s2 + $0x1b8] sm:$0xff] %v836_v7 }
 0x13a   :  { %v727_v8 = vpop.f32.mrf.mxu0  ;;  %v840_v9 = vpop.f32.mrf.mxu1 }
 0x13b   :  { %1100 = vst [vmem:[%s1761_s2 + $0x1c0] sm:$0xff] %v727_v8  ;;  %1102 = vst [vmem:[%s1761_s2 + $0x1d0] sm:$0xff] %v840_v9 }
 0x13c   :  { %v729_v10 = vpop.f32.mrf.mxu0  ;;  %v842_v11 = vpop.f32.mrf.mxu1 }
 0x13d   :  { %1101 = vst [vmem:[%s1761_s2 + $0x1c8] sm:$0xff] %v729_v10  ;;  %1103 = vst [vmem:[%s1761_s2 + $0x1d8] sm:$0xff] %v842_v11 }
 0x13e   :  { %v731_v12 = vpop.f32.mrf.mxu0  ;;  %v844_v13 = vpop.f32.mrf.mxu1 }
 0x13f   :  { %1104 = vst [vmem:[%s1761_s2 + $0x1e0] sm:$0xff] %v731_v12  ;;  %1106 = vst [vmem:[%s1761_s2 + $0x1f0] sm:$0xff] %v844_v13 }
 0x140   :  { %v733_v14 = vpop.f32.mrf.mxu0  ;;  %v846_v15 = vpop.f32.mrf.mxu1 }
 0x141   :  { %1105 = vst [vmem:[%s1761_s2 + $0x1e8] sm:$0xff] %v733_v14  ;;  %1107 = vst [vmem:[%s1761_s2 + $0x1f8] sm:$0xff] %v846_v15 }

// kernel: segnet3d_rec_forward.12
= control target key start
LH: loop header
LB: loop body
LE: loop exit
PB: predicated region body
PF: predicated region fallthrough
CT: control target
= control target key end

     0   :  { %s1183_s15 = smov 0   ;;  %s1540_s0 = inlined_call_operand.vmem [shape: f32[1024,128], index: 0, kind: input, shape index: {}]   ;;  %s1541_s1 = inlined_call_operand.vmem [shape: bf16[128,128], index: 1, kind: input, shape index: {}]   ;;  %s1542_s2 = inlined_call_operand.vmem [shape: f32[1,128], index: 2, kind: input, shape index: {}]   ;;  %s1543_s3 = inlined_call_operand.vmem [shape: f32[1,128], index: 3, kind: input, shape index: {}]   ;;  %s1544_s4 = inlined_call_operand.vmem [shape: f32[1024,128], index: 4, kind: output, shape index: {}]  }
   0x1 LB: > { %s977_s16 = sadd.s32 4294967295, %s1156_s15   ;;  %p981_p0 = scmp.ge.s32.totalorder %s1156_s15, 1  ;;  %s1156_s15 = sphi %s1183_s15, %s14_s15  }
   0x2   : > { %p163_p1 = scmp.lt.s32.totalorder %s1156_s15, 3 }
   0x4   : > { %p164_p2 = pnand %p981_p0, %p163_p1 }
   0x5   : > { %s982_s19 = sshll.u32 (!%p164_p2), %s977_s16, 6 }
   0x6   : > { %167 = sbr.rel (%p164_p2) target bundleno = 304 (0x130), region = 36  ;;  %p190_p3 = scmp.lt.s32.totalorder (!%p164_p2), %s982_s19, 127 }
   0xb   : > { %v1142_v0 = vld [vmem:[%s1541_s1 + $0x38] sm:$0xff]   ;;  %v1143_v1 = vld [vmem:[%s1541_s1 + $0x30] sm:$0xff]   ;;  %s1546_s19 = smov (!%p190_p3, %s982_s19), 127  ;;  %v1144_v2 = vld [vmem:[%s1541_s1 + $0x28] sm:$0xff]  }
   0xc   : > { %1038 = vmatprep.subr.bf16.mxu0 %v1142_v0  ;;  %1118 = vmatprep.subr.bf16.mxu1 %v1142_v0  ;;  %s983_s24 = sshll.u32 %s1546_s19, 3  ;;  %v1145_v3 = vld [vmem:[%s1541_s1 + $0x20] sm:$0xff]   ;;  %v1146_v15 = vld [vmem:[%s1541_s1 + $0x18] sm:$0xff]   ;;  %v1147_v20 = vld [vmem:[%s1541_s1 + $0x10] sm:$0xff]  }
   0xd   : > { %1039 = vmatpush3.bf16.msra.mxu0 %v1142_v0  ;;  %1126 = vmatpush3.bf16.msra.mxu1 %v1142_v0  ;;  %s1208_s27 = scalar_lea.vmem %s1540_s0, %s983_s24  ;;  %v1218_v6 = vld [vmem:[%s1542_s2] ss:$0 sm:$0xff]  ;;  %v1148_v31 = vld [vmem:[%s1541_s1 + $0x8] sm:$0xff]   ;;  %s1409_s20 = scalar_lea.vmem %s1544_s4, %s983_s24 }
   0xe   : > { %1040 = vmatprep.subr.bf16.mxu0 %v1143_v1  ;;  %1119 = vmatprep.subr.bf16.mxu1 %v1143_v1  ;;  %v202_v4 = vld [vmem:[%s1208_s27] sm:$0xff]  ;;  %v203_v5 = vld [vmem:[%s1208_s27 + $0x8] sm:$0xff]  ;;  %v204_v21 = vld [vmem:[%s1208_s27 + $0x10] sm:$0xff] }
   0xf   : > { %v273_v7 = vadd.f32 %v1218_v6, %v202_v4  ;;  %v274_v8 = vadd.f32 %v1218_v6, %v203_v5  ;;  %v234_v9 = vld [vmem:[%s1208_s27 + $0x100] sm:$0xff]  ;;  %v235_v10 = vld [vmem:[%s1208_s27 + $0x108] sm:$0xff]  ;;  %v205_v22 = vld [vmem:[%s1208_s27 + $0x18] sm:$0xff]  ;;  %v275_v27 = vadd.f32 %v1218_v6, %v204_v21 }
  0x10   : > { %v305_v11 = vadd.f32 %v1218_v6, %v234_v9  ;;  %v306_v12 = vadd.f32 %v1218_v6, %v235_v10  ;;  %v236_v23 = vld [vmem:[%s1208_s27 + $0x110] sm:$0xff]  ;;  %v237_v24 = vld [vmem:[%s1208_s27 + $0x118] sm:$0xff]  ;;  %v206_v25 = vld [vmem:[%s1208_s27 + $0x20] sm:$0xff]  ;;  %v276_v28 = vadd.f32 %v1218_v6, %v205_v22 }
  0x11   : > { %1041 = vmatpush3.bf16.msra.mxu0 %v1143_v1  ;;  %1127 = vmatpush3.bf16.msra.mxu1 %v1143_v1  ;;  %v337_v13 = vmax.f32 %v273_v7, 0.0  ;;  %v338_v14 = vmax.f32 %v274_v8, 0.0  ;;  %v207_v26 = vld [vmem:[%s1208_s27 + $0x28] sm:$0xff]  ;;  %v238_v29 = vld [vmem:[%s1208_s27 + $0x120] sm:$0xff]  ;;  %v307_v32 = vadd.f32 %v1218_v6, %v236_v23  ;;  %v308_v33 = vadd.f32 %v1218_v6, %v237_v24  ;;  %v208_v43 = vld [vmem:[%s1208_s27 + $0x30] sm:$0xff] }
  0x12   : > { %1042 = vmatprep.subr.bf16.mxu0 %v1144_v2  ;;  %1120 = vmatprep.subr.bf16.mxu1 %v1144_v2  ;;  %v369_v16 = vmax.f32 %v305_v11, 0.0  ;;  %v370_v17 = vmax.f32 %v306_v12, 0.0  ;;  %v239_v30 = vld [vmem:[%s1208_s27 + $0x128] sm:$0xff]  ;;  %v277_v34 = vadd.f32 %v1218_v6, %v206_v25  ;;  %v278_v35 = vadd.f32 %v1218_v6, %v207_v26  ;;  %v1149_v40 = vld [vmem:[%s1541_s1] sm:$0xff]   ;;  %v209_v46 = vld [vmem:[%s1208_s27 + $0x38] sm:$0xff] }
  0x13   : > { %v401_v18 = vpack.c.bf16 %v338_v14, %v337_v13  ;;  %v309_v36 = vadd.f32 %v1218_v6, %v238_v29  ;;  %v310_v37 = vadd.f32 %v1218_v6, %v239_v30  ;;  %v339_v38 = vmax.f32 %v275_v27, 0.0  ;;  %v240_v47 = vld [vmem:[%s1208_s27 + $0x130] sm:$0xff]  ;;  %v241_v50 = vld [vmem:[%s1208_s27 + $0x138] sm:$0xff]  ;;  %v210_v51 = vld [vmem:[%s1208_s27 + $0x40] sm:$0xff] }
  0x14   : > { %v417_v19 = vpack.c.bf16 %v370_v17, %v369_v16  ;;  %v340_v39 = vmax.f32 %v276_v28, 0.0  ;;  %v371_v41 = vmax.f32 %v307_v32, 0.0  ;;  %v372_v42 = vmax.f32 %v308_v33, 0.0  ;;  %v211_v52 = vld [vmem:[%s1208_s27 + $0x48] sm:$0xff]  ;;  %v242_v55 = vld [vmem:[%s1208_s27 + $0x140] sm:$0xff]  ;;  %v212_v57 = vld [vmem:[%s1208_s27 + $0x50] sm:$0xff] }
  0x15   : > { %1043 = vmatpush3.bf16.msra.mxu0 %v1144_v2  ;;  %1128 = vmatpush3.bf16.msra.mxu1 %v1144_v2  ;;  %v341_v44 = vmax.f32 %v277_v34, 0.0  ;;  %v342_v45 = vmax.f32 %v278_v35, 0.0  ;;  %v373_v48 = vmax.f32 %v309_v36, 0.0  ;;  %v374_v49 = vmax.f32 %v310_v37, 0.0  ;;  %v243_v56 = vld [vmem:[%s1208_s27 + $0x148] sm:$0xff]  ;;  %v213_v61 = vld [vmem:[%s1208_s27 + $0x58] sm:$0xff] }
  0x16   : > { %1044 = vmatprep.subr.bf16.mxu0 %v1145_v3  ;;  %1121 = vmatprep.subr.bf16.mxu1 %v1145_v3  ;;  %v402_v53 = vpack.c.bf16 %v340_v39, %v339_v38  ;;  %v279_v54 = vadd.f32 %v1218_v6, %v208_v43  ;;  %v418_v58 = vpack.c.bf16 %v372_v42, %v371_v41  ;;  %v244_v62 = vld [vmem:[%s1208_s27 + $0x150] sm:$0xff]  ;;  %v245_v63 = vld [vmem:[%s1208_s27 + $0x158] sm:$0xff]  ;;  %v214_v4 = vld [vmem:[%s1208_s27 + $0x60] sm:$0xff] }
  0x17   : > { %1054 = vmatprep.mubr.bf16.mxu0 %v401_v18  ;;  %1086 = vmatprep.mubr.bf16.mxu1 %v417_v19  ;;  %v280_v59 = vadd.f32 %v1218_v6, %v209_v46  ;;  %v311_v60 = vadd.f32 %v1218_v6, %v240_v47  ;;  %v403_v0 = vpack.c.bf16 %v342_v45, %v341_v44  ;;  %v215_v5 = vld [vmem:[%s1208_s27 + $0x68] sm:$0xff]  ;;  %v246_v11 = vld [vmem:[%s1208_s27 + $0x160] sm:$0xff]  ;;  %v216_v34 = vld [vmem:[%s1208_s27 + $0x70] sm:$0xff] }
  0x18   : > { %v312_v1 = vadd.f32 %v1218_v6, %v241_v50  ;;  %v281_v2 = vadd.f32 %v1218_v6, %v210_v51  ;;  %v419_v7 = vpack.c.bf16 %v374_v49, %v373_v48  ;;  %v313_v8 = vadd.f32 %v1218_v6, %v242_v55  ;;  %v247_v12 = vld [vmem:[%s1208_s27 + $0x168] sm:$0xff]  ;;  %v217_v35 = vld [vmem:[%s1208_s27 + $0x78] sm:$0xff]  ;;  %v248_v38 = vld [vmem:[%s1208_s27 + $0x170] sm:$0xff] }
  0x19   : > { %1045 = vmatpush3.bf16.msra.mxu0 %v1145_v3  ;;  %1129 = vmatpush3.bf16.msra.mxu1 %v1145_v3  ;;  %v282_v3 = vadd.f32 %v1218_v6, %v211_v52  ;;  %v314_v9 = vadd.f32 %v1218_v6, %v243_v56  ;;  %v283_v10 = vadd.f32 %v1218_v6, %v212_v57  ;;  %v343_v16 = vmax.f32 %v279_v54, 0.0  ;;  %v249_v39 = vld [vmem:[%s1208_s27 + $0x178] sm:$0xff]  ;;  %v219_v45 = vld [vmem:[%s1208_s27 + $0x88] sm:$0xff]  ;;  %v228_v46 = vld [vmem:[%s1208_s27 + $0xd0] sm:$0xff] }
  0x1a   : > { %1046 = vmatprep.subr.bf16.mxu0 %v1146_v15  ;;  %1122 = vmatprep.subr.bf16.mxu1 %v1146_v15  ;;  %v284_v13 = vadd.f32 %v1218_v6, %v213_v61  ;;  %v315_v14 = vadd.f32 %v1218_v6, %v244_v62  ;;  %v344_v17 = vmax.f32 %v280_v59, 0.0  ;;  %v285_v18 = vadd.f32 %v1218_v6, %v214_v4  ;;  %v229_v47 = vld [vmem:[%s1208_s27 + $0xd8] sm:$0xff]  ;;  %v250_v52 = vld [vmem:[%s1208_s27 + $0x180] sm:$0xff] }
  0x1b   : > { %v286_v19 = vadd.f32 %v1218_v6, %v215_v5  ;;  %v376_v21 = vmax.f32 %v312_v1, 0.0  ;;  %v317_v22 = vadd.f32 %v1218_v6, %v246_v11  ;;  %v318_v23 = vadd.f32 %v1218_v6, %v247_v12  ;;  %v261_v54 = vld [vmem:[%s1208_s27 + $0x1d8] sm:$0xff]  ;;  %v230_v59 = vld [vmem:[%s1208_s27 + $0xe0] sm:$0xff]  ;;  %v232_v12 = vld [vmem:[%s1208_s27 + $0xf0] sm:$0xff] }
  0x1c   : > { %v345_v24 = vmax.f32 %v281_v2, 0.0  ;;  %v346_v25 = vmax.f32 %v282_v3, 0.0  ;;  %v377_v26 = vmax.f32 %v313_v8, 0.0  ;;  %v378_v27 = vmax.f32 %v314_v9, 0.0  ;;  %v262_v2 = vld [vmem:[%s1208_s27 + $0x1e0] sm:$0xff] }
  0x1d   : > { %1047 = vmatpush3.bf16.msra.mxu0 %v1146_v15  ;;  %1130 = vmatpush3.bf16.msra.mxu1 %v1146_v15  ;;  %v316_v15 = vadd.f32 %v1218_v6, %v245_v63  ;;  %v347_v28 = vmax.f32 %v283_v10, 0.0  ;;  %v348_v29 = vmax.f32 %v284_v13, 0.0  ;;  %v379_v30 = vmax.f32 %v315_v14, 0.0  ;;  %v251_v63 = vld [vmem:[%s1208_s27 + $0x188] sm:$0xff]  ;;  %v233_v13 = vld [vmem:[%s1208_s27 + $0xf8] sm:$0xff] }
  0x1e   : > { %1048 = vmatprep.subr.bf16.mxu0 %v1147_v20  ;;  %1123 = vmatprep.subr.bf16.mxu1 %v1147_v20  ;;  %v349_v32 = vmax.f32 %v285_v18, 0.0  ;;  %v350_v33 = vmax.f32 %v286_v19, 0.0  ;;  %v381_v36 = vmax.f32 %v317_v22, 0.0  ;;  %v382_v37 = vmax.f32 %v318_v23, 0.0  ;;  %v264_v18 = vld [vmem:[%s1208_s27 + $0x1f0] sm:$0xff]  ;;  %v265_v19 = vld [vmem:[%s1208_s27 + $0x1f8] sm:$0xff] }
  0x1f   : > { %v404_v41 = vpack.c.bf16 %v344_v17, %v343_v16  ;;  %v405_v43 = vpack.c.bf16 %v346_v25, %v345_v24  ;;  %v421_v44 = vpack.c.bf16 %v378_v27, %v377_v26  ;;  %v406_v48 = vpack.c.bf16 %v348_v29, %v347_v28 }
  0x20   : > { %v1295_v50 = vadd.f32 %v1218_v6, %v216_v34  ;;  %v1298_v51 = vadd.f32 %v1218_v6, %v217_v35  ;;  %v407_v55 = vpack.c.bf16 %v350_v33, %v349_v32  ;;  %v1304_v56 = vadd.f32 %v1218_v6, %v248_v38 }
  0x21   : > { %1049 = vmatpush3.bf16.msra.mxu0 %v1147_v20  ;;  %1131 = vmatpush3.bf16.msra.mxu1 %v1147_v20  ;;  %v375_v20 = vmax.f32 %v311_v60, 0.0  ;;  %v1307_v57 = vadd.f32 %v1218_v6, %v249_v39  ;;  %v231_v60 = vld [vmem:[%s1208_s27 + $0xe8] sm:$0xff]  ;;  %v423_v61 = vpack.c.bf16 %v382_v37, %v381_v36  ;;  %v1315_v62 = vadd.f32 %v1218_v6, %v219_v45  ;;  %v220_v36 = vld [vmem:[%s1208_s27 + $0x90] sm:$0xff]  ;;  %v253_v45 = vld [vmem:[%s1208_s27 + $0x198] sm:$0xff] }
  0x22   : > { %1050 = vmatprep.subr.bf16.mxu0 %v1148_v31  ;;  %1124 = vmatprep.subr.bf16.mxu1 %v1148_v31  ;;  %v300_v1 = vadd.f32 %v1218_v6, %v229_v47  ;;  %v1322_v3 = vadd.f32 %v1218_v6, %v250_v52  ;;  %v332_v5 = vadd.f32 %v1218_v6, %v261_v54  ;;  %v351_v32 = vmax.f32 %v1295_v50, 0.0  ;;  %v222_v50 = vld [vmem:[%s1208_s27 + $0xa0] sm:$0xff]  ;;  %v255_v54 = vld [vmem:[%s1208_s27 + $0x1a8] sm:$0xff] }
  0x23   : > { %v420_v42 = vpack.c.bf16 %v376_v21, %v375_v20  ;;  %v301_v10 = vadd.f32 %v1218_v6, %v230_v59  ;;  %v302_v11 = vadd.f32 %v1218_v6, %v231_v60  ;;  %v322_v14 = vadd.f32 %v1218_v6, %v251_v63 }
  0x24   : > { %v364_v9 = vmax.f32 %v300_v1, 0.0  ;;  %v396_v16 = vmax.f32 %v332_v5, 0.0  ;;  %v333_v17 = vadd.f32 %v1218_v6, %v262_v2  ;;  %v303_v26 = vadd.f32 %v1218_v6, %v232_v12 }
  0x25   : > { %1051 = vmatpush3.bf16.msra.mxu0 %v1148_v31  ;;  %1132 = vmatpush3.bf16.msra.mxu1 %v1148_v31  ;;  %v380_v31 = vmax.f32 %v316_v15, 0.0  ;;  %v365_v21 = vmax.f32 %v301_v10, 0.0  ;;  %v366_v22 = vmax.f32 %v302_v11, 0.0  ;;  %v304_v27 = vadd.f32 %v1218_v6, %v233_v13  ;;  %v224_v10 = vld [vmem:[%s1208_s27 + $0xb0] sm:$0xff]  ;;  %v225_v11 = vld [vmem:[%s1208_s27 + $0xb8] sm:$0xff] }
  0x26   : > { %1052 = vmatprep.subr.bf16.mxu0 %v1149_v40  ;;  %1125 = vmatprep.subr.bf16.mxu1 %v1149_v40  ;;  %v397_v25 = vmax.f32 %v333_v17, 0.0  ;;  %v367_v33 = vmax.f32 %v303_v26, 0.0  ;;  %v352_v35 = vmax.f32 %v1298_v51, 0.0  ;;  %v354_v47 = vmax.f32 %v1315_v62, 0.0  ;;  %v223_v51 = vld [vmem:[%s1208_s27 + $0xa8] sm:$0xff] }
  0x27   : > { %v422_v49 = vpack.c.bf16 %v380_v31, %v379_v30  ;;  %v1342_v28 = vpack.c.bf16 %v366_v22, %v365_v21  ;;  %v335_v30 = vadd.f32 %v1218_v6, %v264_v18  ;;  %v336_v31 = vadd.f32 %v1218_v6, %v265_v19  ;;  %v227_v17 = vld [vmem:[%s1208_s27 + $0xc8] sm:$0xff]  ;;  %v258_v18 = vld [vmem:[%s1208_s27 + $0x1c0] sm:$0xff] }
  0x28   : > { %v368_v34 = vmax.f32 %v304_v27, 0.0  ;;  %v408_v59 = vpack.c.bf16 %v352_v35, %v351_v32  ;;  %v294_v62 = vadd.f32 %v1218_v6, %v223_v51  ;;  %v326_v2 = vadd.f32 %v1218_v6, %v255_v54  ;;  %v259_v19 = vld [vmem:[%s1208_s27 + $0x1c8] sm:$0xff] }
  0x29   : > { %1053 = vmatpush3.bf16.msra.mxu0 %v1149_v40  ;;  %1133 = vmatpush3.bf16.msra.mxu1 %v1149_v40  ;;  %v218_v40 = vld [vmem:[%s1208_s27 + $0x80] sm:$0xff]  ;;  %v399_v38 = vmax.f32 %v335_v30, 0.0  ;;  %v400_v39 = vmax.f32 %v336_v31, 0.0  ;;  %v298_v32 = vadd.f32 %v1218_v6, %v227_v17 }
  0x2a   : > { %v390_v13 = vmax.f32 %v326_v2, 0.0 }
  0x2b   : > { %v1363_v52 = vpack.c.bf16 %v400_v39, %v399_v38 }
  0x2c   : > { %1055 = vmatmul.mubr.bf16.vlgmr.msra.gmra.mxu0 %v402_v53  ;;  %1087 = vmatmul.mubr.bf16.vlgmr.msra.gmra.mxu1 %v418_v58  ;;  %v260_v53 = vld [vmem:[%s1208_s27 + $0x1d0] sm:$0xff]  ;;  %v1310_v58 = vadd.f32 %v1218_v6, %v218_v40  ;;  %v383_v40 = vmax.f32 %v1304_v56, 0.0  ;;  %v291_v56 = vadd.f32 %v1218_v6, %v220_v36 }
  0x2d   : > { %1058 = vmatprep.mubr.bf16.mxu0 %v403_v0  ;;  %1090 = vmatprep.mubr.bf16.mxu1 %v419_v7  ;;  %v299_v0 = vadd.f32 %v1218_v6, %v228_v46  ;;  %v331_v4 = vadd.f32 %v1218_v6, %v260_v53  ;;  %v263_v7 = vld [vmem:[%s1208_s27 + $0x1e8] sm:$0xff]  ;;  %v1357_v46 = vpack.c.bf16 %v368_v34, %v367_v33  ;;  %v254_v53 = vld [vmem:[%s1208_s27 + $0x1a0] sm:$0xff] }
  0x2e   : > { %v334_v23 = vadd.f32 %v1218_v6, %v263_v7  ;;  %v325_v1 = vadd.f32 %v1218_v6, %v254_v53  ;;  %v329_v33 = vadd.f32 %v1218_v6, %v258_v18  ;;  %v330_v34 = vadd.f32 %v1218_v6, %v259_v19 }
  0x2f   : > { %v363_v8 = vmax.f32 %v299_v0, 0.0  ;;  %v395_v15 = vmax.f32 %v331_v4, 0.0 }
  0x30   : > { %v398_v29 = vmax.f32 %v334_v23, 0.0  ;;  %v389_v12 = vmax.f32 %v325_v1, 0.0  ;;  %v295_v23 = vadd.f32 %v1218_v6, %v224_v10 }
  0x31   : > { %v1335_v20 = vpack.c.bf16 %v364_v9, %v363_v8  ;;  %v1338_v24 = vpack.c.bf16 %v396_v16, %v395_v15  ;;  %v358_v9 = vmax.f32 %v294_v62, 0.0  ;;  %v257_v15 = vld [vmem:[%s1208_s27 + $0x1b8] sm:$0xff]  ;;  %v226_v16 = vld [vmem:[%s1208_s27 + $0xc0] sm:$0xff] }
  0x32   : > { %v1349_v37 = vpack.c.bf16 %v398_v29, %v397_v25  ;;  %v296_v25 = vadd.f32 %v1218_v6, %v225_v11  ;;  %v328_v29 = vadd.f32 %v1218_v6, %v257_v15  ;;  %v297_v30 = vadd.f32 %v1218_v6, %v226_v16 }
  0x33   : > { %v427_v31 = vpack.c.bf16 %v390_v13, %v389_v12  ;;  %v359_v35 = vmax.f32 %v295_v23, 0.0 }
  0x34   : > { %1059 = vmatmul.mubr.bf16.gmra.mxu0 %v404_v41  ;;  %1091 = vmatmul.mubr.bf16.gmra.mxu1 %v420_v42  ;;  %v384_v41 = vmax.f32 %v1307_v57, 0.0  ;;  %v353_v42 = vmax.f32 %v1310_v58, 0.0  ;;  %v360_v36 = vmax.f32 %v296_v25, 0.0  ;;  %v392_v39 = vmax.f32 %v328_v29, 0.0 }
  0x35   : > { %1062 = vmatprep.mubr.bf16.mxu0 %v405_v43  ;;  %1094 = vmatprep.mubr.bf16.mxu1 %v421_v44  ;;  %v221_v43 = vld [vmem:[%s1208_s27 + $0x98] sm:$0xff]  ;;  %v252_v44 = vld [vmem:[%s1208_s27 + $0x190] sm:$0xff] }
  0x36   : > { %v292_v57 = vadd.f32 %v1218_v6, %v221_v43  ;;  %v323_v58 = vadd.f32 %v1218_v6, %v252_v44  ;;  %v424_v60 = vpack.c.bf16 %v384_v41, %v383_v40  ;;  %v409_v63 = vpack.c.bf16 %v354_v47, %v353_v42 }
  0x37   : > { %v361_v40 = vmax.f32 %v297_v30, 0.0  ;;  %v362_v41 = vmax.f32 %v298_v32, 0.0  ;;  %v393_v42 = vmax.f32 %v329_v33, 0.0  ;;  %v394_v43 = vmax.f32 %v330_v34, 0.0 }
  0x38   : > { %v356_v4 = vmax.f32 %v292_v57, 0.0  ;;  %v387_v5 = vmax.f32 %v323_v58, 0.0  ;;  %v412_v44 = vpack.c.bf16 %v360_v36, %v359_v35 }
  0x39   : > { %v413_v47 = vpack.c.bf16 %v362_v41, %v361_v40 }
  0x3c   : > { %1063 = vmatmul.mubr.bf16.gmra.mxu0 %v406_v48  ;;  %1095 = vmatmul.mubr.bf16.gmra.mxu1 %v422_v49  ;;  %v385_v48 = vmax.f32 %v1322_v3, 0.0  ;;  %v386_v49 = vmax.f32 %v322_v14, 0.0  ;;  %v355_v3 = vmax.f32 %v291_v56, 0.0  ;;  %v256_v14 = vld [vmem:[%s1208_s27 + $0x1b0] sm:$0xff] }
  0x3d   : > { %1066 = vmatprep.mubr.bf16.mxu0 %v407_v55  ;;  %1098 = vmatprep.mubr.bf16.mxu1 %v423_v61  ;;  %v324_v55 = vadd.f32 %v1218_v6, %v253_v45  ;;  %v293_v61 = vadd.f32 %v1218_v6, %v222_v50  ;;  %v327_v27 = vadd.f32 %v1218_v6, %v256_v14  ;;  %v1400_v6 = vld [vmem:[%s1543_s3] ss:$0 sm:$0xff] }
  0x3e   : > { %v425_v0 = vpack.c.bf16 %v386_v49, %v385_v48  ;;  %v410_v21 = vpack.c.bf16 %v356_v4, %v355_v3  ;;  %v429_v48 = vpack.c.bf16 %v394_v43, %v393_v42 }
  0x3f   : > { %v388_v7 = vmax.f32 %v324_v55, 0.0  ;;  %v357_v8 = vmax.f32 %v293_v61, 0.0  ;;  %v391_v38 = vmax.f32 %v327_v27, 0.0 }
  0x41   : > { %v426_v22 = vpack.c.bf16 %v388_v7, %v387_v5  ;;  %v411_v26 = vpack.c.bf16 %v358_v9, %v357_v8  ;;  %v428_v45 = vpack.c.bf16 %v392_v39, %v391_v38 }
  0x44   : > { %1067 = vmatmul.mubr.bf16.gmra.mxu0 %v408_v59  ;;  %1099 = vmatmul.mubr.bf16.gmra.mxu1 %v424_v60 }
  0x45   : > { %1070 = vmatprep.mubr.bf16.mxu0 %v409_v63  ;;  %1102 = vmatprep.mubr.bf16.mxu1 %v425_v0 }
  0x4c   : > { %1071 = vmatmul.mubr.bf16.gmra.mxu0 %v410_v21  ;;  %1103 = vmatmul.mubr.bf16.gmra.mxu1 %v426_v22 }
  0x4d   : > { %1074 = vmatprep.mubr.bf16.mxu0 %v411_v26  ;;  %1106 = vmatprep.mubr.bf16.mxu1 %v427_v31 }
  0x54   : > { %1075 = vmatmul.mubr.bf16.gmra.mxu0 %v412_v44  ;;  %1107 = vmatmul.mubr.bf16.gmra.mxu1 %v428_v45 }
  0x55   : > { %1078 = vmatprep.mubr.bf16.mxu0 %v413_v47  ;;  %1110 = vmatprep.mubr.bf16.mxu1 %v429_v48 }
  0x5c   : > { %1079 = vmatmul.mubr.bf16.gmra.mxu0 %v1335_v20  ;;  %1111 = vmatmul.mubr.bf16.gmra.mxu1 %v1338_v24 }
  0x5d   : > { %1082 = vmatprep.mubr.bf16.mxu0 %v1342_v28  ;;  %1114 = vmatprep.mubr.bf16.mxu1 %v1349_v37 }
  0x64   : > { %1083 = vmatmul.mubr.bf16.gmra.mxu0 %v1357_v46  ;;  %1115 = vmatmul.mubr.bf16.gmra.mxu1 %v1363_v52 }
  0xec   : > { %v1056_v49 = vpop.f32.mrf.mxu0  ;;  %v1088_v50 = vpop.f32.mrf.mxu1 }
  0xed   : > { %v547_v51 = vadd.f32 %v1056_v49, %v1400_v6  ;;  %v675_v20 = vadd.f32 %v1088_v50, %v1400_v6 }
  0xee   : > { %v538_v24 = vpop.f32.mrf.mxu0  ;;  %v666_v28 = vpop.f32.mrf.mxu1 }
  0xef   : > { %v795_v37 = vmax.f32 %v547_v51, 0.0  ;;  %v827_v46 = vmax.f32 %v675_v20, 0.0  ;;  %v539_v52 = vadd.f32 %v1400_v6, %v538_v24  ;;  %v667_v53 = vadd.f32 %v1400_v6, %v666_v28 }
  0xf0   : > { %v1057_v54 = vpop.f32.mrf.mxu0  ;;  %v1089_v56 = vpop.f32.mrf.mxu1 }
  0xf1   : > { %859 = vst [vmem:[%s1409_s20 + $0x10] sm:$0xff] %v795_v37  ;;  %891 = vst [vmem:[%s1409_s20 + $0x110] sm:$0xff] %v827_v46  ;;  %v793_v57 = vmax.f32 %v539_v52, 0.0  ;;  %v825_v58 = vmax.f32 %v667_v53, 0.0  ;;  %v550_v55 = vadd.f32 %v1057_v54, %v1400_v6  ;;  %v678_v59 = vadd.f32 %v1089_v56, %v1400_v6 }
  0xf2   : > { %v541_v60 = vpop.f32.mrf.mxu0  ;;  %v669_v61 = vpop.f32.mrf.mxu1 }
  0xf3   : > { %857 = vst [vmem:[%s1409_s20] sm:$0xff] %v793_v57  ;;  %889 = vst [vmem:[%s1409_s20 + $0x100] sm:$0xff] %v825_v58  ;;  %v796_v62 = vmax.f32 %v550_v55, 0.0  ;;  %v828_v63 = vmax.f32 %v678_v59, 0.0  ;;  %v542_v0 = vadd.f32 %v1400_v6, %v541_v60  ;;  %v670_v1 = vadd.f32 %v1400_v6, %v669_v61 }
  0xf4   : > { %v1060_v2 = vpop.f32.mrf.mxu0  ;;  %v1092_v3 = vpop.f32.mrf.mxu1 }
  0xf5   : > { %860 = vst [vmem:[%s1409_s20 + $0x18] sm:$0xff] %v796_v62  ;;  %892 = vst [vmem:[%s1409_s20 + $0x118] sm:$0xff] %v828_v63  ;;  %v794_v4 = vmax.f32 %v542_v0, 0.0  ;;  %v826_v5 = vmax.f32 %v670_v1, 0.0  ;;  %v563_v7 = vadd.f32 %v1060_v2, %v1400_v6  ;;  %v691_v8 = vadd.f32 %v1092_v3, %v1400_v6 }
  0xf6   : > { %v554_v9 = vpop.f32.mrf.mxu0  ;;  %v682_v10 = vpop.f32.mrf.mxu1 }
  0xf7   : > { %858 = vst [vmem:[%s1409_s20 + $0x8] sm:$0xff] %v794_v4  ;;  %890 = vst [vmem:[%s1409_s20 + $0x108] sm:$0xff] %v826_v5  ;;  %v799_v11 = vmax.f32 %v563_v7, 0.0  ;;  %v831_v12 = vmax.f32 %v691_v8, 0.0  ;;  %v555_v13 = vadd.f32 %v1400_v6, %v554_v9  ;;  %v683_v14 = vadd.f32 %v1400_v6, %v682_v10 }
  0xf8   : > { %v1061_v15 = vpop.f32.mrf.mxu0  ;;  %v1093_v16 = vpop.f32.mrf.mxu1 }
  0xf9   : > { %863 = vst [vmem:[%s1409_s20 + $0x30] sm:$0xff] %v799_v11  ;;  %895 = vst [vmem:[%s1409_s20 + $0x130] sm:$0xff] %v831_v12  ;;  %v797_v17 = vmax.f32 %v555_v13, 0.0  ;;  %v829_v18 = vmax.f32 %v683_v14, 0.0  ;;  %v566_v19 = vadd.f32 %v1061_v15, %v1400_v6  ;;  %v694_v21 = vadd.f32 %v1093_v16, %v1400_v6 }
  0xfa   : > { %v557_v22 = vpop.f32.mrf.mxu0  ;;  %v685_v23 = vpop.f32.mrf.mxu1 }
  0xfb   : > { %861 = vst [vmem:[%s1409_s20 + $0x20] sm:$0xff] %v797_v17  ;;  %893 = vst [vmem:[%s1409_s20 + $0x120] sm:$0xff] %v829_v18  ;;  %v800_v25 = vmax.f32 %v566_v19, 0.0  ;;  %v832_v26 = vmax.f32 %v694_v21, 0.0  ;;  %v558_v27 = vadd.f32 %v1400_v6, %v557_v22  ;;  %v686_v29 = vadd.f32 %v1400_v6, %v685_v23 }
  0xfc   : > { %v1064_v30 = vpop.f32.mrf.mxu0  ;;  %v1096_v31 = vpop.f32.mrf.mxu1 }
  0xfd   : > { %864 = vst [vmem:[%s1409_s20 + $0x38] sm:$0xff] %v800_v25  ;;  %896 = vst [vmem:[%s1409_s20 + $0x138] sm:$0xff] %v832_v26  ;;  %v798_v32 = vmax.f32 %v558_v27, 0.0  ;;  %v830_v33 = vmax.f32 %v686_v29, 0.0  ;;  %v579_v34 = vadd.f32 %v1064_v30, %v1400_v6  ;;  %v707_v35 = vadd.f32 %v1096_v31, %v1400_v6 }
  0xfe   : > { %v570_v36 = vpop.f32.mrf.mxu0  ;;  %v698_v38 = vpop.f32.mrf.mxu1 }
  0xff   : > { %862 = vst [vmem:[%s1409_s20 + $0x28] sm:$0xff] %v798_v32  ;;  %894 = vst [vmem:[%s1409_s20 + $0x128] sm:$0xff] %v830_v33  ;;  %v803_v39 = vmax.f32 %v579_v34, 0.0  ;;  %v835_v40 = vmax.f32 %v707_v35, 0.0  ;;  %v571_v41 = vadd.f32 %v1400_v6, %v570_v36  ;;  %v699_v42 = vadd.f32 %v1400_v6, %v698_v38 }
 0x100   : > { %v1065_v43 = vpop.f32.mrf.mxu0  ;;  %v1097_v44 = vpop.f32.mrf.mxu1 }
 0x101   : > { %867 = vst [vmem:[%s1409_s20 + $0x50] sm:$0xff] %v803_v39  ;;  %899 = vst [vmem:[%s1409_s20 + $0x150] sm:$0xff] %v835_v40  ;;  %v801_v45 = vmax.f32 %v571_v41, 0.0  ;;  %v833_v47 = vmax.f32 %v699_v42, 0.0  ;;  %v582_v48 = vadd.f32 %v1065_v43, %v1400_v6  ;;  %v710_v49 = vadd.f32 %v1097_v44, %v1400_v6 }
 0x102   : > { %v573_v50 = vpop.f32.mrf.mxu0  ;;  %v701_v51 = vpop.f32.mrf.mxu1 }
 0x103   : > { %865 = vst [vmem:[%s1409_s20 + $0x40] sm:$0xff] %v801_v45  ;;  %897 = vst [vmem:[%s1409_s20 + $0x140] sm:$0xff] %v833_v47  ;;  %v804_v20 = vmax.f32 %v582_v48, 0.0  ;;  %v836_v24 = vmax.f32 %v710_v49, 0.0  ;;  %v574_v28 = vadd.f32 %v1400_v6, %v573_v50  ;;  %v702_v37 = vadd.f32 %v1400_v6, %v701_v51 }
 0x104   : > { %v1068_v46 = vpop.f32.mrf.mxu0  ;;  %v1100_v52 = vpop.f32.mrf.mxu1 }
 0x105   : > { %868 = vst [vmem:[%s1409_s20 + $0x58] sm:$0xff] %v804_v20  ;;  %900 = vst [vmem:[%s1409_s20 + $0x158] sm:$0xff] %v836_v24  ;;  %v802_v53 = vmax.f32 %v574_v28, 0.0  ;;  %v834_v54 = vmax.f32 %v702_v37, 0.0  ;;  %v595_v56 = vadd.f32 %v1068_v46, %v1400_v6  ;;  %v723_v57 = vadd.f32 %v1100_v52, %v1400_v6 }
 0x106   : > { %v586_v58 = vpop.f32.mrf.mxu0  ;;  %v714_v55 = vpop.f32.mrf.mxu1 }
 0x107   : > { %866 = vst [vmem:[%s1409_s20 + $0x48] sm:$0xff] %v802_v53  ;;  %898 = vst [vmem:[%s1409_s20 + $0x148] sm:$0xff] %v834_v54  ;;  %v807_v59 = vmax.f32 %v595_v56, 0.0  ;;  %v839_v60 = vmax.f32 %v723_v57, 0.0  ;;  %v587_v61 = vadd.f32 %v1400_v6, %v586_v58  ;;  %v715_v62 = vadd.f32 %v1400_v6, %v714_v55 }
 0x108   : > { %v1069_v63 = vpop.f32.mrf.mxu0  ;;  %v1101_v0 = vpop.f32.mrf.mxu1 }
 0x109   : > { %871 = vst [vmem:[%s1409_s20 + $0x70] sm:$0xff] %v807_v59  ;;  %903 = vst [vmem:[%s1409_s20 + $0x170] sm:$0xff] %v839_v60  ;;  %v805_v1 = vmax.f32 %v587_v61, 0.0  ;;  %v837_v2 = vmax.f32 %v715_v62, 0.0  ;;  %v598_v3 = vadd.f32 %v1069_v63, %v1400_v6  ;;  %v726_v4 = vadd.f32 %v1101_v0, %v1400_v6 }
 0x10a   : > { %v589_v5 = vpop.f32.mrf.mxu0  ;;  %v717_v7 = vpop.f32.mrf.mxu1 }
 0x10b   : > { %869 = vst [vmem:[%s1409_s20 + $0x60] sm:$0xff] %v805_v1  ;;  %901 = vst [vmem:[%s1409_s20 + $0x160] sm:$0xff] %v837_v2  ;;  %v808_v8 = vmax.f32 %v598_v3, 0.0  ;;  %v840_v9 = vmax.f32 %v726_v4, 0.0  ;;  %v590_v10 = vadd.f32 %v1400_v6, %v589_v5  ;;  %v718_v11 = vadd.f32 %v1400_v6, %v717_v7 }
 0x10c   : > { %v1072_v12 = vpop.f32.mrf.mxu0  ;;  %v1104_v13 = vpop.f32.mrf.mxu1 }
 0x10d   : > { %872 = vst [vmem:[%s1409_s20 + $0x78] sm:$0xff] %v808_v8  ;;  %904 = vst [vmem:[%s1409_s20 + $0x178] sm:$0xff] %v840_v9  ;;  %v806_v14 = vmax.f32 %v590_v10, 0.0  ;;  %v838_v15 = vmax.f32 %v718_v11, 0.0  ;;  %v611_v16 = vadd.f32 %v1072_v12, %v1400_v6  ;;  %v739_v17 = vadd.f32 %v1104_v13, %v1400_v6 }
 0x10e   : > { %v602_v18 = vpop.f32.mrf.mxu0  ;;  %v730_v19 = vpop.f32.mrf.mxu1 }
 0x10f   : > { %870 = vst [vmem:[%s1409_s20 + $0x68] sm:$0xff] %v806_v14  ;;  %902 = vst [vmem:[%s1409_s20 + $0x168] sm:$0xff] %v838_v15  ;;  %v811_v21 = vmax.f32 %v611_v16, 0.0  ;;  %v843_v22 = vmax.f32 %v739_v17, 0.0  ;;  %v603_v23 = vadd.f32 %v1400_v6, %v602_v18  ;;  %v731_v25 = vadd.f32 %v1400_v6, %v730_v19 }
 0x110   : > { %v1073_v26 = vpop.f32.mrf.mxu0  ;;  %v1105_v27 = vpop.f32.mrf.mxu1 }
 0x111   : > { %875 = vst [vmem:[%s1409_s20 + $0x90] sm:$0xff] %v811_v21  ;;  %907 = vst [vmem:[%s1409_s20 + $0x190] sm:$0xff] %v843_v22  ;;  %v809_v29 = vmax.f32 %v603_v23, 0.0  ;;  %v841_v30 = vmax.f32 %v731_v25, 0.0  ;;  %v614_v31 = vadd.f32 %v1073_v26, %v1400_v6  ;;  %v742_v32 = vadd.f32 %v1105_v27, %v1400_v6 }
 0x112   : > { %v605_v33 = vpop.f32.mrf.mxu0  ;;  %v733_v34 = vpop.f32.mrf.mxu1 }
 0x113   : > { %873 = vst [vmem:[%s1409_s20 + $0x80] sm:$0xff] %v809_v29  ;;  %905 = vst [vmem:[%s1409_s20 + $0x180] sm:$0xff] %v841_v30  ;;  %v812_v35 = vmax.f32 %v614_v31, 0.0  ;;  %v844_v36 = vmax.f32 %v742_v32, 0.0  ;;  %v606_v38 = vadd.f32 %v1400_v6, %v605_v33  ;;  %v734_v39 = vadd.f32 %v1400_v6, %v733_v34 }
 0x114   : > { %v1076_v40 = vpop.f32.mrf.mxu0  ;;  %v1108_v41 = vpop.f32.mrf.mxu1 }
 0x115   : > { %876 = vst [vmem:[%s1409_s20 + $0x98] sm:$0xff] %v812_v35  ;;  %908 = vst [vmem:[%s1409_s20 + $0x198] sm:$0xff] %v844_v36  ;;  %v810_v42 = vmax.f32 %v606_v38, 0.0  ;;  %v842_v43 = vmax.f32 %v734_v39, 0.0  ;;  %v627_v44 = vadd.f32 %v1076_v40, %v1400_v6  ;;  %v755_v45 = vadd.f32 %v1108_v41, %v1400_v6 }
 0x116   : > { %v618_v47 = vpop.f32.mrf.mxu0  ;;  %v746_v48 = vpop.f32.mrf.mxu1 }
 0x117   : > { %874 = vst [vmem:[%s1409_s20 + $0x88] sm:$0xff] %v810_v42  ;;  %906 = vst [vmem:[%s1409_s20 + $0x188] sm:$0xff] %v842_v43  ;;  %v815_v49 = vmax.f32 %v627_v44, 0.0  ;;  %v847_v50 = vmax.f32 %v755_v45, 0.0  ;;  %v619_v51 = vadd.f32 %v1400_v6, %v618_v47  ;;  %v747_v20 = vadd.f32 %v1400_v6, %v746_v48 }
 0x118   : > { %v1077_v24 = vpop.f32.mrf.mxu0  ;;  %v1109_v28 = vpop.f32.mrf.mxu1 }
 0x119   : > { %879 = vst [vmem:[%s1409_s20 + $0xb0] sm:$0xff] %v815_v49  ;;  %911 = vst [vmem:[%s1409_s20 + $0x1b0] sm:$0xff] %v847_v50  ;;  %v813_v37 = vmax.f32 %v619_v51, 0.0  ;;  %v845_v46 = vmax.f32 %v747_v20, 0.0  ;;  %v630_v52 = vadd.f32 %v1077_v24, %v1400_v6  ;;  %v758_v53 = vadd.f32 %v1109_v28, %v1400_v6 }
 0x11a   : > { %v621_v54 = vpop.f32.mrf.mxu0  ;;  %v749_v56 = vpop.f32.mrf.mxu1 }
 0x11b   : > { %877 = vst [vmem:[%s1409_s20 + $0xa0] sm:$0xff] %v813_v37  ;;  %909 = vst [vmem:[%s1409_s20 + $0x1a0] sm:$0xff] %v845_v46  ;;  %v816_v57 = vmax.f32 %v630_v52, 0.0  ;;  %v848_v58 = vmax.f32 %v758_v53, 0.0  ;;  %v622_v55 = vadd.f32 %v1400_v6, %v621_v54  ;;  %v750_v59 = vadd.f32 %v1400_v6, %v749_v56 }
 0x11c   : > { %v1080_v60 = vpop.f32.mrf.mxu0  ;;  %v1112_v61 = vpop.f32.mrf.mxu1 }
 0x11d   : > { %880 = vst [vmem:[%s1409_s20 + $0xb8] sm:$0xff] %v816_v57  ;;  %912 = vst [vmem:[%s1409_s20 + $0x1b8] sm:$0xff] %v848_v58  ;;  %v814_v62 = vmax.f32 %v622_v55, 0.0  ;;  %v846_v63 = vmax.f32 %v750_v59, 0.0  ;;  %v643_v0 = vadd.f32 %v1080_v60, %v1400_v6  ;;  %v771_v1 = vadd.f32 %v1112_v61, %v1400_v6 }
 0x11e   : > { %v634_v2 = vpop.f32.mrf.mxu0  ;;  %v762_v3 = vpop.f32.mrf.mxu1 }
 0x11f   : > { %878 = vst [vmem:[%s1409_s20 + $0xa8] sm:$0xff] %v814_v62  ;;  %910 = vst [vmem:[%s1409_s20 + $0x1a8] sm:$0xff] %v846_v63  ;;  %v819_v4 = vmax.f32 %v643_v0, 0.0  ;;  %v851_v5 = vmax.f32 %v771_v1, 0.0  ;;  %v635_v7 = vadd.f32 %v1400_v6, %v634_v2  ;;  %v763_v8 = vadd.f32 %v1400_v6, %v762_v3 }
 0x120   : > { %v1081_v9 = vpop.f32.mrf.mxu0  ;;  %v1113_v10 = vpop.f32.mrf.mxu1 }
 0x121   : > { %883 = vst [vmem:[%s1409_s20 + $0xd0] sm:$0xff] %v819_v4  ;;  %915 = vst [vmem:[%s1409_s20 + $0x1d0] sm:$0xff] %v851_v5  ;;  %v817_v11 = vmax.f32 %v635_v7, 0.0  ;;  %v849_v12 = vmax.f32 %v763_v8, 0.0  ;;  %v646_v13 = vadd.f32 %v1081_v9, %v1400_v6  ;;  %v774_v14 = vadd.f32 %v1113_v10, %v1400_v6 }
 0x122   : > { %v637_v15 = vpop.f32.mrf.mxu0  ;;  %v765_v16 = vpop.f32.mrf.mxu1 }
 0x123   : > { %881 = vst [vmem:[%s1409_s20 + $0xc0] sm:$0xff] %v817_v11  ;;  %913 = vst [vmem:[%s1409_s20 + $0x1c0] sm:$0xff] %v849_v12  ;;  %v820_v17 = vmax.f32 %v646_v13, 0.0  ;;  %v852_v18 = vmax.f32 %v774_v14, 0.0  ;;  %v638_v19 = vadd.f32 %v1400_v6, %v637_v15  ;;  %v766_v21 = vadd.f32 %v1400_v6, %v765_v16 }
 0x124   : > { %v1084_v22 = vpop.f32.mrf.mxu0  ;;  %v1116_v23 = vpop.f32.mrf.mxu1 }
 0x125   : > { %884 = vst [vmem:[%s1409_s20 + $0xd8] sm:$0xff] %v820_v17  ;;  %916 = vst [vmem:[%s1409_s20 + $0x1d8] sm:$0xff] %v852_v18  ;;  %v818_v25 = vmax.f32 %v638_v19, 0.0  ;;  %v850_v26 = vmax.f32 %v766_v21, 0.0  ;;  %v659_v27 = vadd.f32 %v1084_v22, %v1400_v6  ;;  %v787_v29 = vadd.f32 %v1116_v23, %v1400_v6 }
 0x126   : > { %v650_v30 = vpop.f32.mrf.mxu0  ;;  %v778_v31 = vpop.f32.mrf.mxu1 }
 0x127   : > { %882 = vst [vmem:[%s1409_s20 + $0xc8] sm:$0xff] %v818_v25  ;;  %914 = vst [vmem:[%s1409_s20 + $0x1c8] sm:$0xff] %v850_v26  ;;  %v823_v32 = vmax.f32 %v659_v27, 0.0  ;;  %v855_v33 = vmax.f32 %v787_v29, 0.0  ;;  %v651_v34 = vadd.f32 %v1400_v6, %v650_v30  ;;  %v779_v35 = vadd.f32 %v1400_v6, %v778_v31 }
 0x128   : > { %v1085_v36 = vpop.f32.mrf.mxu0  ;;  %v1117_v38 = vpop.f32.mrf.mxu1 }
 0x129   : > { %887 = vst [vmem:[%s1409_s20 + $0xf0] sm:$0xff] %v823_v32  ;;  %919 = vst [vmem:[%s1409_s20 + $0x1f0] sm:$0xff] %v855_v33  ;;  %v821_v39 = vmax.f32 %v651_v34, 0.0  ;;  %v853_v40 = vmax.f32 %v779_v35, 0.0  ;;  %v662_v41 = vadd.f32 %v1085_v36, %v1400_v6  ;;  %v790_v42 = vadd.f32 %v1117_v38, %v1400_v6 }
 0x12a   : > { %v653_v43 = vpop.f32.mrf.mxu0  ;;  %v781_v44 = vpop.f32.mrf.mxu1 }
 0x12b   : > { %885 = vst [vmem:[%s1409_s20 + $0xe0] sm:$0xff] %v821_v39  ;;  %917 = vst [vmem:[%s1409_s20 + $0x1e0] sm:$0xff] %v853_v40  ;;  %v824_v45 = vmax.f32 %v662_v41, 0.0  ;;  %v856_v47 = vmax.f32 %v790_v42, 0.0  ;;  %v654_v48 = vadd.f32 %v1400_v6, %v653_v43  ;;  %v782_v49 = vadd.f32 %v1400_v6, %v781_v44 }
 0x12d   : > { %888 = vst [vmem:[%s1409_s20 + $0xf8] sm:$0xff] %v824_v45  ;;  %920 = vst [vmem:[%s1409_s20 + $0x1f8] sm:$0xff] %v856_v47  ;;  %v822_v50 = vmax.f32 %v654_v48, 0.0  ;;  %v854_v51 = vmax.f32 %v782_v49, 0.0 }
 0x12f   : > { %886 = vst [vmem:[%s1409_s20 + $0xe8] sm:$0xff] %v822_v50  ;;  %918 = vst [vmem:[%s1409_s20 + $0x1e8] sm:$0xff] %v854_v51 }
 0x130 PF: > { %s14_s15 = sadd.s32 1, %s1156_s15  }
 0x131   : > { %p11_p4 = scmp.ge.s32.totalorder %s14_s15, 4  }
 0x133   :  { %13 = sbr.rel (!%p11_p4) target bundleno = 1 (0x1), region = 66 }

// kernel: segnet3d_rec_forward.13
= control target key start
LH: loop header
LB: loop body
LE: loop exit
PB: predicated region body
PF: predicated region fallthrough
CT: control target
= control target key end

     0   :  { %s2422_s9 = smov 0   ;;  %s2424_s10 = smov 0   ;;  %s2674_s0 = inlined_call_operand.vmem [shape: bf16[1024,256], index: 0, kind: input, shape index: {}]   ;;  %s2675_s1 = inlined_call_operand.vmem [shape: bf16[256,128], index: 1, kind: input, shape index: {}]   ;;  %s2676_s2 = inlined_call_operand.vmem [shape: f32[1024,128], index: 2, kind: output, shape index: {}]  }
   0x1   :  { %s2426_s11 = smov 0  }
   0x2 LB: > { %s24_s12 = sadd.s32 1, %s2400_s10  ;;  %p1868_p0 = scmp.ge.s32.totalorder %s2404_s11, 1  ;;  %s2404_s11 = sphi %s2426_s11, %s12_s11   ;;  %s2400_s10 = sphi %s2424_s10, %s2678_s10   ;;  %s2396_s9 = sphi %s2422_s9, %s2677_s9  }
   0x3   : > { %p26_p1 = scmp.ge.s32.totalorder %s24_s12, 2  ;;  %p144_p2 = scmp.lt.s32.totalorder %s2404_s11, 3 }
   0x5   : > { %s2680_s12 = smov (%p26_p1, %s24_s12), 0  ;;  %p145_p3 = pnand %p1868_p0, %p144_p2 }
   0x6   : > { %s1869_s15 = sshll.u32 (!%p145_p3), %s2396_s9, 6 }
   0x7   : > { %148 = sbr.rel (%p145_p3) target bundleno = 432 (0x1b0), region = 28  ;;  %p178_p4 = scmp.lt.s32.totalorder (!%p145_p3), %s1869_s15, 127 }
   0xc   : > { %v2014_v0 = vld [vmem:[%s2675_s1 + $0x38] sm:$0xff]   ;;  %v2406_v1 = vmov 0   ;;  %v2015_v2 = vld [vmem:[%s2675_s1 + $0x30] sm:$0xff]   ;;  %v2016_v3 = vld [vmem:[%s2675_s1 + $0x28] sm:$0xff]   ;;  %s2682_s15 = smov (!%p178_p4, %s1869_s15), 127 }
   0xd   : > { %845 = vmatprep.subr.bf16.mxu0 %v2406_v1  ;;  %1957 = vmatprep.subr.bf16.mxu1 %v2406_v1  ;;  %v2017_v4 = vld [vmem:[%s2675_s1 + $0x20] sm:$0xff]   ;;  %s1956_s22 = sshll.u32 %s2682_s15, 3  ;;  %v2018_v5 = vld [vmem:[%s2675_s1 + $0x18] sm:$0xff]   ;;  %v2019_v7 = vld [vmem:[%s2675_s1 + $0x10] sm:$0xff]  }
   0xe   : > { %846 = vmatpush1.bf16.msra.mxu0 %v2014_v0  ;;  %1973 = vmatpush1.bf16.msra.mxu1 %v2014_v0  ;;  %s2471_s27 = scalar_lea.vmem %s2674_s0, %s1956_s22  ;;  %v2020_v9 = vld [vmem:[%s2675_s1 + $0x8] sm:$0xff]   ;;  %v2021_v10 = vld [vmem:[%s2675_s1] sm:$0xff]   ;;  %v2022_v11 = vld [vmem:[%s2675_s1 + $0x78] sm:$0xff]   ;;  %s2599_s29 = scalar_lea.vmem %s2676_s2, %s1956_s22 }
   0xf   : > { %847 = vmatprep.subr.bf16.mxu0 %v2406_v1  ;;  %1958 = vmatprep.subr.bf16.mxu1 %v2406_v1  ;;  %v2032_v6 = vld [vmem:[%s2471_s27 + $0x4] ss:$8 sps:$4 sm:$0xff]   ;;  %v2023_v12 = vld [vmem:[%s2675_s1 + $0x70] sm:$0xff]   ;;  %v2026_v15 = vld [vmem:[%s2675_s1 + $0x58] sm:$0xff]  }
  0x10   : > { %v2035_v8 = vld [vmem:[%s2471_s27 + $0x104] ss:$8 sps:$4 sm:$0xff]   ;;  %877 = vmatprep.mubr.bf16.mxu0 %v2032_v6  ;;  %v2027_v16 = vld [vmem:[%s2675_s1 + $0x50] sm:$0xff]   ;;  %v2030_v19 = vld [vmem:[%s2471_s27] ss:$8 sps:$4 sm:$0xff]  }
  0x11   : > { %1005 = vmatprep.mubr.bf16.mxu1 %v2035_v8  ;;  %v2024_v13 = vld [vmem:[%s2675_s1 + $0x68] sm:$0xff]   ;;  %v2025_v14 = vld [vmem:[%s2675_s1 + $0x60] sm:$0xff]   ;;  %v2036_v21 = vld [vmem:[%s2471_s27 + $0x14] ss:$8 sps:$4 sm:$0xff]  }
  0x12   : > { %848 = vmatpush1.bf16.msra.mxu0 %v2015_v2  ;;  %1974 = vmatpush1.bf16.msra.mxu1 %v2015_v2  ;;  %v2028_v17 = vld [vmem:[%s2675_s1 + $0x48] sm:$0xff]   ;;  %v2029_v18 = vld [vmem:[%s2675_s1 + $0x40] sm:$0xff]   ;;  %v2038_v22 = vld [vmem:[%s2471_s27 + $0x114] ss:$8 sps:$4 sm:$0xff]  }
  0x13   : > { %849 = vmatprep.subr.bf16.mxu0 %v2406_v1  ;;  %1959 = vmatprep.subr.bf16.mxu1 %v2406_v1  ;;  %v2033_v20 = vld [vmem:[%s2471_s27 + $0x100] ss:$8 sps:$4 sm:$0xff]   ;;  %v2040_v23 = vld [vmem:[%s2471_s27 + $0x10] ss:$8 sps:$4 sm:$0xff]   ;;  %v2042_v25 = vld [vmem:[%s2471_s27 + $0x24] ss:$8 sps:$4 sm:$0xff]  }
  0x14   : > { %v2041_v24 = vld [vmem:[%s2471_s27 + $0x110] ss:$8 sps:$4 sm:$0xff]   ;;  %v2044_v26 = vld [vmem:[%s2471_s27 + $0x124] ss:$8 sps:$4 sm:$0xff]   ;;  %v2046_v27 = vld [vmem:[%s2471_s27 + $0x20] ss:$8 sps:$4 sm:$0xff]  }
  0x15   : > { %v2047_v28 = vld [vmem:[%s2471_s27 + $0x120] ss:$8 sps:$4 sm:$0xff]   ;;  %v2048_v29 = vld [vmem:[%s2471_s27 + $0x34] ss:$8 sps:$4 sm:$0xff]   ;;  %v2052_v31 = vld [vmem:[%s2471_s27 + $0x30] ss:$8 sps:$4 sm:$0xff]  }
  0x16   : > { %850 = vmatpush1.bf16.msra.mxu0 %v2016_v3  ;;  %1975 = vmatpush1.bf16.msra.mxu1 %v2016_v3  ;;  %v2050_v30 = vld [vmem:[%s2471_s27 + $0x134] ss:$8 sps:$4 sm:$0xff]   ;;  %v2053_v32 = vld [vmem:[%s2471_s27 + $0x130] ss:$8 sps:$4 sm:$0xff]   ;;  %v2054_v33 = vld [vmem:[%s2471_s27 + $0x44] ss:$8 sps:$4 sm:$0xff]  }
  0x17   : > { %851 = vmatprep.subr.bf16.mxu0 %v2406_v1  ;;  %1960 = vmatprep.subr.bf16.mxu1 %v2406_v1  ;;  %v2056_v34 = vld [vmem:[%s2471_s27 + $0x144] ss:$8 sps:$4 sm:$0xff]   ;;  %v2058_v35 = vld [vmem:[%s2471_s27 + $0x40] ss:$8 sps:$4 sm:$0xff]   ;;  %v2060_v37 = vld [vmem:[%s2471_s27 + $0x54] ss:$8 sps:$4 sm:$0xff]  }
  0x18   : > { %v2059_v36 = vld [vmem:[%s2471_s27 + $0x140] ss:$8 sps:$4 sm:$0xff]   ;;  %v2062_v38 = vld [vmem:[%s2471_s27 + $0x154] ss:$8 sps:$4 sm:$0xff]   ;;  %v2064_v39 = vld [vmem:[%s2471_s27 + $0x50] ss:$8 sps:$4 sm:$0xff]  }
  0x19   : > { %v2065_v40 = vld [vmem:[%s2471_s27 + $0x150] ss:$8 sps:$4 sm:$0xff]   ;;  %v2066_v41 = vld [vmem:[%s2471_s27 + $0x64] ss:$8 sps:$4 sm:$0xff]   ;;  %v2070_v43 = vld [vmem:[%s2471_s27 + $0x60] ss:$8 sps:$4 sm:$0xff]  }
  0x1a   : > { %852 = vmatpush1.bf16.msra.mxu0 %v2017_v4  ;;  %1976 = vmatpush1.bf16.msra.mxu1 %v2017_v4  ;;  %v2068_v42 = vld [vmem:[%s2471_s27 + $0x164] ss:$8 sps:$4 sm:$0xff]   ;;  %v2071_v44 = vld [vmem:[%s2471_s27 + $0x160] ss:$8 sps:$4 sm:$0xff]   ;;  %v2072_v45 = vld [vmem:[%s2471_s27 + $0x74] ss:$8 sps:$4 sm:$0xff]  }
  0x1b   : > { %853 = vmatprep.subr.bf16.mxu0 %v2406_v1  ;;  %1961 = vmatprep.subr.bf16.mxu1 %v2406_v1  ;;  %v2074_v46 = vld [vmem:[%s2471_s27 + $0x174] ss:$8 sps:$4 sm:$0xff]   ;;  %v2076_v47 = vld [vmem:[%s2471_s27 + $0x70] ss:$8 sps:$4 sm:$0xff]   ;;  %v2078_v49 = vld [vmem:[%s2471_s27 + $0x84] ss:$8 sps:$4 sm:$0xff]  }
  0x1c   : > { %v2077_v48 = vld [vmem:[%s2471_s27 + $0x170] ss:$8 sps:$4 sm:$0xff]   ;;  %v2080_v50 = vld [vmem:[%s2471_s27 + $0x184] ss:$8 sps:$4 sm:$0xff]   ;;  %v2082_v51 = vld [vmem:[%s2471_s27 + $0x80] ss:$8 sps:$4 sm:$0xff]  }
  0x1d   : > { %v2083_v52 = vld [vmem:[%s2471_s27 + $0x180] ss:$8 sps:$4 sm:$0xff]   ;;  %v2084_v53 = vld [vmem:[%s2471_s27 + $0x94] ss:$8 sps:$4 sm:$0xff]   ;;  %v2088_v55 = vld [vmem:[%s2471_s27 + $0x90] ss:$8 sps:$4 sm:$0xff]  }
  0x1e   : > { %854 = vmatpush1.bf16.msra.mxu0 %v2018_v5  ;;  %1977 = vmatpush1.bf16.msra.mxu1 %v2018_v5  ;;  %v2086_v54 = vld [vmem:[%s2471_s27 + $0x194] ss:$8 sps:$4 sm:$0xff]   ;;  %v2089_v56 = vld [vmem:[%s2471_s27 + $0x190] ss:$8 sps:$4 sm:$0xff]   ;;  %v2090_v57 = vld [vmem:[%s2471_s27 + $0xa4] ss:$8 sps:$4 sm:$0xff]  }
  0x1f   : > { %855 = vmatprep.subr.bf16.mxu0 %v2406_v1  ;;  %1962 = vmatprep.subr.bf16.mxu1 %v2406_v1  ;;  %v2092_v58 = vld [vmem:[%s2471_s27 + $0x1a4] ss:$8 sps:$4 sm:$0xff]   ;;  %v2094_v59 = vld [vmem:[%s2471_s27 + $0xa0] ss:$8 sps:$4 sm:$0xff]   ;;  %v2096_v61 = vld [vmem:[%s2471_s27 + $0xb4] ss:$8 sps:$4 sm:$0xff]  }
  0x20   : > { %v2095_v60 = vld [vmem:[%s2471_s27 + $0x1a0] ss:$8 sps:$4 sm:$0xff]   ;;  %v2098_v62 = vld [vmem:[%s2471_s27 + $0x1b4] ss:$8 sps:$4 sm:$0xff]   ;;  %v2100_v63 = vld [vmem:[%s2471_s27 + $0xb0] ss:$8 sps:$4 sm:$0xff]  }
  0x21   : > { %v2101_v0 = vld [vmem:[%s2471_s27 + $0x1b0] ss:$8 sps:$4 sm:$0xff]   ;;  %v2104_v2 = vld [vmem:[%s2471_s27 + $0x1c4] ss:$8 sps:$4 sm:$0xff]   ;;  %v2106_v3 = vld [vmem:[%s2471_s27 + $0xc0] ss:$8 sps:$4 sm:$0xff]  }
  0x22   : > { %856 = vmatpush1.bf16.msra.mxu0 %v2019_v7  ;;  %1978 = vmatpush1.bf16.msra.mxu1 %v2019_v7  ;;  %v2107_v4 = vld [vmem:[%s2471_s27 + $0x1c0] ss:$8 sps:$4 sm:$0xff]   ;;  %v2108_v5 = vld [vmem:[%s2471_s27 + $0xd4] ss:$8 sps:$4 sm:$0xff]   ;;  %v2112_v7 = vld [vmem:[%s2471_s27 + $0xd0] ss:$8 sps:$4 sm:$0xff]  }
  0x23   : > { %857 = vmatprep.subr.bf16.mxu0 %v2406_v1  ;;  %1963 = vmatprep.subr.bf16.mxu1 %v2406_v1  ;;  %v2110_v6 = vld [vmem:[%s2471_s27 + $0x1d4] ss:$8 sps:$4 sm:$0xff]   ;;  %v2113_v8 = vld [vmem:[%s2471_s27 + $0x1d0] ss:$8 sps:$4 sm:$0xff]  }
  0x26   : > { %858 = vmatpush1.bf16.msra.mxu0 %v2020_v9  ;;  %1979 = vmatpush1.bf16.msra.mxu1 %v2020_v9  ;;  %v2114_v9 = vld [vmem:[%s2471_s27 + $0xe4] ss:$8 sps:$4 sm:$0xff]  }
  0x27   : > { %859 = vmatprep.subr.bf16.mxu0 %v2406_v1  ;;  %1964 = vmatprep.subr.bf16.mxu1 %v2406_v1 }
  0x2a   : > { %860 = vmatpush1.bf16.msra.mxu0 %v2021_v10  ;;  %1980 = vmatpush1.bf16.msra.mxu1 %v2021_v10  ;;  %v2116_v10 = vld [vmem:[%s2471_s27 + $0x1e4] ss:$8 sps:$4 sm:$0xff]  }
  0x2b   : > { %861 = vmatprep.subr.bf16.mxu0 %v2406_v1  ;;  %1965 = vmatprep.subr.bf16.mxu1 %v2406_v1 }
  0x2e   : > { %862 = vmatpush2.bf16.msra.mxu0 %v2022_v11  ;;  %1981 = vmatpush2.bf16.msra.mxu1 %v2022_v11  ;;  %v2118_v11 = vld [vmem:[%s2471_s27 + $0xe0] ss:$8 sps:$4 sm:$0xff]  }
  0x2f   : > { %863 = vmatprep.subr.bf16.mxu0 %v2406_v1  ;;  %1966 = vmatprep.subr.bf16.mxu1 %v2406_v1 }
  0x32   : > { %864 = vmatpush2.bf16.msra.mxu0 %v2023_v12  ;;  %1982 = vmatpush2.bf16.msra.mxu1 %v2023_v12  ;;  %v2119_v12 = vld [vmem:[%s2471_s27 + $0x1e0] ss:$8 sps:$4 sm:$0xff]  }
  0x33   : > { %865 = vmatprep.subr.bf16.mxu0 %v2406_v1  ;;  %1967 = vmatprep.subr.bf16.mxu1 %v2406_v1 }
  0x36   : > { %866 = vmatpush2.bf16.msra.mxu0 %v2024_v13  ;;  %1983 = vmatpush2.bf16.msra.mxu1 %v2024_v13  ;;  %v2120_v13 = vld [vmem:[%s2471_s27 + $0xf4] ss:$8 sps:$4 sm:$0xff]  }
  0x37   : > { %867 = vmatprep.subr.bf16.mxu0 %v2406_v1  ;;  %1968 = vmatprep.subr.bf16.mxu1 %v2406_v1 }
  0x3a   : > { %868 = vmatpush2.bf16.msra.mxu0 %v2025_v14  ;;  %1984 = vmatpush2.bf16.msra.mxu1 %v2025_v14  ;;  %v2122_v14 = vld [vmem:[%s2471_s27 + $0x1f4] ss:$8 sps:$4 sm:$0xff]  }
  0x3b   : > { %869 = vmatprep.subr.bf16.mxu0 %v2406_v1  ;;  %1969 = vmatprep.subr.bf16.mxu1 %v2406_v1 }
  0x3e   : > { %870 = vmatpush2.bf16.msra.mxu0 %v2026_v15  ;;  %1985 = vmatpush2.bf16.msra.mxu1 %v2026_v15  ;;  %v2124_v15 = vld [vmem:[%s2471_s27 + $0xf0] ss:$8 sps:$4 sm:$0xff]  }
  0x3f   : > { %871 = vmatprep.subr.bf16.mxu0 %v2406_v1  ;;  %1970 = vmatprep.subr.bf16.mxu1 %v2406_v1 }
  0x42   : > { %872 = vmatpush2.bf16.msra.mxu0 %v2027_v16  ;;  %1986 = vmatpush2.bf16.msra.mxu1 %v2027_v16  ;;  %v2125_v16 = vld [vmem:[%s2471_s27 + $0x1f0] ss:$8 sps:$4 sm:$0xff]  }
  0x43   : > { %873 = vmatprep.subr.bf16.mxu0 %v2406_v1  ;;  %1971 = vmatprep.subr.bf16.mxu1 %v2406_v1 }
  0x46   : > { %874 = vmatpush2.bf16.msra.mxu0 %v2028_v17  ;;  %1987 = vmatpush2.bf16.msra.mxu1 %v2028_v17 }
  0x47   : > { %875 = vmatprep.subr.bf16.mxu0 %v2406_v1  ;;  %1972 = vmatprep.subr.bf16.mxu1 %v2406_v1  ;;  %v2102_v1 = vld [vmem:[%s2471_s27 + $0xc4] ss:$8 sps:$4 sm:$0xff]  }
  0x4a   : > { %876 = vmatpush2.bf16.msra.mxu0 %v2029_v18  ;;  %1988 = vmatpush2.bf16.msra.mxu1 %v2029_v18 }
  0x4d   : > { %878 = vmatmul.mubr.bf16.vlgmr.msra.gmra.mxu0 %v2030_v19  ;;  %1006 = vmatmul.mubr.bf16.vlgmr.msra.gmra.mxu1 %v2033_v20 }
  0x4e   : > { %885 = vmatprep.mubr.bf16.mxu0 %v2036_v21  ;;  %1013 = vmatprep.mubr.bf16.mxu1 %v2038_v22 }
  0x55   : > { %886 = vmatmul.mubr.bf16.gmra.mxu0 %v2040_v23  ;;  %1014 = vmatmul.mubr.bf16.gmra.mxu1 %v2041_v24 }
  0x56   : > { %893 = vmatprep.mubr.bf16.mxu0 %v2042_v25  ;;  %1021 = vmatprep.mubr.bf16.mxu1 %v2044_v26 }
  0x5d   : > { %894 = vmatmul.mubr.bf16.gmra.mxu0 %v2046_v27  ;;  %1022 = vmatmul.mubr.bf16.gmra.mxu1 %v2047_v28 }
  0x5e   : > { %901 = vmatprep.mubr.bf16.mxu0 %v2048_v29  ;;  %1029 = vmatprep.mubr.bf16.mxu1 %v2050_v30 }
  0x65   : > { %902 = vmatmul.mubr.bf16.gmra.mxu0 %v2052_v31  ;;  %1030 = vmatmul.mubr.bf16.gmra.mxu1 %v2053_v32 }
  0x66   : > { %909 = vmatprep.mubr.bf16.mxu0 %v2054_v33  ;;  %1037 = vmatprep.mubr.bf16.mxu1 %v2056_v34 }
  0x6d   : > { %910 = vmatmul.mubr.bf16.gmra.mxu0 %v2058_v35  ;;  %1038 = vmatmul.mubr.bf16.gmra.mxu1 %v2059_v36 }
  0x6e   : > { %917 = vmatprep.mubr.bf16.mxu0 %v2060_v37  ;;  %1045 = vmatprep.mubr.bf16.mxu1 %v2062_v38 }
  0x75   : > { %918 = vmatmul.mubr.bf16.gmra.mxu0 %v2064_v39  ;;  %1046 = vmatmul.mubr.bf16.gmra.mxu1 %v2065_v40 }
  0x76   : > { %925 = vmatprep.mubr.bf16.mxu0 %v2066_v41  ;;  %1053 = vmatprep.mubr.bf16.mxu1 %v2068_v42 }
  0x7d   : > { %926 = vmatmul.mubr.bf16.gmra.mxu0 %v2070_v43  ;;  %1054 = vmatmul.mubr.bf16.gmra.mxu1 %v2071_v44 }
  0x7e   : > { %933 = vmatprep.mubr.bf16.mxu0 %v2072_v45  ;;  %1061 = vmatprep.mubr.bf16.mxu1 %v2074_v46 }
  0x85   : > { %934 = vmatmul.mubr.bf16.gmra.mxu0 %v2076_v47  ;;  %1062 = vmatmul.mubr.bf16.gmra.mxu1 %v2077_v48 }
  0x86   : > { %941 = vmatprep.mubr.bf16.mxu0 %v2078_v49  ;;  %1069 = vmatprep.mubr.bf16.mxu1 %v2080_v50 }
  0x8d   : > { %942 = vmatmul.mubr.bf16.gmra.mxu0 %v2082_v51  ;;  %1070 = vmatmul.mubr.bf16.gmra.mxu1 %v2083_v52 }
  0x8e   : > { %949 = vmatprep.mubr.bf16.mxu0 %v2084_v53  ;;  %1077 = vmatprep.mubr.bf16.mxu1 %v2086_v54 }
  0x95   : > { %950 = vmatmul.mubr.bf16.gmra.mxu0 %v2088_v55  ;;  %1078 = vmatmul.mubr.bf16.gmra.mxu1 %v2089_v56 }
  0x96   : > { %957 = vmatprep.mubr.bf16.mxu0 %v2090_v57  ;;  %1085 = vmatprep.mubr.bf16.mxu1 %v2092_v58 }
  0x9d   : > { %958 = vmatmul.mubr.bf16.gmra.mxu0 %v2094_v59  ;;  %1086 = vmatmul.mubr.bf16.gmra.mxu1 %v2095_v60 }
  0x9e   : > { %965 = vmatprep.mubr.bf16.mxu0 %v2096_v61  ;;  %1093 = vmatprep.mubr.bf16.mxu1 %v2098_v62 }
  0xa5   : > { %966 = vmatmul.mubr.bf16.gmra.mxu0 %v2100_v63  ;;  %1094 = vmatmul.mubr.bf16.gmra.mxu1 %v2101_v0 }
  0xa6   : > { %973 = vmatprep.mubr.bf16.mxu0 %v2102_v1  ;;  %1101 = vmatprep.mubr.bf16.mxu1 %v2104_v2 }
  0xad   : > { %974 = vmatmul.mubr.bf16.gmra.mxu0 %v2106_v3  ;;  %1102 = vmatmul.mubr.bf16.gmra.mxu1 %v2107_v4 }
  0xae   : > { %981 = vmatprep.mubr.bf16.mxu0 %v2108_v5  ;;  %1109 = vmatprep.mubr.bf16.mxu1 %v2110_v6 }
  0xb5   : > { %982 = vmatmul.mubr.bf16.gmra.mxu0 %v2112_v7  ;;  %1110 = vmatmul.mubr.bf16.gmra.mxu1 %v2113_v8 }
  0xb6   : > { %989 = vmatprep.mubr.bf16.mxu0 %v2114_v9  ;;  %1117 = vmatprep.mubr.bf16.mxu1 %v2116_v10 }
  0xbd   : > { %990 = vmatmul.mubr.bf16.gmra.mxu0 %v2118_v11  ;;  %1118 = vmatmul.mubr.bf16.gmra.mxu1 %v2119_v12 }
  0xbe   : > { %997 = vmatprep.mubr.bf16.mxu0 %v2120_v13  ;;  %1125 = vmatprep.mubr.bf16.mxu1 %v2122_v14 }
  0xc5   : > { %998 = vmatmul.mubr.bf16.gmra.mxu0 %v2124_v15  ;;  %1126 = vmatmul.mubr.bf16.gmra.mxu1 %v2125_v16 }
 0x10d   : > { %v879_v17 = vpop.f32.mrf.mxu0  ;;  %v1007_v18 = vpop.f32.mrf.mxu1 }
 0x10e   : > { %v1329_v19 = vsub.f32 0.0, %v879_v17  ;;  %v1361_v20 = vsub.f32 0.0, %v1007_v18 }
 0x10f   : > { %v881_v21 = vpop.f32.mrf.mxu0  ;;  %v1009_v22 = vpop.f32.mrf.mxu1 }
 0x110   : > { %v1393_v23 = vmul.f32 1.442695, %v1329_v19  ;;  %v1457_v24 = vmul.f32 1.442695, %v1361_v20 }
 0x111   : > { %v882_v25 = vpop.f32.mrf.mxu0  ;;  %v1010_v26 = vpop.f32.mrf.mxu1 }
 0x112   : > { %2126 = vpow2.f32 %v1393_v23  ;;  %v1330_v27 = vsub.f32 0.0, %v882_v25  ;;  %v1362_v28 = vsub.f32 0.0, %v1010_v26 }
 0x113   : > { %2128 = vpow2.f32 %v1457_v24  ;;  %v884_v29 = vpop.f32.mrf.mxu0  ;;  %v1012_v30 = vpop.f32.mrf.mxu1 }
 0x114   : > { %v1395_v31 = vmul.f32 1.442695, %v1330_v27  ;;  %v1459_v32 = vmul.f32 1.442695, %v1362_v28 }
 0x115   : > { %v887_v33 = vpop.f32.mrf.mxu0  ;;  %v1015_v34 = vpop.f32.mrf.mxu1 }
 0x116   : > { %2130 = vpow2.f32 %v1395_v31  ;;  %v1331_v35 = vsub.f32 0.0, %v887_v33  ;;  %v1363_v36 = vsub.f32 0.0, %v1015_v34 }
 0x117   : > { %2132 = vpow2.f32 %v1459_v32  ;;  %v889_v37 = vpop.f32.mrf.mxu0  ;;  %v1017_v38 = vpop.f32.mrf.mxu1 }
 0x118   : > { %v1397_v39 = vmul.f32 1.442695, %v1331_v35  ;;  %v1461_v40 = vmul.f32 1.442695, %v1363_v36 }
 0x119   : > { %v890_v41 = vpop.f32.mrf.mxu0  ;;  %v1018_v42 = vpop.f32.mrf.mxu1 }
 0x11a   : > { %2134 = vpow2.f32 %v1397_v39  ;;  %v1332_v43 = vsub.f32 0.0, %v890_v41  ;;  %v1364_v44 = vsub.f32 0.0, %v1018_v42 }
 0x11b   : > { %2136 = vpow2.f32 %v1461_v40  ;;  %v892_v45 = vpop.f32.mrf.mxu0  ;;  %v1020_v46 = vpop.f32.mrf.mxu1 }
 0x11c   : > { %v1399_v47 = vmul.f32 1.442695, %v1332_v43  ;;  %v1463_v48 = vmul.f32 1.442695, %v1364_v44 }
 0x11d   : > { %v895_v49 = vpop.f32.mrf.mxu0  ;;  %v1023_v50 = vpop.f32.mrf.mxu1 }
 0x11e   : > { %2138 = vpow2.f32 %v1399_v47  ;;  %v1333_v51 = vsub.f32 0.0, %v895_v49  ;;  %v1365_v52 = vsub.f32 0.0, %v1023_v50 }
 0x11f   : > { %v2127_v53 = vpop.eup %2126  ;;  %2140 = vpow2.f32 %v1463_v48  ;;  %v897_v54 = vpop.f32.mrf.mxu0 }
 0x120   : > { %v1025_v55 = vpop.f32.mrf.mxu1  ;;  %v2129_v56 = vpop.eup %2128  ;;  %v1521_v57 = vadd.f32 1.0, %v2127_v53  ;;  %v1401_v58 = vmul.f32 1.442695, %v1333_v51  ;;  %v1465_v60 = vmul.f32 1.442695, %v1365_v52 }
 0x121   : > { %v1553_v59 = vadd.f32 1.0, %v2129_v56  ;;  %v898_v61 = vpop.f32.mrf.mxu0 }
 0x122   : > { %v1026_v62 = vpop.f32.mrf.mxu1  ;;  %2142 = vrcp.f32 %v1521_v57  ;;  %v1334_v63 = vsub.f32 0.0, %v898_v61 }
 0x123   : > { %v1366_v0 = vsub.f32 0.0, %v1026_v62  ;;  %v2131_v1 = vpop.eup %2130  ;;  %2144 = vrcp.f32 %v1553_v59  ;;  %v900_v2 = vpop.f32.mrf.mxu0 }
 0x124   : > { %v1028_v3 = vpop.f32.mrf.mxu1  ;;  %v2133_v4 = vpop.eup %2132  ;;  %v1522_v5 = vadd.f32 1.0, %v2131_v1  ;;  %2146 = vpow2.f32 %v1401_v58  ;;  %v1403_v6 = vmul.f32 1.442695, %v1334_v63 }
 0x125   : > { %v1554_v7 = vadd.f32 1.0, %v2133_v4  ;;  %2148 = vpow2.f32 %v1465_v60  ;;  %v1467_v8 = vmul.f32 1.442695, %v1366_v0  ;;  %v903_v9 = vpop.f32.mrf.mxu0 }
 0x126   : > { %v1031_v10 = vpop.f32.mrf.mxu1  ;;  %2150 = vrcp.f32 %v1522_v5  ;;  %v1335_v11 = vsub.f32 0.0, %v903_v9 }
 0x127   : > { %v1367_v12 = vsub.f32 0.0, %v1031_v10  ;;  %v2135_v13 = vpop.eup %2134  ;;  %2152 = vrcp.f32 %v1554_v7  ;;  %v905_v14 = vpop.f32.mrf.mxu0 }
 0x128   : > { %v1033_v15 = vpop.f32.mrf.mxu1  ;;  %v2137_v16 = vpop.eup %2136  ;;  %v1523_v17 = vadd.f32 1.0, %v2135_v13  ;;  %2154 = vpow2.f32 %v1403_v6  ;;  %v1405_v18 = vmul.f32 1.442695, %v1335_v11 }
 0x129   : > { %v1555_v19 = vadd.f32 1.0, %v2137_v16  ;;  %2156 = vpow2.f32 %v1467_v8  ;;  %v1469_v20 = vmul.f32 1.442695, %v1367_v12  ;;  %v906_v21 = vpop.f32.mrf.mxu0 }
 0x12a   : > { %v1034_v22 = vpop.f32.mrf.mxu1  ;;  %2158 = vrcp.f32 %v1523_v17  ;;  %v1336_v23 = vsub.f32 0.0, %v906_v21 }
 0x12b   : > { %v1368_v24 = vsub.f32 0.0, %v1034_v22  ;;  %v2139_v25 = vpop.eup %2138  ;;  %2160 = vrcp.f32 %v1555_v19  ;;  %v908_v26 = vpop.f32.mrf.mxu0 }
 0x12c   : > { %v1036_v27 = vpop.f32.mrf.mxu1  ;;  %v2141_v28 = vpop.eup %2140  ;;  %v1524_v29 = vadd.f32 1.0, %v2139_v25  ;;  %2162 = vpow2.f32 %v1405_v18  ;;  %v1407_v30 = vmul.f32 1.442695, %v1336_v23 }
 0x12d   : > { %v1556_v31 = vadd.f32 1.0, %v2141_v28  ;;  %2164 = vpow2.f32 %v1469_v20  ;;  %v1471_v32 = vmul.f32 1.442695, %v1368_v24  ;;  %v911_v33 = vpop.f32.mrf.mxu0 }
 0x12e   : > { %v1039_v34 = vpop.f32.mrf.mxu1  ;;  %2166 = vrcp.f32 %v1524_v29  ;;  %v1337_v35 = vsub.f32 0.0, %v911_v33 }
 0x12f   : > { %v1369_v36 = vsub.f32 0.0, %v1039_v34  ;;  %v2143_v37 = vpop.eup %2142  ;;  %2168 = vrcp.f32 %v1556_v31  ;;  %v913_v38 = vpop.f32.mrf.mxu0 }
 0x130   : > { %v1041_v39 = vpop.f32.mrf.mxu1  ;;  %v2145_v40 = vpop.eup %2144  ;;  %1713 = vst [vmem:[%s2599_s29] sm:$0xff] %v2143_v37  ;;  %2170 = vpow2.f32 %v1407_v30  ;;  %v1409_v41 = vmul.f32 1.442695, %v1337_v35 }
 0x131   : > { %v1473_v42 = vmul.f32 1.442695, %v1369_v36  ;;  %v2147_v43 = vpop.eup %2146  ;;  %1745 = vst [vmem:[%s2599_s29 + $0x100] sm:$0xff] %v2145_v40  ;;  %2172 = vpow2.f32 %v1471_v32  ;;  %v914_v44 = vpop.f32.mrf.mxu0 }
 0x132   : > { %v1042_v45 = vpop.f32.mrf.mxu1  ;;  %v2149_v46 = vpop.eup %2148  ;;  %v1525_v47 = vadd.f32 1.0, %v2147_v43  ;;  %2174 = vpow2.f32 %v1409_v41  ;;  %v1338_v48 = vsub.f32 0.0, %v914_v44 }
 0x133   : > { %v1370_v49 = vsub.f32 0.0, %v1042_v45  ;;  %v2151_v50 = vpop.eup %2150  ;;  %v1557_v51 = vadd.f32 1.0, %v2149_v46  ;;  %2176 = vpow2.f32 %v1473_v42  ;;  %v916_v52 = vpop.f32.mrf.mxu0 }
 0x134   : > { %v1044_v53 = vpop.f32.mrf.mxu1  ;;  %v2153_v54 = vpop.eup %2152  ;;  %1714 = vst [vmem:[%s2599_s29 + $0x8] sm:$0xff] %v2151_v50  ;;  %2178 = vrcp.f32 %v1525_v47  ;;  %v1411_v55 = vmul.f32 1.442695, %v1338_v48 }
 0x135   : > { %v1475_v56 = vmul.f32 1.442695, %v1370_v49  ;;  %v2155_v57 = vpop.eup %2154  ;;  %1746 = vst [vmem:[%s2599_s29 + $0x108] sm:$0xff] %v2153_v54  ;;  %2180 = vrcp.f32 %v1557_v51  ;;  %v919_v58 = vpop.f32.mrf.mxu0 }
 0x136   : > { %v1047_v59 = vpop.f32.mrf.mxu1  ;;  %v2157_v60 = vpop.eup %2156  ;;  %v1526_v61 = vadd.f32 1.0, %v2155_v57  ;;  %2182 = vpow2.f32 %v1411_v55  ;;  %v1339_v62 = vsub.f32 0.0, %v919_v58 }
 0x137   : > { %v1371_v63 = vsub.f32 0.0, %v1047_v59  ;;  %v2159_v0 = vpop.eup %2158  ;;  %v1558_v1 = vadd.f32 1.0, %v2157_v60  ;;  %2184 = vpow2.f32 %v1475_v56  ;;  %v921_v2 = vpop.f32.mrf.mxu0 }
 0x138   : > { %v1049_v3 = vpop.f32.mrf.mxu1  ;;  %v2161_v4 = vpop.eup %2160  ;;  %1715 = vst [vmem:[%s2599_s29 + $0x10] sm:$0xff] %v2159_v0  ;;  %2186 = vrcp.f32 %v1526_v61  ;;  %v1413_v5 = vmul.f32 1.442695, %v1339_v62 }
 0x139   : > { %v1477_v6 = vmul.f32 1.442695, %v1371_v63  ;;  %v2163_v7 = vpop.eup %2162  ;;  %1747 = vst [vmem:[%s2599_s29 + $0x110] sm:$0xff] %v2161_v4  ;;  %2188 = vrcp.f32 %v1558_v1  ;;  %v922_v8 = vpop.f32.mrf.mxu0 }
 0x13a   : > { %v1050_v9 = vpop.f32.mrf.mxu1  ;;  %v2165_v10 = vpop.eup %2164  ;;  %v1527_v11 = vadd.f32 1.0, %v2163_v7  ;;  %2190 = vpow2.f32 %v1413_v5  ;;  %v1340_v12 = vsub.f32 0.0, %v922_v8 }
 0x13b   : > { %v1372_v13 = vsub.f32 0.0, %v1050_v9  ;;  %v2167_v14 = vpop.eup %2166  ;;  %v1559_v15 = vadd.f32 1.0, %v2165_v10  ;;  %2192 = vpow2.f32 %v1477_v6  ;;  %v924_v16 = vpop.f32.mrf.mxu0 }
 0x13c   : > { %v1052_v17 = vpop.f32.mrf.mxu1  ;;  %v2169_v18 = vpop.eup %2168  ;;  %1716 = vst [vmem:[%s2599_s29 + $0x18] sm:$0xff] %v2167_v14  ;;  %2194 = vrcp.f32 %v1527_v11  ;;  %v1415_v19 = vmul.f32 1.442695, %v1340_v12 }
 0x13d   : > { %v1479_v20 = vmul.f32 1.442695, %v1372_v13  ;;  %v2171_v21 = vpop.eup %2170  ;;  %1748 = vst [vmem:[%s2599_s29 + $0x118] sm:$0xff] %v2169_v18  ;;  %2196 = vrcp.f32 %v1559_v15  ;;  %v927_v22 = vpop.f32.mrf.mxu0 }
 0x13e   : > { %v1055_v23 = vpop.f32.mrf.mxu1  ;;  %v2173_v24 = vpop.eup %2172  ;;  %v1528_v25 = vadd.f32 1.0, %v2171_v21  ;;  %2198 = vpow2.f32 %v1415_v19  ;;  %v1341_v26 = vsub.f32 0.0, %v927_v22 }
 0x13f   : > { %v1373_v27 = vsub.f32 0.0, %v1055_v23  ;;  %v2175_v28 = vpop.eup %2174  ;;  %v1560_v29 = vadd.f32 1.0, %v2173_v24  ;;  %2200 = vpow2.f32 %v1479_v20  ;;  %v929_v30 = vpop.f32.mrf.mxu0 }
 0x140   : > { %v1057_v31 = vpop.f32.mrf.mxu1  ;;  %v2177_v32 = vpop.eup %2176  ;;  %2202 = vrcp.f32 %v1528_v25  ;;  %v1529_v33 = vadd.f32 1.0, %v2175_v28  ;;  %v1417_v34 = vmul.f32 1.442695, %v1341_v26 }
 0x141   : > { %v2179_v35 = vpop.eup %2178  ;;  %2204 = vrcp.f32 %v1560_v29  ;;  %v1561_v36 = vadd.f32 1.0, %v2177_v32  ;;  %v1481_v37 = vmul.f32 1.442695, %v1373_v27  ;;  %v930_v38 = vpop.f32.mrf.mxu0 }
 0x142   : > { %v1058_v39 = vpop.f32.mrf.mxu1  ;;  %v2181_v40 = vpop.eup %2180  ;;  %1717 = vst [vmem:[%s2599_s29 + $0x20] sm:$0xff] %v2179_v35  ;;  %2206 = vrcp.f32 %v1529_v33  ;;  %v1342_v41 = vsub.f32 0.0, %v930_v38 }
 0x143   : > { %v1374_v42 = vsub.f32 0.0, %v1058_v39  ;;  %v2183_v43 = vpop.eup %2182  ;;  %1749 = vst [vmem:[%s2599_s29 + $0x120] sm:$0xff] %v2181_v40  ;;  %2208 = vrcp.f32 %v1561_v36  ;;  %v932_v44 = vpop.f32.mrf.mxu0 }
 0x144   : > { %v1060_v45 = vpop.f32.mrf.mxu1  ;;  %v2185_v46 = vpop.eup %2184  ;;  %v1530_v47 = vadd.f32 1.0, %v2183_v43  ;;  %2210 = vpow2.f32 %v1417_v34  ;;  %v1419_v48 = vmul.f32 1.442695, %v1342_v41 }
 0x145   : > { %v2187_v49 = vpop.eup %2186  ;;  %v1562_v50 = vadd.f32 1.0, %v2185_v46  ;;  %2212 = vpow2.f32 %v1481_v37  ;;  %v1483_v51 = vmul.f32 1.442695, %v1374_v42  ;;  %v935_v52 = vpop.f32.mrf.mxu0 }
 0x146   : > { %v1063_v53 = vpop.f32.mrf.mxu1  ;;  %v2189_v54 = vpop.eup %2188  ;;  %1718 = vst [vmem:[%s2599_s29 + $0x28] sm:$0xff] %v2187_v49  ;;  %2214 = vrcp.f32 %v1530_v47  ;;  %v1343_v55 = vsub.f32 0.0, %v935_v52 }
 0x147   : > { %v1375_v56 = vsub.f32 0.0, %v1063_v53  ;;  %v2191_v57 = vpop.eup %2190  ;;  %1750 = vst [vmem:[%s2599_s29 + $0x128] sm:$0xff] %v2189_v54  ;;  %2216 = vrcp.f32 %v1562_v50  ;;  %v937_v58 = vpop.f32.mrf.mxu0 }
 0x148   : > { %v1065_v59 = vpop.f32.mrf.mxu1  ;;  %v2193_v60 = vpop.eup %2192  ;;  %v1531_v61 = vadd.f32 1.0, %v2191_v57  ;;  %2218 = vpow2.f32 %v1419_v48  ;;  %v1421_v62 = vmul.f32 1.442695, %v1343_v55 }
 0x149   : > { %v2195_v63 = vpop.eup %2194  ;;  %v1563_v0 = vadd.f32 1.0, %v2193_v60  ;;  %2220 = vpow2.f32 %v1483_v51  ;;  %v1485_v1 = vmul.f32 1.442695, %v1375_v56  ;;  %v938_v2 = vpop.f32.mrf.mxu0 }
 0x14a   : > { %v1066_v3 = vpop.f32.mrf.mxu1  ;;  %v2197_v4 = vpop.eup %2196  ;;  %1719 = vst [vmem:[%s2599_s29 + $0x30] sm:$0xff] %v2195_v63  ;;  %2222 = vrcp.f32 %v1531_v61  ;;  %v1344_v5 = vsub.f32 0.0, %v938_v2 }
 0x14b   : > { %v1376_v6 = vsub.f32 0.0, %v1066_v3  ;;  %v2199_v7 = vpop.eup %2198  ;;  %1751 = vst [vmem:[%s2599_s29 + $0x130] sm:$0xff] %v2197_v4  ;;  %2224 = vrcp.f32 %v1563_v0  ;;  %v940_v8 = vpop.f32.mrf.mxu0 }
 0x14c   : > { %v1068_v9 = vpop.f32.mrf.mxu1  ;;  %v2201_v10 = vpop.eup %2200  ;;  %v1532_v11 = vadd.f32 1.0, %v2199_v7  ;;  %2226 = vpow2.f32 %v1421_v62  ;;  %v1423_v12 = vmul.f32 1.442695, %v1344_v5 }
 0x14d   : > { %v2203_v13 = vpop.eup %2202  ;;  %v1564_v14 = vadd.f32 1.0, %v2201_v10  ;;  %2228 = vpow2.f32 %v1485_v1  ;;  %v1487_v15 = vmul.f32 1.442695, %v1376_v6  ;;  %v943_v16 = vpop.f32.mrf.mxu0 }
 0x14e   : > { %v1071_v17 = vpop.f32.mrf.mxu1  ;;  %v2205_v18 = vpop.eup %2204  ;;  %1720 = vst [vmem:[%s2599_s29 + $0x38] sm:$0xff] %v2203_v13  ;;  %2230 = vrcp.f32 %v1532_v11  ;;  %v1345_v19 = vsub.f32 0.0, %v943_v16 }
 0x14f   : > { %v1377_v20 = vsub.f32 0.0, %v1071_v17  ;;  %v2207_v21 = vpop.eup %2206  ;;  %1752 = vst [vmem:[%s2599_s29 + $0x138] sm:$0xff] %v2205_v18  ;;  %2232 = vrcp.f32 %v1564_v14  ;;  %v945_v22 = vpop.f32.mrf.mxu0 }
 0x150   : > { %v1073_v23 = vpop.f32.mrf.mxu1  ;;  %v2209_v24 = vpop.eup %2208  ;;  %1721 = vst [vmem:[%s2599_s29 + $0x40] sm:$0xff] %v2207_v21  ;;  %2234 = vpow2.f32 %v1423_v12  ;;  %v1425_v25 = vmul.f32 1.442695, %v1345_v19 }
 0x151   : > { %v1489_v26 = vmul.f32 1.442695, %v1377_v20  ;;  %v2211_v27 = vpop.eup %2210  ;;  %1753 = vst [vmem:[%s2599_s29 + $0x140] sm:$0xff] %v2209_v24  ;;  %2236 = vpow2.f32 %v1487_v15  ;;  %v946_v28 = vpop.f32.mrf.mxu0 }
 0x152   : > { %v1074_v29 = vpop.f32.mrf.mxu1  ;;  %v2213_v30 = vpop.eup %2212  ;;  %v1533_v31 = vadd.f32 1.0, %v2211_v27  ;;  %2238 = vpow2.f32 %v1425_v25  ;;  %v1346_v32 = vsub.f32 0.0, %v946_v28 }
 0x153   : > { %v1378_v33 = vsub.f32 0.0, %v1074_v29  ;;  %v2215_v34 = vpop.eup %2214  ;;  %v1565_v35 = vadd.f32 1.0, %v2213_v30  ;;  %2240 = vpow2.f32 %v1489_v26  ;;  %v948_v36 = vpop.f32.mrf.mxu0 }
 0x154   : > { %v1076_v37 = vpop.f32.mrf.mxu1  ;;  %v2217_v38 = vpop.eup %2216  ;;  %1722 = vst [vmem:[%s2599_s29 + $0x48] sm:$0xff] %v2215_v34  ;;  %2242 = vrcp.f32 %v1533_v31  ;;  %v1427_v39 = vmul.f32 1.442695, %v1346_v32 }
 0x155   : > { %v1491_v40 = vmul.f32 1.442695, %v1378_v33  ;;  %v2219_v41 = vpop.eup %2218  ;;  %1754 = vst [vmem:[%s2599_s29 + $0x148] sm:$0xff] %v2217_v38  ;;  %2244 = vrcp.f32 %v1565_v35  ;;  %v951_v42 = vpop.f32.mrf.mxu0 }
 0x156   : > { %v1079_v43 = vpop.f32.mrf.mxu1  ;;  %v2221_v44 = vpop.eup %2220  ;;  %v1534_v45 = vadd.f32 1.0, %v2219_v41  ;;  %2246 = vpow2.f32 %v1427_v39  ;;  %v1347_v46 = vsub.f32 0.0, %v951_v42 }
 0x157   : > { %v1379_v47 = vsub.f32 0.0, %v1079_v43  ;;  %v2223_v48 = vpop.eup %2222  ;;  %v1566_v49 = vadd.f32 1.0, %v2221_v44  ;;  %2248 = vpow2.f32 %v1491_v40  ;;  %v953_v50 = vpop.f32.mrf.mxu0 }
 0x158   : > { %v1081_v51 = vpop.f32.mrf.mxu1  ;;  %v2225_v52 = vpop.eup %2224  ;;  %1723 = vst [vmem:[%s2599_s29 + $0x50] sm:$0xff] %v2223_v48  ;;  %2250 = vrcp.f32 %v1534_v45  ;;  %v1429_v53 = vmul.f32 1.442695, %v1347_v46 }
 0x159   : > { %v1493_v54 = vmul.f32 1.442695, %v1379_v47  ;;  %v2227_v55 = vpop.eup %2226  ;;  %1755 = vst [vmem:[%s2599_s29 + $0x150] sm:$0xff] %v2225_v52  ;;  %2252 = vrcp.f32 %v1566_v49  ;;  %v954_v56 = vpop.f32.mrf.mxu0 }
 0x15a   : > { %v1082_v57 = vpop.f32.mrf.mxu1  ;;  %v2229_v58 = vpop.eup %2228  ;;  %v1535_v59 = vadd.f32 1.0, %v2227_v55  ;;  %2254 = vpow2.f32 %v1429_v53  ;;  %v1348_v60 = vsub.f32 0.0, %v954_v56 }
 0x15b   : > { %v1380_v61 = vsub.f32 0.0, %v1082_v57  ;;  %v2231_v62 = vpop.eup %2230  ;;  %v1567_v63 = vadd.f32 1.0, %v2229_v58  ;;  %2256 = vpow2.f32 %v1493_v54  ;;  %v956_v0 = vpop.f32.mrf.mxu0 }
 0x15c   : > { %v1084_v1 = vpop.f32.mrf.mxu1  ;;  %v2233_v2 = vpop.eup %2232  ;;  %1724 = vst [vmem:[%s2599_s29 + $0x58] sm:$0xff] %v2231_v62  ;;  %2258 = vrcp.f32 %v1535_v59  ;;  %v1431_v3 = vmul.f32 1.442695, %v1348_v60 }
 0x15d   : > { %v1495_v4 = vmul.f32 1.442695, %v1380_v61  ;;  %v2235_v5 = vpop.eup %2234  ;;  %1756 = vst [vmem:[%s2599_s29 + $0x158] sm:$0xff] %v2233_v2  ;;  %2260 = vrcp.f32 %v1567_v63  ;;  %v959_v6 = vpop.f32.mrf.mxu0 }
 0x15e   : > { %v1087_v7 = vpop.f32.mrf.mxu1  ;;  %v2237_v8 = vpop.eup %2236  ;;  %v1536_v9 = vadd.f32 1.0, %v2235_v5  ;;  %2262 = vpow2.f32 %v1431_v3  ;;  %v1349_v10 = vsub.f32 0.0, %v959_v6 }
 0x15f   : > { %v1381_v11 = vsub.f32 0.0, %v1087_v7  ;;  %v2239_v12 = vpop.eup %2238  ;;  %v1568_v13 = vadd.f32 1.0, %v2237_v8  ;;  %2264 = vpow2.f32 %v1495_v4  ;;  %v961_v14 = vpop.f32.mrf.mxu0 }
 0x160   : > { %v1089_v15 = vpop.f32.mrf.mxu1  ;;  %v2241_v16 = vpop.eup %2240  ;;  %2266 = vrcp.f32 %v1536_v9  ;;  %v1537_v17 = vadd.f32 1.0, %v2239_v12  ;;  %v1433_v18 = vmul.f32 1.442695, %v1349_v10 }
 0x161   : > { %v2243_v19 = vpop.eup %2242  ;;  %2268 = vrcp.f32 %v1568_v13  ;;  %v1569_v20 = vadd.f32 1.0, %v2241_v16  ;;  %v1497_v21 = vmul.f32 1.442695, %v1381_v11  ;;  %v962_v22 = vpop.f32.mrf.mxu0 }
 0x162   : > { %v1090_v23 = vpop.f32.mrf.mxu1  ;;  %v2245_v24 = vpop.eup %2244  ;;  %1725 = vst [vmem:[%s2599_s29 + $0x60] sm:$0xff] %v2243_v19  ;;  %2270 = vrcp.f32 %v1537_v17  ;;  %v1350_v25 = vsub.f32 0.0, %v962_v22 }
 0x163   : > { %v1382_v26 = vsub.f32 0.0, %v1090_v23  ;;  %v2247_v27 = vpop.eup %2246  ;;  %1757 = vst [vmem:[%s2599_s29 + $0x160] sm:$0xff] %v2245_v24  ;;  %2272 = vrcp.f32 %v1569_v20  ;;  %v964_v28 = vpop.f32.mrf.mxu0 }
 0x164   : > { %v1092_v29 = vpop.f32.mrf.mxu1  ;;  %v2249_v30 = vpop.eup %2248  ;;  %v1538_v31 = vadd.f32 1.0, %v2247_v27  ;;  %2274 = vpow2.f32 %v1433_v18  ;;  %v1435_v32 = vmul.f32 1.442695, %v1350_v25 }
 0x165   : > { %v2251_v33 = vpop.eup %2250  ;;  %v1570_v34 = vadd.f32 1.0, %v2249_v30  ;;  %2276 = vpow2.f32 %v1497_v21  ;;  %v1499_v35 = vmul.f32 1.442695, %v1382_v26  ;;  %v967_v36 = vpop.f32.mrf.mxu0 }
 0x166   : > { %v1095_v37 = vpop.f32.mrf.mxu1  ;;  %v2253_v38 = vpop.eup %2252  ;;  %1726 = vst [vmem:[%s2599_s29 + $0x68] sm:$0xff] %v2251_v33  ;;  %2278 = vrcp.f32 %v1538_v31  ;;  %v1351_v39 = vsub.f32 0.0, %v967_v36 }
 0x167   : > { %v1383_v40 = vsub.f32 0.0, %v1095_v37  ;;  %v2255_v41 = vpop.eup %2254  ;;  %1758 = vst [vmem:[%s2599_s29 + $0x168] sm:$0xff] %v2253_v38  ;;  %2280 = vrcp.f32 %v1570_v34  ;;  %v969_v42 = vpop.f32.mrf.mxu0 }
 0x168   : > { %v1097_v43 = vpop.f32.mrf.mxu1  ;;  %v2257_v44 = vpop.eup %2256  ;;  %v1539_v45 = vadd.f32 1.0, %v2255_v41  ;;  %2282 = vpow2.f32 %v1435_v32  ;;  %v1437_v46 = vmul.f32 1.442695, %v1351_v39 }
 0x169   : > { %v2259_v47 = vpop.eup %2258  ;;  %v1571_v48 = vadd.f32 1.0, %v2257_v44  ;;  %2284 = vpow2.f32 %v1499_v35  ;;  %v1501_v49 = vmul.f32 1.442695, %v1383_v40  ;;  %v970_v50 = vpop.f32.mrf.mxu0 }
 0x16a   : > { %v1098_v51 = vpop.f32.mrf.mxu1  ;;  %v2261_v52 = vpop.eup %2260  ;;  %1727 = vst [vmem:[%s2599_s29 + $0x70] sm:$0xff] %v2259_v47  ;;  %2286 = vrcp.f32 %v1539_v45  ;;  %v1352_v53 = vsub.f32 0.0, %v970_v50 }
 0x16b   : > { %v1384_v54 = vsub.f32 0.0, %v1098_v51  ;;  %v2263_v55 = vpop.eup %2262  ;;  %1759 = vst [vmem:[%s2599_s29 + $0x170] sm:$0xff] %v2261_v52  ;;  %2288 = vrcp.f32 %v1571_v48  ;;  %v972_v56 = vpop.f32.mrf.mxu0 }
 0x16c   : > { %v1100_v57 = vpop.f32.mrf.mxu1  ;;  %v2265_v58 = vpop.eup %2264  ;;  %v1540_v59 = vadd.f32 1.0, %v2263_v55  ;;  %2290 = vpow2.f32 %v1437_v46  ;;  %v1439_v60 = vmul.f32 1.442695, %v1352_v53 }
 0x16d   : > { %v2267_v61 = vpop.eup %2266  ;;  %v1572_v62 = vadd.f32 1.0, %v2265_v58  ;;  %2292 = vpow2.f32 %v1501_v49  ;;  %v1503_v63 = vmul.f32 1.442695, %v1384_v54  ;;  %v975_v0 = vpop.f32.mrf.mxu0 }
 0x16e   : > { %v1103_v1 = vpop.f32.mrf.mxu1  ;;  %v2269_v2 = vpop.eup %2268  ;;  %1728 = vst [vmem:[%s2599_s29 + $0x78] sm:$0xff] %v2267_v61  ;;  %2294 = vrcp.f32 %v1540_v59  ;;  %v1353_v3 = vsub.f32 0.0, %v975_v0 }
 0x16f   : > { %v1385_v4 = vsub.f32 0.0, %v1103_v1  ;;  %v2271_v5 = vpop.eup %2270  ;;  %1760 = vst [vmem:[%s2599_s29 + $0x178] sm:$0xff] %v2269_v2  ;;  %2296 = vrcp.f32 %v1572_v62  ;;  %v977_v6 = vpop.f32.mrf.mxu0 }
 0x170   : > { %v1105_v7 = vpop.f32.mrf.mxu1  ;;  %v2273_v8 = vpop.eup %2272  ;;  %1729 = vst [vmem:[%s2599_s29 + $0x80] sm:$0xff] %v2271_v5  ;;  %2298 = vpow2.f32 %v1439_v60  ;;  %v1441_v9 = vmul.f32 1.442695, %v1353_v3 }
 0x171   : > { %v1505_v10 = vmul.f32 1.442695, %v1385_v4  ;;  %v2275_v11 = vpop.eup %2274  ;;  %1761 = vst [vmem:[%s2599_s29 + $0x180] sm:$0xff] %v2273_v8  ;;  %2300 = vpow2.f32 %v1503_v63  ;;  %v978_v12 = vpop.f32.mrf.mxu0 }
 0x172   : > { %v1106_v13 = vpop.f32.mrf.mxu1  ;;  %v2277_v14 = vpop.eup %2276  ;;  %v1541_v15 = vadd.f32 1.0, %v2275_v11  ;;  %2302 = vpow2.f32 %v1441_v9  ;;  %v1354_v16 = vsub.f32 0.0, %v978_v12 }
 0x173   : > { %v1386_v17 = vsub.f32 0.0, %v1106_v13  ;;  %v2279_v18 = vpop.eup %2278  ;;  %v1573_v19 = vadd.f32 1.0, %v2277_v14  ;;  %2304 = vpow2.f32 %v1505_v10  ;;  %v980_v20 = vpop.f32.mrf.mxu0 }
 0x174   : > { %v1108_v21 = vpop.f32.mrf.mxu1  ;;  %v2281_v22 = vpop.eup %2280  ;;  %1730 = vst [vmem:[%s2599_s29 + $0x88] sm:$0xff] %v2279_v18  ;;  %2306 = vrcp.f32 %v1541_v15  ;;  %v1443_v23 = vmul.f32 1.442695, %v1354_v16 }
 0x175   : > { %v1507_v24 = vmul.f32 1.442695, %v1386_v17  ;;  %v2283_v25 = vpop.eup %2282  ;;  %1762 = vst [vmem:[%s2599_s29 + $0x188] sm:$0xff] %v2281_v22  ;;  %2308 = vrcp.f32 %v1573_v19  ;;  %v983_v26 = vpop.f32.mrf.mxu0 }
 0x176   : > { %v1111_v27 = vpop.f32.mrf.mxu1  ;;  %v2285_v28 = vpop.eup %2284  ;;  %v1542_v29 = vadd.f32 1.0, %v2283_v25  ;;  %2310 = vpow2.f32 %v1443_v23  ;;  %v1355_v30 = vsub.f32 0.0, %v983_v26 }
 0x177   : > { %v1387_v31 = vsub.f32 0.0, %v1111_v27  ;;  %v2287_v32 = vpop.eup %2286  ;;  %v1574_v33 = vadd.f32 1.0, %v2285_v28  ;;  %2312 = vpow2.f32 %v1507_v24  ;;  %v985_v34 = vpop.f32.mrf.mxu0 }
 0x178   : > { %v1113_v35 = vpop.f32.mrf.mxu1  ;;  %v2289_v36 = vpop.eup %2288  ;;  %1731 = vst [vmem:[%s2599_s29 + $0x90] sm:$0xff] %v2287_v32  ;;  %2314 = vrcp.f32 %v1542_v29  ;;  %v1445_v37 = vmul.f32 1.442695, %v1355_v30 }
 0x179   : > { %v1509_v38 = vmul.f32 1.442695, %v1387_v31  ;;  %v2291_v39 = vpop.eup %2290  ;;  %1763 = vst [vmem:[%s2599_s29 + $0x190] sm:$0xff] %v2289_v36  ;;  %2316 = vrcp.f32 %v1574_v33  ;;  %v986_v40 = vpop.f32.mrf.mxu0 }
 0x17a   : > { %v1114_v41 = vpop.f32.mrf.mxu1  ;;  %v2293_v42 = vpop.eup %2292  ;;  %v1543_v43 = vadd.f32 1.0, %v2291_v39  ;;  %2318 = vpow2.f32 %v1445_v37  ;;  %v1356_v44 = vsub.f32 0.0, %v986_v40 }
 0x17b   : > { %v1388_v45 = vsub.f32 0.0, %v1114_v41  ;;  %v2295_v46 = vpop.eup %2294  ;;  %v1575_v47 = vadd.f32 1.0, %v2293_v42  ;;  %2320 = vpow2.f32 %v1509_v38  ;;  %v988_v48 = vpop.f32.mrf.mxu0 }
 0x17c   : > { %v1116_v49 = vpop.f32.mrf.mxu1  ;;  %v2297_v50 = vpop.eup %2296  ;;  %1732 = vst [vmem:[%s2599_s29 + $0x98] sm:$0xff] %v2295_v46  ;;  %2322 = vrcp.f32 %v1543_v43  ;;  %v1447_v51 = vmul.f32 1.442695, %v1356_v44 }
 0x17d   : > { %v1511_v52 = vmul.f32 1.442695, %v1388_v45  ;;  %v2299_v53 = vpop.eup %2298  ;;  %1764 = vst [vmem:[%s2599_s29 + $0x198] sm:$0xff] %v2297_v50  ;;  %2324 = vrcp.f32 %v1575_v47  ;;  %v991_v54 = vpop.f32.mrf.mxu0 }
 0x17e   : > { %v1119_v55 = vpop.f32.mrf.mxu1  ;;  %v2301_v56 = vpop.eup %2300  ;;  %v1544_v57 = vadd.f32 1.0, %v2299_v53  ;;  %2326 = vpow2.f32 %v1447_v51  ;;  %v1357_v58 = vsub.f32 0.0, %v991_v54 }
 0x17f   : > { %v1389_v59 = vsub.f32 0.0, %v1119_v55  ;;  %v2303_v60 = vpop.eup %2302  ;;  %v1576_v61 = vadd.f32 1.0, %v2301_v56  ;;  %2328 = vpow2.f32 %v1511_v52  ;;  %v993_v62 = vpop.f32.mrf.mxu0 }
 0x180   : > { %v1121_v63 = vpop.f32.mrf.mxu1  ;;  %v2305_v0 = vpop.eup %2304  ;;  %2330 = vrcp.f32 %v1544_v57  ;;  %v1545_v1 = vadd.f32 1.0, %v2303_v60  ;;  %v1449_v2 = vmul.f32 1.442695, %v1357_v58 }
 0x181   : > { %v2307_v3 = vpop.eup %2306  ;;  %2332 = vrcp.f32 %v1576_v61  ;;  %v1577_v4 = vadd.f32 1.0, %v2305_v0  ;;  %v1513_v5 = vmul.f32 1.442695, %v1389_v59  ;;  %v994_v6 = vpop.f32.mrf.mxu0 }
 0x182   : > { %v1122_v7 = vpop.f32.mrf.mxu1  ;;  %v2309_v8 = vpop.eup %2308  ;;  %1733 = vst [vmem:[%s2599_s29 + $0xa0] sm:$0xff] %v2307_v3  ;;  %2334 = vrcp.f32 %v1545_v1  ;;  %v1358_v9 = vsub.f32 0.0, %v994_v6 }
 0x183   : > { %v1390_v10 = vsub.f32 0.0, %v1122_v7  ;;  %v2311_v11 = vpop.eup %2310  ;;  %1765 = vst [vmem:[%s2599_s29 + $0x1a0] sm:$0xff] %v2309_v8  ;;  %2336 = vrcp.f32 %v1577_v4  ;;  %v996_v12 = vpop.f32.mrf.mxu0 }
 0x184   : > { %v1124_v13 = vpop.f32.mrf.mxu1  ;;  %v2313_v14 = vpop.eup %2312  ;;  %v1546_v15 = vadd.f32 1.0, %v2311_v11  ;;  %2338 = vpow2.f32 %v1449_v2  ;;  %v1451_v16 = vmul.f32 1.442695, %v1358_v9 }
 0x185   : > { %v2315_v17 = vpop.eup %2314  ;;  %v1578_v18 = vadd.f32 1.0, %v2313_v14  ;;  %2340 = vpow2.f32 %v1513_v5  ;;  %v1515_v19 = vmul.f32 1.442695, %v1390_v10  ;;  %v999_v20 = vpop.f32.mrf.mxu0 }
 0x186   : > { %v1127_v21 = vpop.f32.mrf.mxu1  ;;  %v2317_v22 = vpop.eup %2316  ;;  %1734 = vst [vmem:[%s2599_s29 + $0xa8] sm:$0xff] %v2315_v17  ;;  %2342 = vrcp.f32 %v1546_v15  ;;  %v1359_v23 = vsub.f32 0.0, %v999_v20 }
 0x187   : > { %v1391_v24 = vsub.f32 0.0, %v1127_v21  ;;  %v2319_v25 = vpop.eup %2318  ;;  %1766 = vst [vmem:[%s2599_s29 + $0x1a8] sm:$0xff] %v2317_v22  ;;  %2344 = vrcp.f32 %v1578_v18  ;;  %v1001_v26 = vpop.f32.mrf.mxu0 }
 0x188   : > { %v1129_v27 = vpop.f32.mrf.mxu1  ;;  %v2321_v28 = vpop.eup %2320  ;;  %v1547_v29 = vadd.f32 1.0, %v2319_v25  ;;  %2346 = vpow2.f32 %v1451_v16  ;;  %v1453_v30 = vmul.f32 1.442695, %v1359_v23 }
 0x189   : > { %v2323_v31 = vpop.eup %2322  ;;  %v1579_v32 = vadd.f32 1.0, %v2321_v28  ;;  %2348 = vpow2.f32 %v1515_v19  ;;  %v1517_v33 = vmul.f32 1.442695, %v1391_v24  ;;  %v1002_v34 = vpop.f32.mrf.mxu0 }
 0x18a   : > { %v1130_v35 = vpop.f32.mrf.mxu1  ;;  %v2325_v36 = vpop.eup %2324  ;;  %1735 = vst [vmem:[%s2599_s29 + $0xb0] sm:$0xff] %v2323_v31  ;;  %2350 = vrcp.f32 %v1547_v29  ;;  %v1360_v37 = vsub.f32 0.0, %v1002_v34 }
 0x18b   : > { %v1392_v38 = vsub.f32 0.0, %v1130_v35  ;;  %v2327_v39 = vpop.eup %2326  ;;  %1767 = vst [vmem:[%s2599_s29 + $0x1b0] sm:$0xff] %v2325_v36  ;;  %2352 = vrcp.f32 %v1579_v32  ;;  %v1004_v40 = vpop.f32.mrf.mxu0 }
 0x18c   : > { %v1132_v41 = vpop.f32.mrf.mxu1  ;;  %v2329_v42 = vpop.eup %2328  ;;  %v1548_v43 = vadd.f32 1.0, %v2327_v39  ;;  %2354 = vpow2.f32 %v1453_v30  ;;  %v1455_v44 = vmul.f32 1.442695, %v1360_v37 }
 0x18d   : > { %v2331_v45 = vpop.eup %2330  ;;  %v1580_v46 = vadd.f32 1.0, %v2329_v42  ;;  %2356 = vpow2.f32 %v1517_v33  ;;  %v1519_v47 = vmul.f32 1.442695, %v1392_v38 }
 0x18e   : > { %v2333_v48 = vpop.eup %2332  ;;  %1736 = vst [vmem:[%s2599_s29 + $0xb8] sm:$0xff] %v2331_v45  ;;  %2358 = vrcp.f32 %v1548_v43 }
 0x18f   : > { %v2335_v49 = vpop.eup %2334  ;;  %1768 = vst [vmem:[%s2599_s29 + $0x1b8] sm:$0xff] %v2333_v48  ;;  %2360 = vrcp.f32 %v1580_v46 }
 0x190   : > { %v2337_v50 = vpop.eup %2336  ;;  %1737 = vst [vmem:[%s2599_s29 + $0xc0] sm:$0xff] %v2335_v49  ;;  %2362 = vpow2.f32 %v1455_v44 }
 0x191   : > { %v2339_v51 = vpop.eup %2338  ;;  %1769 = vst [vmem:[%s2599_s29 + $0x1c0] sm:$0xff] %v2337_v50  ;;  %2364 = vpow2.f32 %v1519_v47 }
 0x192   : > { %v2341_v52 = vpop.eup %2340  ;;  %v1549_v53 = vadd.f32 1.0, %v2339_v51 }
 0x193   : > { %v2343_v54 = vpop.eup %2342  ;;  %v1581_v55 = vadd.f32 1.0, %v2341_v52 }
 0x194   : > { %v2345_v56 = vpop.eup %2344  ;;  %1738 = vst [vmem:[%s2599_s29 + $0xc8] sm:$0xff] %v2343_v54  ;;  %2366 = vrcp.f32 %v1549_v53 }
 0x195   : > { %v2347_v57 = vpop.eup %2346  ;;  %1770 = vst [vmem:[%s2599_s29 + $0x1c8] sm:$0xff] %v2345_v56  ;;  %2368 = vrcp.f32 %v1581_v55 }
 0x196   : > { %v2349_v58 = vpop.eup %2348  ;;  %v1550_v59 = vadd.f32 1.0, %v2347_v57 }
 0x197   : > { %v2351_v60 = vpop.eup %2350  ;;  %v1582_v61 = vadd.f32 1.0, %v2349_v58 }
 0x198   : > { %v2353_v62 = vpop.eup %2352  ;;  %1739 = vst [vmem:[%s2599_s29 + $0xd0] sm:$0xff] %v2351_v60  ;;  %2370 = vrcp.f32 %v1550_v59 }
 0x199   : > { %v2355_v63 = vpop.eup %2354  ;;  %1771 = vst [vmem:[%s2599_s29 + $0x1d0] sm:$0xff] %v2353_v62  ;;  %2372 = vrcp.f32 %v1582_v61 }
 0x19a   : > { %v2357_v0 = vpop.eup %2356  ;;  %v1551_v1 = vadd.f32 1.0, %v2355_v63 }
 0x19b   : > { %v2359_v2 = vpop.eup %2358  ;;  %v1583_v3 = vadd.f32 1.0, %v2357_v0 }
 0x19c   : > { %v2361_v4 = vpop.eup %2360  ;;  %1740 = vst [vmem:[%s2599_s29 + $0xd8] sm:$0xff] %v2359_v2  ;;  %2374 = vrcp.f32 %v1551_v1 }
 0x19d   : > { %v2363_v5 = vpop.eup %2362  ;;  %1772 = vst [vmem:[%s2599_s29 + $0x1d8] sm:$0xff] %v2361_v4  ;;  %2376 = vrcp.f32 %v1583_v3 }
 0x19e   : > { %v2365_v6 = vpop.eup %2364  ;;  %v1552_v7 = vadd.f32 1.0, %v2363_v5 }
 0x19f   : > { %v1584_v8 = vadd.f32 1.0, %v2365_v6 }
 0x1a0   : > { %2378 = vrcp.f32 %v1552_v7 }
 0x1a1   : > { %v2367_v9 = vpop.eup %2366  ;;  %2380 = vrcp.f32 %v1584_v8 }
 0x1a2   : > { %v2369_v10 = vpop.eup %2368  ;;  %1741 = vst [vmem:[%s2599_s29 + $0xe0] sm:$0xff] %v2367_v9 }
 0x1a3   : > { %1773 = vst [vmem:[%s2599_s29 + $0x1e0] sm:$0xff] %v2369_v10 }
 0x1a5   : > { %v2371_v11 = vpop.eup %2370 }
 0x1a6   : > { %v2373_v12 = vpop.eup %2372  ;;  %1742 = vst [vmem:[%s2599_s29 + $0xe8] sm:$0xff] %v2371_v11 }
 0x1a7   : > { %1774 = vst [vmem:[%s2599_s29 + $0x1e8] sm:$0xff] %v2373_v12 }
 0x1a9   : > { %v2375_v13 = vpop.eup %2374 }
 0x1aa   : > { %v2377_v14 = vpop.eup %2376  ;;  %1743 = vst [vmem:[%s2599_s29 + $0xf0] sm:$0xff] %v2375_v13 }
 0x1ab   : > { %1775 = vst [vmem:[%s2599_s29 + $0x1f0] sm:$0xff] %v2377_v14 }
 0x1ad   : > { %v2379_v15 = vpop.eup %2378 }
 0x1ae   : > { %v2381_v16 = vpop.eup %2380  ;;  %1744 = vst [vmem:[%s2599_s29 + $0xf8] sm:$0xff] %v2379_v15 }
 0x1af   : > { %1776 = vst [vmem:[%s2599_s29 + $0x1f8] sm:$0xff] %v2381_v16 }
 0x1b0 PF: > { %s12_s11 = sadd.s32 1, %s2404_s11   ;;  %s2677_s9 = smov %s2400_s10 }
 0x1b1   : > { %p9_p5 = scmp.ge.s32.totalorder %s12_s11, 4   ;;  %s2678_s10 = smov %s2680_s12 }
 0x1b3   :  { %11 = sbr.rel (!%p9_p5) target bundleno = 2 (0x2), region = 69 }

</bundles_post_ra>
